<compile_context>
chip_gen: v6e
topology: v6e:2x2x1
jax: 0.10.0
libtpu: 0.0.40
codegen_flags: <defaults>
</compile_context>

<pallas_src>
import functools

import jax
import jax.numpy as jnp
from jax.experimental import pallas as pl
from jax.experimental.pallas import tpu as pltpu


_VMEM_LIMIT = 32 * 1024 * 1024


def _round8(c):
    return max(8, ((c + 7) // 8) * 8)


# ----------------------------------------------------------------------------
# In-kernel helpers
# ----------------------------------------------------------------------------
def _dx_folded_patch(x, dy, H, W):
    """(H+2, W+2, C) padded activation -> (H*W, 3*C) patch for row-offset dy.

    The three dx taps are folded into the contraction (channel) axis so the
    following matmul has K = 3*C instead of K = C.
    """
    c = x.shape[-1]
    rows = x[dy:dy + H]                                   # (H, W+2, C)
    p = jnp.concatenate(
        [rows[:, 0:W, :], rows[:, 1:W + 1, :], rows[:, 2:W + 2, :]], axis=-1)
    return p.reshape(H * W, 3 * c)                        # (H*W, 3*C)


def _maxpool2x2_value(y_flat, H, W, C):
    """(H*W, C) -> (H//2, W//2, C) 2x2/stride-2 max pool (reshape + reduce)."""
    yr = y_flat.reshape(H // 2, 2, W // 2, 2, C)
    return jnp.max(jnp.max(yr, axis=3), axis=1)


# ----------------------------------------------------------------------------
# Generic 3x3 conv (stride 1, padding 1) with optional fused ReLU / maxpool.
# Input is spatially pre-padded in the wrapper.
# ----------------------------------------------------------------------------
def _conv3x3_kernel(x_ref, w_ref, b_ref, o_ref, *, H, W, relu_out, pool_out):
    # x_ref: (1, H+2, W+2, Cin_p)   w_ref: (3, 3*Cin_p, Cout)  b_ref: (1, Cout)
    cout = w_ref.shape[-1]
    x = x_ref[0].astype(jnp.bfloat16)
    acc = None
    for dy in range(3):                                   # 3 matmuls, K = 3*Cin
        p = _dx_folded_patch(x, dy, H, W)
        d = jnp.dot(p, w_ref[dy], preferred_element_type=jnp.float32)
        acc = d if acc is None else acc + d
    y = acc + b_ref[...]
    if relu_out:
        y = jnp.maximum(y, 0.0)
    if pool_out:
        o_ref[0] = _maxpool2x2_value(y, H, W, cout).astype(o_ref.dtype)
    else:
        o_ref[0] = y.reshape(H, W, cout).astype(o_ref.dtype)


# ----------------------------------------------------------------------------
# Fused block 1: conv1_1 + ReLU + conv1_2, plus the slice2 prologue
# (ReLU + 2x2 maxpool) as a second output.  Intermediate stays in VMEM.
# ----------------------------------------------------------------------------
def _block1_kernel(x_ref, w1_ref, b1_ref, w2_ref, b2_ref,
                   o_raw_ref, o_pool_ref, pad_ref, *, H, W):
    c1 = w1_ref.shape[-1]                                 # 64
    x = x_ref[0].astype(jnp.bfloat16)                     # (H+2, W+2, 8)

    # conv1_1 + ReLU: one full-im2col matmul, K = 9 * Cin_pad = 72.
    patch = jnp.concatenate(
        [_dx_folded_patch(x, dy, H, W) for dy in range(3)], axis=-1)
    h1 = jnp.dot(patch, w1_ref[...], preferred_element_type=jnp.float32)
    h1 = jnp.maximum(h1 + b1_ref[...], 0.0)               # (H*W, 64)

    # Stash into a zero-halo VMEM scratch; conv1_2 never touches HBM.
    pad_ref[...] = jnp.zeros(pad_ref.shape, pad_ref.dtype)
    pad_ref[1:H + 1, 1:W + 1, :] = h1.reshape(H, W, c1).astype(pad_ref.dtype)

    # conv1_2: three dy matmuls, K = 3 * 64 = 192.
    xp = pad_ref[...]
    acc = None
    for dy in range(3):
        p = _dx_folded_patch(xp, dy, H, W)
        d = jnp.dot(p, w2_ref[dy], preferred_element_type=jnp.float32)
        acc = d if acc is None else acc + d
    y = acc + b2_ref[...]                                 # pre-ReLU conv1_2

    o_raw_ref[0] = y.reshape(H, W, c1).astype(o_raw_ref.dtype)   # h_conv1_2
    yr = jnp.maximum(y, 0.0)                              # slice2: ReLU
    o_pool_ref[0] = _maxpool2x2_value(yr, H, W, c1).astype(o_pool_ref.dtype)


# ----------------------------------------------------------------------------
# Wrappers (weight folding + pallas_call plumbing)
# ----------------------------------------------------------------------------
def _fold_weights_dy(w_oihw, cin_p):
    """torch (Cout, Cin, 3, 3) -> bf16 (3, 3*Cin_p, Cout) with dx folded in."""
    co, ci = w_oihw.shape[0], w_oihw.shape[1]
    w = jnp.transpose(w_oihw, (2, 3, 1, 0)).astype(jnp.float32)  # (3,3,Cin,Cout)
    if cin_p != ci:
        w = jnp.pad(w, ((0, 0), (0, 0), (0, cin_p - ci), (0, 0)))
    return w.reshape(3, 3 * cin_p, co).astype(jnp.bfloat16)


def conv3x3(x_nhwc, w_oihw, b, *, relu_out, pool_out=False):
    """3x3 conv (stride 1, pad 1), optional fused ReLU and 2x2 maxpool."""
    N, H, W, Cin = x_nhwc.shape
    Cout = w_oihw.shape[0]
    cin_p = _round8(Cin)
    if cin_p != Cin:
        x_nhwc = jnp.pad(x_nhwc, ((0, 0), (0, 0), (0, 0), (0, cin_p - Cin)))
    xp = jnp.pad(x_nhwc, ((0, 0), (1, 1), (1, 1), (0, 0)))      # conv padding=1
    w = _fold_weights_dy(w_oihw, cin_p)                          # (3,3*Cin_p,Cout)
    b2 = b.reshape(1, Cout).astype(jnp.float32)
    Ho, Wo = (H // 2, W // 2) if pool_out else (H, W)

    kernel = functools.partial(_conv3x3_kernel, H=H, W=W,
                               relu_out=relu_out, pool_out=pool_out)
    return pl.pallas_call(
        kernel,
        out_shape=jax.ShapeDtypeStruct((N, Ho, Wo, Cout), jnp.float32),
        grid_spec=pltpu.PrefetchScalarGridSpec(
            num_scalar_prefetch=0,
            grid=(N,),
            in_specs=[
                pl.BlockSpec((1, H + 2, W + 2, cin_p), lambda n: (n, 0, 0, 0)),
                pl.BlockSpec((3, 3 * cin_p, Cout), lambda n: (0, 0, 0)),
                pl.BlockSpec((1, Cout), lambda n: (0, 0)),
            ],
            out_specs=pl.BlockSpec((1, Ho, Wo, Cout), lambda n: (n, 0, 0, 0)),
        ),
        compiler_params=pltpu.CompilerParams(
            dimension_semantics=("parallel",),
            vmem_limit_bytes=_VMEM_LIMIT),
    )(xp, w, b2)


def block1(x_nhwc, w11, b11, w12, b12):
    """Fused conv1_1+ReLU+conv1_2 (+ ReLU+maxpool) -> (h_conv1_2, pooled)."""
    N, H, W, Cin = x_nhwc.shape
    cin_p = _round8(Cin)                                   # 3 -> 8
    C1 = w11.shape[0]                                      # 64
    if cin_p != Cin:
        x_nhwc = jnp.pad(x_nhwc, ((0, 0), (0, 0), (0, 0), (0, cin_p - Cin)))
    xp = jnp.pad(x_nhwc, ((0, 0), (1, 1), (1, 1), (0, 0)))
    w1 = _fold_weights_dy(w11, cin_p).reshape(9 * cin_p, C1)     # (72, 64)
    b1 = b11.reshape(1, C1).astype(jnp.float32)
    w2 = _fold_weights_dy(w12, C1)                               # (3, 192, 64)
    b2 = b12.reshape(1, C1).astype(jnp.float32)

    kernel = functools.partial(_block1_kernel, H=H, W=W)
    return pl.pallas_call(
        kernel,
        out_shape=(jax.ShapeDtypeStruct((N, H, W, C1), jnp.float32),
                   jax.ShapeDtypeStruct((N, H // 2, W // 2, C1), jnp.float32)),
        grid_spec=pltpu.PrefetchScalarGridSpec(
            num_scalar_prefetch=0,
            grid=(N,),
            in_specs=[
                pl.BlockSpec((1, H + 2, W + 2, cin_p), lambda n: (n, 0, 0, 0)),
                pl.BlockSpec((9 * cin_p, C1), lambda n: (0, 0)),
                pl.BlockSpec((1, C1), lambda n: (0, 0)),
                pl.BlockSpec((3, 3 * C1, C1), lambda n: (0, 0, 0)),
                pl.BlockSpec((1, C1), lambda n: (0, 0)),
            ],
            out_specs=[
                pl.BlockSpec((1, H, W, C1), lambda n: (n, 0, 0, 0)),
                pl.BlockSpec((1, H // 2, W // 2, C1), lambda n: (n, 0, 0, 0)),
            ],
            scratch_shapes=[pltpu.VMEM((H + 2, W + 2, C1), jnp.bfloat16)],
        ),
        compiler_params=pltpu.CompilerParams(
            dimension_semantics=("parallel",),
            vmem_limit_bytes=_VMEM_LIMIT),
    )(xp, w1, b1, w2, b2)


# ----------------------------------------------------------------------------
# Vgg19 forward (Pallas), parameters, and a plain-JAX reference for checking.
# ----------------------------------------------------------------------------
_CONV_SPECS = [  # (Cout, Cin): conv1_1, conv1_2, conv2_1, conv2_2, conv3_1, conv3_2
    (64, 3), (64, 64), (128, 64), (128, 128), (256, 128), (256, 256)]


def init_vgg19_params(key):
    params = []
    for (co, ci) in _CONV_SPECS:
        key, kw, kb = jax.random.split(key, 3)
        w = jax.random.normal(kw, (co, ci, 3, 3), jnp.float32) * 0.05
        b = jax.random.normal(kb, (co,), jnp.float32) * 0.05
        params.append((w, b))
    return params


def vgg19_forward(x_nchw, params):
    (w11, b11), (w12, b12), (w21, b21), (w22, b22), (w31, b31), (w32, b32) = params
    x = jnp.transpose(x_nchw, (0, 2, 3, 1)).astype(jnp.float32)  # NCHW -> NHWC

    # slice1 (conv1_1+ReLU+conv1_2) and slice2 prologue (ReLU+maxpool), fused.
    h_conv1_2, h_pool1 = block1(x, w11, b11, w12, b12)
    # slice2 tail: conv2_1 + ReLU
    h_conv2_2 = conv3x3(h_pool1, w21, b21, relu_out=True)
    # slice3: conv2_2 + ReLU + maxpool (pool fused into the conv epilogue)
    h_relu3_2 = conv3x3(h_conv2_2, w22, b22, relu_out=True, pool_out=True)
    # slice4: conv3_1 + ReLU
    h_relu4_2 = conv3x3(h_relu3_2, w31, b31, relu_out=True)
    # slice5: conv3_2 + ReLU
    h_relu5_2 = conv3x3(h_relu4_2, w32, b32, relu_out=True)

    outs_nhwc = [x, h_conv1_2, h_conv2_2, h_relu3_2, h_relu4_2, h_relu5_2]
    # back to NCHW to match the PyTorch module's return convention
    return [jnp.transpose(o, (0, 3, 1, 2)) for o in outs_nhwc]


def _ref_conv(x_nhwc, w_oihw, b, relu_out):
    y = jax.lax.conv_general_dilated(
        x_nhwc, jnp.transpose(w_oihw, (2, 3, 1, 0)),
        window_strides=(1, 1), padding=((1, 1), (1, 1)),
        dimension_numbers=("NHWC", "HWIO", "NHWC"),
        precision=jax.lax.Precision.HIGHEST)
    y = y + b[None, None, None, :]
    return jnp.maximum(y, 0.0) if relu_out else y


def _ref_pool(x_nhwc, relu_in):
    if relu_in:
        x_nhwc = jnp.maximum(x_nhwc, 0.0)
    return jax.lax.reduce_window(x_nhwc, -jnp.inf, jax.lax.max,
                                 (1, 2, 2, 1), (1, 2, 2, 1), "VALID")


def vgg19_forward_ref(x_nchw, params):
    (w11, b11), (w12, b12), (w21, b21), (w22, b22), (w31, b31), (w32, b32) = params
    x = jnp.transpose(x_nchw, (0, 2, 3, 1)).astype(jnp.float32)
    h = _ref_conv(x, w11, b11, True)
    h1 = _ref_conv(h, w12, b12, False)
    h = _ref_pool(h1, True)
    h2 = _ref_conv(h, w21, b21, True)
    h = _ref_conv(h2, w22, b22, True)
    h3 = _ref_pool(h, False)
    h4 = _ref_conv(h3, w31, b31, True)
    h5 = _ref_conv(h4, w32, b32, True)
    return [jnp.transpose(o, (0, 3, 1, 2)) for o in [x, h1, h2, h3, h4, h5]]


if __name__ == "__main__":
    key = jax.random.PRNGKey(0)
    key, kx, kp = jax.random.split(key, 3)
    x = jax.random.normal(kx, (2, 3, 16, 16), jnp.float32)   # NCHW, like torch
    params = init_vgg19_params(kp)

    fwd = jax.jit(vgg19_forward)
    outs = jax.block_until_ready(fwd(x, params))

    # sanity check against plain-JAX / XLA f32 reference (kernel uses bf16 MXU
    # inputs with f32 accumulation, so allow a small abs+rel tolerance)
    ref_outs = jax.block_until_ready(jax.jit(vgg19_forward_ref)(x, params))
    for o, r in zip(outs, ref_outs):
        assert o.shape == r.shape and o.dtype == r.dtype
        err = float(jnp.max(jnp.abs(o - r)))
        scale = float(jnp.max(jnp.abs(r)))
        assert err <= 3e-2 + 2e-2 * scale, (err, scale)

    print("KERNEL_OK")
</pallas_src>

<mosaic_0001>
module attributes {stable_mosaic.version = 11 : i64} {
  func.func @_block1_kernel(%arg0: i32, %arg1: memref<1x18x18x8xf32, #tpu.memory_space<vmem>>, %arg2: memref<72x64xbf16, #tpu.memory_space<vmem>>, %arg3: memref<1x64xf32, #tpu.memory_space<vmem>>, %arg4: memref<3x192x64xbf16, #tpu.memory_space<vmem>>, %arg5: memref<1x64xf32, #tpu.memory_space<vmem>>, %arg6: memref<1x16x16x64xf32, #tpu.memory_space<vmem>>, %arg7: memref<1x8x8x64xf32, #tpu.memory_space<vmem>>, %arg8: memref<18x18x64xbf16, #tpu.memory_space<vmem>>) attributes {dimension_semantics = [#tpu.dimension_semantics<parallel>], iteration_bounds = array<i64: 2>, scalar_prefetch = 0 : i64, scratch_operands = 1 : i64, tpu.core_type = #tpu.core_type<tc>, window_params = [{transform_indices = @transform_0, window_bounds = array<i64: 1, 18, 18, 8>}, {pipeline_mode = #tpu.pipeline_mode<synchronous>, transform_indices = @transform_1, window_bounds = array<i64: 72, 64>}, {pipeline_mode = #tpu.pipeline_mode<synchronous>, transform_indices = @transform_2, window_bounds = array<i64: 1, 64>}, {pipeline_mode = #tpu.pipeline_mode<synchronous>, transform_indices = @transform_3, window_bounds = array<i64: 3, 192, 64>}, {pipeline_mode = #tpu.pipeline_mode<synchronous>, transform_indices = @transform_4, window_bounds = array<i64: 1, 64>}, {transform_indices = @transform_5, window_bounds = array<i64: 1, 16, 16, 64>}, {transform_indices = @transform_6, window_bounds = array<i64: 1, 8, 8, 64>}]} {
    %c0 = arith.constant 0 : index
    %c0_0 = arith.constant 0 : index
    %c0_1 = arith.constant 0 : index
    %c0_2 = arith.constant 0 : index
    %0 = vector.load %arg1[%c0, %c0_0, %c0_1, %c0_2] : memref<1x18x18x8xf32, #tpu.memory_space<vmem>>, vector<1x18x18x8xf32>
    %1 = vector.shape_cast %0 : vector<1x18x18x8xf32> to vector<18x18x8xf32>
    %2 = arith.truncf %1 : vector<18x18x8xf32> to vector<18x18x8xbf16>
    %3 = vector.extract_strided_slice %2 {offsets = [0, 0, 0], sizes = [16, 18, 8], strides = [1, 1, 1]} : vector<18x18x8xbf16> to vector<16x18x8xbf16>
    %4 = vector.extract_strided_slice %3 {offsets = [0, 0, 0], sizes = [16, 16, 8], strides = [1, 1, 1]} : vector<16x18x8xbf16> to vector<16x16x8xbf16>
    %5 = vector.extract_strided_slice %3 {offsets = [0, 1, 0], sizes = [16, 16, 8], strides = [1, 1, 1]} : vector<16x18x8xbf16> to vector<16x16x8xbf16>
    %6 = vector.extract_strided_slice %3 {offsets = [0, 2, 0], sizes = [16, 16, 8], strides = [1, 1, 1]} : vector<16x18x8xbf16> to vector<16x16x8xbf16>
    %7 = tpu.concatenate %4, %5, %6 in 2 : vector<16x16x8xbf16>, vector<16x16x8xbf16>, vector<16x16x8xbf16> -> vector<16x16x24xbf16>
    %8 = vector.shape_cast %7 : vector<16x16x24xbf16> to vector<256x24xbf16>
    %9 = vector.extract_strided_slice %2 {offsets = [1, 0, 0], sizes = [16, 18, 8], strides = [1, 1, 1]} : vector<18x18x8xbf16> to vector<16x18x8xbf16>
    %10 = vector.extract_strided_slice %9 {offsets = [0, 0, 0], sizes = [16, 16, 8], strides = [1, 1, 1]} : vector<16x18x8xbf16> to vector<16x16x8xbf16>
    %11 = vector.extract_strided_slice %9 {offsets = [0, 1, 0], sizes = [16, 16, 8], strides = [1, 1, 1]} : vector<16x18x8xbf16> to vector<16x16x8xbf16>
    %12 = vector.extract_strided_slice %9 {offsets = [0, 2, 0], sizes = [16, 16, 8], strides = [1, 1, 1]} : vector<16x18x8xbf16> to vector<16x16x8xbf16>
    %13 = tpu.concatenate %10, %11, %12 in 2 : vector<16x16x8xbf16>, vector<16x16x8xbf16>, vector<16x16x8xbf16> -> vector<16x16x24xbf16>
    %14 = vector.shape_cast %13 : vector<16x16x24xbf16> to vector<256x24xbf16>
    %15 = vector.extract_strided_slice %2 {offsets = [2, 0, 0], sizes = [16, 18, 8], strides = [1, 1, 1]} : vector<18x18x8xbf16> to vector<16x18x8xbf16>
    %16 = vector.extract_strided_slice %15 {offsets = [0, 0, 0], sizes = [16, 16, 8], strides = [1, 1, 1]} : vector<16x18x8xbf16> to vector<16x16x8xbf16>
    %17 = vector.extract_strided_slice %15 {offsets = [0, 1, 0], sizes = [16, 16, 8], strides = [1, 1, 1]} : vector<16x18x8xbf16> to vector<16x16x8xbf16>
    %18 = vector.extract_strided_slice %15 {offsets = [0, 2, 0], sizes = [16, 16, 8], strides = [1, 1, 1]} : vector<16x18x8xbf16> to vector<16x16x8xbf16>
    %19 = tpu.concatenate %16, %17, %18 in 2 : vector<16x16x8xbf16>, vector<16x16x8xbf16>, vector<16x16x8xbf16> -> vector<16x16x24xbf16>
    %20 = vector.shape_cast %19 : vector<16x16x24xbf16> to vector<256x24xbf16>
    %21 = tpu.concatenate %8, %14, %20 in 1 : vector<256x24xbf16>, vector<256x24xbf16>, vector<256x24xbf16> -> vector<256x72xbf16>
    %c0_3 = arith.constant 0 : index
    %c0_4 = arith.constant 0 : index
    %22 = vector.load %arg2[%c0_3, %c0_4] : memref<72x64xbf16, #tpu.memory_space<vmem>>, vector<72x64xbf16>
    %cst = arith.constant dense<0.000000e+00> : vector<256x64xf32>
    %23 = tpu.matmul %21, %22, %cst {dimension_numbers = #tpu.dot_dimension_numbers<[1], [0], [0], [1], [0, 0, 1, 1], [], []>} : vector<256x72xbf16>, vector<72x64xbf16>, vector<256x64xf32> -> vector<256x64xf32>
    %c0_5 = arith.constant 0 : index
    %c0_6 = arith.constant 0 : index
    %24 = vector.load %arg3[%c0_5, %c0_6] : memref<1x64xf32, #tpu.memory_space<vmem>>, vector<1x64xf32>
    %25 = vector.broadcast %24 : vector<1x64xf32> to vector<256x64xf32>
    %26 = arith.addf %23, %25 : vector<256x64xf32>
    %cst_7 = arith.constant 0.000000e+00 : f32
    %27 = vector.broadcast %cst_7 : f32 to vector<256x64xf32>
    %28 = arith.maximumf %26, %27 : vector<256x64xf32>
    %cst_8 = arith.constant 0.000000e+00 : bf16
    %29 = vector.broadcast %cst_8 : bf16 to vector<18x18x64xbf16>
    %c0_9 = arith.constant 0 : index
    %c0_10 = arith.constant 0 : index
    %c0_11 = arith.constant 0 : index
    %30 = vector.load %arg8[%c0_9, %c0_10, %c0_11] : memref<18x18x64xbf16, #tpu.memory_space<vmem>>, vector<18x18x64xbf16>
    tpu.vector_store %arg8[%c0_9, %c0_10, %c0_11], %29 {strides = array<i32>} : memref<18x18x64xbf16, #tpu.memory_space<vmem>>, vector<18x18x64xbf16>,
    %31 = vector.shape_cast %28 : vector<256x64xf32> to vector<16x16x64xf32>
    %32 = arith.truncf %31 : vector<16x16x64xf32> to vector<16x16x64xbf16>
    %c1 = arith.constant 1 : index
    %c1_12 = arith.constant 1 : index
    %c0_13 = arith.constant 0 : index
    %33 = vector.load %arg8[%c1, %c1_12, %c0_13] : memref<18x18x64xbf16, #tpu.memory_space<vmem>>, vector<16x16x64xbf16>
    tpu.vector_store %arg8[%c1, %c1_12, %c0_13], %32 {strides = array<i32>} : memref<18x18x64xbf16, #tpu.memory_space<vmem>>, vector<16x16x64xbf16>,
    %c0_14 = arith.constant 0 : index
    %c0_15 = arith.constant 0 : index
    %c0_16 = arith.constant 0 : index
    %34 = vector.load %arg8[%c0_14, %c0_15, %c0_16] : memref<18x18x64xbf16, #tpu.memory_space<vmem>>, vector<18x18x64xbf16>
    %35 = vector.extract_strided_slice %34 {offsets = [0, 0, 0], sizes = [16, 18, 64], strides = [1, 1, 1]} : vector<18x18x64xbf16> to vector<16x18x64xbf16>
    %36 = vector.extract_strided_slice %35 {offsets = [0, 0, 0], sizes = [16, 16, 64], strides = [1, 1, 1]} : vector<16x18x64xbf16> to vector<16x16x64xbf16>
    %37 = vector.extract_strided_slice %35 {offsets = [0, 1, 0], sizes = [16, 16, 64], strides = [1, 1, 1]} : vector<16x18x64xbf16> to vector<16x16x64xbf16>
    %38 = vector.extract_strided_slice %35 {offsets = [0, 2, 0], sizes = [16, 16, 64], strides = [1, 1, 1]} : vector<16x18x64xbf16> to vector<16x16x64xbf16>
    %39 = tpu.concatenate %36, %37, %38 in 2 : vector<16x16x64xbf16>, vector<16x16x64xbf16>, vector<16x16x64xbf16> -> vector<16x16x192xbf16>
    %40 = vector.shape_cast %39 : vector<16x16x192xbf16> to vector<256x192xbf16>
    %c0_17 = arith.constant 0 : index
    %c0_18 = arith.constant 0 : index
    %c0_19 = arith.constant 0 : index
    %41 = vector.load %arg4[%c0_17, %c0_18, %c0_19] : memref<3x192x64xbf16, #tpu.memory_space<vmem>>, vector<1x192x64xbf16>
    %42 = vector.shape_cast %41 : vector<1x192x64xbf16> to vector<192x64xbf16>
    %cst_20 = arith.constant dense<0.000000e+00> : vector<256x64xf32>
    %43 = tpu.matmul %40, %42, %cst_20 {dimension_numbers = #tpu.dot_dimension_numbers<[1], [0], [0], [1], [0, 0, 1, 1], [], []>} : vector<256x192xbf16>, vector<192x64xbf16>, vector<256x64xf32> -> vector<256x64xf32>
    %44 = vector.extract_strided_slice %34 {offsets = [1, 0, 0], sizes = [16, 18, 64], strides = [1, 1, 1]} : vector<18x18x64xbf16> to vector<16x18x64xbf16>
    %45 = vector.extract_strided_slice %44 {offsets = [0, 0, 0], sizes = [16, 16, 64], strides = [1, 1, 1]} : vector<16x18x64xbf16> to vector<16x16x64xbf16>
    %46 = vector.extract_strided_slice %44 {offsets = [0, 1, 0], sizes = [16, 16, 64], strides = [1, 1, 1]} : vector<16x18x64xbf16> to vector<16x16x64xbf16>
    %47 = vector.extract_strided_slice %44 {offsets = [0, 2, 0], sizes = [16, 16, 64], strides = [1, 1, 1]} : vector<16x18x64xbf16> to vector<16x16x64xbf16>
    %48 = tpu.concatenate %45, %46, %47 in 2 : vector<16x16x64xbf16>, vector<16x16x64xbf16>, vector<16x16x64xbf16> -> vector<16x16x192xbf16>
    %49 = vector.shape_cast %48 : vector<16x16x192xbf16> to vector<256x192xbf16>
    %c1_21 = arith.constant 1 : index
    %c0_22 = arith.constant 0 : index
    %c0_23 = arith.constant 0 : index
    %50 = vector.load %arg4[%c1_21, %c0_22, %c0_23] : memref<3x192x64xbf16, #tpu.memory_space<vmem>>, vector<1x192x64xbf16>
    %51 = vector.shape_cast %50 : vector<1x192x64xbf16> to vector<192x64xbf16>
    %cst_24 = arith.constant dense<0.000000e+00> : vector<256x64xf32>
    %52 = tpu.matmul %49, %51, %cst_24 {dimension_numbers = #tpu.dot_dimension_numbers<[1], [0], [0], [1], [0, 0, 1, 1], [], []>} : vector<256x192xbf16>, vector<192x64xbf16>, vector<256x64xf32> -> vector<256x64xf32>
    %53 = arith.addf %43, %52 : vector<256x64xf32>
    %54 = vector.extract_strided_slice %34 {offsets = [2, 0, 0], sizes = [16, 18, 64], strides = [1, 1, 1]} : vector<18x18x64xbf16> to vector<16x18x64xbf16>
    %55 = vector.extract_strided_slice %54 {offsets = [0, 0, 0], sizes = [16, 16, 64], strides = [1, 1, 1]} : vector<16x18x64xbf16> to vector<16x16x64xbf16>
    %56 = vector.extract_strided_slice %54 {offsets = [0, 1, 0], sizes = [16, 16, 64], strides = [1, 1, 1]} : vector<16x18x64xbf16> to vector<16x16x64xbf16>
    %57 = vector.extract_strided_slice %54 {offsets = [0, 2, 0], sizes = [16, 16, 64], strides = [1, 1, 1]} : vector<16x18x64xbf16> to vector<16x16x64xbf16>
    %58 = tpu.concatenate %55, %56, %57 in 2 : vector<16x16x64xbf16>, vector<16x16x64xbf16>, vector<16x16x64xbf16> -> vector<16x16x192xbf16>
    %59 = vector.shape_cast %58 : vector<16x16x192xbf16> to vector<256x192xbf16>
    %c2 = arith.constant 2 : index
    %c0_25 = arith.constant 0 : index
    %c0_26 = arith.constant 0 : index
    %60 = vector.load %arg4[%c2, %c0_25, %c0_26] : memref<3x192x64xbf16, #tpu.memory_space<vmem>>, vector<1x192x64xbf16>
    %61 = vector.shape_cast %60 : vector<1x192x64xbf16> to vector<192x64xbf16>
    %cst_27 = arith.constant dense<0.000000e+00> : vector<256x64xf32>
    %62 = tpu.matmul %59, %61, %cst_27 {dimension_numbers = #tpu.dot_dimension_numbers<[1], [0], [0], [1], [0, 0, 1, 1], [], []>} : vector<256x192xbf16>, vector<192x64xbf16>, vector<256x64xf32> -> vector<256x64xf32>
    %63 = arith.addf %53, %62 : vector<256x64xf32>
    %c0_28 = arith.constant 0 : index
    %c0_29 = arith.constant 0 : index
    %64 = vector.load %arg5[%c0_28, %c0_29] : memref<1x64xf32, #tpu.memory_space<vmem>>, vector<1x64xf32>
    %65 = vector.broadcast %64 : vector<1x64xf32> to vector<256x64xf32>
    %66 = arith.addf %63, %65 : vector<256x64xf32>
    %67 = vector.shape_cast %66 : vector<256x64xf32> to vector<16x16x64xf32>
    %c0_30 = arith.constant 0 : index
    %c0_31 = arith.constant 0 : index
    %c0_32 = arith.constant 0 : index
    %c0_33 = arith.constant 0 : index
    %68 = vector.load %arg6[%c0_30, %c0_31, %c0_32, %c0_33] : memref<1x16x16x64xf32, #tpu.memory_space<vmem>>, vector<1x16x16x64xf32>
    %69 = vector.shape_cast %68 : vector<1x16x16x64xf32> to vector<16x16x64xf32>
    %70 = vector.shape_cast %67 : vector<16x16x64xf32> to vector<1x16x16x64xf32>
    tpu.vector_store %arg6[%c0_30, %c0_31, %c0_32, %c0_33], %70 {strides = array<i32>} : memref<1x16x16x64xf32, #tpu.memory_space<vmem>>, vector<1x16x16x64xf32>,
    %cst_34 = arith.constant 0.000000e+00 : f32
    %71 = vector.broadcast %cst_34 : f32 to vector<256x64xf32>
    %72 = arith.maximumf %66, %71 : vector<256x64xf32>
    %73 = vector.shape_cast %72 : vector<256x64xf32> to vector<8x2x8x2x64xf32>
    %cst_35 = arith.constant dense<0xFF800000> : vector<8x2x8x64xf32>
    %74 = vector.multi_reduction <maximumf>, %73, %cst_35 [3] : vector<8x2x8x2x64xf32> to vector<8x2x8x64xf32>
    %cst_36 = arith.constant dense<0xFF800000> : vector<8x8x64xf32>
    %75 = vector.multi_reduction <maximumf>, %74, %cst_36 [1] : vector<8x2x8x64xf32> to vector<8x8x64xf32>
    %c0_37 = arith.constant 0 : index
    %c0_38 = arith.constant 0 : index
    %c0_39 = arith.constant 0 : index
    %c0_40 = arith.constant 0 : index
    %76 = vector.load %arg7[%c0_37, %c0_38, %c0_39, %c0_40] : memref<1x8x8x64xf32, #tpu.memory_space<vmem>>, vector<1x8x8x64xf32>
    %77 = vector.shape_cast %76 : vector<1x8x8x64xf32> to vector<8x8x64xf32>
    %78 = vector.shape_cast %75 : vector<8x8x64xf32> to vector<1x8x8x64xf32>
    tpu.vector_store %arg7[%c0_37, %c0_38, %c0_39, %c0_40], %78 {strides = array<i32>} : memref<1x8x8x64xf32, #tpu.memory_space<vmem>>, vector<1x8x8x64xf32>,
    return
  }
  func.func @transform_0(%arg0: i32) -> (i32, i32, i32, i32) {
    %c0_i32 = arith.constant 0 : i32
    %c0_i32_0 = arith.constant 0 : i32
    %c0_i32_1 = arith.constant 0 : i32
    %c0_i32_2 = arith.constant 0 : i32
    return %arg0, %c0_i32, %c0_i32_0, %c0_i32_1 : i32, i32, i32, i32
  }
  func.func @transform_1(%arg0: i32) -> (i32, i32) {
    %c0_i32 = arith.constant 0 : i32
    %c0_i32_0 = arith.constant 0 : i32
    %c0_i32_1 = arith.constant 0 : i32
    return %c0_i32, %c0_i32_0 : i32, i32
  }
  func.func @transform_2(%arg0: i32) -> (i32, i32) {
    %c0_i32 = arith.constant 0 : i32
    %c0_i32_0 = arith.constant 0 : i32
    %c0_i32_1 = arith.constant 0 : i32
    return %c0_i32, %c0_i32_0 : i32, i32
  }
  func.func @transform_3(%arg0: i32) -> (i32, i32, i32) {
    %c0_i32 = arith.constant 0 : i32
    %c0_i32_0 = arith.constant 0 : i32
    %c0_i32_1 = arith.constant 0 : i32
    %c0_i32_2 = arith.constant 0 : i32
    return %c0_i32, %c0_i32_0, %c0_i32_1 : i32, i32, i32
  }
  func.func @transform_4(%arg0: i32) -> (i32, i32) {
    %c0_i32 = arith.constant 0 : i32
    %c0_i32_0 = arith.constant 0 : i32
    %c0_i32_1 = arith.constant 0 : i32
    return %c0_i32, %c0_i32_0 : i32, i32
  }
  func.func @transform_5(%arg0: i32) -> (i32, i32, i32, i32) {
    %c0_i32 = arith.constant 0 : i32
    %c0_i32_0 = arith.constant 0 : i32
    %c0_i32_1 = arith.constant 0 : i32
    %c0_i32_2 = arith.constant 0 : i32
    return %arg0, %c0_i32, %c0_i32_0, %c0_i32_1 : i32, i32, i32, i32
  }
  func.func @transform_6(%arg0: i32) -> (i32, i32, i32, i32) {
    %c0_i32 = arith.constant 0 : i32
    %c0_i32_0 = arith.constant 0 : i32
    %c0_i32_1 = arith.constant 0 : i32
    %c0_i32_2 = arith.constant 0 : i32
    return %arg0, %c0_i32, %c0_i32_0, %c0_i32_1 : i32, i32, i32, i32
  }
}

module attributes {stable_mosaic.version = 11 : i64} {
  func.func @_conv3x3_kernel(%arg0: i32, %arg1: memref<1x10x10x64xf32, #tpu.memory_space<vmem>>, %arg2: memref<3x192x128xbf16, #tpu.memory_space<vmem>>, %arg3: memref<1x128xf32, #tpu.memory_space<vmem>>, %arg4: memref<1x8x8x128xf32, #tpu.memory_space<vmem>>) attributes {dimension_semantics = [#tpu.dimension_semantics<parallel>], iteration_bounds = array<i64: 2>, scalar_prefetch = 0 : i64, scratch_operands = 0 : i64, tpu.core_type = #tpu.core_type<tc>, window_params = [{transform_indices = @transform_0, window_bounds = array<i64: 1, 10, 10, 64>}, {pipeline_mode = #tpu.pipeline_mode<synchronous>, transform_indices = @transform_1, window_bounds = array<i64: 3, 192, 128>}, {pipeline_mode = #tpu.pipeline_mode<synchronous>, transform_indices = @transform_2, window_bounds = array<i64: 1, 128>}, {transform_indices = @transform_3, window_bounds = array<i64: 1, 8, 8, 128>}]} {
    %c0 = arith.constant 0 : index
    %c0_0 = arith.constant 0 : index
    %c0_1 = arith.constant 0 : index
    %c0_2 = arith.constant 0 : index
    %0 = vector.load %arg1[%c0, %c0_0, %c0_1, %c0_2] : memref<1x10x10x64xf32, #tpu.memory_space<vmem>>, vector<1x10x10x64xf32>
    %1 = vector.shape_cast %0 : vector<1x10x10x64xf32> to vector<10x10x64xf32>
    %2 = arith.truncf %1 : vector<10x10x64xf32> to vector<10x10x64xbf16>
    %3 = vector.extract_strided_slice %2 {offsets = [0, 0, 0], sizes = [8, 10, 64], strides = [1, 1, 1]} : vector<10x10x64xbf16> to vector<8x10x64xbf16>
    %4 = vector.extract_strided_slice %3 {offsets = [0, 0, 0], sizes = [8, 8, 64], strides = [1, 1, 1]} : vector<8x10x64xbf16> to vector<8x8x64xbf16>
    %5 = vector.extract_strided_slice %3 {offsets = [0, 1, 0], sizes = [8, 8, 64], strides = [1, 1, 1]} : vector<8x10x64xbf16> to vector<8x8x64xbf16>
    %6 = vector.extract_strided_slice %3 {offsets = [0, 2, 0], sizes = [8, 8, 64], strides = [1, 1, 1]} : vector<8x10x64xbf16> to vector<8x8x64xbf16>
    %7 = tpu.concatenate %4, %5, %6 in 2 : vector<8x8x64xbf16>, vector<8x8x64xbf16>, vector<8x8x64xbf16> -> vector<8x8x192xbf16>
    %8 = vector.shape_cast %7 : vector<8x8x192xbf16> to vector<64x192xbf16>
    %c0_3 = arith.constant 0 : index
    %c0_4 = arith.constant 0 : index
    %c0_5 = arith.constant 0 : index
    %9 = vector.load %arg2[%c0_3, %c0_4, %c0_5] : memref<3x192x128xbf16, #tpu.memory_space<vmem>>, vector<1x192x128xbf16>
    %10 = vector.shape_cast %9 : vector<1x192x128xbf16> to vector<192x128xbf16>
    %cst = arith.constant dense<0.000000e+00> : vector<64x128xf32>
    %11 = tpu.matmul %8, %10, %cst {dimension_numbers = #tpu.dot_dimension_numbers<[1], [0], [0], [1], [0, 0, 1, 1], [], []>} : vector<64x192xbf16>, vector<192x128xbf16>, vector<64x128xf32> -> vector<64x128xf32>
    %12 = vector.extract_strided_slice %2 {offsets = [1, 0, 0], sizes = [8, 10, 64], strides = [1, 1, 1]} : vector<10x10x64xbf16> to vector<8x10x64xbf16>
    %13 = vector.extract_strided_slice %12 {offsets = [0, 0, 0], sizes = [8, 8, 64], strides = [1, 1, 1]} : vector<8x10x64xbf16> to vector<8x8x64xbf16>
    %14 = vector.extract_strided_slice %12 {offsets = [0, 1, 0], sizes = [8, 8, 64], strides = [1, 1, 1]} : vector<8x10x64xbf16> to vector<8x8x64xbf16>
    %15 = vector.extract_strided_slice %12 {offsets = [0, 2, 0], sizes = [8, 8, 64], strides = [1, 1, 1]} : vector<8x10x64xbf16> to vector<8x8x64xbf16>
    %16 = tpu.concatenate %13, %14, %15 in 2 : vector<8x8x64xbf16>, vector<8x8x64xbf16>, vector<8x8x64xbf16> -> vector<8x8x192xbf16>
    %17 = vector.shape_cast %16 : vector<8x8x192xbf16> to vector<64x192xbf16>
    %c1 = arith.constant 1 : index
    %c0_6 = arith.constant 0 : index
    %c0_7 = arith.constant 0 : index
    %18 = vector.load %arg2[%c1, %c0_6, %c0_7] : memref<3x192x128xbf16, #tpu.memory_space<vmem>>, vector<1x192x128xbf16>
    %19 = vector.shape_cast %18 : vector<1x192x128xbf16> to vector<192x128xbf16>
    %cst_8 = arith.constant dense<0.000000e+00> : vector<64x128xf32>
    %20 = tpu.matmul %17, %19, %cst_8 {dimension_numbers = #tpu.dot_dimension_numbers<[1], [0], [0], [1], [0, 0, 1, 1], [], []>} : vector<64x192xbf16>, vector<192x128xbf16>, vector<64x128xf32> -> vector<64x128xf32>
    %21 = arith.addf %11, %20 : vector<64x128xf32>
    %22 = vector.extract_strided_slice %2 {offsets = [2, 0, 0], sizes = [8, 10, 64], strides = [1, 1, 1]} : vector<10x10x64xbf16> to vector<8x10x64xbf16>
    %23 = vector.extract_strided_slice %22 {offsets = [0, 0, 0], sizes = [8, 8, 64], strides = [1, 1, 1]} : vector<8x10x64xbf16> to vector<8x8x64xbf16>
    %24 = vector.extract_strided_slice %22 {offsets = [0, 1, 0], sizes = [8, 8, 64], strides = [1, 1, 1]} : vector<8x10x64xbf16> to vector<8x8x64xbf16>
    %25 = vector.extract_strided_slice %22 {offsets = [0, 2, 0], sizes = [8, 8, 64], strides = [1, 1, 1]} : vector<8x10x64xbf16> to vector<8x8x64xbf16>
    %26 = tpu.concatenate %23, %24, %25 in 2 : vector<8x8x64xbf16>, vector<8x8x64xbf16>, vector<8x8x64xbf16> -> vector<8x8x192xbf16>
    %27 = vector.shape_cast %26 : vector<8x8x192xbf16> to vector<64x192xbf16>
    %c2 = arith.constant 2 : index
    %c0_9 = arith.constant 0 : index
    %c0_10 = arith.constant 0 : index
    %28 = vector.load %arg2[%c2, %c0_9, %c0_10] : memref<3x192x128xbf16, #tpu.memory_space<vmem>>, vector<1x192x128xbf16>
    %29 = vector.shape_cast %28 : vector<1x192x128xbf16> to vector<192x128xbf16>
    %cst_11 = arith.constant dense<0.000000e+00> : vector<64x128xf32>
    %30 = tpu.matmul %27, %29, %cst_11 {dimension_numbers = #tpu.dot_dimension_numbers<[1], [0], [0], [1], [0, 0, 1, 1], [], []>} : vector<64x192xbf16>, vector<192x128xbf16>, vector<64x128xf32> -> vector<64x128xf32>
    %31 = arith.addf %21, %30 : vector<64x128xf32>
    %c0_12 = arith.constant 0 : index
    %c0_13 = arith.constant 0 : index
    %32 = vector.load %arg3[%c0_12, %c0_13] : memref<1x128xf32, #tpu.memory_space<vmem>>, vector<1x128xf32>
    %33 = vector.broadcast %32 : vector<1x128xf32> to vector<64x128xf32>
    %34 = arith.addf %31, %33 : vector<64x128xf32>
    %cst_14 = arith.constant 0.000000e+00 : f32
    %35 = vector.broadcast %cst_14 : f32 to vector<64x128xf32>
    %36 = arith.maximumf %34, %35 : vector<64x128xf32>
    %37 = vector.shape_cast %36 : vector<64x128xf32> to vector<8x8x128xf32>
    %c0_15 = arith.constant 0 : index
    %c0_16 = arith.constant 0 : index
    %c0_17 = arith.constant 0 : index
    %c0_18 = arith.constant 0 : index
    %38 = vector.load %arg4[%c0_15, %c0_16, %c0_17, %c0_18] : memref<1x8x8x128xf32, #tpu.memory_space<vmem>>, vector<1x8x8x128xf32>
    %39 = vector.shape_cast %38 : vector<1x8x8x128xf32> to vector<8x8x128xf32>
    %40 = vector.shape_cast %37 : vector<8x8x128xf32> to vector<1x8x8x128xf32>
    tpu.vector_store %arg4[%c0_15, %c0_16, %c0_17, %c0_18], %40 {strides = array<i32>} : memref<1x8x8x128xf32, #tpu.memory_space<vmem>>, vector<1x8x8x128xf32>,
    return
  }
  func.func @transform_0(%arg0: i32) -> (i32, i32, i32, i32) {
    %c0_i32 = arith.constant 0 : i32
    %c0_i32_0 = arith.constant 0 : i32
    %c0_i32_1 = arith.constant 0 : i32
    %c0_i32_2 = arith.constant 0 : i32
    return %arg0, %c0_i32, %c0_i32_0, %c0_i32_1 : i32, i32, i32, i32
  }
  func.func @transform_1(%arg0: i32) -> (i32, i32, i32) {
    %c0_i32 = arith.constant 0 : i32
    %c0_i32_0 = arith.constant 0 : i32
    %c0_i32_1 = arith.constant 0 : i32
    %c0_i32_2 = arith.constant 0 : i32
    return %c0_i32, %c0_i32_0, %c0_i32_1 : i32, i32, i32
  }
  func.func @transform_2(%arg0: i32) -> (i32, i32) {
    %c0_i32 = arith.constant 0 : i32
    %c0_i32_0 = arith.constant 0 : i32
    %c0_i32_1 = arith.constant 0 : i32
    return %c0_i32, %c0_i32_0 : i32, i32
  }
  func.func @transform_3(%arg0: i32) -> (i32, i32, i32, i32) {
    %c0_i32 = arith.constant 0 : i32
    %c0_i32_0 = arith.constant 0 : i32
    %c0_i32_1 = arith.constant 0 : i32
    %c0_i32_2 = arith.constant 0 : i32
    return %arg0, %c0_i32, %c0_i32_0, %c0_i32_1 : i32, i32, i32, i32
  }
}

module attributes {stable_mosaic.version = 11 : i64} {
  func.func @_conv3x3_kernel(%arg0: i32, %arg1: memref<1x10x10x128xf32, #tpu.memory_space<vmem>>, %arg2: memref<3x384x128xbf16, #tpu.memory_space<vmem>>, %arg3: memref<1x128xf32, #tpu.memory_space<vmem>>, %arg4: memref<1x4x4x128xf32, #tpu.memory_space<vmem>>) attributes {dimension_semantics = [#tpu.dimension_semantics<parallel>], iteration_bounds = array<i64: 2>, scalar_prefetch = 0 : i64, scratch_operands = 0 : i64, tpu.core_type = #tpu.core_type<tc>, window_params = [{transform_indices = @transform_0, window_bounds = array<i64: 1, 10, 10, 128>}, {pipeline_mode = #tpu.pipeline_mode<synchronous>, transform_indices = @transform_1, window_bounds = array<i64: 3, 384, 128>}, {pipeline_mode = #tpu.pipeline_mode<synchronous>, transform_indices = @transform_2, window_bounds = array<i64: 1, 128>}, {transform_indices = @transform_3, window_bounds = array<i64: 1, 4, 4, 128>}]} {
    %c0 = arith.constant 0 : index
    %c0_0 = arith.constant 0 : index
    %c0_1 = arith.constant 0 : index
    %c0_2 = arith.constant 0 : index
    %0 = vector.load %arg1[%c0, %c0_0, %c0_1, %c0_2] : memref<1x10x10x128xf32, #tpu.memory_space<vmem>>, vector<1x10x10x128xf32>
    %1 = vector.shape_cast %0 : vector<1x10x10x128xf32> to vector<10x10x128xf32>
    %2 = arith.truncf %1 : vector<10x10x128xf32> to vector<10x10x128xbf16>
    %3 = vector.extract_strided_slice %2 {offsets = [0, 0, 0], sizes = [8, 10, 128], strides = [1, 1, 1]} : vector<10x10x128xbf16> to vector<8x10x128xbf16>
    %4 = vector.extract_strided_slice %3 {offsets = [0, 0, 0], sizes = [8, 8, 128], strides = [1, 1, 1]} : vector<8x10x128xbf16> to vector<8x8x128xbf16>
    %5 = vector.extract_strided_slice %3 {offsets = [0, 1, 0], sizes = [8, 8, 128], strides = [1, 1, 1]} : vector<8x10x128xbf16> to vector<8x8x128xbf16>
    %6 = vector.extract_strided_slice %3 {offsets = [0, 2, 0], sizes = [8, 8, 128], strides = [1, 1, 1]} : vector<8x10x128xbf16> to vector<8x8x128xbf16>
    %7 = tpu.concatenate %4, %5, %6 in 2 : vector<8x8x128xbf16>, vector<8x8x128xbf16>, vector<8x8x128xbf16> -> vector<8x8x384xbf16>
    %8 = vector.shape_cast %7 : vector<8x8x384xbf16> to vector<64x384xbf16>
    %c0_3 = arith.constant 0 : index
    %c0_4 = arith.constant 0 : index
    %c0_5 = arith.constant 0 : index
    %9 = vector.load %arg2[%c0_3, %c0_4, %c0_5] : memref<3x384x128xbf16, #tpu.memory_space<vmem>>, vector<1x384x128xbf16>
    %10 = vector.shape_cast %9 : vector<1x384x128xbf16> to vector<384x128xbf16>
    %cst = arith.constant dense<0.000000e+00> : vector<64x128xf32>
    %11 = tpu.matmul %8, %10, %cst {dimension_numbers = #tpu.dot_dimension_numbers<[1], [0], [0], [1], [0, 0, 1, 1], [], []>} : vector<64x384xbf16>, vector<384x128xbf16>, vector<64x128xf32> -> vector<64x128xf32>
    %12 = vector.extract_strided_slice %2 {offsets = [1, 0, 0], sizes = [8, 10, 128], strides = [1, 1, 1]} : vector<10x10x128xbf16> to vector<8x10x128xbf16>
    %13 = vector.extract_strided_slice %12 {offsets = [0, 0, 0], sizes = [8, 8, 128], strides = [1, 1, 1]} : vector<8x10x128xbf16> to vector<8x8x128xbf16>
    %14 = vector.extract_strided_slice %12 {offsets = [0, 1, 0], sizes = [8, 8, 128], strides = [1, 1, 1]} : vector<8x10x128xbf16> to vector<8x8x128xbf16>
    %15 = vector.extract_strided_slice %12 {offsets = [0, 2, 0], sizes = [8, 8, 128], strides = [1, 1, 1]} : vector<8x10x128xbf16> to vector<8x8x128xbf16>
    %16 = tpu.concatenate %13, %14, %15 in 2 : vector<8x8x128xbf16>, vector<8x8x128xbf16>, vector<8x8x128xbf16> -> vector<8x8x384xbf16>
    %17 = vector.shape_cast %16 : vector<8x8x384xbf16> to vector<64x384xbf16>
    %c1 = arith.constant 1 : index
    %c0_6 = arith.constant 0 : index
    %c0_7 = arith.constant 0 : index
    %18 = vector.load %arg2[%c1, %c0_6, %c0_7] : memref<3x384x128xbf16, #tpu.memory_space<vmem>>, vector<1x384x128xbf16>
    %19 = vector.shape_cast %18 : vector<1x384x128xbf16> to vector<384x128xbf16>
    %cst_8 = arith.constant dense<0.000000e+00> : vector<64x128xf32>
    %20 = tpu.matmul %17, %19, %cst_8 {dimension_numbers = #tpu.dot_dimension_numbers<[1], [0], [0], [1], [0, 0, 1, 1], [], []>} : vector<64x384xbf16>, vector<384x128xbf16>, vector<64x128xf32> -> vector<64x128xf32>
    %21 = arith.addf %11, %20 : vector<64x128xf32>
    %22 = vector.extract_strided_slice %2 {offsets = [2, 0, 0], sizes = [8, 10, 128], strides = [1, 1, 1]} : vector<10x10x128xbf16> to vector<8x10x128xbf16>
    %23 = vector.extract_strided_slice %22 {offsets = [0, 0, 0], sizes = [8, 8, 128], strides = [1, 1, 1]} : vector<8x10x128xbf16> to vector<8x8x128xbf16>
    %24 = vector.extract_strided_slice %22 {offsets = [0, 1, 0], sizes = [8, 8, 128], strides = [1, 1, 1]} : vector<8x10x128xbf16> to vector<8x8x128xbf16>
    %25 = vector.extract_strided_slice %22 {offsets = [0, 2, 0], sizes = [8, 8, 128], strides = [1, 1, 1]} : vector<8x10x128xbf16> to vector<8x8x128xbf16>
    %26 = tpu.concatenate %23, %24, %25 in 2 : vector<8x8x128xbf16>, vector<8x8x128xbf16>, vector<8x8x128xbf16> -> vector<8x8x384xbf16>
    %27 = vector.shape_cast %26 : vector<8x8x384xbf16> to vector<64x384xbf16>
    %c2 = arith.constant 2 : index
    %c0_9 = arith.constant 0 : index
    %c0_10 = arith.constant 0 : index
    %28 = vector.load %arg2[%c2, %c0_9, %c0_10] : memref<3x384x128xbf16, #tpu.memory_space<vmem>>, vector<1x384x128xbf16>
    %29 = vector.shape_cast %28 : vector<1x384x128xbf16> to vector<384x128xbf16>
    %cst_11 = arith.constant dense<0.000000e+00> : vector<64x128xf32>
    %30 = tpu.matmul %27, %29, %cst_11 {dimension_numbers = #tpu.dot_dimension_numbers<[1], [0], [0], [1], [0, 0, 1, 1], [], []>} : vector<64x384xbf16>, vector<384x128xbf16>, vector<64x128xf32> -> vector<64x128xf32>
    %31 = arith.addf %21, %30 : vector<64x128xf32>
    %c0_12 = arith.constant 0 : index
    %c0_13 = arith.constant 0 : index
    %32 = vector.load %arg3[%c0_12, %c0_13] : memref<1x128xf32, #tpu.memory_space<vmem>>, vector<1x128xf32>
    %33 = vector.broadcast %32 : vector<1x128xf32> to vector<64x128xf32>
    %34 = arith.addf %31, %33 : vector<64x128xf32>
    %cst_14 = arith.constant 0.000000e+00 : f32
    %35 = vector.broadcast %cst_14 : f32 to vector<64x128xf32>
    %36 = arith.maximumf %34, %35 : vector<64x128xf32>
    %37 = vector.shape_cast %36 : vector<64x128xf32> to vector<4x2x4x2x128xf32>
    %cst_15 = arith.constant dense<0xFF800000> : vector<4x2x4x128xf32>
    %38 = vector.multi_reduction <maximumf>, %37, %cst_15 [3] : vector<4x2x4x2x128xf32> to vector<4x2x4x128xf32>
    %cst_16 = arith.constant dense<0xFF800000> : vector<4x4x128xf32>
    %39 = vector.multi_reduction <maximumf>, %38, %cst_16 [1] : vector<4x2x4x128xf32> to vector<4x4x128xf32>
    %c0_17 = arith.constant 0 : index
    %c0_18 = arith.constant 0 : index
    %c0_19 = arith.constant 0 : index
    %c0_20 = arith.constant 0 : index
    %40 = vector.load %arg4[%c0_17, %c0_18, %c0_19, %c0_20] : memref<1x4x4x128xf32, #tpu.memory_space<vmem>>, vector<1x4x4x128xf32>
    %41 = vector.shape_cast %40 : vector<1x4x4x128xf32> to vector<4x4x128xf32>
    %42 = vector.shape_cast %39 : vector<4x4x128xf32> to vector<1x4x4x128xf32>
    tpu.vector_store %arg4[%c0_17, %c0_18, %c0_19, %c0_20], %42 {strides = array<i32>} : memref<1x4x4x128xf32, #tpu.memory_space<vmem>>, vector<1x4x4x128xf32>,
    return
  }
  func.func @transform_0(%arg0: i32) -> (i32, i32, i32, i32) {
    %c0_i32 = arith.constant 0 : i32
    %c0_i32_0 = arith.constant 0 : i32
    %c0_i32_1 = arith.constant 0 : i32
    %c0_i32_2 = arith.constant 0 : i32
    return %arg0, %c0_i32, %c0_i32_0, %c0_i32_1 : i32, i32, i32, i32
  }
  func.func @transform_1(%arg0: i32) -> (i32, i32, i32) {
    %c0_i32 = arith.constant 0 : i32
    %c0_i32_0 = arith.constant 0 : i32
    %c0_i32_1 = arith.constant 0 : i32
    %c0_i32_2 = arith.constant 0 : i32
    return %c0_i32, %c0_i32_0, %c0_i32_1 : i32, i32, i32
  }
  func.func @transform_2(%arg0: i32) -> (i32, i32) {
    %c0_i32 = arith.constant 0 : i32
    %c0_i32_0 = arith.constant 0 : i32
    %c0_i32_1 = arith.constant 0 : i32
    return %c0_i32, %c0_i32_0 : i32, i32
  }
  func.func @transform_3(%arg0: i32) -> (i32, i32, i32, i32) {
    %c0_i32 = arith.constant 0 : i32
    %c0_i32_0 = arith.constant 0 : i32
    %c0_i32_1 = arith.constant 0 : i32
    %c0_i32_2 = arith.constant 0 : i32
    return %arg0, %c0_i32, %c0_i32_0, %c0_i32_1 : i32, i32, i32, i32
  }
}

module attributes {stable_mosaic.version = 11 : i64} {
  func.func @_conv3x3_kernel(%arg0: i32, %arg1: memref<1x6x6x128xf32, #tpu.memory_space<vmem>>, %arg2: memref<3x384x256xbf16, #tpu.memory_space<vmem>>, %arg3: memref<1x256xf32, #tpu.memory_space<vmem>>, %arg4: memref<1x4x4x256xf32, #tpu.memory_space<vmem>>) attributes {dimension_semantics = [#tpu.dimension_semantics<parallel>], iteration_bounds = array<i64: 2>, scalar_prefetch = 0 : i64, scratch_operands = 0 : i64, tpu.core_type = #tpu.core_type<tc>, window_params = [{transform_indices = @transform_0, window_bounds = array<i64: 1, 6, 6, 128>}, {pipeline_mode = #tpu.pipeline_mode<synchronous>, transform_indices = @transform_1, window_bounds = array<i64: 3, 384, 256>}, {pipeline_mode = #tpu.pipeline_mode<synchronous>, transform_indices = @transform_2, window_bounds = array<i64: 1, 256>}, {transform_indices = @transform_3, window_bounds = array<i64: 1, 4, 4, 256>}]} {
    %c0 = arith.constant 0 : index
    %c0_0 = arith.constant 0 : index
    %c0_1 = arith.constant 0 : index
    %c0_2 = arith.constant 0 : index
    %0 = vector.load %arg1[%c0, %c0_0, %c0_1, %c0_2] : memref<1x6x6x128xf32, #tpu.memory_space<vmem>>, vector<1x6x6x128xf32>
    %1 = vector.shape_cast %0 : vector<1x6x6x128xf32> to vector<6x6x128xf32>
    %2 = arith.truncf %1 : vector<6x6x128xf32> to vector<6x6x128xbf16>
    %3 = vector.extract_strided_slice %2 {offsets = [0, 0, 0], sizes = [4, 6, 128], strides = [1, 1, 1]} : vector<6x6x128xbf16> to vector<4x6x128xbf16>
    %4 = vector.extract_strided_slice %3 {offsets = [0, 0, 0], sizes = [4, 4, 128], strides = [1, 1, 1]} : vector<4x6x128xbf16> to vector<4x4x128xbf16>
    %5 = vector.extract_strided_slice %3 {offsets = [0, 1, 0], sizes = [4, 4, 128], strides = [1, 1, 1]} : vector<4x6x128xbf16> to vector<4x4x128xbf16>
    %6 = vector.extract_strided_slice %3 {offsets = [0, 2, 0], sizes = [4, 4, 128], strides = [1, 1, 1]} : vector<4x6x128xbf16> to vector<4x4x128xbf16>
    %7 = tpu.concatenate %4, %5, %6 in 2 : vector<4x4x128xbf16>, vector<4x4x128xbf16>, vector<4x4x128xbf16> -> vector<4x4x384xbf16>
    %8 = vector.shape_cast %7 : vector<4x4x384xbf16> to vector<16x384xbf16>
    %c0_3 = arith.constant 0 : index
    %c0_4 = arith.constant 0 : index
    %c0_5 = arith.constant 0 : index
    %9 = vector.load %arg2[%c0_3, %c0_4, %c0_5] : memref<3x384x256xbf16, #tpu.memory_space<vmem>>, vector<1x384x256xbf16>
    %10 = vector.shape_cast %9 : vector<1x384x256xbf16> to vector<384x256xbf16>
    %cst = arith.constant dense<0.000000e+00> : vector<16x256xf32>
    %11 = tpu.matmul %8, %10, %cst {dimension_numbers = #tpu.dot_dimension_numbers<[1], [0], [0], [1], [0, 0, 1, 1], [], []>} : vector<16x384xbf16>, vector<384x256xbf16>, vector<16x256xf32> -> vector<16x256xf32>
    %12 = vector.extract_strided_slice %2 {offsets = [1, 0, 0], sizes = [4, 6, 128], strides = [1, 1, 1]} : vector<6x6x128xbf16> to vector<4x6x128xbf16>
    %13 = vector.extract_strided_slice %12 {offsets = [0, 0, 0], sizes = [4, 4, 128], strides = [1, 1, 1]} : vector<4x6x128xbf16> to vector<4x4x128xbf16>
    %14 = vector.extract_strided_slice %12 {offsets = [0, 1, 0], sizes = [4, 4, 128], strides = [1, 1, 1]} : vector<4x6x128xbf16> to vector<4x4x128xbf16>
    %15 = vector.extract_strided_slice %12 {offsets = [0, 2, 0], sizes = [4, 4, 128], strides = [1, 1, 1]} : vector<4x6x128xbf16> to vector<4x4x128xbf16>
    %16 = tpu.concatenate %13, %14, %15 in 2 : vector<4x4x128xbf16>, vector<4x4x128xbf16>, vector<4x4x128xbf16> -> vector<4x4x384xbf16>
    %17 = vector.shape_cast %16 : vector<4x4x384xbf16> to vector<16x384xbf16>
    %c1 = arith.constant 1 : index
    %c0_6 = arith.constant 0 : index
    %c0_7 = arith.constant 0 : index
    %18 = vector.load %arg2[%c1, %c0_6, %c0_7] : memref<3x384x256xbf16, #tpu.memory_space<vmem>>, vector<1x384x256xbf16>
    %19 = vector.shape_cast %18 : vector<1x384x256xbf16> to vector<384x256xbf16>
    %cst_8 = arith.constant dense<0.000000e+00> : vector<16x256xf32>
    %20 = tpu.matmul %17, %19, %cst_8 {dimension_numbers = #tpu.dot_dimension_numbers<[1], [0], [0], [1], [0, 0, 1, 1], [], []>} : vector<16x384xbf16>, vector<384x256xbf16>, vector<16x256xf32> -> vector<16x256xf32>
    %21 = arith.addf %11, %20 : vector<16x256xf32>
    %22 = vector.extract_strided_slice %2 {offsets = [2, 0, 0], sizes = [4, 6, 128], strides = [1, 1, 1]} : vector<6x6x128xbf16> to vector<4x6x128xbf16>
    %23 = vector.extract_strided_slice %22 {offsets = [0, 0, 0], sizes = [4, 4, 128], strides = [1, 1, 1]} : vector<4x6x128xbf16> to vector<4x4x128xbf16>
    %24 = vector.extract_strided_slice %22 {offsets = [0, 1, 0], sizes = [4, 4, 128], strides = [1, 1, 1]} : vector<4x6x128xbf16> to vector<4x4x128xbf16>
    %25 = vector.extract_strided_slice %22 {offsets = [0, 2, 0], sizes = [4, 4, 128], strides = [1, 1, 1]} : vector<4x6x128xbf16> to vector<4x4x128xbf16>
    %26 = tpu.concatenate %23, %24, %25 in 2 : vector<4x4x128xbf16>, vector<4x4x128xbf16>, vector<4x4x128xbf16> -> vector<4x4x384xbf16>
    %27 = vector.shape_cast %26 : vector<4x4x384xbf16> to vector<16x384xbf16>
    %c2 = arith.constant 2 : index
    %c0_9 = arith.constant 0 : index
    %c0_10 = arith.constant 0 : index
    %28 = vector.load %arg2[%c2, %c0_9, %c0_10] : memref<3x384x256xbf16, #tpu.memory_space<vmem>>, vector<1x384x256xbf16>
    %29 = vector.shape_cast %28 : vector<1x384x256xbf16> to vector<384x256xbf16>
    %cst_11 = arith.constant dense<0.000000e+00> : vector<16x256xf32>
    %30 = tpu.matmul %27, %29, %cst_11 {dimension_numbers = #tpu.dot_dimension_numbers<[1], [0], [0], [1], [0, 0, 1, 1], [], []>} : vector<16x384xbf16>, vector<384x256xbf16>, vector<16x256xf32> -> vector<16x256xf32>
    %31 = arith.addf %21, %30 : vector<16x256xf32>
    %c0_12 = arith.constant 0 : index
    %c0_13 = arith.constant 0 : index
    %32 = vector.load %arg3[%c0_12, %c0_13] : memref<1x256xf32, #tpu.memory_space<vmem>>, vector<1x256xf32>
    %33 = vector.broadcast %32 : vector<1x256xf32> to vector<16x256xf32>
    %34 = arith.addf %31, %33 : vector<16x256xf32>
    %cst_14 = arith.constant 0.000000e+00 : f32
    %35 = vector.broadcast %cst_14 : f32 to vector<16x256xf32>
    %36 = arith.maximumf %34, %35 : vector<16x256xf32>
    %37 = vector.shape_cast %36 : vector<16x256xf32> to vector<4x4x256xf32>
    %c0_15 = arith.constant 0 : index
    %c0_16 = arith.constant 0 : index
    %c0_17 = arith.constant 0 : index
    %c0_18 = arith.constant 0 : index
    %38 = vector.load %arg4[%c0_15, %c0_16, %c0_17, %c0_18] : memref<1x4x4x256xf32, #tpu.memory_space<vmem>>, vector<1x4x4x256xf32>
    %39 = vector.shape_cast %38 : vector<1x4x4x256xf32> to vector<4x4x256xf32>
    %40 = vector.shape_cast %37 : vector<4x4x256xf32> to vector<1x4x4x256xf32>
    tpu.vector_store %arg4[%c0_15, %c0_16, %c0_17, %c0_18], %40 {strides = array<i32>} : memref<1x4x4x256xf32, #tpu.memory_space<vmem>>, vector<1x4x4x256xf32>,
    return
  }
  func.func @transform_0(%arg0: i32) -> (i32, i32, i32, i32) {
    %c0_i32 = arith.constant 0 : i32
    %c0_i32_0 = arith.constant 0 : i32
    %c0_i32_1 = arith.constant 0 : i32
    %c0_i32_2 = arith.constant 0 : i32
    return %arg0, %c0_i32, %c0_i32_0, %c0_i32_1 : i32, i32, i32, i32
  }
  func.func @transform_1(%arg0: i32) -> (i32, i32, i32) {
    %c0_i32 = arith.constant 0 : i32
    %c0_i32_0 = arith.constant 0 : i32
    %c0_i32_1 = arith.constant 0 : i32
    %c0_i32_2 = arith.constant 0 : i32
    return %c0_i32, %c0_i32_0, %c0_i32_1 : i32, i32, i32
  }
  func.func @transform_2(%arg0: i32) -> (i32, i32) {
    %c0_i32 = arith.constant 0 : i32
    %c0_i32_0 = arith.constant 0 : i32
    %c0_i32_1 = arith.constant 0 : i32
    return %c0_i32, %c0_i32_0 : i32, i32
  }
  func.func @transform_3(%arg0: i32) -> (i32, i32, i32, i32) {
    %c0_i32 = arith.constant 0 : i32
    %c0_i32_0 = arith.constant 0 : i32
    %c0_i32_1 = arith.constant 0 : i32
    %c0_i32_2 = arith.constant 0 : i32
    return %arg0, %c0_i32, %c0_i32_0, %c0_i32_1 : i32, i32, i32, i32
  }
}

module attributes {stable_mosaic.version = 11 : i64} {
  func.func @_conv3x3_kernel(%arg0: i32, %arg1: memref<1x6x6x256xf32, #tpu.memory_space<vmem>>, %arg2: memref<3x768x256xbf16, #tpu.memory_space<vmem>>, %arg3: memref<1x256xf32, #tpu.memory_space<vmem>>, %arg4: memref<1x4x4x256xf32, #tpu.memory_space<vmem>>) attributes {dimension_semantics = [#tpu.dimension_semantics<parallel>], iteration_bounds = array<i64: 2>, scalar_prefetch = 0 : i64, scratch_operands = 0 : i64, tpu.core_type = #tpu.core_type<tc>, window_params = [{transform_indices = @transform_0, window_bounds = array<i64: 1, 6, 6, 256>}, {pipeline_mode = #tpu.pipeline_mode<synchronous>, transform_indices = @transform_1, window_bounds = array<i64: 3, 768, 256>}, {pipeline_mode = #tpu.pipeline_mode<synchronous>, transform_indices = @transform_2, window_bounds = array<i64: 1, 256>}, {transform_indices = @transform_3, window_bounds = array<i64: 1, 4, 4, 256>}]} {
    %c0 = arith.constant 0 : index
    %c0_0 = arith.constant 0 : index
    %c0_1 = arith.constant 0 : index
    %c0_2 = arith.constant 0 : index
    %0 = vector.load %arg1[%c0, %c0_0, %c0_1, %c0_2] : memref<1x6x6x256xf32, #tpu.memory_space<vmem>>, vector<1x6x6x256xf32>
    %1 = vector.shape_cast %0 : vector<1x6x6x256xf32> to vector<6x6x256xf32>
    %2 = arith.truncf %1 : vector<6x6x256xf32> to vector<6x6x256xbf16>
    %3 = vector.extract_strided_slice %2 {offsets = [0, 0, 0], sizes = [4, 6, 256], strides = [1, 1, 1]} : vector<6x6x256xbf16> to vector<4x6x256xbf16>
    %4 = vector.extract_strided_slice %3 {offsets = [0, 0, 0], sizes = [4, 4, 256], strides = [1, 1, 1]} : vector<4x6x256xbf16> to vector<4x4x256xbf16>
    %5 = vector.extract_strided_slice %3 {offsets = [0, 1, 0], sizes = [4, 4, 256], strides = [1, 1, 1]} : vector<4x6x256xbf16> to vector<4x4x256xbf16>
    %6 = vector.extract_strided_slice %3 {offsets = [0, 2, 0], sizes = [4, 4, 256], strides = [1, 1, 1]} : vector<4x6x256xbf16> to vector<4x4x256xbf16>
    %7 = tpu.concatenate %4, %5, %6 in 2 : vector<4x4x256xbf16>, vector<4x4x256xbf16>, vector<4x4x256xbf16> -> vector<4x4x768xbf16>
    %8 = vector.shape_cast %7 : vector<4x4x768xbf16> to vector<16x768xbf16>
    %c0_3 = arith.constant 0 : index
    %c0_4 = arith.constant 0 : index
    %c0_5 = arith.constant 0 : index
    %9 = vector.load %arg2[%c0_3, %c0_4, %c0_5] : memref<3x768x256xbf16, #tpu.memory_space<vmem>>, vector<1x768x256xbf16>
    %10 = vector.shape_cast %9 : vector<1x768x256xbf16> to vector<768x256xbf16>
    %cst = arith.constant dense<0.000000e+00> : vector<16x256xf32>
    %11 = tpu.matmul %8, %10, %cst {dimension_numbers = #tpu.dot_dimension_numbers<[1], [0], [0], [1], [0, 0, 1, 1], [], []>} : vector<16x768xbf16>, vector<768x256xbf16>, vector<16x256xf32> -> vector<16x256xf32>
    %12 = vector.extract_strided_slice %2 {offsets = [1, 0, 0], sizes = [4, 6, 256], strides = [1, 1, 1]} : vector<6x6x256xbf16> to vector<4x6x256xbf16>
    %13 = vector.extract_strided_slice %12 {offsets = [0, 0, 0], sizes = [4, 4, 256], strides = [1, 1, 1]} : vector<4x6x256xbf16> to vector<4x4x256xbf16>
    %14 = vector.extract_strided_slice %12 {offsets = [0, 1, 0], sizes = [4, 4, 256], strides = [1, 1, 1]} : vector<4x6x256xbf16> to vector<4x4x256xbf16>
    %15 = vector.extract_strided_slice %12 {offsets = [0, 2, 0], sizes = [4, 4, 256], strides = [1, 1, 1]} : vector<4x6x256xbf16> to vector<4x4x256xbf16>
    %16 = tpu.concatenate %13, %14, %15 in 2 : vector<4x4x256xbf16>, vector<4x4x256xbf16>, vector<4x4x256xbf16> -> vector<4x4x768xbf16>
    %17 = vector.shape_cast %16 : vector<4x4x768xbf16> to vector<16x768xbf16>
    %c1 = arith.constant 1 : index
    %c0_6 = arith.constant 0 : index
    %c0_7 = arith.constant 0 : index
    %18 = vector.load %arg2[%c1, %c0_6, %c0_7] : memref<3x768x256xbf16, #tpu.memory_space<vmem>>, vector<1x768x256xbf16>
    %19 = vector.shape_cast %18 : vector<1x768x256xbf16> to vector<768x256xbf16>
    %cst_8 = arith.constant dense<0.000000e+00> : vector<16x256xf32>
    %20 = tpu.matmul %17, %19, %cst_8 {dimension_numbers = #tpu.dot_dimension_numbers<[1], [0], [0], [1], [0, 0, 1, 1], [], []>} : vector<16x768xbf16>, vector<768x256xbf16>, vector<16x256xf32> -> vector<16x256xf32>
    %21 = arith.addf %11, %20 : vector<16x256xf32>
    %22 = vector.extract_strided_slice %2 {offsets = [2, 0, 0], sizes = [4, 6, 256], strides = [1, 1, 1]} : vector<6x6x256xbf16> to vector<4x6x256xbf16>
    %23 = vector.extract_strided_slice %22 {offsets = [0, 0, 0], sizes = [4, 4, 256], strides = [1, 1, 1]} : vector<4x6x256xbf16> to vector<4x4x256xbf16>
    %24 = vector.extract_strided_slice %22 {offsets = [0, 1, 0], sizes = [4, 4, 256], strides = [1, 1, 1]} : vector<4x6x256xbf16> to vector<4x4x256xbf16>
    %25 = vector.extract_strided_slice %22 {offsets = [0, 2, 0], sizes = [4, 4, 256], strides = [1, 1, 1]} : vector<4x6x256xbf16> to vector<4x4x256xbf16>
    %26 = tpu.concatenate %23, %24, %25 in 2 : vector<4x4x256xbf16>, vector<4x4x256xbf16>, vector<4x4x256xbf16> -> vector<4x4x768xbf16>
    %27 = vector.shape_cast %26 : vector<4x4x768xbf16> to vector<16x768xbf16>
    %c2 = arith.constant 2 : index
    %c0_9 = arith.constant 0 : index
    %c0_10 = arith.constant 0 : index
    %28 = vector.load %arg2[%c2, %c0_9, %c0_10] : memref<3x768x256xbf16, #tpu.memory_space<vmem>>, vector<1x768x256xbf16>
    %29 = vector.shape_cast %28 : vector<1x768x256xbf16> to vector<768x256xbf16>
    %cst_11 = arith.constant dense<0.000000e+00> : vector<16x256xf32>
    %30 = tpu.matmul %27, %29, %cst_11 {dimension_numbers = #tpu.dot_dimension_numbers<[1], [0], [0], [1], [0, 0, 1, 1], [], []>} : vector<16x768xbf16>, vector<768x256xbf16>, vector<16x256xf32> -> vector<16x256xf32>
    %31 = arith.addf %21, %30 : vector<16x256xf32>
    %c0_12 = arith.constant 0 : index
    %c0_13 = arith.constant 0 : index
    %32 = vector.load %arg3[%c0_12, %c0_13] : memref<1x256xf32, #tpu.memory_space<vmem>>, vector<1x256xf32>
    %33 = vector.broadcast %32 : vector<1x256xf32> to vector<16x256xf32>
    %34 = arith.addf %31, %33 : vector<16x256xf32>
    %cst_14 = arith.constant 0.000000e+00 : f32
    %35 = vector.broadcast %cst_14 : f32 to vector<16x256xf32>
    %36 = arith.maximumf %34, %35 : vector<16x256xf32>
    %37 = vector.shape_cast %36 : vector<16x256xf32> to vector<4x4x256xf32>
    %c0_15 = arith.constant 0 : index
    %c0_16 = arith.constant 0 : index
    %c0_17 = arith.constant 0 : index
    %c0_18 = arith.constant 0 : index
    %38 = vector.load %arg4[%c0_15, %c0_16, %c0_17, %c0_18] : memref<1x4x4x256xf32, #tpu.memory_space<vmem>>, vector<1x4x4x256xf32>
    %39 = vector.shape_cast %38 : vector<1x4x4x256xf32> to vector<4x4x256xf32>
    %40 = vector.shape_cast %37 : vector<4x4x256xf32> to vector<1x4x4x256xf32>
    tpu.vector_store %arg4[%c0_15, %c0_16, %c0_17, %c0_18], %40 {strides = array<i32>} : memref<1x4x4x256xf32, #tpu.memory_space<vmem>>, vector<1x4x4x256xf32>,
    return
  }
  func.func @transform_0(%arg0: i32) -> (i32, i32, i32, i32) {
    %c0_i32 = arith.constant 0 : i32
    %c0_i32_0 = arith.constant 0 : i32
    %c0_i32_1 = arith.constant 0 : i32
    %c0_i32_2 = arith.constant 0 : i32
    return %arg0, %c0_i32, %c0_i32_0, %c0_i32_1 : i32, i32, i32, i32
  }
  func.func @transform_1(%arg0: i32) -> (i32, i32, i32) {
    %c0_i32 = arith.constant 0 : i32
    %c0_i32_0 = arith.constant 0 : i32
    %c0_i32_1 = arith.constant 0 : i32
    %c0_i32_2 = arith.constant 0 : i32
    return %c0_i32, %c0_i32_0, %c0_i32_1 : i32, i32, i32
  }
  func.func @transform_2(%arg0: i32) -> (i32, i32) {
    %c0_i32 = arith.constant 0 : i32
    %c0_i32_0 = arith.constant 0 : i32
    %c0_i32_1 = arith.constant 0 : i32
    return %c0_i32, %c0_i32_0 : i32, i32
  }
  func.func @transform_3(%arg0: i32) -> (i32, i32, i32, i32) {
    %c0_i32 = arith.constant 0 : i32
    %c0_i32_0 = arith.constant 0 : i32
    %c0_i32_1 = arith.constant 0 : i32
    %c0_i32_2 = arith.constant 0 : i32
    return %arg0, %c0_i32, %c0_i32_0, %c0_i32_1 : i32, i32, i32, i32
  }
}

</mosaic_0001>

<bundles_post_ra>
// kernel: vgg19_forward.6
= control target key start
LH: loop header
LB: loop body
LE: loop exit
PB: predicated region body
PF: predicated region fallthrough
CT: control target
= control target key end

     0   :  { %s1223_s12 = smov 0   ;;  %s1547_s0 = inlined_call_operand.vmem [shape: f32[2,10,10,64], index: 0, kind: input, shape index: {}]   ;;  %s1548_s1 = inlined_call_operand.vmem [shape: bf16[3,192,128], index: 1, kind: input, shape index: {}]   ;;  %s1549_s2 = inlined_call_operand.vmem [shape: f32[1,128], index: 2, kind: input, shape index: {}]   ;;  %s1550_s3 = inlined_call_operand.vmem [shape: f32[2,8,8,128], index: 3, kind: output, shape index: {}]  }
   0x1 LB: > { %s996_s13 = sadd.s32 4294967295, %s1199_s12   ;;  %p1000_p0 = scmp.ge.s32.totalorder %s1199_s12, 1  ;;  %s1199_s12 = sphi %s1223_s12, %s13_s12  }
   0x2   : > { %p137_p1 = scmp.lt.s32.totalorder %s1199_s12, 3 }
   0x4   : > { %p138_p2 = pnand %p1000_p0, %p137_p1 }
   0x5   : > { %p161_p3 = scmp.lt.s32.totalorder (!%p138_p2), %s996_s13, 1  ;;  %s1202_s5 = smov (!%p138_p2), 64  }
   0x6   : > { %141 = sbr.rel (%p138_p2) target bundleno = 407 (0x197), region = 32 }
   0xb   : > { %v1157_v0 = vld [vmem:[%s1548_s1 + $0x98] sm:$0xff]   ;;  %v1201_v1 = vmov 0   ;;  %s1552_s13 = smov (!%p161_p3, %s996_s13), 1  ;;  %v1159_v3 = vld [vmem:[%s1548_s1 + $0x90] sm:$0xff]   ;;  %v1161_v5 = vld [vmem:[%s1548_s1 + $0x88] sm:$0xff]   ;;  %vm290_vm0 = vcmask 523264  }
   0xc   : > { %492 = vmatprep.subr.bf16.mxu0 %v1201_v1  ;;  %653 = vmatprep.subr.bf16.mxu1 %v1201_v1  ;;  %v1158_v2 = vld [vmem:[%s1548_s1 + $0x38] sm:$0xff]   ;;  %s1146_s20 = smul.u32 160, %s1552_s13  ;;  %v1160_v4 = vld [vmem:[%s1548_s1 + $0x30] sm:$0xff]   ;;  %v1162_v6 = vld [vmem:[%s1548_s1 + $0x28] sm:$0xff]   ;;  %s1121_s18 = sshll.u32 %s1552_s13, 6 }
   0xd   : > { %493 = vmatpush1.bf16.msra.mxu0 %v1157_v0  ;;  %654 = vmatpush1.bf16.msra.mxu1 %v1158_v2  ;;  %v1163_v47 = vld [vmem:[%s1548_s1 + $0x80] sm:$0xff]   ;;  %v1165_v62 = vld [vmem:[%s1548_s1 + $0x78] sm:$0xff]   ;;  %s1534_s21 = scalar_lea.vmem %s1550_s3, %s1121_s18 }
   0xe   : > { %494 = vmatprep.subr.bf16.mxu0 %v1201_v1  ;;  %655 = vmatprep.subr.bf16.mxu1 %v1201_v1  ;;  %s1256_s27 = scalar_lea.vmem %s1547_s0, %s1146_s20  ;;  %v1164_v57 = vld [vmem:[%s1548_s1 + $0x20] sm:$0xff]   ;;  %v1166_v63 = vld [vmem:[%s1548_s1 + $0x18] sm:$0xff]  }
   0xf   : > { %v176_v7 = vld [vmem:[%s1256_s27 + $0x20] sm:$0xff]  ;;  %v177_v8 = vld [vmem:[%s1256_s27 + $0x28] sm:$0x3]  ;;  %v178_v12 = vld [vmem:[%s1256_s27 + $0x30] sm:$0xff] }
  0x10   : > { %v172_v9 = vld [vmem:[%s1256_s27] sm:$0xff]  ;;  %v1265_v10 = vpack.c.bf16 %v177_v8, %v176_v7  ;;  %v173_v11 = vld [vmem:[%s1256_s27 + $0x8] sm:$0x3]  ;;  %v179_v13 = vld [vmem:[%s1256_s27 + $0x38] sm:$0x3] }
  0x11   : > { %495 = vmatpush1.bf16.msra.mxu0 %v1159_v3  ;;  %656 = vmatpush1.bf16.msra.mxu1 %v1160_v4  ;;  %v1270_v14 = vpack.c.bf16 %v173_v11, %v172_v9  ;;  %v1272_v15 = vpack.c.bf16 %v179_v13, %v178_v12  ;;  %v174_v16 = vld [vmem:[%s1256_s27 + $0x10] sm:$0xff]  ;;  %v175_v17 = vld [vmem:[%s1256_s27 + $0x18] sm:$0x3]  ;;  %v180_v18 = vld [vmem:[%s1256_s27 + $0x40] sm:$0xff] }
  0x12   : > { %496 = vmatprep.subr.bf16.mxu0 %v1201_v1  ;;  %657 = vmatprep.subr.bf16.mxu1 %v1201_v1  ;;  %v217_v19 = vshrl.u32 %v1265_v10, 16  ;;  %v219_v20 = vshll.u32 %v1265_v10, 16  ;;  %v1280_v21 = vpack.c.bf16 %v175_v17, %v174_v16  ;;  %v181_v22 = vld [vmem:[%s1256_s27 + $0x48] sm:$0x3]  ;;  %v182_v23 = vld [vmem:[%s1256_s27 + $0x50] sm:$0xff]  ;;  %v184_v24 = vld [vmem:[%s1256_s27 + $0x60] sm:$0xff] }
  0x13   : > { %v203_v25 = vshrl.u32 %v1270_v14, 16  ;;  %v205_v26 = vshll.u32 %v1270_v14, 16  ;;  %v224_v27 = vshrl.u32 %v1272_v15, 16  ;;  %v226_v28 = vshll.u32 %v1272_v15, 16  ;;  %v183_v29 = vld [vmem:[%s1256_s27 + $0x58] sm:$0x3] }
  0x14   : > { %v221_v30 = vrot.slane %v219_v20, 1  ;;  %v210_v31 = vshrl.u32 %v1280_v21, 16  ;;  %v212_v32 = vshll.u32 %v1280_v21, 16  ;;  %v1293_v33 = vpack.c.bf16 %v181_v22, %v180_v18  ;;  %v185_v34 = vld [vmem:[%s1256_s27 + $0x68] sm:$0x3]  ;;  %v186_v39 = vld [vmem:[%s1256_s27 + $0x70] sm:$0xff] }
  0x15   : > { %497 = vmatpush1.bf16.msra.mxu0 %v1161_v5  ;;  %658 = vmatpush1.bf16.msra.mxu1 %v1162_v6  ;;  %v207_v35 = vrot.slane %v205_v26, 1  ;;  %v228_v36 = vrot.slane %v226_v28, 1  ;;  %v1296_v37 = vpack.c.bf16 %v183_v29, %v182_v23  ;;  %v1298_v38 = vpack.c.bf16 %v185_v34, %v184_v24  ;;  %v187_v40 = vld [vmem:[%s1256_s27 + $0x78] sm:$0x3]  ;;  %v188_v41 = vld [vmem:[%s1256_s27 + $0x80] sm:$0xff]  ;;  %v190_v46 = vld [vmem:[%s1256_s27 + $0x90] sm:$0xff] }
  0x16   : > { %498 = vmatprep.subr.bf16.mxu0 %v1201_v1  ;;  %659 = vmatprep.subr.bf16.mxu1 %v1201_v1  ;;  %v222_v42 = vor.u32 %v221_v30, %v217_v19  ;;  %v214_v43 = vrot.slane %v212_v32, 1  ;;  %v233_v44 = vshll.u32 %v1293_v33, 16  ;;  %v189_v45 = vld [vmem:[%s1256_s27 + $0x88] sm:$0x3]  ;;  %v231_v50 = vshrl.u32 %v1293_v33, 16  ;;  %v1167_v7 = vld [vmem:[%s1548_s1 + $0x70] sm:$0xff]  }
  0x17   : > { %v208_v48 = vor.u32 %v207_v35, %v203_v25  ;;  %v229_v49 = vor.u32 %v228_v36, %v224_v27  ;;  %v240_v51 = vshll.u32 %v1296_v37, 16  ;;  %v191_v52 = vld [vmem:[%s1256_s27 + $0x98] sm:$0x3]  ;;  %v238_v55 = vshrl.u32 %v1296_v37, 16  ;;  %v1168_v13 = vld [vmem:[%s1548_s1 + $0x10] sm:$0xff]   ;;  %v1169_v16 = vld [vmem:[%s1548_s1 + $0x68] sm:$0xff]  }
  0x18   : > { %262 = vrot.lane.b32.xlu1 %v222_v42, %s1202_s5  ;;  %v215_v53 = vor.u32 %v214_v43, %v210_v31  ;;  %v235_v54 = vrot.slane %v233_v44, 1  ;;  %v247_v56 = vshll.u32 %v1298_v38, 16  ;;  %v1320_v59 = vpack.c.bf16 %v187_v40, %v186_v39  ;;  %v1170_v25 = vld [vmem:[%s1548_s1 + $0x8] sm:$0xff]   ;;  %v1171_v29 = vld [vmem:[%s1548_s1 + $0x60] sm:$0xff]   ;;  %v1173_v34 = vld [vmem:[%s1548_s1 + $0xb8] sm:$0xff]  }
  0x19   : > { %499 = vmatpush1.bf16.msra.mxu0 %v1163_v47  ;;  %258 = vrot.lane.b32.xlu0 %v208_v48, %s1202_s5  ;;  %v242_v58 = vrot.slane %v240_v51, 1  ;;  %v1322_v60 = vpack.c.bf16 %v189_v45, %v188_v41  ;;  %v1324_v61 = vpack.c.bf16 %v191_v52, %v190_v46  ;;  %v245_v0 = vshrl.u32 %v1298_v38, 16  ;;  %v1172_v32 = vld [vmem:[%s1548_s1] sm:$0xff]   ;;  %v1174_v35 = vld [vmem:[%s1548_s1 + $0x58] sm:$0xff]   ;;  %v1175_v36 = vld [vmem:[%s1548_s1 + $0xb0] sm:$0xff]  }
  0x1a   : > { %500 = vmatprep.subr.bf16.mxu0 %v1201_v1  ;;  %660 = vmatpush1.bf16.msra.mxu1 %v1164_v57  ;;  %v254_v2 = vshll.u32 %v1320_v59, 16  ;;  %v249_v4 = vrot.slane %v247_v56, 1  ;;  %v252_v5 = vshrl.u32 %v1320_v59, 16  ;;  %v236_v8 = vor.u32 %v235_v54, %v231_v50  ;;  %v1176_v39 = vld [vmem:[%s1548_s1 + $0x50] sm:$0xff]   ;;  %v1177_v40 = vld [vmem:[%s1548_s1 + $0xa8] sm:$0xff]   ;;  %v1179_v42 = vld [vmem:[%s1548_s1 + $0xa0] sm:$0xff]  }
  0x1b   : > { %661 = vmatprep.subr.bf16.mxu1 %v1201_v1  ;;  %v243_v3 = vor.u32 %v242_v58, %v238_v55  ;;  %v721_v6 = vshll.u32 %v1324_v61, 16  ;;  %v358_v11 = vshll.u32 %v1322_v60, 16  ;;  %v719_v12 = vshrl.u32 %v1324_v61, 16  ;;  %v1178_v41 = vld [vmem:[%s1548_s1 + $0x48] sm:$0xff]   ;;  %v1180_v43 = vld [vmem:[%s1548_s1 + $0x40] sm:$0xff]   ;;  %v1181_v52 = vld [vmem:[%s1548_s1 + $0xf8] sm:$0xff]  }
  0x1c   : > { %264 = vrot.lane.b32.xlu1 %v229_v49, %s1202_s5  ;;  %v256_v9 = vrot.slane %v254_v2, 1  ;;  %v283_v17 = vrot.slane %v1280_v21, 1  ;;  %v284_v20 = vrot.slane %v1265_v10, 1  ;;  %v250_v22 = vor.u32 %v249_v4, %v245_v0 }
  0x1d   : > { %501 = vmatpush1.bf16.msra.mxu0 %v1165_v62  ;;  %260 = vrot.lane.b32.xlu0 %v215_v53, %s1202_s5  ;;  %v723_v19 = vrot.slane %v721_v6, 1  ;;  %v356_v23 = vshrl.u32 %v1322_v60, 16  ;;  %v360_v24 = vrot.slane %v358_v11, 1  ;;  %v282_v27 = vrot.slane %v1270_v14, 1  ;;  %v1184_v6 = vld [vmem:[%s1548_s1 + $0xe0] sm:$0xff]  }
  0x1e   : > { %502 = vmatprep.subr.bf16.mxu0 %v1201_v1  ;;  %662 = vmatpush1.bf16.msra.mxu1 %v1166_v63  ;;  %v257_v18 = vor.u32 %v256_v9, %v252_v5  ;;  %v1029_v26 = vcombine.low %v283_v17, %v284_v20  ;;  %v285_v47 = vrot.slane %v1272_v15, 1  ;;  %v286_v48 = vrot.slane %v1293_v33, 1 }
  0x1f   : > { %663 = vmatprep.subr.bf16.mxu1 %v1201_v1  ;;  %v724_v28 = vor.u32 %v723_v19, %v719_v12  ;;  %v1053_v30 = vcombine.low %v282_v27, %v283_v17  ;;  %v361_v31 = vor.u32 %v360_v24, %v356_v23  ;;  %v287_v62 = vrot.slane %v1296_v37, 1  ;;  %v1186_v19 = vld [vmem:[%s1548_s1 + $0xd0] sm:$0xff]   ;;  %v1191_v27 = vld [vmem:[%s1548_s1 + $0x108] sm:$0xff]  }
  0x20   : > { %268 = vrot.lane.b32.xlu1 %v243_v3, %s1202_s5  ;;  %1048 = vmatprep.mubr.msk.bf16.mxu0 %vm290_vm0, %v1029_v26  ;;  %v1427_v55 = vcombine.low %v284_v20, %v285_v47  ;;  %v1031_v56 = vcombine.low %v285_v47, %v286_v48  ;;  %v288_v63 = vrot.slane %v1298_v38, 1  ;;  %v289_v9 = vrot.slane %v1320_v59, 1  ;;  %v1190_v26 = vld [vmem:[%s1548_s1 + $0x110] sm:$0xff]  }
  0x21   : > { %503 = vmatpush1.bf16.msra.mxu0 %v1167_v7  ;;  %266 = vrot.lane.b32.xlu0 %v236_v8, %s1202_s5  ;;  %v1450_v4 = vcombine.low %v286_v48, %v287_v62  ;;  %v365_v11 = vrot.slane %v1322_v60, 1 }
  0x22   : > { %504 = vmatprep.subr.bf16.mxu0 %v1201_v1  ;;  %664 = vmatpush1.bf16.msra.mxu1 %v1168_v13  ;;  %v1033_v5 = vcombine.low %v287_v62, %v288_v63  ;;  %v1059_v17 = vcombine.low %v288_v63, %v289_v9 }
  0x23   : > { %665 = vmatprep.subr.bf16.mxu1 %v1201_v1  ;;  %1072 = vmatprep.mubr.msk.bf16.mxu1 %vm290_vm0, %v1053_v30 }
  0x24   : > { %272 = vrot.lane.b32.xlu1 %v257_v18, %s1202_s5  ;;  %v1035_v18 = vcombine.low %v289_v9, %v365_v11 }
  0x25   : > { %505 = vmatpush1.bf16.msra.mxu0 %v1169_v16  ;;  %270 = vrot.lane.b32.xlu0 %v250_v22, %s1202_s5 }
  0x26   : > { %506 = vmatprep.subr.bf16.mxu0 %v1201_v1  ;;  %666 = vmatpush1.bf16.msra.mxu1 %v1170_v25  ;;  %v1187_v25 = vld [vmem:[%s1548_s1 + $0xc8] sm:$0xff]  }
  0x27   : > { %667 = vmatprep.subr.bf16.mxu1 %v1201_v1 }
  0x28   : > { %725 = vrot.lane.b32.xlu1 %v724_v28, %s1202_s5  ;;  %v1192_v28 = vld [vmem:[%s1548_s1 + $0x100] sm:$0xff]  }
  0x29   : > { %507 = vmatpush1.bf16.msra.mxu0 %v1171_v29  ;;  %362 = vrot.lane.b32.xlu0 %v361_v31, %s1202_s5  ;;  %v728_v29 = vrot.slane %v1324_v61, 1 }
  0x2a   : > { %516 = vmatprep.subr.bf16.mxu0 %v1201_v1  ;;  %668 = vmatpush1.bf16.msra.mxu1 %v1172_v32 }
  0x2b   : > { %677 = vmatprep.subr.bf16.mxu1 %v1201_v1  ;;  %v1101_v30 = vcombine.low %v365_v11, %v728_v29 }
  0x2d   : > { %517 = vmatpush2.bf16.msra.mxu0 %v1173_v34 }
  0x2e   : > { %518 = vmatprep.subr.bf16.mxu0 %v1201_v1  ;;  %678 = vmatpush2.bf16.msra.mxu1 %v1174_v35 }
  0x2f   : > { %679 = vmatprep.subr.bf16.mxu1 %v1201_v1 }
  0x31   : > { %519 = vmatpush2.bf16.msra.mxu0 %v1175_v36 }
  0x32   : > { %520 = vmatprep.subr.bf16.mxu0 %v1201_v1  ;;  %680 = vmatpush2.bf16.msra.mxu1 %v1176_v39 }
  0x33   : > { %681 = vmatprep.subr.bf16.mxu1 %v1201_v1 }
  0x35   : > { %521 = vmatpush2.bf16.msra.mxu0 %v1177_v40 }
  0x36   : > { %522 = vmatprep.subr.bf16.mxu0 %v1201_v1  ;;  %682 = vmatpush2.bf16.msra.mxu1 %v1178_v41 }
  0x37   : > { %683 = vmatprep.subr.bf16.mxu1 %v1201_v1 }
  0x39   : > { %523 = vmatpush2.bf16.msra.mxu0 %v1179_v42 }
  0x3a   : > { %837 = vmatprep.subr.bf16.mxu0 %v1201_v1  ;;  %684 = vmatpush2.bf16.msra.mxu1 %v1180_v43 }
  0x3b   : > { %1122 = vmatprep.subr.bf16.mxu1 %v1201_v1 }
  0x8a   : > { %v263_v45 = vpop.permute.xlu1 %262 }
  0x8b   : > { %v259_v44 = vpop.permute.xlu0 %258  ;;  %v296_v46 = vsel %vm290_vm0, %v1265_v10, %v263_v45 }
  0x8c   : > { %v292_v50 = vsel %vm290_vm0, %v1270_v14, %v259_v44  ;;  %v1182_v14 = vld [vmem:[%s1548_s1 + $0xf0] sm:$0xff]  }
  0x8e   : > { %v265_v57 = vpop.permute.xlu1 %264 }
  0x8f   : > { %v261_v49 = vpop.permute.xlu0 %260  ;;  %v298_v10 = vsel %vm290_vm0, %v1272_v15, %v265_v57 }
  0x90   : > { %v294_v51 = vsel %vm290_vm0, %v1280_v21, %v261_v49  ;;  %v1446_v2 = vcombine.low %v296_v46, %v298_v10 }
  0x91   : > { %v1028_v53 = vcombine.low %v294_v51, %v296_v46  ;;  %v1052_v54 = vcombine.low %v292_v50, %v294_v51 }
  0x92   : > { %v269_v15 = vpop.permute.xlu1 %268 }
  0x93   : > { %525 = vmatmul.mubr.bf16.vlgmr.msra.gmra.mxu0 %v1028_v53  ;;  %686 = vmatmul.mubr.bf16.vlgmr.msra.gmra.mxu1 %v1052_v54  ;;  %v267_v58 = vpop.permute.xlu0 %266  ;;  %v302_v7 = vsel %vm290_vm0, %v1296_v37, %v269_v15  ;;  %v1185_v37 = vld [vmem:[%s1548_s1 + $0xd8] sm:$0xff]  }
  0x94   : > { %838 = vmatpush1.bf16.msra.mxu0 %v1181_v52  ;;  %1134 = vmatpush1.bf16.msra.mxu1 %v1181_v52  ;;  %v300_v21 = vsel %vm290_vm0, %v1293_v33, %v267_v58  ;;  %v1183_v33 = vld [vmem:[%s1548_s1 + $0xe8] sm:$0xff]  }
  0x95   : > { %839 = vmatprep.subr.bf16.mxu0 %v1201_v1  ;;  %1123 = vmatprep.subr.bf16.mxu1 %v1201_v1  ;;  %v1030_v0 = vcombine.low %v298_v10, %v300_v21  ;;  %v1467_v12 = vcombine.low %v300_v21, %v302_v7 }
  0x96   : > { %1049 = vmatprep.mubr.msk.bf16.mxu0 %vm290_vm0, %v1031_v56  ;;  %1073 = vmatprep.mubr.msk.bf16.mxu1 %vm290_vm0, %v1427_v55 }
  0x97   : > { %v271_v3 = vpop.permute.xlu0 %270 }
  0x98   : > { %840 = vmatpush1.bf16.msra.mxu0 %v1182_v14  ;;  %1135 = vmatpush1.bf16.msra.mxu1 %v1182_v14  ;;  %v304_v8 = vsel %vm290_vm0, %v1298_v38, %v271_v3  ;;  %v273_v38 = vpop.permute.xlu1 %272 }
  0x99   : > { %841 = vmatprep.subr.bf16.mxu0 %v1201_v1  ;;  %1124 = vmatprep.subr.bf16.mxu1 %v1201_v1  ;;  %v1032_v13 = vcombine.low %v302_v7, %v304_v8  ;;  %v306_v20 = vsel %vm290_vm0, %v1320_v59, %v273_v38  ;;  %v1188_v59 = vld [vmem:[%s1548_s1 + $0xc0] sm:$0xff]  }
  0x9a   : > { %v1058_v23 = vcombine.low %v304_v8, %v306_v20 }
  0x9b   : > { %533 = vmatmul.mubr.bf16.gmra.mxu0 %v1030_v0  ;;  %694 = vmatmul.mubr.bf16.gmra.mxu1 %v1446_v2  ;;  %v363_v16 = vpop.permute.xlu0 %362 }
  0x9c   : > { %842 = vmatpush1.bf16.msra.mxu0 %v1183_v33  ;;  %1136 = vmatpush1.bf16.msra.mxu1 %v1183_v33  ;;  %v367_v22 = vsel %vm290_vm0, %v1322_v60, %v363_v16  ;;  %v1189_v60 = vld [vmem:[%s1548_s1 + $0x118] sm:$0xff]   ;;  %v726_v31 = vpop.permute.xlu1 %725 }
  0x9d   : > { %843 = vmatprep.subr.bf16.mxu0 %v1201_v1  ;;  %1125 = vmatprep.subr.bf16.mxu1 %v1201_v1  ;;  %v1034_v24 = vcombine.low %v306_v20, %v367_v22  ;;  %v730_v32 = vsel %vm290_vm0, %v1324_v61, %v726_v31 }
  0x9e   : > { %1074 = vmatprep.mubr.msk.bf16.mxu1 %vm290_vm0, %v1450_v4  ;;  %1050 = vmatprep.mubr.msk.bf16.mxu0 %vm290_vm0, %v1033_v5  ;;  %v1100_v34 = vcombine.low %v367_v22, %v730_v32  ;;  %v1118_v5 = vld [vmem:[%s1549_s2] ss:$0 sm:$0xff] }
  0xa0   : > { %844 = vmatpush1.bf16.msra.mxu0 %v1184_v6  ;;  %1137 = vmatpush1.bf16.msra.mxu1 %v1184_v6 }
  0xa1   : > { %845 = vmatprep.subr.bf16.mxu0 %v1201_v1  ;;  %1126 = vmatprep.subr.bf16.mxu1 %v1201_v1 }
  0xa3   : > { %702 = vmatmul.mubr.bf16.gmra.mxu1 %v1467_v12  ;;  %541 = vmatmul.mubr.bf16.gmra.mxu0 %v1032_v13 }
  0xa4   : > { %846 = vmatpush1.bf16.msra.mxu0 %v1185_v37  ;;  %1138 = vmatpush1.bf16.msra.mxu1 %v1185_v37 }
  0xa5   : > { %847 = vmatprep.subr.bf16.mxu0 %v1201_v1  ;;  %1127 = vmatprep.subr.bf16.mxu1 %v1201_v1 }
  0xa6   : > { %1075 = vmatprep.mubr.msk.bf16.mxu1 %vm290_vm0, %v1059_v17  ;;  %1051 = vmatprep.mubr.msk.bf16.mxu0 %vm290_vm0, %v1035_v18 }
  0xa8   : > { %848 = vmatpush1.bf16.msra.mxu0 %v1186_v19  ;;  %1139 = vmatpush1.bf16.msra.mxu1 %v1186_v19 }
  0xa9   : > { %849 = vmatprep.subr.bf16.mxu0 %v1201_v1  ;;  %1128 = vmatprep.subr.bf16.mxu1 %v1201_v1 }
  0xab   : > { %710 = vmatmul.mubr.bf16.gmra.mxu1 %v1058_v23  ;;  %549 = vmatmul.mubr.bf16.gmra.mxu0 %v1034_v24 }
  0xac   : > { %850 = vmatpush1.bf16.msra.mxu0 %v1187_v25  ;;  %1140 = vmatpush1.bf16.msra.mxu1 %v1187_v25 }
  0xad   : > { %851 = vmatprep.subr.bf16.mxu0 %v1201_v1  ;;  %1129 = vmatprep.subr.bf16.mxu1 %v1201_v1 }
  0xae   : > { %1114 = vmatprep.mubr.msk.bf16.mxu0 %vm290_vm0, %v1427_v55  ;;  %1116 = vmatprep.mubr.msk.bf16.mxu1 %vm290_vm0, %v1059_v17 }
  0xb0   : > { %852 = vmatpush1.bf16.msra.mxu0 %v1188_v59  ;;  %1141 = vmatpush1.bf16.msra.mxu1 %v1188_v59 }
  0xb1   : > { %861 = vmatprep.subr.bf16.mxu0 %v1201_v1  ;;  %1130 = vmatprep.subr.bf16.mxu1 %v1201_v1 }
  0xb4   : > { %862 = vmatpush2.bf16.msra.mxu0 %v1189_v60  ;;  %1142 = vmatpush2.bf16.msra.mxu1 %v1189_v60 }
  0xb5   : > { %863 = vmatprep.subr.bf16.mxu0 %v1201_v1  ;;  %1131 = vmatprep.subr.bf16.mxu1 %v1201_v1 }
  0xb8   : > { %864 = vmatpush2.bf16.msra.mxu0 %v1190_v26  ;;  %1143 = vmatpush2.bf16.msra.mxu1 %v1190_v26 }
  0xb9   : > { %865 = vmatprep.subr.bf16.mxu0 %v1201_v1  ;;  %1132 = vmatprep.subr.bf16.mxu1 %v1201_v1 }
  0xbc   : > { %866 = vmatpush2.bf16.msra.mxu0 %v1191_v27  ;;  %1144 = vmatpush2.bf16.msra.mxu1 %v1191_v27 }
  0xbd   : > { %867 = vmatprep.subr.bf16.mxu0 %v1201_v1  ;;  %1133 = vmatprep.subr.bf16.mxu1 %v1201_v1 }
  0xc0   : > { %868 = vmatpush2.bf16.msra.mxu0 %v1192_v28  ;;  %1145 = vmatpush2.bf16.msra.mxu1 %v1192_v28 }
  0xc3   : > { %870 = vmatmul.mubr.bf16.vlgmr.msra.gmra.mxu0 %v1446_v2  ;;  %886 = vmatmul.mubr.bf16.vlgmr.msra.gmra.mxu1 %v1058_v23 }
  0xc4   : > { %1115 = vmatprep.mubr.msk.bf16.mxu0 %vm290_vm0, %v1450_v4  ;;  %1117 = vmatprep.mubr.msk.bf16.mxu1 %vm290_vm0, %v1101_v30 }
  0xcb   : > { %878 = vmatmul.mubr.bf16.gmra.mxu0 %v1467_v12  ;;  %894 = vmatmul.mubr.bf16.gmra.mxu1 %v1100_v34 }
 0x153   : > { %v526_v1 = vpop.f32.mrf.mxu0  ;;  %v687_v35 = vpop.f32.mrf.mxu1 }
 0x154   : > { %v688_v15 = vadd.f32 %v687_v35, %v526_v1 }
 0x155   : > { %v528_v36 = vpop.f32.mrf.mxu0  ;;  %v689_v39 = vpop.f32.mrf.mxu1 }
 0x157   : > { %v529_v40 = vpop.f32.mrf.mxu0  ;;  %v690_v41 = vpop.f32.mrf.mxu1 }
 0x158   : > { %v691_v12 = vadd.f32 %v690_v41, %v529_v40 }
 0x159   : > { %v531_v42 = vpop.f32.mrf.mxu0  ;;  %v692_v43 = vpop.f32.mrf.mxu1 }
 0x15b   : > { %v534_v44 = vpop.f32.mrf.mxu0  ;;  %v695_v45 = vpop.f32.mrf.mxu1 }
 0x15c   : > { %v696_v25 = vadd.f32 %v695_v45, %v534_v44 }
 0x15d   : > { %v536_v46 = vpop.f32.mrf.mxu0  ;;  %v697_v47 = vpop.f32.mrf.mxu1 }
 0x15f   : > { %v537_v48 = vpop.f32.mrf.mxu0  ;;  %v698_v49 = vpop.f32.mrf.mxu1 }
 0x160   : > { %v699_v35 = vadd.f32 %v698_v49, %v537_v48 }
 0x161   : > { %v700_v50 = vpop.f32.mrf.mxu1  ;;  %v539_v61 = vpop.f32.mrf.mxu0 }
 0x163   : > { %v703_v51 = vpop.f32.mrf.mxu1  ;;  %v542_v52 = vpop.f32.mrf.mxu0 }
 0x164   : > { %v704_v3 = vadd.f32 %v703_v51, %v542_v52 }
 0x165   : > { %v705_v53 = vpop.f32.mrf.mxu1  ;;  %v544_v54 = vpop.f32.mrf.mxu0 }
 0x167   : > { %v706_v55 = vpop.f32.mrf.mxu1  ;;  %v545_v56 = vpop.f32.mrf.mxu0 }
 0x168   : > { %v707_v13 = vadd.f32 %v706_v55, %v545_v56 }
 0x169   : > { %v708_v57 = vpop.f32.mrf.mxu1  ;;  %v547_v58 = vpop.f32.mrf.mxu0 }
 0x16b   : > { %v711_v14 = vpop.f32.mrf.mxu1  ;;  %v550_v21 = vpop.f32.mrf.mxu0 }
 0x16c   : > { %v712_v59 = vadd.f32 %v711_v14, %v550_v21 }
 0x16d   : > { %v713_v10 = vpop.f32.mrf.mxu1  ;;  %v552_v62 = vpop.f32.mrf.mxu0 }
 0x16f   : > { %v714_v63 = vpop.f32.mrf.mxu1  ;;  %v553_v0 = vpop.f32.mrf.mxu0 }
 0x170   : > { %v715_v36 = vadd.f32 %v714_v63, %v553_v0 }
 0x171   : > { %v716_v33 = vpop.f32.mrf.mxu1  ;;  %v555_v2 = vpop.f32.mrf.mxu0 }
 0x183   : > { %v871_v4 = vpop.f32.mrf.mxu0  ;;  %v887_v6 = vpop.f32.mrf.mxu1 }
 0x184   : > { %v902_v7 = vadd.f32 %v871_v4, %v688_v15  ;;  %v906_v8 = vadd.f32 %v887_v6, %v704_v3 }
 0x185   : > { %v873_v9 = vpop.f32.mrf.mxu0  ;;  %v889_v11 = vpop.f32.mrf.mxu1 }
 0x186   : > { %v917_v37 = vadd.f32 %v1118_v5, %v902_v7  ;;  %v921_v38 = vadd.f32 %v1118_v5, %v906_v8 }
 0x187   : > { %v874_v16 = vpop.f32.mrf.mxu0  ;;  %v890_v17 = vpop.f32.mrf.mxu1 }
 0x188   : > { %v925_v18 = vmax.f32 %v917_v37, 0.0  ;;  %v929_v19 = vmax.f32 %v921_v38, 0.0  ;;  %v903_v20 = vadd.f32 %v874_v16, %v691_v12  ;;  %v907_v22 = vadd.f32 %v890_v17, %v707_v13 }
 0x189   : > { %v876_v23 = vpop.f32.mrf.mxu0  ;;  %v892_v24 = vpop.f32.mrf.mxu1 }
 0x18a   : > { %933 = vst [vmem:[%s1534_s21] sm:$0xff] %v925_v18  ;;  %937 = vst [vmem:[%s1534_s21 + $0x20] sm:$0xff] %v929_v19  ;;  %v918_v60 = vadd.f32 %v1118_v5, %v903_v20  ;;  %v922_v26 = vadd.f32 %v1118_v5, %v907_v22 }
 0x18b   : > { %v879_v27 = vpop.f32.mrf.mxu0  ;;  %v895_v28 = vpop.f32.mrf.mxu1 }
 0x18c   : > { %v926_v29 = vmax.f32 %v918_v60, 0.0  ;;  %v930_v30 = vmax.f32 %v922_v26, 0.0  ;;  %v904_v31 = vadd.f32 %v879_v27, %v696_v25  ;;  %v908_v32 = vadd.f32 %v895_v28, %v712_v59 }
 0x18d   : > { %v881_v34 = vpop.f32.mrf.mxu0  ;;  %v897_v1 = vpop.f32.mrf.mxu1 }
 0x18e   : > { %934 = vst [vmem:[%s1534_s21 + $0x8] sm:$0xff] %v926_v29  ;;  %938 = vst [vmem:[%s1534_s21 + $0x28] sm:$0xff] %v930_v30  ;;  %v919_v39 = vadd.f32 %v1118_v5, %v904_v31  ;;  %v923_v40 = vadd.f32 %v1118_v5, %v908_v32 }
 0x18f   : > { %v882_v41 = vpop.f32.mrf.mxu0  ;;  %v898_v42 = vpop.f32.mrf.mxu1 }
 0x190   : > { %v927_v43 = vmax.f32 %v919_v39, 0.0  ;;  %v931_v44 = vmax.f32 %v923_v40, 0.0  ;;  %v905_v45 = vadd.f32 %v882_v41, %v699_v35  ;;  %v909_v46 = vadd.f32 %v898_v42, %v715_v36 }
 0x191   : > { %v884_v47 = vpop.f32.mrf.mxu0  ;;  %v900_v50 = vpop.f32.mrf.mxu1 }
 0x192   : > { %935 = vst [vmem:[%s1534_s21 + $0x10] sm:$0xff] %v927_v43  ;;  %939 = vst [vmem:[%s1534_s21 + $0x30] sm:$0xff] %v931_v44  ;;  %v920_v61 = vadd.f32 %v1118_v5, %v905_v45  ;;  %v924_v51 = vadd.f32 %v1118_v5, %v909_v46 }
 0x194   : > { %v928_v48 = vmax.f32 %v920_v61, 0.0  ;;  %v932_v49 = vmax.f32 %v924_v51, 0.0 }
 0x196   : > { %936 = vst [vmem:[%s1534_s21 + $0x18] sm:$0xff] %v928_v48  ;;  %940 = vst [vmem:[%s1534_s21 + $0x38] sm:$0xff] %v932_v49 }
 0x197 PF: > { %s13_s12 = sadd.s32 1, %s1199_s12  }
 0x198   : > { %p10_p4 = scmp.ge.s32.totalorder %s13_s12, 4  }
 0x19a   :  { %12 = sbr.rel (!%p10_p4) target bundleno = 1 (0x1), region = 64 }

// kernel: vgg19_forward.7
= control target key start
LH: loop header
LB: loop body
LE: loop exit
PB: predicated region body
PF: predicated region fallthrough
CT: control target
= control target key end

     0   :  { %s2441_s12 = smov 0   ;;  %s3017_s0 = inlined_call_operand.vmem [shape: f32[2,10,10,128], index: 0, kind: input, shape index: {}]   ;;  %s3018_s1 = inlined_call_operand.vmem [shape: bf16[3,384,128], index: 1, kind: input, shape index: {}]   ;;  %s3019_s2 = inlined_call_operand.vmem [shape: f32[1,128], index: 2, kind: input, shape index: {}]   ;;  %s3020_s3 = inlined_call_operand.vmem [shape: f32[2,4,4,128], index: 3, kind: output, shape index: {}]  }
   0x1 LB: > { %s1886_s13 = sadd.s32 4294967295, %s2418_s12   ;;  %p1890_p0 = scmp.ge.s32.totalorder %s2418_s12, 1  ;;  %s2418_s12 = sphi %s2441_s12, %s13_s12  }
   0x2   : > { %p137_p1 = scmp.lt.s32.totalorder %s2418_s12, 3 }
   0x4   : > { %p138_p2 = pnand %p1890_p0, %p137_p1 }
   0x5   : > { %p161_p3 = scmp.lt.s32.totalorder (!%p138_p2), %s1886_s13, 1 }
   0x6   : > { %141 = sbr.rel (%p138_p2) target bundleno = 403 (0x193), region = 32 }
   0xb   : > { %v2340_v0 = vld [vmem:[%s3018_s1 + $0x138] sm:$0xff]   ;;  %v2343_v3 = vld [vmem:[%s3018_s1 + $0x130] sm:$0xff]   ;;  %v2346_v6 = vld [vmem:[%s3018_s1 + $0x128] sm:$0xff]   ;;  %s3022_s13 = smov (!%p161_p3, %s1886_s13), 1  ;;  %vm1551_vm0 = vcmask 1041408   ;;  %vm1808_vm1 = vcmask 1041409  }
   0xc   : > { %v2341_v1 = vld [vmem:[%s3018_s1 + $0xf8] sm:$0xff]   ;;  %2102 = vmatprep.subr.bf16.mxu0 %v2340_v0  ;;  %v2344_v4 = vld [vmem:[%s3018_s1 + $0xf0] sm:$0xff]   ;;  %v2347_v7 = vld [vmem:[%s3018_s1 + $0xe8] sm:$0xff]   ;;  %s2330_s21 = smul.u32 160, %s3022_s13  ;;  %vm1810_vm2 = vcmask 1042434   ;;  %vm1812_vm3 = vcmask 1043459  }
   0xd   : > { %v2342_v2 = vld [vmem:[%s3018_s1 + $0x178] sm:$0xff]   ;;  %2103 = vmatpush3.bf16.msra.mxu0 %v2341_v1  ;;  %v2345_v5 = vld [vmem:[%s3018_s1 + $0x170] sm:$0xff]   ;;  %v2348_v8 = vld [vmem:[%s3018_s1 + $0x168] sm:$0xff]   ;;  %s2092_s17 = sshll.u32 %s3022_s13, 4 }
   0xe   : > { %2258 = vmatprep.subr.bf16.mxu1 %v2342_v2  ;;  %2104 = vmatprep.subr.bf16.mxu0 %v2343_v3  ;;  %v2349_v9 = vld [vmem:[%s3018_s1 + $0x120] sm:$0xff]   ;;  %v2352_v12 = vld [vmem:[%s3018_s1 + $0x118] sm:$0xff]   ;;  %v2355_v15 = vld [vmem:[%s3018_s1 + $0x110] sm:$0xff]   ;;  %s2519_s5 = scalar_lea.vmem %s3017_s0, %s2330_s21  ;;  %s2946_s13 = scalar_lea.vmem %s3020_s3, %s2092_s17 }
   0xf   : > { %2259 = vmatpush3.bf16.msra.mxu1 %v2342_v2  ;;  %v2350_v10 = vld [vmem:[%s3018_s1 + $0xe0] sm:$0xff]   ;;  %v2354_v13 = vld [vmem:[%s3018_s1 + $0x158] sm:$0xff]   ;;  %v2357_v16 = vld [vmem:[%s3018_s1 + $0x150] sm:$0xff]  }
  0x10   : > { %2260 = vmatprep.subr.bf16.mxu1 %v2345_v5  ;;  %v2351_v11 = vld [vmem:[%s3018_s1 + $0x160] sm:$0xff]   ;;  %v2353_v14 = vld [vmem:[%s3018_s1 + $0xd8] sm:$0xff]   ;;  %v2356_v17 = vld [vmem:[%s3018_s1 + $0xd0] sm:$0xff]  }
  0x11   : > { %2105 = vmatpush3.bf16.msra.mxu0 %v2344_v4  ;;  %v2358_v18 = vld [vmem:[%s3018_s1 + $0x108] sm:$0xff]   ;;  %v2361_v21 = vld [vmem:[%s3018_s1 + $0x100] sm:$0xff]   ;;  %v2528_v22 = vld [vmem:[%s2519_s5 + $0x10] sm:$0xff] }
  0x12   : > { %2106 = vmatprep.subr.bf16.mxu0 %v2346_v6  ;;  %v2359_v19 = vld [vmem:[%s3018_s1 + $0xc8] sm:$0xff]   ;;  %v175_v23 = vld [vmem:[%s2519_s5 + $0x18] sm:$0x3]  ;;  %v2532_v24 = vld [vmem:[%s2519_s5 + $0x20] sm:$0xff] }
  0x13   : > { %2261 = vmatpush3.bf16.msra.mxu1 %v2345_v5  ;;  %v2360_v20 = vld [vmem:[%s3018_s1 + $0x148] sm:$0xff]   ;;  %v2362_v25 = vld [vmem:[%s3018_s1 + $0xc0] sm:$0xff]   ;;  %v2539_v27 = vpack.c.bf16 %v175_v23, %v2528_v22  ;;  %v2548_v30 = vld [vmem:[%s2519_s5 + $0x30] sm:$0xff]  ;;  %v2093_v50 = vpack.c.bf16 %v2532_v24, %v2528_v22 }
  0x14   : > { %2262 = vmatprep.subr.bf16.mxu1 %v2348_v8  ;;  %v177_v26 = vld [vmem:[%s2519_s5 + $0x28] sm:$0x3]  ;;  %v2363_v28 = vld [vmem:[%s3018_s1 + $0x140] sm:$0xff]   ;;  %v179_v31 = vld [vmem:[%s2519_s5 + $0x38] sm:$0x3] }
  0x15   : > { %2107 = vmatpush3.bf16.msra.mxu0 %v2347_v7  ;;  %v2545_v29 = vpack.c.bf16 %v177_v26, %v2532_v24  ;;  %v210_v32 = vshrl.u32 %v2539_v27, 16  ;;  %v212_v33 = vshll.u32 %v2539_v27, 16  ;;  %v2364_v34 = vld [vmem:[%s3018_s1 + $0x78] sm:$0xff]   ;;  %v2557_v35 = vpack.c.bf16 %v179_v31, %v2548_v30  ;;  %v2564_v40 = vld [vmem:[%s2519_s5 + $0x40] sm:$0xff]  ;;  %v181_v43 = vld [vmem:[%s2519_s5 + $0x48] sm:$0x3] }
  0x16   : > { %2108 = vmatprep.subr.bf16.mxu0 %v2349_v9  ;;  %v267_v36 = vrot.slane %v2539_v27, 1  ;;  %v2573_v46 = vpack.c.bf16 %v181_v43, %v2564_v40  ;;  %v2366_v47 = vld [vmem:[%s3018_s1 + $0xb8] sm:$0xff]   ;;  %v2367_v53 = vld [vmem:[%s3018_s1 + $0x70] sm:$0xff]   ;;  %v2372_v2 = vld [vmem:[%s3018_s1 + $0xa8] sm:$0xff]  }
  0x17   : > { %2263 = vmatpush3.bf16.msra.mxu1 %v2348_v8  ;;  %v217_v37 = vshrl.u32 %v2545_v29, 16  ;;  %v219_v38 = vshll.u32 %v2545_v29, 16  ;;  %v268_v39 = vrot.slane %v2545_v29, 1  ;;  %v214_v41 = vrot.slane %v212_v33, 1  ;;  %v2365_v51 = vld [vmem:[%s3018_s1 + $0x38] sm:$0xff]   ;;  %v2369_v60 = vld [vmem:[%s3018_s1 + $0xb0] sm:$0xff]  }
  0x18   : > { %2264 = vmatprep.subr.bf16.mxu1 %v2351_v11  ;;  %v269_v42 = vrot.slane %v2557_v35, 1  ;;  %v270_v52 = vrot.slane %v2573_v46, 1  ;;  %v224_v54 = vshrl.u32 %v2557_v35, 16  ;;  %v226_v55 = vshll.u32 %v2557_v35, 16  ;;  %v2368_v63 = vld [vmem:[%s3018_s1 + $0x30] sm:$0xff]   ;;  %v2370_v4 = vld [vmem:[%s3018_s1 + $0x68] sm:$0xff]  }
  0x19   : > { %2109 = vmatpush3.bf16.msra.mxu0 %v2350_v10  ;;  %v221_v44 = vrot.slane %v219_v38, 1  ;;  %v1944_v45 = vcombine.low %v267_v36, %v268_v39  ;;  %v2578_v48 = vor.u32 %v214_v41, %v210_v32  ;;  %v231_v56 = vshrl.u32 %v2573_v46, 16  ;;  %v2371_v5 = vld [vmem:[%s3018_s1 + $0x28] sm:$0xff]   ;;  %v2623_v6 = vld [vmem:[%s2519_s5 + $0x50] sm:$0xff]  ;;  %v183_v7 = vld [vmem:[%s2519_s5 + $0x58] sm:$0x3] }
  0x1a   : > { %2110 = vmatprep.subr.bf16.mxu0 %v2352_v12  ;;  %v233_v57 = vshll.u32 %v2573_v46, 16  ;;  %v1947_v59 = vcombine.low %v269_v42, %v270_v52  ;;  %v228_v61 = vrot.slane %v226_v55, 1  ;;  %v2094_v8 = vpack.c.bf16 %v2564_v40, %v2548_v30  ;;  %v2629_v9 = vld [vmem:[%s2519_s5 + $0x60] sm:$0xff]  ;;  %v185_v10 = vld [vmem:[%s2519_s5 + $0x68] sm:$0x3]  ;;  %v2654_v23 = vld [vmem:[%s2519_s5 + $0x70] sm:$0xff] }
  0x1b   : > { %2265 = vmatpush3.bf16.msra.mxu1 %v2351_v11  ;;  %v2580_v49 = vor.u32 %v221_v44, %v217_v37  ;;  %2274 = vmatprep.mubr.bf16.mxu1 %v1944_v45  ;;  %v2633_v11 = vpack.c.bf16 %v183_v7, %v2623_v6  ;;  %v2375_v12 = vld [vmem:[%s3018_s1 + $0xa0] sm:$0xff]   ;;  %v189_v31 = vld [vmem:[%s2519_s5 + $0x88] sm:$0x3]  ;;  %v2378_v38 = vld [vmem:[%s3018_s1 + $0x98] sm:$0xff]  }
  0x1c   : > { %2266 = vmatprep.subr.bf16.mxu1 %v2354_v13  ;;  %v235_v62 = vrot.slane %v233_v57, 1  ;;  %v2607_v0 = vor.u32 %v228_v61, %v224_v54  ;;  %v2376_v43 = vld [vmem:[%s3018_s1 + $0x58] sm:$0xff]   ;;  %v2391_v29 = vld [vmem:[%s3018_s1 + $0x1f0] sm:$0xff]   ;;  %v2394_v46 = vld [vmem:[%s3018_s1 + $0x1e8] sm:$0xff]  }
  0x1d   : > { %2111 = vmatpush3.bf16.msra.mxu0 %v2353_v14  ;;  %v1943_v58 = vcombine.low %v2578_v48, %v2580_v49  ;;  %v2373_v14 = vld [vmem:[%s3018_s1 + $0x60] sm:$0xff]  }
  0x1e   : > { %2112 = vmatprep.subr.bf16.mxu0 %v2355_v15  ;;  %v2609_v1 = vor.u32 %v235_v62, %v231_v56  ;;  %v238_v15 = vshrl.u32 %v2633_v11, 16  ;;  %v2760_v35 = vcombine.low %v2580_v49, %v2607_v0  ;;  %v2098_v49 = vpack.c.bf16 %v2548_v30, %v2532_v24  ;;  %v2398_v24 = vld [vmem:[%s3018_s1 + $0x1a0] sm:$0xff]   ;;  %v2402_v30 = vld [vmem:[%s3018_s1 + $0x218] sm:$0xff]  }
  0x1f   : > { %2267 = vmatpush3.bf16.msra.mxu1 %v2354_v13  ;;  %607 = vmatprep.mubr.bf16.mxu0 %v1943_v58  ;;  %v2639_v13 = vpack.c.bf16 %v185_v10, %v2629_v9  ;;  %v173_v10 = vld [vmem:[%s2519_s5 + $0x8] sm:$0x3] }
  0x20   : > { %2268 = vmatprep.subr.bf16.mxu1 %v2357_v16  ;;  %v1946_v3 = vcombine.low %v2607_v0, %v2609_v1  ;;  %v2399_v0 = vld [vmem:[%s3018_s1 + $0x220] sm:$0xff]  }
  0x21   : > { %2113 = vmatpush3.bf16.msra.mxu0 %v2356_v17  ;;  %v271_v17 = vrot.slane %v2633_v11, 1 }
  0x22   : > { %2114 = vmatprep.subr.bf16.mxu0 %v2358_v18  ;;  %v2374_v18 = vld [vmem:[%s3018_s1 + $0x20] sm:$0xff]  }
  0x23   : > { %2269 = vmatpush3.bf16.msra.mxu1 %v2357_v16  ;;  %v240_v16 = vshll.u32 %v2633_v11, 16  ;;  %v2397_v11 = vld [vmem:[%s3018_s1 + $0x1e0] sm:$0xff]  }
  0x24   : > { %2270 = vmatprep.subr.bf16.mxu1 %v2360_v20 }
  0x25   : > { %2115 = vmatpush3.bf16.msra.mxu0 %v2359_v19  ;;  %v245_v19 = vshrl.u32 %v2639_v13, 16  ;;  %v242_v26 = vrot.slane %v240_v16, 1  ;;  %v2387_v16 = vld [vmem:[%s3018_s1 + $0x80] sm:$0xff]  }
  0x26   : > { %2116 = vmatprep.subr.bf16.mxu0 %v2361_v21  ;;  %v272_v21 = vrot.slane %v2639_v13, 1 }
  0x27   : > { %2271 = vmatpush3.bf16.msra.mxu1 %v2360_v20  ;;  %v247_v20 = vshll.u32 %v2639_v13, 16  ;;  %v2674_v41 = vor.u32 %v242_v26, %v238_v15  ;;  %v2386_v26 = vld [vmem:[%s3018_s1] sm:$0xff]  }
  0x28   : > { %2272 = vmatprep.subr.bf16.mxu1 %v2363_v28 }
  0x29   : > { %2117 = vmatpush3.bf16.msra.mxu0 %v2362_v25  ;;  %v187_v25 = vld [vmem:[%s2519_s5 + $0x78] sm:$0x3]  ;;  %v249_v33 = vrot.slane %v247_v20, 1  ;;  %v1985_v13 = vcombine.low %v2609_v1, %v2674_v41  ;;  %v2099_v1 = vpack.c.bf16 %v2623_v6, %v2564_v40 }
  0x2a   : > { %2154 = vmatprep.subr.bf16.mxu0 %v2364_v34  ;;  %v2662_v32 = vpack.c.bf16 %v187_v25, %v2654_v23  ;;  %v1950_v34 = vcombine.low %v271_v17, %v272_v21 }
  0x2b   : > { %2273 = vmatpush3.bf16.msra.mxu1 %v2363_v28  ;;  %v2658_v28 = vld [vmem:[%s2519_s5 + $0x80] sm:$0xff]  ;;  %v2680_v45 = vor.u32 %v249_v33, %v245_v19 }
  0x2c   : > { %2282 = vmatprep.subr.bf16.mxu1 %v2366_v47  ;;  %608 = vmatmul.mubr.bf16.vlgmr.msra.gmra.mxu0 %v2093_v50  ;;  %v2669_v37 = vpack.c.bf16 %v189_v31, %v2658_v28  ;;  %v273_v44 = vrot.slane %v2662_v32, 1  ;;  %v2095_v50 = vpack.c.bf16 %v2629_v9, %v2623_v6  ;;  %v252_v54 = vshrl.u32 %v2662_v32, 16  ;;  %v2404_v6 = vld [vmem:[%s3018_s1 + $0x190] sm:$0xff]  }
  0x2d   : > { %2155 = vmatpush3.bf16.msra.mxu0 %v2365_v51  ;;  %615 = vmatprep.mubr.bf16.mxu0 %v1946_v3  ;;  %v2377_v51 = vld [vmem:[%s3018_s1 + $0x18] sm:$0xff]   ;;  %v254_v55 = vshll.u32 %v2662_v32, 16  ;;  %v1949_v56 = vcombine.low %v2674_v41, %v2680_v45  ;;  %v2405_v41 = vld [vmem:[%s3018_s1 + $0x210] sm:$0xff]  }
  0x2e   : > { %2275 = vmatmul.mubr.bf16.vlgmr.msra.gmra.mxu1 %v1947_v59  ;;  %2156 = vmatprep.subr.bf16.mxu0 %v2367_v53  ;;  %v2381_v53 = vld [vmem:[%s3018_s1 + $0x90] sm:$0xff]   ;;  %v347_v58 = vshrl.u32 %v2669_v37, 16  ;;  %v349_v59 = vshll.u32 %v2669_v37, 16  ;;  %v2401_v32 = vld [vmem:[%s3018_s1 + $0x198] sm:$0xff]  }
  0x2f   : > { %2283 = vmatpush3.bf16.msra.mxu1 %v2366_v47  ;;  %2278 = vmatprep.mubr.bf16.mxu1 %v1950_v34  ;;  %v354_v47 = vrot.slane %v2669_v37, 1  ;;  %v256_v61 = vrot.slane %v254_v55, 1  ;;  %v2390_v34 = vld [vmem:[%s3018_s1 + $0x238] sm:$0xff]   ;;  %v2406_v55 = vld [vmem:[%s3018_s1 + $0x1c8] sm:$0xff]  }
  0x30   : > { %2284 = vmatprep.subr.bf16.mxu1 %v2369_v60  ;;  %v351_v62 = vrot.slane %v349_v59, 1  ;;  %v191_v59 = vld [vmem:[%s2519_s5 + $0x98] sm:$0x3] }
  0x31   : > { %2157 = vmatpush3.bf16.msra.mxu0 %v2368_v63  ;;  %v1953_v57 = vcombine.low %v273_v44, %v354_v47  ;;  %v2380_v63 = vld [vmem:[%s3018_s1 + $0x10] sm:$0xff]  }
  0x32   : > { %2158 = vmatprep.subr.bf16.mxu0 %v2370_v4  ;;  %v2709_v3 = vor.u32 %v351_v62, %v347_v58  ;;  %v2382_v4 = vld [vmem:[%s3018_s1 + $0x48] sm:$0xff]   ;;  %v2409_v58 = vld [vmem:[%s3018_s1 + $0x1c0] sm:$0xff]  }
  0x33   : > { %2285 = vmatpush3.bf16.msra.mxu1 %v2369_v60  ;;  %v2379_v60 = vld [vmem:[%s3018_s1 + $0x50] sm:$0xff]  }
  0x34   : > { %2286 = vmatprep.subr.bf16.mxu1 %v2372_v2  ;;  %616 = vmatmul.mubr.bf16.gmra.mxu0 %v2094_v8  ;;  %v172_v8 = vld [vmem:[%s2519_s5] sm:$0xff] }
  0x35   : > { %2159 = vmatpush3.bf16.msra.mxu0 %v2371_v5  ;;  %623 = vmatprep.mubr.bf16.mxu0 %v1949_v56  ;;  %v2384_v5 = vld [vmem:[%s3018_s1 + $0x88] sm:$0xff]   ;;  %v192_v15 = vpack.c.bf16 %v173_v10, %v172_v8 }
  0x36   : > { %2160 = vmatprep.subr.bf16.mxu0 %v2373_v14  ;;  %2279 = vmatmul.mubr.bf16.gmra.mxu1 %v1953_v57  ;;  %v2383_v14 = vld [vmem:[%s3018_s1 + $0x8] sm:$0xff]   ;;  %v2411_v57 = vld [vmem:[%s3018_s1 + $0x200] sm:$0xff]  }
  0x37   : > { %2287 = vmatpush3.bf16.msra.mxu1 %v2372_v2  ;;  %v2707_v2 = vor.u32 %v256_v61, %v252_v54  ;;  %v203_v19 = vshrl.u32 %v192_v15, 16  ;;  %v205_v20 = vshll.u32 %v192_v15, 16  ;;  %v266_v25 = vrot.slane %v192_v15, 1  ;;  %v2403_v54 = vld [vmem:[%s3018_s1 + $0x1d0] sm:$0xff]   ;;  %v2407_v56 = vld [vmem:[%s3018_s1 + $0x188] sm:$0xff]  }
  0x38   : > { %2288 = vmatprep.subr.bf16.mxu1 %v2375_v12 }
  0x39   : > { %2161 = vmatpush3.bf16.msra.mxu0 %v2374_v18  ;;  %v1952_v7 = vcombine.low %v2707_v2, %v2709_v3  ;;  %v2385_v18 = vld [vmem:[%s3018_s1 + $0x40] sm:$0xff]   ;;  %v207_v31 = vrot.slane %v205_v20, 1  ;;  %v1980_v33 = vcombine.low %v266_v25, %v267_v36  ;;  %v2097_v36 = vpack.c.bf16 %v2528_v22, %v172_v8 }
  0x3a   : > { %2162 = vmatprep.subr.bf16.mxu0 %v2376_v43  ;;  %v2388_v43 = vld [vmem:[%s3018_s1 + $0x1f8] sm:$0xff]   ;;  %v2766_v22 = vcombine.low %v270_v52, %v271_v17  ;;  %v2395_v52 = vld [vmem:[%s3018_s1 + $0x1a8] sm:$0xff]   ;;  %v1988_v40 = vcombine.low %v2680_v45, %v2707_v2  ;;  %v2100_v45 = vpack.c.bf16 %v2654_v23, %v2629_v9  ;;  %v2410_v9 = vld [vmem:[%s3018_s1 + $0x180] sm:$0xff]  }
  0x3b   : > { %2289 = vmatpush3.bf16.msra.mxu1 %v2375_v12  ;;  %v2096_v12 = vpack.c.bf16 %v2658_v28, %v2654_v23  ;;  %2298 = vmatprep.mubr.bf16.mxu1 %v1980_v33  ;;  %v2400_v17 = vld [vmem:[%s3018_s1 + $0x1d8] sm:$0xff]  }
  0x3c   : > { %2290 = vmatprep.subr.bf16.mxu1 %v2378_v38  ;;  %624 = vmatmul.mubr.bf16.gmra.mxu0 %v2095_v50  ;;  %v1983_v50 = vcombine.low %v268_v39, %v269_v42  ;;  %v2392_v39 = vld [vmem:[%s3018_s1 + $0x1b0] sm:$0xff]   ;;  %v2396_v42 = vld [vmem:[%s3018_s1 + $0x228] sm:$0xff]  }
  0x3d   : > { %2163 = vmatpush3.bf16.msra.mxu0 %v2377_v51  ;;  %631 = vmatprep.mubr.bf16.mxu0 %v1952_v7  ;;  %v2389_v51 = vld [vmem:[%s3018_s1 + $0x1b8] sm:$0xff]  }
  0x3e   : > { %2164 = vmatprep.subr.bf16.mxu0 %v2379_v60 }
  0x3f   : > { %2291 = vmatpush3.bf16.msra.mxu1 %v2378_v38  ;;  %v208_v38 = vor.u32 %v207_v31, %v203_v19 }
  0x40   : > { %2292 = vmatprep.subr.bf16.mxu1 %v2381_v53 }
  0x41   : > { %2165 = vmatpush3.bf16.msra.mxu0 %v2380_v63  ;;  %v1979_v27 = vcombine.low %v208_v38, %v2578_v48  ;;  %v1989_v48 = vcombine.low %v272_v21, %v273_v44  ;;  %v190_v21 = vld [vmem:[%s2519_s5 + $0x90] sm:$0xff] }
  0x42   : > { %2166 = vmatprep.subr.bf16.mxu0 %v2382_v4  ;;  %v2101_v44 = vpack.c.bf16 %v190_v21, %v2658_v28  ;;  %v2408_v28 = vld [vmem:[%s3018_s1 + $0x208] sm:$0xff]   ;;  %v201_v23 = vpack.c.bf16 %v191_v59, %v190_v21 }
  0x43   : > { %2293 = vmatpush3.bf16.msra.mxu1 %v2381_v53  ;;  %v2393_v53 = vld [vmem:[%s3018_s1 + $0x230] sm:$0xff]  }
  0x44   : > { %2294 = vmatprep.subr.bf16.mxu1 %v2384_v5  ;;  %632 = vmatmul.mubr.bf16.gmra.mxu0 %v2096_v12  ;;  %v1011_v60 = vrot.slane %v201_v23, 1  ;;  %v1006_v61 = vshll.u32 %v201_v23, 16  ;;  %v1004_v63 = vshrl.u32 %v201_v23, 16 }
  0x45   : > { %2167 = vmatpush3.bf16.msra.mxu0 %v2383_v14  ;;  %905 = vmatprep.mubr.bf16.mxu0 %v1979_v27 }
  0x46   : > { %2168 = vmatprep.subr.bf16.mxu0 %v2385_v18  ;;  %v2064_v62 = vcombine.low %v354_v47, %v1011_v60  ;;  %v1008_v2 = vrot.slane %v1006_v61, 1 }
  0x47   : > { %2295 = vmatpush3.bf16.msra.mxu1 %v2384_v5 }
  0x48   : > { %2296 = vmatprep.subr.bf16.mxu1 %v2387_v16  ;;  %v1009_v4 = vor.u32 %v1008_v2, %v1004_v63 }
  0x49   : > { %2169 = vmatpush3.bf16.msra.mxu0 %v2386_v26 }
  0x4a   : > { %2206 = vmatprep.subr.bf16.mxu0 %v2388_v43  ;;  %v2063_v5 = vcombine.low %v2709_v3, %v1009_v4 }
  0x4b   : > { %2297 = vmatpush3.bf16.msra.mxu1 %v2387_v16 }
  0x4c   : > { %2306 = vmatprep.subr.bf16.mxu1 %v2390_v34  ;;  %906 = vmatmul.mubr.bf16.vlgmr.msra.gmra.mxu0 %v2097_v36 }
  0x4d   : > { %2207 = vmatpush3.bf16.msra.mxu0 %v2389_v51  ;;  %913 = vmatprep.mubr.bf16.mxu0 %v2760_v35 }
  0x4e   : > { %2299 = vmatmul.mubr.bf16.vlgmr.msra.gmra.mxu1 %v1983_v50  ;;  %2208 = vmatprep.subr.bf16.mxu0 %v2391_v29 }
  0x4f   : > { %2307 = vmatpush3.bf16.msra.mxu1 %v2390_v34  ;;  %2302 = vmatprep.mubr.bf16.mxu1 %v2766_v22 }
  0x50   : > { %2308 = vmatprep.subr.bf16.mxu1 %v2393_v53 }
  0x51   : > { %2209 = vmatpush3.bf16.msra.mxu0 %v2392_v39 }
  0x52   : > { %2210 = vmatprep.subr.bf16.mxu0 %v2394_v46 }
  0x53   : > { %2309 = vmatpush3.bf16.msra.mxu1 %v2393_v53 }
  0x54   : > { %2310 = vmatprep.subr.bf16.mxu1 %v2396_v42  ;;  %914 = vmatmul.mubr.bf16.gmra.mxu0 %v2098_v49 }
  0x55   : > { %2211 = vmatpush3.bf16.msra.mxu0 %v2395_v52  ;;  %921 = vmatprep.mubr.bf16.mxu0 %v1985_v13 }
  0x56   : > { %2303 = vmatmul.mubr.bf16.gmra.mxu1 %v1989_v48  ;;  %2212 = vmatprep.subr.bf16.mxu0 %v2397_v11 }
  0x57   : > { %2311 = vmatpush3.bf16.msra.mxu1 %v2396_v42  ;;  %2322 = vmatprep.mubr.bf16.mxu1 %v1983_v50 }
  0x58   : > { %2312 = vmatprep.subr.bf16.mxu1 %v2399_v0 }
  0x59   : > { %2213 = vmatpush3.bf16.msra.mxu0 %v2398_v24 }
  0x5a   : > { %2214 = vmatprep.subr.bf16.mxu0 %v2400_v17 }
  0x5b   : > { %2313 = vmatpush3.bf16.msra.mxu1 %v2399_v0 }
  0x5c   : > { %2314 = vmatprep.subr.bf16.mxu1 %v2402_v30  ;;  %922 = vmatmul.mubr.bf16.gmra.mxu0 %v2099_v1 }
  0x5d   : > { %2215 = vmatpush3.bf16.msra.mxu0 %v2401_v32  ;;  %929 = vmatprep.mubr.bf16.mxu0 %v1988_v40 }
  0x5e   : > { %2216 = vmatprep.subr.bf16.mxu0 %v2403_v54 }
  0x5f   : > { %2315 = vmatpush3.bf16.msra.mxu1 %v2402_v30 }
  0x60   : > { %2316 = vmatprep.subr.bf16.mxu1 %v2405_v41 }
  0x61   : > { %2217 = vmatpush3.bf16.msra.mxu0 %v2404_v6 }
  0x62   : > { %2218 = vmatprep.subr.bf16.mxu0 %v2406_v55 }
  0x63   : > { %2317 = vmatpush3.bf16.msra.mxu1 %v2405_v41 }
  0x64   : > { %2318 = vmatprep.subr.bf16.mxu1 %v2408_v28  ;;  %930 = vmatmul.mubr.bf16.gmra.mxu0 %v2100_v45 }
  0x65   : > { %2219 = vmatpush3.bf16.msra.mxu0 %v2407_v56  ;;  %1246 = vmatprep.mubr.bf16.mxu0 %v2760_v35 }
  0x66   : > { %2220 = vmatprep.subr.bf16.mxu0 %v2409_v58 }
  0x67   : > { %2319 = vmatpush3.bf16.msra.mxu1 %v2408_v28 }
  0x68   : > { %2320 = vmatprep.subr.bf16.mxu1 %v2411_v57 }
  0x69   : > { %2221 = vmatpush3.bf16.msra.mxu0 %v2410_v9 }
  0x6b   : > { %2321 = vmatpush3.bf16.msra.mxu1 %v2411_v57 }
  0x6c   : > { %1247 = vmatmul.mubr.bf16.vlgmr.msra.gmra.mxu0 %v2098_v49 }
  0x6d   : > { %1254 = vmatprep.mubr.bf16.mxu0 %v1985_v13 }
  0x6e   : > { %2323 = vmatmul.mubr.bf16.vlgmr.msra.gmra.mxu1 %v2766_v22 }
  0x6f   : > { %2326 = vmatprep.mubr.bf16.mxu1 %v1989_v48 }
  0x74   : > { %1255 = vmatmul.mubr.bf16.gmra.mxu0 %v2099_v1 }
  0x75   : > { %1262 = vmatprep.mubr.bf16.mxu0 %v1988_v40 }
  0x76   : > { %2327 = vmatmul.mubr.bf16.gmra.mxu1 %v2064_v62 }
  0x7c   : > { %1263 = vmatmul.mubr.bf16.gmra.mxu0 %v2100_v45 }
  0x7d   : > { %1270 = vmatprep.mubr.bf16.mxu0 %v2063_v5 }
  0x84   : > { %1271 = vmatmul.mubr.bf16.gmra.mxu0 %v2101_v44 }
  0xec   : > { %v2118_v7 = vpop.f32.mrf.mxu0 }
  0xee   : > { %v2849_v8 = vpop.f32.mrf.mxu1  ;;  %v2119_v10 = vpop.f32.mrf.mxu0 }
  0xef   : > { %v2120_v12 = vadd.f32 %v2119_v10, %v2118_v7 }
  0xf0   : > { %v2121_v14 = vpop.f32.mrf.mxu0  ;;  %v674_v15 = vpop.f32.mrf.mxu1 }
  0xf1   : > { %v675_v2 = vadd.f32 %v2120_v12, %v674_v15 }
  0xf2   : > { %v2122_v37 = vpop.f32.mrf.mxu0  ;;  %v2851_v16 = vpop.f32.mrf.mxu1 }
  0xf3   : > { %v2123_v4 = vadd.f32 %v2122_v37, %v2121_v14 }
  0xf4   : > { %v2124_v47 = vpop.f32.mrf.mxu0  ;;  %v2855_v25 = vpop.f32.mrf.mxu1 }
  0xf6   : > { %v2125_v18 = vpop.f32.mrf.mxu0  ;;  %v2280_v31 = vpop.f32.mrf.mxu1 }
  0xf7   : > { %v2853_v19 = vadd.f32 %v2125_v18, %v2124_v47  ;;  %v2420_v18 = vmov 1983009808  }
  0xf8   : > { %v2127_v20 = vpop.f32.mrf.mxu0  ;;  %v690_v38 = vpop.f32.mrf.mxu1 }
  0xfa   : > { %v2128_v3 = vpop.f32.mrf.mxu0  ;;  %v2281_v39 = vpop.f32.mrf.mxu1 }
  0xfb   : > { %v2857_v26 = vadd.f32 %v2128_v3, %v2127_v20  ;;  %v1385_v20 = vunpack.c.l.s4 %v2420_v18 }
  0xfc   : > { %v2130_v33 = vpop.f32.mrf.mxu0  ;;  %v2863_v52 = vpop.f32.mrf.mxu1 }
  0xfd   : > { %v1386_v15 = vunpack.c.0.s8 %v1385_v20 }
  0xfe   : > { %v2131_v34 = vpop.f32.mrf.mxu0 }
  0xff   : > { %v2132_v43 = vadd.f32 %v2131_v34, %v2130_v33 }
 0x100   : > { %v2133_v50 = vpop.f32.mrf.mxu0 }
 0x101   : > { %v2859_v27 = vadd.f32 %v2132_v43, %v690_v38  ;;  %v1387_v38 = vlaneseq }
 0x102   : > { %v2134_v36 = vpop.f32.mrf.mxu0 }
 0x103   : > { %v2861_v51 = vadd.f32 %v2134_v36, %v2133_v50  ;;  %v678_v50 = vadd.f32 %v2123_v4, %v2855_v25 }
 0x104   : > { %v2136_v53 = vpop.f32.mrf.mxu0 }
 0x106   : > { %v2137_v29 = vpop.f32.mrf.mxu0 }
 0x107   : > { %v2138_v35 = vadd.f32 %v2137_v29, %v2136_v53 }
 0x108   : > { %v2139_v22 = vpop.f32.mrf.mxu0 }
 0x109   : > { %v699_v42 = vadd.f32 %v2280_v31, %v2138_v35 }
 0x10a   : > { %v2140_v46 = vpop.f32.mrf.mxu0 }
 0x10b   : > { %v2141_v48 = vadd.f32 %v2140_v46, %v2139_v22  ;;  %v1388_v22 = vshrl.u32 %v1387_v38, 7 }
 0x10c   : > { %v2170_v49 = vpop.f32.mrf.mxu0 }
 0x10d   : > { %v702_v0 = vadd.f32 %v2281_v39, %v2141_v48  ;;  %v2881_v48 = vld [vmem:[%s3019_s2] ss:$0 sm:$0xff] }
 0x10e   : > { %v2171_v11 = vpop.f32.mrf.mxu0  ;;  %v2865_v13 = vpop.f32.mrf.mxu1 }
 0x10f   : > { %v2172_v60 = vadd.f32 %v2171_v11, %v2170_v49 }
 0x110   : > { %v2173_v24 = vpop.f32.mrf.mxu0  ;;  %v972_v17 = vpop.f32.mrf.mxu1 }
 0x111   : > { %v908_v31 = vadd.f32 %v2172_v60, %v675_v2 }
 0x112   : > { %v2174_v30 = vpop.f32.mrf.mxu0  ;;  %v2867_v32 = vpop.f32.mrf.mxu1 }
 0x113   : > { %v2175_v3 = vadd.f32 %v2174_v30, %v2173_v24  ;;  %v973_v37 = vadd.f32 %v972_v17, %v908_v31  ;;  %v683_v24 = vadd.f32 %v2849_v8, %v2853_v19  ;;  %v686_v30 = vadd.f32 %v2851_v16, %v2857_v26 }
 0x114   : > { %v2176_v1 = vpop.f32.mrf.mxu0  ;;  %v975_v54 = vpop.f32.mrf.mxu1 }
 0x115   : > { %v911_v29 = vadd.f32 %v2175_v3, %v678_v50 }
 0x116   : > { %v2177_v21 = vpop.f32.mrf.mxu0  ;;  %v2304_v6 = vpop.f32.mrf.mxu1 }
 0x117   : > { %v2178_v39 = vadd.f32 %v2177_v21, %v2176_v1  ;;  %v976_v1 = vadd.f32 %v975_v54, %v911_v29 }
 0x118   : > { %v2179_v41 = vpop.f32.mrf.mxu0  ;;  %v2869_v45 = vpop.f32.mrf.mxu1 }
 0x11a   : > { %v2180_v44 = vpop.f32.mrf.mxu0  ;;  %v2305_v58 = vpop.f32.mrf.mxu1 }
 0x11c   : > { %v2182_v40 = vpop.f32.mrf.mxu0  ;;  %v2871_v62 = vpop.f32.mrf.mxu1 }
 0x11e   : > { %v2183_v28 = vpop.f32.mrf.mxu0 }
 0x11f   : > { %v2184_v46 = vadd.f32 %v2183_v28, %v2182_v40  ;;  %v694_v40 = vadd.f32 %v2861_v51, %v2863_v52  ;;  %v916_v28 = vadd.f32 %v2178_v39, %v683_v24 }
 0x120   : > { %v2185_v55 = vpop.f32.mrf.mxu0 }
 0x121   : > { %v981_v60 = vadd.f32 %v2865_v13, %v916_v28 }
 0x122   : > { %v2186_v56 = vpop.f32.mrf.mxu0 }
 0x123   : > { %v2187_v17 = vadd.f32 %v2186_v56, %v2185_v55 }
 0x124   : > { %v2188_v57 = vpop.f32.mrf.mxu0 }
 0x125   : > { %v927_v16 = vadd.f32 %v2187_v17, %v694_v40 }
 0x126   : > { %v2189_v59 = vpop.f32.mrf.mxu0 }
 0x127   : > { %v2190_v9 = vadd.f32 %v2189_v59, %v2188_v57 }
 0x128   : > { %v2191_v23 = vpop.f32.mrf.mxu0 }
 0x129   : > { %v932_v61 = vadd.f32 %v2190_v9, %v699_v42  ;;  %v2181_v42 = vadd.f32 %v2180_v44, %v2179_v41  ;;  %v2888_v41 = vsub.s32 %v1386_v15, %v1388_v22 }
 0x12a   : > { %v2192_v63 = vpop.f32.mrf.mxu0 }
 0x12b   : > { %v2873_v5 = vadd.f32 %v2304_v6, %v932_v61  ;;  %v2193_v7 = vadd.f32 %v2192_v63, %v2191_v23  ;;  %v919_v57 = vadd.f32 %v2181_v42, %v686_v30 }
 0x12c   : > { %v2222_v47 = vpop.f32.mrf.mxu0 }
 0x12d   : > { %v935_v33 = vadd.f32 %v2193_v7, %v702_v0  ;;  %v2897_v51 = vadd.f32 %v2867_v32, %v919_v57  ;;  %v2905_v7 = vadd.f32 %v2871_v62, %v927_v16 }
 0x12e   : > { %v2324_v10 = vpop.f32.mrf.mxu1  ;;  %v2223_v43 = vpop.f32.mrf.mxu0 }
 0x12f   : > { %v2876_v36 = vadd.f32 %v2305_v58, %v935_v33  ;;  %v2224_v53 = vadd.f32 %v2223_v43, %v2222_v47  ;;  %v924_v58 = vadd.f32 %v2184_v46, %v2859_v27 }
 0x130   : > { %v1313_v34 = vpop.f32.mrf.mxu1  ;;  %v2225_v14 = vpop.f32.mrf.mxu0 }
 0x131   : > { %v1314_v35 = vadd.f32 %v2224_v53, %v1313_v34  ;;  %v2900_v27 = vadd.f32 %v2869_v45, %v924_v58 }
 0x132   : > { %v2325_v12 = vpop.f32.mrf.mxu1  ;;  %v2226_v49 = vpop.f32.mrf.mxu0 }
 0x133   : > { %v1344_v0 = vadd.f32 %v1314_v35, %v973_v37  ;;  %v2227_v11 = vadd.f32 %v2226_v49, %v2225_v14 }
 0x134   : > { %v1316_v25 = vpop.f32.mrf.mxu1  ;;  %v2228_v6 = vpop.f32.mrf.mxu0 }
 0x135   : > { %v1359_v21 = vadd.f32 %v2881_v48, %v1344_v0  ;;  %v1317_v44 = vadd.f32 %v2227_v11, %v1316_v25 }
 0x136   : > { %v2229_v59 = vpop.f32.mrf.mxu0 }
 0x137   : > { %v1367_v8 = vmax.f32 %v1359_v21, 0.0  ;;  %v1345_v19 = vadd.f32 %v1317_v44, %v976_v1  ;;  %v2230_v9 = vadd.f32 %v2229_v59, %v2228_v6 }
 0x138   : > { %v2231_v26 = vpop.f32.mrf.mxu0 }
 0x139   : > { %v1383_v54 = vcombine.high %v1367_v8, %v1367_v8  ;;  %v1390_v55 = vrot.slane %v1367_v8, %v2888_v41  ;;  %v1360_v56 = vadd.f32 %v2881_v48, %v1345_v19  ;;  %v1322_v23 = vadd.f32 %v2324_v10, %v2230_v9 }
 0x13a   : > { %v2232_v52 = vpop.f32.mrf.mxu0 }
 0x13b   : > { %v1397_v61 = vrot.slane %v1383_v54, %v2888_v41  ;;  %v1398_v63 = vcombine.high %v1390_v55, %v1390_v55  ;;  %v1552_v2 = vsel %vm1551_vm0, %v1390_v55, -inf  ;;  %v1368_v4 = vmax.f32 %v1360_v56, 0.0 }
 0x13c   : > { %v1553_v47 = vrot.slane %v1552_v2, 4  ;;  %v1346_v10 = vadd.f32 %v1322_v23, %v981_v60  ;;  %v2233_v18 = vadd.f32 %v2232_v52, %v2231_v26  ;;  %v2910_v38 = vpop.f32.mrf.mxu0 }
 0x13d   : > { %v1399_v13 = vcombine.high %v1397_v61, %v1397_v61  ;;  %v1559_v32 = vsel %vm1551_vm0, %v1398_v63, -inf  ;;  %v1566_v20 = vsel %vm1551_vm0, %v1397_v61, -inf  ;;  %v1400_v45 = vcombine.high %v1368_v4, %v1368_v4 }
 0x13e   : > { %v1554_v3 = vmax.f32 %v1552_v2, %v1553_v47  ;;  %v1560_v31 = vrot.slane %v1559_v32, 4  ;;  %v1567_v33 = vrot.slane %v1566_v20, 4  ;;  %v1407_v34 = vrot.slane %v1368_v4, %v2888_v41  ;;  %v2917_v11 = vpop.f32.mrf.mxu0 }
 0x13f   : > { %v1573_v43 = vsel %vm1551_vm0, %v1399_v13, -inf  ;;  %v1414_v62 = vrot.slane %v1400_v45, %v2888_v41  ;;  %v1361_v50 = vadd.f32 %v2881_v48, %v1346_v10  ;;  %v1325_v53 = vadd.f32 %v2325_v12, %v2233_v18 }
 0x140   : > { %v1555_v14 = vrot.slane %v1554_v3, 2  ;;  %v1561_v15 = vmax.f32 %v1559_v32, %v1560_v31  ;;  %v1568_v37 = vmax.f32 %v1566_v20, %v1567_v33  ;;  %v1574_v29 = vrot.slane %v1573_v43, 4  ;;  %v2923_v16 = vpop.f32.mrf.mxu0 }
 0x141   : > { %v1415_v35 = vcombine.high %v1407_v34, %v1407_v34  ;;  %v1416_v22 = vcombine.high %v1414_v62, %v1414_v62  ;;  %v1580_v39 = vsel %vm1551_vm0, %v1407_v34, -inf  ;;  %v1594_v42 = vsel %vm1551_vm0, %v1414_v62, -inf }
 0x142   : > { %v1556_v46 = vmax.f32 %v1554_v3, %v1555_v14  ;;  %v1562_v49 = vrot.slane %v1561_v15, 2  ;;  %v1569_v25 = vrot.slane %v1568_v37, 2  ;;  %v1575_v0 = vmax.f32 %v1573_v43, %v1574_v29  ;;  %v2927_v20 = vpop.f32.mrf.mxu0 }
 0x143   : > { %v1581_v24 = vrot.slane %v1580_v39, 4  ;;  %v1587_v30 = vsel %vm1551_vm0, %v1415_v35, -inf  ;;  %v1595_v12 = vrot.slane %v1594_v42, 4  ;;  %v1601_v17 = vsel %vm1551_vm0, %v1416_v22, -inf }
 0x144   : > { %v1557_v6 = vrot.slane %v1556_v46, 1  ;;  %v1563_v1 = vmax.f32 %v1561_v15, %v1562_v49  ;;  %v1570_v21 = vmax.f32 %v1568_v37, %v1569_v25  ;;  %v1576_v44 = vrot.slane %v1575_v0, 2 }
 0x145   : > { %v1582_v40 = vmax.f32 %v1580_v39, %v1581_v24  ;;  %v1588_v28 = vrot.slane %v1587_v30, 4  ;;  %v1596_v57 = vmax.f32 %v1594_v42, %v1595_v12  ;;  %v1602_v58 = vrot.slane %v1601_v17, 4  ;;  %v2934_v39 = vpop.f32.mrf.mxu0 }
 0x146   : > { %v2921_v59 = vmax.f32 %v1556_v46, %v1557_v6  ;;  %v1564_v8 = vrot.slane %v1563_v1, 1  ;;  %v1571_v19 = vrot.slane %v1570_v21, 1  ;;  %v1577_v9 = vmax.f32 %v1575_v0, %v1576_v44  ;;  %v2937_v0 = vpop.f32.mrf.mxu1 }
 0x147   : > { %v1583_v26 = vrot.slane %v1582_v40, 2  ;;  %v1589_v54 = vmax.f32 %v1587_v30, %v1588_v28  ;;  %v1597_v55 = vrot.slane %v1596_v57, 2  ;;  %v1603_v56 = vmax.f32 %v1601_v17, %v1602_v58 }
 0x148   : > { %v1565_v23 = vmax.f32 %v1563_v1, %v1564_v8  ;;  %v1572_v60 = vmax.f32 %v1570_v21, %v1571_v19  ;;  %v1578_v52 = vrot.slane %v1577_v9, 1  ;;  %v1369_v61 = vmax.f32 %v1361_v50, 0.0 }
 0x149   : > { %v1584_v63 = vmax.f32 %v1582_v40, %v1583_v26  ;;  %v1590_v2 = vrot.slane %v1589_v54, 2  ;;  %v1598_v4 = vmax.f32 %v1596_v57, %v1597_v55  ;;  %v1604_v47 = vrot.slane %v1603_v56, 2 }
 0x14a   : > { %v1579_v10 = vmax.f32 %v1577_v9, %v1578_v52  ;;  %v1417_v18 = vcombine.high %v1369_v61, %v1369_v61  ;;  %v1424_v13 = vrot.slane %v1369_v61, %v2888_v41  ;;  %v1347_v32 = vadd.f32 %v1325_v53, %v2897_v51 }
 0x14b   : > { %v1585_v45 = vrot.slane %v1584_v63, 1  ;;  %v1591_v3 = vmax.f32 %v1589_v54, %v1590_v2  ;;  %v1599_v31 = vrot.slane %v1598_v4, 1  ;;  %v1605_v33 = vmax.f32 %v1603_v56, %v1604_v47  ;;  %v1329_v54 = vpop.f32.mrf.mxu1 }
 0x14c   : > { %v1431_v34 = vrot.slane %v1417_v18, %v2888_v41  ;;  %v1432_v43 = vcombine.high %v1424_v13, %v1424_v13  ;;  %v1608_v62 = vsel %vm1551_vm0, %v1424_v13, -inf  ;;  %v1362_v50 = vadd.f32 %v2881_v48, %v1347_v32 }
 0x14d   : > { %v1586_v14 = vmax.f32 %v1584_v63, %v1585_v45  ;;  %v1592_v15 = vrot.slane %v1591_v3, 1  ;;  %v1600_v37 = vmax.f32 %v1598_v4, %v1599_v31  ;;  %v1606_v29 = vrot.slane %v1605_v33, 1 }
 0x14e   : > { %v1433_v35 = vcombine.high %v1431_v34, %v1431_v34  ;;  %v1609_v51 = vrot.slane %v1608_v62, 4  ;;  %v1615_v53 = vsel %vm1551_vm0, %v1432_v43, -inf  ;;  %v1622_v22 = vsel %vm1551_vm0, %v1431_v34, -inf }
 0x14f   : > { %v1593_v42 = vmax.f32 %v1591_v3, %v1592_v15  ;;  %v1607_v46 = vmax.f32 %v1605_v33, %v1606_v29  ;;  %v1776_v49 = vmax.f32 %v2921_v59, %v1586_v14  ;;  %v1778_v25 = vmax.f32 %v1572_v60, %v1600_v37  ;;  %v2241_v59 = vpop.f32.mrf.mxu0  ;;  %v2329_v3 = vpop.f32.mrf.mxu1 }
 0x150   : > { %v1610_v24 = vmax.f32 %v1608_v62, %v1609_v51  ;;  %v1616_v30 = vrot.slane %v1615_v53, 4  ;;  %v1623_v12 = vrot.slane %v1622_v22, 4  ;;  %v1629_v17 = vsel %vm1551_vm0, %v1433_v35, -inf }
 0x151   : > { %v1777_v6 = vmax.f32 %v1565_v23, %v1593_v42  ;;  %v1779_v1 = vmax.f32 %v1579_v10, %v1607_v46  ;;  %v1630_v21 = vrot.slane %v1629_v17, 4  ;;  %v1370_v44 = vmax.f32 %v1362_v50, 0.0  ;;  %v2243_v10 = vpop.f32.mrf.mxu0 }
 0x152   : > { %v1611_v40 = vrot.slane %v1610_v24, 2  ;;  %v1617_v28 = vmax.f32 %v1615_v53, %v1616_v30  ;;  %v1624_v57 = vmax.f32 %v1622_v22, %v1623_v12  ;;  %v2236_v58 = vadd.f32 %v2917_v11, %v2910_v38 }
 0x153   : > { %v1809_v8 = vsel %vm1808_vm1, %v1777_v6, %v1776_v49  ;;  %v1631_v19 = vmax.f32 %v1629_v17, %v1630_v21  ;;  %v1434_v9 = vcombine.high %v1370_v44, %v1370_v44  ;;  %v1441_v26 = vrot.slane %v1370_v44, %v2888_v41  ;;  %v2244_v53 = vpop.f32.mrf.mxu0 }
 0x154   : > { %v1811_v55 = vsel %vm1810_vm2, %v1778_v25, %v1809_v8  ;;  %v1612_v56 = vmax.f32 %v1610_v24, %v1611_v40  ;;  %v1618_v23 = vrot.slane %v1617_v28, 2  ;;  %v1625_v60 = vrot.slane %v1624_v57, 2  ;;  %v1332_v25 = vpop.f32.mrf.mxu1 }
 0x155   : > { %v1813_v38 = vsel %vm1812_vm3, %v1779_v1, %v1811_v55  ;;  %v1632_v11 = vrot.slane %v1631_v19, 2  ;;  %v1448_v52 = vrot.slane %v1434_v9, %v2888_v41  ;;  %v1449_v61 = vcombine.high %v1441_v26, %v1441_v26 }
 0x156   : > { %1827 = vst [vmem:[%s2946_s13] sm:$0xf] %v1813_v38  ;;  %v1613_v63 = vrot.slane %v1612_v56, 1  ;;  %v1619_v2 = vmax.f32 %v1617_v28, %v1618_v23  ;;  %v1626_v4 = vmax.f32 %v1624_v57, %v1625_v60  ;;  %v1636_v47 = vsel %vm1551_vm0, %v1441_v26, -inf }
 0x157   : > { %v1633_v18 = vmax.f32 %v1631_v19, %v1632_v11  ;;  %v1450_v13 = vcombine.high %v1448_v52, %v1448_v52  ;;  %v1637_v32 = vrot.slane %v1636_v47, 4  ;;  %v1643_v45 = vsel %vm1551_vm0, %v1449_v61, -inf }
 0x158   : > { %v1614_v31 = vmax.f32 %v1612_v56, %v1613_v63  ;;  %v1620_v33 = vrot.slane %v1619_v2, 1  ;;  %v1627_v34 = vrot.slane %v1626_v4, 1  ;;  %v1644_v43 = vrot.slane %v1643_v45, 4 }
 0x159   : > { %v1634_v62 = vrot.slane %v1633_v18, 1  ;;  %v1638_v50 = vmax.f32 %v1636_v47, %v1637_v32  ;;  %v1650_v14 = vsel %vm1551_vm0, %v1448_v52, -inf  ;;  %v1657_v15 = vsel %vm1551_vm0, %v1450_v13, -inf }
 0x15a   : > { %v1621_v37 = vmax.f32 %v1619_v2, %v1620_v33  ;;  %v1628_v29 = vmax.f32 %v1626_v4, %v1627_v34  ;;  %v1645_v35 = vmax.f32 %v1643_v45, %v1644_v43  ;;  %v1651_v51 = vrot.slane %v1650_v14, 4 }
 0x15b   : > { %v1635_v22 = vmax.f32 %v1633_v18, %v1634_v62  ;;  %v1639_v42 = vrot.slane %v1638_v50, 2  ;;  %v1658_v46 = vrot.slane %v1657_v15, 4  ;;  %v1330_v49 = vadd.f32 %v2236_v58, %v1329_v54 }
 0x15c   : > { %v1646_v24 = vrot.slane %v1645_v35, 2  ;;  %v1652_v30 = vmax.f32 %v1650_v14, %v1651_v51  ;;  %v2239_v12 = vadd.f32 %v2927_v20, %v2923_v16  ;;  %v2242_v17 = vadd.f32 %v2241_v59, %v2934_v39 }
 0x15d   : > { %v1640_v6 = vmax.f32 %v1638_v50, %v1639_v42  ;;  %v1659_v1 = vmax.f32 %v1657_v15, %v1658_v46  ;;  %v1348_v21 = vadd.f32 %v1330_v49, %v2900_v27  ;;  %v2245_v44 = vadd.f32 %v2244_v53, %v2243_v10 }
 0x15e   : > { %v1647_v40 = vmax.f32 %v1645_v35, %v1646_v24  ;;  %v1653_v28 = vrot.slane %v1652_v30, 2  ;;  %v1333_v57 = vadd.f32 %v2239_v12, %v1332_v25  ;;  %v1338_v8 = vadd.f32 %v2937_v0, %v2242_v17 }
 0x15f   : > { %v1641_v19 = vrot.slane %v1640_v6, 1  ;;  %v1660_v58 = vrot.slane %v1659_v1, 2  ;;  %v1363_v9 = vadd.f32 %v2881_v48, %v1348_v21  ;;  %v1341_v26 = vadd.f32 %v2329_v3, %v2245_v44 }
 0x160   : > { %v1648_v54 = vrot.slane %v1647_v40, 1  ;;  %v1654_v55 = vmax.f32 %v1652_v30, %v1653_v28  ;;  %v1349_v16 = vadd.f32 %v1333_v57, %v2905_v7  ;;  %v1350_v20 = vadd.f32 %v1338_v8, %v2873_v5 }
 0x161   : > { %v1642_v39 = vmax.f32 %v1640_v6, %v1641_v19  ;;  %v1661_v59 = vmax.f32 %v1659_v1, %v1660_v58  ;;  %v1371_v27 = vmax.f32 %v1363_v9, 0.0  ;;  %v2967_v56 = vadd.f32 %v1341_v26, %v2876_v36 }
 0x162   : > { %v1649_v23 = vmax.f32 %v1647_v40, %v1648_v54  ;;  %v1655_v60 = vrot.slane %v1654_v55, 1  ;;  %v1364_v0 = vadd.f32 %v2881_v48, %v1349_v16  ;;  %v1365_v38 = vadd.f32 %v2881_v48, %v1350_v20 }
 0x163   : > { %v1662_v11 = vrot.slane %v1661_v59, 1  ;;  %v1780_v52 = vmax.f32 %v1614_v31, %v1642_v39  ;;  %v1451_v61 = vcombine.high %v1371_v27, %v1371_v27  ;;  %v1458_v63 = vrot.slane %v1371_v27, %v2888_v41 }
 0x164   : > { %v1656_v7 = vmax.f32 %v1654_v55, %v1655_v60  ;;  %v1781_v2 = vmax.f32 %v1621_v37, %v1649_v23  ;;  %v1372_v5 = vmax.f32 %v1364_v0, 0.0  ;;  %v2972_v4 = vmax.f32 %v1365_v38, 0.0 }
 0x165   : > { %v1663_v47 = vmax.f32 %v1661_v59, %v1662_v11  ;;  %v1465_v36 = vrot.slane %v1451_v61, %v2888_v41  ;;  %v1466_v10 = vcombine.high %v1458_v63, %v1458_v63  ;;  %v1664_v18 = vsel %vm1551_vm0, %v1458_v63, -inf }
 0x166   : > { %v1782_v13 = vmax.f32 %v1628_v29, %v1656_v7  ;;  %v1814_v32 = vsel %vm1808_vm1, %v1781_v2, %v1780_v52  ;;  %v1665_v45 = vrot.slane %v1664_v18, 4  ;;  %v1468_v3 = vcombine.high %v1372_v5, %v1372_v5 }
 0x167   : > { %v1783_v31 = vmax.f32 %v1635_v22, %v1663_v47  ;;  %v1467_v33 = vcombine.high %v1465_v36, %v1465_v36  ;;  %v1671_v34 = vsel %vm1551_vm0, %v1466_v10, -inf  ;;  %v1678_v43 = vsel %vm1551_vm0, %v1465_v36, -inf }
 0x168   : > { %v1815_v62 = vsel %vm1810_vm2, %v1782_v13, %v1814_v32  ;;  %v1666_v50 = vmax.f32 %v1664_v18, %v1665_v45  ;;  %v1672_v14 = vrot.slane %v1671_v34, 4  ;;  %v1679_v15 = vrot.slane %v1678_v43, 4 }
 0x169   : > { %v1816_v37 = vsel %vm1812_vm3, %v1783_v31, %v1815_v62  ;;  %v1685_v29 = vsel %vm1551_vm0, %v1467_v33, -inf  ;;  %v1475_v35 = vrot.slane %v1372_v5, %v2888_v41  ;;  %v1482_v51 = vrot.slane %v1468_v3, %v2888_v41 }
 0x16a   : > { %1828 = vst [vmem:[%s2946_s13 + $0x4] sm:$0xf] %v1816_v37  ;;  %v1667_v53 = vrot.slane %v1666_v50, 2  ;;  %v1673_v22 = vmax.f32 %v1671_v34, %v1672_v14  ;;  %v1680_v42 = vmax.f32 %v1678_v43, %v1679_v15  ;;  %v1686_v46 = vrot.slane %v1685_v29, 4 }
 0x16b   : > { %v1483_v49 = vcombine.high %v1475_v35, %v1475_v35  ;;  %v1484_v25 = vcombine.high %v1482_v51, %v1482_v51  ;;  %v1692_v24 = vsel %vm1551_vm0, %v1475_v35, -inf  ;;  %v1706_v30 = vsel %vm1551_vm0, %v1482_v51, -inf }
 0x16c   : > { %v1668_v12 = vmax.f32 %v1666_v50, %v1667_v53  ;;  %v1674_v17 = vrot.slane %v1673_v22, 2  ;;  %v1681_v6 = vrot.slane %v1680_v42, 2  ;;  %v1687_v1 = vmax.f32 %v1685_v29, %v1686_v46 }
 0x16d   : > { %v1693_v21 = vrot.slane %v1692_v24, 4  ;;  %v1699_v44 = vsel %vm1551_vm0, %v1483_v49, -inf  ;;  %v1707_v40 = vrot.slane %v1706_v30, 4  ;;  %v1713_v28 = vsel %vm1551_vm0, %v1484_v25, -inf }
 0x16e   : > { %v1669_v57 = vrot.slane %v1668_v12, 1  ;;  %v1675_v8 = vmax.f32 %v1673_v22, %v1674_v17  ;;  %v1682_v19 = vmax.f32 %v1680_v42, %v1681_v6  ;;  %v1688_v58 = vrot.slane %v1687_v1, 2 }
 0x16f   : > { %v1694_v9 = vmax.f32 %v1692_v24, %v1693_v21  ;;  %v1700_v26 = vrot.slane %v1699_v44, 4  ;;  %v1708_v54 = vmax.f32 %v1706_v30, %v1707_v40  ;;  %v1714_v55 = vrot.slane %v1713_v28, 4 }
 0x170   : > { %v1670_v16 = vmax.f32 %v1668_v12, %v1669_v57  ;;  %v1676_v20 = vrot.slane %v1675_v8, 1  ;;  %v1683_v39 = vrot.slane %v1682_v19, 1  ;;  %v1689_v59 = vmax.f32 %v1687_v1, %v1688_v58 }
 0x171   : > { %v1695_v27 = vrot.slane %v1694_v9, 2  ;;  %v1701_v23 = vmax.f32 %v1699_v44, %v1700_v26  ;;  %v1709_v60 = vrot.slane %v1708_v54, 2  ;;  %v1715_v0 = vmax.f32 %v1713_v28, %v1714_v55 }
 0x172   : > { %v1677_v38 = vmax.f32 %v1675_v8, %v1676_v20  ;;  %v1684_v11 = vmax.f32 %v1682_v19, %v1683_v39  ;;  %v1690_v52 = vrot.slane %v1689_v59, 1  ;;  %v1485_v61 = vcombine.high %v2972_v4, %v2972_v4 }
 0x173   : > { %v1696_v63 = vmax.f32 %v1694_v9, %v1695_v27  ;;  %v1702_v7 = vrot.slane %v1701_v23, 2  ;;  %v1710_v2 = vmax.f32 %v1708_v54, %v1709_v60  ;;  %v1716_v5 = vrot.slane %v1715_v0, 2 }
 0x174   : > { %v1691_v47 = vmax.f32 %v1689_v59, %v1690_v52  ;;  %v1492_v36 = vrot.slane %v2972_v4, %v2888_v41  ;;  %v1499_v10 = vrot.slane %v1485_v61, %v2888_v41  ;;  %v1366_v18 = vadd.f32 %v2881_v48, %v2967_v56 }
 0x175   : > { %v1697_v13 = vrot.slane %v1696_v63, 1  ;;  %v1703_v32 = vmax.f32 %v1701_v23, %v1702_v7  ;;  %v1711_v45 = vrot.slane %v1710_v2, 1  ;;  %v1717_v3 = vmax.f32 %v1715_v0, %v1716_v5 }
 0x176   : > { %v1500_v31 = vcombine.high %v1492_v36, %v1492_v36  ;;  %v1501_v33 = vcombine.high %v1499_v10, %v1499_v10  ;;  %v1720_v34 = vsel %vm1551_vm0, %v1492_v36, -inf  ;;  %v1734_v43 = vsel %vm1551_vm0, %v1499_v10, -inf }
 0x177   : > { %v1698_v62 = vmax.f32 %v1696_v63, %v1697_v13  ;;  %v1704_v50 = vrot.slane %v1703_v32, 1  ;;  %v1712_v14 = vmax.f32 %v1710_v2, %v1711_v45  ;;  %v1718_v15 = vrot.slane %v1717_v3, 1 }
 0x178   : > { %v1721_v4 = vrot.slane %v1720_v34, 4  ;;  %v1727_v37 = vsel %vm1551_vm0, %v1500_v31, -inf  ;;  %v1735_v29 = vrot.slane %v1734_v43, 4  ;;  %v1741_v48 = vsel %vm1551_vm0, %v1501_v33, -inf }
 0x179   : > { %v1705_v56 = vmax.f32 %v1703_v32, %v1704_v50  ;;  %v1719_v35 = vmax.f32 %v1717_v3, %v1718_v15  ;;  %v1784_v51 = vmax.f32 %v1670_v16, %v1698_v62  ;;  %v1786_v53 = vmax.f32 %v1684_v11, %v1712_v14 }
 0x17a   : > { %v1728_v22 = vrot.slane %v1727_v37, 4  ;;  %v1742_v42 = vrot.slane %v1741_v48, 4  ;;  %v1722_v25 = vmax.f32 %v1720_v34, %v1721_v4  ;;  %v1374_v24 = vmax.f32 %v1366_v18, 0.0 }
 0x17b   : > { %v1785_v46 = vmax.f32 %v1677_v38, %v1705_v56  ;;  %v1787_v49 = vmax.f32 %v1691_v47, %v1719_v35  ;;  %v1736_v17 = vmax.f32 %v1734_v43, %v1735_v29 }
 0x17c   : > { %v1729_v30 = vmax.f32 %v1727_v37, %v1728_v22  ;;  %v1502_v6 = vcombine.high %v1374_v24, %v1374_v24  ;;  %v1509_v1 = vrot.slane %v1374_v24, %v2888_v41  ;;  %v1743_v44 = vmax.f32 %v1741_v48, %v1742_v42 }
 0x17d   : > { %v1817_v12 = vsel %vm1808_vm1, %v1785_v46, %v1784_v51  ;;  %v1723_v28 = vrot.slane %v1722_v25, 2  ;;  %v1737_v9 = vrot.slane %v1736_v17, 2 }
 0x17e   : > { %v1818_v21 = vsel %vm1810_vm2, %v1786_v53, %v1817_v12  ;;  %v1516_v57 = vrot.slane %v1502_v6, %v2888_v41  ;;  %v1517_v8 = vcombine.high %v1509_v1, %v1509_v1  ;;  %v1730_v19 = vrot.slane %v1729_v30, 2 }
 0x17f   : > { %v1819_v40 = vsel %vm1812_vm3, %v1787_v49, %v1818_v21  ;;  %v1748_v58 = vsel %vm1551_vm0, %v1509_v1, -inf  ;;  %v1744_v16 = vrot.slane %v1743_v44, 2  ;;  %v1724_v39 = vmax.f32 %v1722_v25, %v1723_v28 }
 0x180   : > { %1829 = vst [vmem:[%s2946_s13 + $0x8] sm:$0xf] %v1819_v40  ;;  %v1518_v26 = vcombine.high %v1516_v57, %v1516_v57  ;;  %v1749_v54 = vrot.slane %v1748_v58, 4  ;;  %v1755_v55 = vsel %vm1551_vm0, %v1517_v8, -inf  ;;  %v1762_v27 = vsel %vm1551_vm0, %v1516_v57, -inf }
 0x181   : > { %v1756_v20 = vrot.slane %v1755_v55, 4  ;;  %v1731_v60 = vmax.f32 %v1729_v30, %v1730_v19  ;;  %v1763_v0 = vrot.slane %v1762_v27, 4  ;;  %v1738_v11 = vmax.f32 %v1736_v17, %v1737_v9 }
 0x182   : > { %v1750_v59 = vmax.f32 %v1748_v58, %v1749_v54  ;;  %v1769_v23 = vsel %vm1551_vm0, %v1518_v26, -inf  ;;  %v1745_v61 = vmax.f32 %v1743_v44, %v1744_v16  ;;  %v1725_v5 = vrot.slane %v1724_v39, 1 }
 0x183   : > { %v1757_v41 = vmax.f32 %v1755_v55, %v1756_v20  ;;  %v1770_v38 = vrot.slane %v1769_v23, 4  ;;  %v1764_v7 = vmax.f32 %v1762_v27, %v1763_v0  ;;  %v1732_v36 = vrot.slane %v1731_v60, 1 }
 0x184   : > { %v1751_v52 = vrot.slane %v1750_v59, 2  ;;  %v1739_v32 = vrot.slane %v1738_v11, 1  ;;  %v1746_v3 = vrot.slane %v1745_v61, 1  ;;  %v1726_v43 = vmax.f32 %v1724_v39, %v1725_v5 }
 0x185   : > { %v1758_v63 = vrot.slane %v1757_v41, 2  ;;  %v1771_v2 = vmax.f32 %v1769_v23, %v1770_v38  ;;  %v1765_v18 = vrot.slane %v1764_v7, 2  ;;  %v1733_v50 = vmax.f32 %v1731_v60, %v1732_v36 }
 0x186   : > { %v1752_v47 = vmax.f32 %v1750_v59, %v1751_v52  ;;  %v1740_v37 = vmax.f32 %v1738_v11, %v1739_v32  ;;  %v1747_v48 = vmax.f32 %v1745_v61, %v1746_v3 }
 0x187   : > { %v1759_v10 = vmax.f32 %v1757_v41, %v1758_v63  ;;  %v1772_v13 = vrot.slane %v1771_v2, 2  ;;  %v1766_v33 = vmax.f32 %v1764_v7, %v1765_v18 }
 0x188   : > { %v1753_v45 = vrot.slane %v1752_v47, 1 }
 0x189   : > { %v1760_v31 = vrot.slane %v1759_v10, 1  ;;  %v1773_v34 = vmax.f32 %v1771_v2, %v1772_v13  ;;  %v1767_v15 = vrot.slane %v1766_v33, 1 }
 0x18a   : > { %v1754_v62 = vmax.f32 %v1752_v47, %v1753_v45 }
 0x18b   : > { %v1761_v14 = vmax.f32 %v1759_v10, %v1760_v31  ;;  %v1774_v4 = vrot.slane %v1773_v34, 1  ;;  %v1768_v56 = vmax.f32 %v1766_v33, %v1767_v15 }
 0x18c   : > { %v1788_v29 = vmax.f32 %v1726_v43, %v1754_v62 }
 0x18d   : > { %v1775_v35 = vmax.f32 %v1773_v34, %v1774_v4  ;;  %v1789_v51 = vmax.f32 %v1733_v50, %v1761_v14  ;;  %v1790_v53 = vmax.f32 %v1740_v37, %v1768_v56 }
 0x18f   : > { %v1791_v22 = vmax.f32 %v1747_v48, %v1775_v35  ;;  %v1820_v42 = vsel %vm1808_vm1, %v1789_v51, %v1788_v29 }
 0x190   : > { %v1821_v46 = vsel %vm1810_vm2, %v1790_v53, %v1820_v42 }
 0x191   : > { %v1822_v49 = vsel %vm1812_vm3, %v1791_v22, %v1821_v46 }
 0x192   : > { %1830 = vst [vmem:[%s2946_s13 + $0xc] sm:$0xf] %v1822_v49 }
 0x193 PF: > { %s13_s12 = sadd.s32 1, %s2418_s12  }
 0x194   : > { %p10_p4 = scmp.ge.s32.totalorder %s13_s12, 4  }
 0x196   :  { %12 = sbr.rel (!%p10_p4) target bundleno = 1 (0x1), region = 64 }

// kernel: vgg19_forward.8
= control target key start
LH: loop header
LB: loop body
LE: loop exit
PB: predicated region body
PF: predicated region fallthrough
CT: control target
= control target key end

     0   :  { %s2169_s12 = smov 0   ;;  %s2730_s0 = inlined_call_operand.vmem [shape: f32[2,6,6,128], index: 0, kind: input, shape index: {}]   ;;  %s2731_s1 = inlined_call_operand.vmem [shape: bf16[3,384,256], index: 1, kind: input, shape index: {}]   ;;  %s2732_s2 = inlined_call_operand.vmem [shape: f32[1,256], index: 2, kind: input, shape index: {}]   ;;  %s2733_s3 = inlined_call_operand.vmem [shape: f32[2,4,4,256], index: 3, kind: output, shape index: {}]  }
   0x1 LB: > { %s1651_s13 = sadd.s32 4294967295, %s2145_s12   ;;  %p1655_p0 = scmp.ge.s32.totalorder %s2145_s12, 1  ;;  %s2145_s12 = sphi %s2169_s12, %s13_s12  }
   0x2   : > { %p137_p1 = scmp.lt.s32.totalorder %s2145_s12, 3 }
   0x4   : > { %p138_p2 = pnand %p1655_p0, %p137_p1 }
   0x5   : > { %p161_p3 = scmp.lt.s32.totalorder (!%p138_p2), %s1651_s13, 1 }
   0x6   : > { %141 = sbr.rel (%p138_p2) target bundleno = 382 (0x17e), region = 32 }
   0xb   : > { %v1923_v0 = vld [vmem:[%s2731_s1 + $0x1f4] ss:$8 sps:$4 sm:$0xff]   ;;  %v2147_v2 = vmov 0   ;;  %v1927_v3 = vld [vmem:[%s2731_s1 + $0x1f0] ss:$8 sps:$4 sm:$0xff]   ;;  %s2735_s13 = smov (!%p161_p3, %s1651_s13), 1  ;;  %v224_v24 = vlaneseq }
   0xc   : > { %v1925_v1 = vld [vmem:[%s2731_s1 + $0x2f4] ss:$8 sps:$4 sm:$0xff]   ;;  %759 = vmatprep.mubr.bf16.mxu1 %v2147_v2  ;;  %684 = vmatprep.subr.bf16.mxu0 %v1923_v0  ;;  %v1928_v4 = vld [vmem:[%s2731_s1 + $0x2f0] ss:$8 sps:$4 sm:$0xff]   ;;  %v1929_v5 = vld [vmem:[%s2731_s1 + $0x1e4] ss:$8 sps:$4 sm:$0xff]  }
   0xd   : > { %727 = vmatprep.subr.bf16.mxu1 %v1925_v1  ;;  %685 = vmatpush1.bf16.msra.mxu0 %v1927_v3  ;;  %v1931_v6 = vld [vmem:[%s2731_s1 + $0x2e4] ss:$8 sps:$4 sm:$0xff]   ;;  %v1933_v7 = vld [vmem:[%s2731_s1 + $0x1e0] ss:$8 sps:$4 sm:$0xff]   ;;  %v1935_v9 = vld [vmem:[%s2731_s1 + $0x1d4] ss:$8 sps:$4 sm:$0xff]  }
   0xe   : > { %728 = vmatpush1.bf16.msra.mxu1 %v1928_v4  ;;  %686 = vmatprep.subr.bf16.mxu0 %v1929_v5  ;;  %v1934_v8 = vld [vmem:[%s2731_s1 + $0x2e0] ss:$8 sps:$4 sm:$0xff]   ;;  %v1937_v10 = vld [vmem:[%s2731_s1 + $0x2d4] ss:$8 sps:$4 sm:$0xff]   ;;  %v1939_v11 = vld [vmem:[%s2731_s1 + $0x1d0] ss:$8 sps:$4 sm:$0xff]  }
   0xf   : > { %729 = vmatprep.subr.bf16.mxu1 %v1931_v6  ;;  %v1940_v12 = vld [vmem:[%s2731_s1 + $0x2d0] ss:$8 sps:$4 sm:$0xff]   ;;  %v1941_v13 = vld [vmem:[%s2731_s1 + $0x1c4] ss:$8 sps:$4 sm:$0xff]   ;;  %v1945_v15 = vld [vmem:[%s2731_s1 + $0x1c0] ss:$8 sps:$4 sm:$0xff]  }
  0x10   : > { %v1943_v14 = vld [vmem:[%s2731_s1 + $0x2c4] ss:$8 sps:$4 sm:$0xff]   ;;  %v1946_v16 = vld [vmem:[%s2731_s1 + $0x2c0] ss:$8 sps:$4 sm:$0xff]   ;;  %v1947_v17 = vld [vmem:[%s2731_s1 + $0x1b4] ss:$8 sps:$4 sm:$0xff]  }
  0x11   : > { %687 = vmatpush1.bf16.msra.mxu0 %v1933_v7  ;;  %v1949_v18 = vld [vmem:[%s2731_s1 + $0x2b4] ss:$8 sps:$4 sm:$0xff]   ;;  %v1951_v19 = vld [vmem:[%s2731_s1 + $0x1b0] ss:$8 sps:$4 sm:$0xff]   ;;  %v1953_v21 = vld [vmem:[%s2731_s1 + $0x1a4] ss:$8 sps:$4 sm:$0xff]  }
  0x12   : > { %730 = vmatpush1.bf16.msra.mxu1 %v1934_v8  ;;  %688 = vmatprep.subr.bf16.mxu0 %v1935_v9  ;;  %v1952_v20 = vld [vmem:[%s2731_s1 + $0x2b0] ss:$8 sps:$4 sm:$0xff]   ;;  %v2148_v22 = vmov 1983009808   ;;  %v1955_v25 = vld [vmem:[%s2731_s1 + $0x2a4] ss:$8 sps:$4 sm:$0xff]  }
  0x13   : > { %731 = vmatprep.subr.bf16.mxu1 %v1937_v10  ;;  %v222_v23 = vunpack.c.l.s4 %v2148_v22  ;;  %s1912_s6 = smul.u32 48, %s2735_s13  ;;  %v1957_v26 = vld [vmem:[%s2731_s1 + $0x1a0] ss:$8 sps:$4 sm:$0xff]   ;;  %v1959_v28 = vld [vmem:[%s2731_s1 + $0x194] ss:$8 sps:$4 sm:$0xff]   ;;  %v2260_v30 = vshrl.u32 %v224_v24, 7 }
  0x14   : > { %v1958_v27 = vld [vmem:[%s2731_s1 + $0x2a0] ss:$8 sps:$4 sm:$0xff]   ;;  %v1961_v31 = vld [vmem:[%s2731_s1 + $0x294] ss:$8 sps:$4 sm:$0xff]   ;;  %v1963_v32 = vld [vmem:[%s2731_s1 + $0x190] ss:$8 sps:$4 sm:$0xff]  }
  0x15   : > { %689 = vmatpush1.bf16.msra.mxu0 %v1939_v11  ;;  %v223_v29 = vunpack.c.0.s8 %v222_v23  ;;  %s2268_s19 = scalar_lea.vmem %s2730_s0, %s1912_s6  ;;  %v1964_v33 = vld [vmem:[%s2731_s1 + $0x290] ss:$8 sps:$4 sm:$0xff]   ;;  %v1965_v34 = vld [vmem:[%s2731_s1 + $0x184] ss:$8 sps:$4 sm:$0xff]   ;;  %v1969_v45 = vld [vmem:[%s2731_s1 + $0x180] ss:$8 sps:$4 sm:$0xff]  }
  0x16   : > { %732 = vmatpush1.bf16.msra.mxu1 %v1940_v12  ;;  %690 = vmatprep.subr.bf16.mxu0 %v1941_v13  ;;  %v1967_v35 = vld [vmem:[%s2731_s1 + $0x284] ss:$8 sps:$4 sm:$0xff]   ;;  %v174_v37 = vld [vmem:[%s2268_s19 + $0x10] sm:$0x3f]  ;;  %v175_v38 = vld [vmem:[%s2268_s19 + $0x18] sm:$0x3f] }
  0x17   : > { %733 = vmatprep.subr.bf16.mxu1 %v1943_v14  ;;  %v173_v36 = vld [vmem:[%s2268_s19 + $0x8] sm:$0x3f]  ;;  %v2286_v39 = vsub.s32 %v223_v29, %v2260_v30  ;;  %v176_v40 = vld [vmem:[%s2268_s19 + $0x20] sm:$0x3f]  ;;  %v180_v42 = vpack.c.bf16 %v174_v37, %v174_v37  ;;  %v2289_v43 = vpack.c.bf16 %v175_v38, %v175_v38  ;;  %v1971_v50 = vld [vmem:[%s2731_s1 + $0x274] ss:$8 sps:$4 sm:$0xff]  }
  0x18   : > { %v179_v41 = vpack.c.bf16 %v173_v36, %v173_v36  ;;  %v2291_v44 = vpack.c.bf16 %v176_v40, %v176_v40  ;;  %v1970_v49 = vld [vmem:[%s2731_s1 + $0x280] ss:$8 sps:$4 sm:$0xff]   ;;  %v1975_v52 = vld [vmem:[%s2731_s1 + $0x74] ss:$8 sps:$4 sm:$0xff]   ;;  %v1976_v60 = vld [vmem:[%s2731_s1 + $0x270] ss:$8 sps:$4 sm:$0xff]  }
  0x19   : > { %691 = vmatpush1.bf16.msra.mxu0 %v1945_v15  ;;  %v218_v47 = vrot.slane %v180_v42, 1  ;;  %v219_v48 = vrot.slane %v2289_v43, 1  ;;  %v199_v62 = vshrl.u32 %v180_v42, 16  ;;  %v201_v63 = vshll.u32 %v180_v42, 16  ;;  %v1977_v1 = vld [vmem:[%s2731_s1 + $0x264] ss:$8 sps:$4 sm:$0xff]  }
  0x1a   : > { %734 = vmatpush1.bf16.msra.mxu1 %v1946_v16  ;;  %692 = vmatprep.subr.bf16.mxu0 %v1947_v17  ;;  %v217_v46 = vrot.slane %v179_v41, 1  ;;  %v340_v51 = vrot.slane %v2291_v44, 1  ;;  %v192_v58 = vshrl.u32 %v179_v41, 16  ;;  %v194_v59 = vshll.u32 %v179_v41, 16  ;;  %v1973_v8 = vld [vmem:[%s2731_s1 + $0x70] ss:$8 sps:$4 sm:$0xff]  }
  0x1b   : > { %735 = vmatprep.subr.bf16.mxu1 %v1949_v18  ;;  %v2311_v54 = vrot.slane %v218_v47, %v2286_v39  ;;  %v2314_v55 = vrot.slane %v219_v48, %v2286_v39  ;;  %v203_v5 = vrot.slane %v201_v63, 1  ;;  %v206_v6 = vshrl.u32 %v2289_v43, 16  ;;  %v1981_v9 = vld [vmem:[%s2731_s1 + $0x64] ss:$8 sps:$4 sm:$0xff]   ;;  %v1982_v12 = vld [vmem:[%s2731_s1 + $0x260] ss:$8 sps:$4 sm:$0xff]  }
  0x1c   : > { %v2308_v53 = vrot.slane %v217_v46, %v2286_v39  ;;  %v2317_v56 = vrot.slane %v340_v51, %v2286_v39  ;;  %v196_v3 = vrot.slane %v194_v59, 1  ;;  %v208_v7 = vshll.u32 %v2289_v43, 16  ;;  %v1983_v16 = vld [vmem:[%s2731_s1 + $0x254] ss:$8 sps:$4 sm:$0xff]   ;;  %v1994_v36 = vld [vmem:[%s2731_s1 + $0x240] ss:$8 sps:$4 sm:$0xff]  }
  0x1d   : > { %693 = vmatpush1.bf16.msra.mxu0 %v1951_v19  ;;  %v204_v13 = vor.u32 %v203_v5, %v199_v62  ;;  %v335_v15 = vshll.u32 %v2291_v44, 16  ;;  %v333_v18 = vshrl.u32 %v2291_v44, 16  ;;  %v1979_v19 = vld [vmem:[%s2731_s1 + $0x60] ss:$8 sps:$4 sm:$0xff]   ;;  %v1987_v22 = vld [vmem:[%s2731_s1 + $0x54] ss:$8 sps:$4 sm:$0xff]  }
  0x1e   : > { %736 = vmatpush1.bf16.msra.mxu1 %v1952_v20  ;;  %694 = vmatprep.subr.bf16.mxu0 %v1953_v21  ;;  %v1708_v57 = vcombine.low %v2308_v53, %v2311_v54  ;;  %v1710_v61 = vcombine.low %v2314_v55, %v2317_v56  ;;  %v197_v10 = vor.u32 %v196_v3, %v192_v58  ;;  %v210_v14 = vrot.slane %v208_v7, 1  ;;  %v1995_v37 = vld [vmem:[%s2731_s1 + $0x234] ss:$8 sps:$4 sm:$0xff]   ;;  %v1991_v40 = vld [vmem:[%s2731_s1 + $0x40] ss:$8 sps:$4 sm:$0xff]   ;;  %s1911_s11 = sshll.u32 %s2735_s13, 5 }
  0x1f   : > { %737 = vmatprep.subr.bf16.mxu1 %v1955_v25  ;;  %v252_v21 = vcombine.low %v180_v42, %v204_v13  ;;  %v337_v24 = vrot.slane %v335_v15, 1  ;;  %v1988_v25 = vld [vmem:[%s2731_s1 + $0x250] ss:$8 sps:$4 sm:$0xff]   ;;  %v2005_v48 = vld [vmem:[%s2731_s1 + $0x24] ss:$8 sps:$4 sm:$0xff]   ;;  %s170_s16 = scalar_lea.vmem %s2733_s3, %s1911_s11 }
  0x20   : > { %v423_v0 = vrot.slane %v1708_v57, %v2286_v39  ;;  %v437_v4 = vrot.slane %v1710_v61, %v2286_v39  ;;  %v236_v17 = vcombine.low %v179_v41, %v197_v10  ;;  %v211_v20 = vor.u32 %v210_v14, %v206_v6  ;;  %v1999_v41 = vld [vmem:[%s2731_s1 + $0x34] ss:$8 sps:$4 sm:$0xff]   ;;  %v1997_v47 = vld [vmem:[%s2731_s1 + $0x30] ss:$8 sps:$4 sm:$0xff]   ;;  %v2013_v59 = vld [vmem:[%s2731_s1 + $0x204] ss:$8 sps:$4 sm:$0xff]  }
  0x21   : > { %695 = vmatpush1.bf16.msra.mxu0 %v1957_v26  ;;  %v2360_v26 = vrot.slane %v252_v21, %v2286_v39  ;;  %v338_v29 = vor.u32 %v337_v24, %v333_v18  ;;  %v2007_v51 = vld [vmem:[%s2731_s1 + $0x214] ss:$8 sps:$4 sm:$0xff]   ;;  %v2012_v58 = vld [vmem:[%s2731_s1 + $0x210] ss:$8 sps:$4 sm:$0xff]   ;;  %v2017_v61 = vld [vmem:[%s2731_s1 + $0x4] ss:$8 sps:$4 sm:$0xff]  }
  0x22   : > { %738 = vmatpush1.bf16.msra.mxu1 %v1958_v27  ;;  %696 = vmatprep.subr.bf16.mxu0 %v1959_v28  ;;  %v440_v11 = vcombine.low %v423_v0, %v437_v4  ;;  %v2354_v23 = vrot.slane %v236_v17, %v2286_v39  ;;  %v268_v27 = vcombine.low %v2289_v43, %v211_v20  ;;  %v1989_v28 = vld [vmem:[%s2731_s1 + $0x244] ss:$8 sps:$4 sm:$0xff]   ;;  %v2011_v57 = vld [vmem:[%s2731_s1 + $0x14] ss:$8 sps:$4 sm:$0xff]   ;;  %v2018_v62 = vld [vmem:[%s2731_s1 + $0x200] ss:$8 sps:$4 sm:$0xff]  }
  0x23   : > { %739 = vmatprep.subr.bf16.mxu1 %v1961_v31  ;;  %v1985_v31 = vld [vmem:[%s2731_s1 + $0x50] ss:$8 sps:$4 sm:$0xff]   ;;  %v2024_v63 = vld [vmem:[%s2731_s1 + $0x174] ss:$8 sps:$4 sm:$0xff]   ;;  %v2015_v0 = vld [vmem:[%s2731_s1] ss:$8 sps:$4 sm:$0xff]  }
  0x24   : > { %v2021_v3 = vld [vmem:[%s2731_s1 + $0xf4] ss:$8 sps:$4 sm:$0xff]   ;;  %v2022_v4 = vld [vmem:[%s2731_s1 + $0x170] ss:$8 sps:$4 sm:$0xff]   ;;  %v2030_v5 = vld [vmem:[%s2731_s1 + $0x164] ss:$8 sps:$4 sm:$0xff]  }
  0x25   : > { %697 = vmatpush1.bf16.msra.mxu0 %v1963_v32  ;;  %v1993_v32 = vld [vmem:[%s2731_s1 + $0x44] ss:$8 sps:$4 sm:$0xff]   ;;  %v2019_v7 = vld [vmem:[%s2731_s1 + $0xf0] ss:$8 sps:$4 sm:$0xff]   ;;  %v2028_v10 = vld [vmem:[%s2731_s1 + $0x160] ss:$8 sps:$4 sm:$0xff]  }
  0x26   : > { %740 = vmatpush1.bf16.msra.mxu1 %v1964_v33  ;;  %698 = vmatprep.subr.bf16.mxu0 %v1965_v34  ;;  %v2373_v33 = vrot.slane %v268_v27, %v2286_v39  ;;  %v341_v34 = vcombine.low %v2291_v44, %v338_v29  ;;  %v2000_v44 = vld [vmem:[%s2731_s1 + $0x230] ss:$8 sps:$4 sm:$0xff]   ;;  %v172_v6 = vld [vmem:[%s2268_s19] sm:$0x3f]  ;;  %v2036_v13 = vld [vmem:[%s2731_s1 + $0x154] ss:$8 sps:$4 sm:$0xff]  }
  0x27   : > { %741 = vmatprep.subr.bf16.mxu1 %v1967_v35  ;;  %v1707_v35 = vcombine.low %v2354_v23, %v2360_v26  ;;  %v2025_v15 = vld [vmem:[%s2731_s1 + $0xe0] ss:$8 sps:$4 sm:$0xff]   ;;  %v2034_v17 = vld [vmem:[%s2731_s1 + $0x150] ss:$8 sps:$4 sm:$0xff]   ;;  %v2039_v24 = vld [vmem:[%s2731_s1 + $0xc4] ss:$8 sps:$4 sm:$0xff]  }
  0x28   : > { %v2385_v38 = vrot.slane %v341_v34, %v2286_v39  ;;  %v1761_v20 = vcombine.low %v2360_v26, %v2373_v33  ;;  %v2048_v26 = vld [vmem:[%s2731_s1 + $0x134] ss:$8 sps:$4 sm:$0xff]   ;;  %v2046_v34 = vld [vmem:[%s2731_s1 + $0x130] ss:$8 sps:$4 sm:$0xff]  }
  0x29   : > { %699 = vmatpush1.bf16.msra.mxu0 %v1969_v45  ;;  %v416_v43 = vrot.slane %v1707_v35, %v2286_v39  ;;  %v2001_v45 = vld [vmem:[%s2731_s1 + $0x224] ss:$8 sps:$4 sm:$0xff]  }
  0x2a   : > { %742 = vmatpush1.bf16.msra.mxu1 %v1970_v49  ;;  %700 = vmatprep.subr.bf16.mxu0 %v1971_v50  ;;  %v1709_v42 = vcombine.low %v2373_v33, %v2385_v38  ;;  %v2006_v50 = vld [vmem:[%s2731_s1 + $0x220] ss:$8 sps:$4 sm:$0xff]   ;;  %v2045_v33 = vld [vmem:[%s2731_s1 + $0xb4] ss:$8 sps:$4 sm:$0xff]  }
  0x2b   : > { %1048 = vmatprep.subr.bf16.mxu1 %v1975_v52  ;;  %v2003_v52 = vld [vmem:[%s2731_s1 + $0x20] ss:$8 sps:$4 sm:$0xff]  }
  0x2c   : > { %v430_v46 = vrot.slane %v1709_v42, %v2286_v39  ;;  %v2052_v42 = vld [vmem:[%s2731_s1 + $0x120] ss:$8 sps:$4 sm:$0xff]  }
  0x2d   : > { %701 = vmatpush2.bf16.msra.mxu0 %v1976_v60  ;;  %760 = vmatmul.mubr.bf16.vlgmr.msra.gmra.mxu1 %v440_v11  ;;  %v2009_v60 = vld [vmem:[%s2731_s1 + $0x10] ss:$8 sps:$4 sm:$0xff]  }
  0x2e   : > { %702 = vmatprep.subr.bf16.mxu0 %v1977_v1  ;;  %1049 = vmatpush1.bf16.msra.mxu1 %v1973_v8  ;;  %v439_v49 = vcombine.high %v416_v43, %v430_v46  ;;  %v438_v1 = vcombine.low %v416_v43, %v430_v46  ;;  %v178_v8 = vpack.c.bf16 %v172_v6, %v172_v6  ;;  %v2060_v43 = vld [vmem:[%s2731_s1 + $0x114] ss:$8 sps:$4 sm:$0xff]  }
  0x2f   : > { %1050 = vmatprep.subr.bf16.mxu1 %v1981_v9  ;;  %v2027_v9 = vld [vmem:[%s2731_s1 + $0xe4] ss:$8 sps:$4 sm:$0xff]   ;;  %v1762_v46 = vcombine.low %v2311_v54, %v2314_v55 }
  0x30   : > { %716 = vmatprep.mubr.bf16.mxu0 %v439_v49  ;;  %v185_v11 = vshrl.u32 %v178_v8, 16  ;;  %v2066_v49 = vld [vmem:[%s2731_s1 + $0x104] ss:$8 sps:$4 sm:$0xff]  }
  0x31   : > { %703 = vmatpush2.bf16.msra.mxu0 %v1982_v12  ;;  %v187_v12 = vshll.u32 %v178_v8, 16  ;;  %v2543_v55 = vrot.slane %v1762_v46, %v2286_v39  ;;  %v2097_v46 = vld [vmem:[%s2731_s1 + $0x3f0] ss:$8 sps:$4 sm:$0xff]  }
  0x32   : > { %704 = vmatprep.subr.bf16.mxu0 %v1983_v16  ;;  %1051 = vmatpush1.bf16.msra.mxu1 %v1979_v19  ;;  %v2033_v16 = vld [vmem:[%s2731_s1 + $0xd4] ss:$8 sps:$4 sm:$0xff]   ;;  %v2042_v19 = vld [vmem:[%s2731_s1 + $0x144] ss:$8 sps:$4 sm:$0xff]  }
  0x33   : > { %1052 = vmatprep.subr.bf16.mxu1 %v1987_v22  ;;  %v189_v14 = vrot.slane %v187_v12, 1  ;;  %v2031_v22 = vld [vmem:[%s2731_s1 + $0xd0] ss:$8 sps:$4 sm:$0xff]  }
  0x35   : > { %705 = vmatpush2.bf16.msra.mxu0 %v1988_v25  ;;  %v190_v18 = vor.u32 %v189_v14, %v185_v11  ;;  %v2040_v25 = vld [vmem:[%s2731_s1 + $0x140] ss:$8 sps:$4 sm:$0xff]   ;;  %v2102_v11 = vld [vmem:[%s2731_s1 + $0x454] ss:$8 sps:$4 sm:$0xff]  }
  0x36   : > { %706 = vmatprep.subr.bf16.mxu0 %v1989_v28  ;;  %1053 = vmatpush1.bf16.msra.mxu1 %v1985_v31  ;;  %v2493_v28 = vrot.slane %v1761_v20, %v2286_v39  ;;  %v2037_v31 = vld [vmem:[%s2731_s1 + $0xc0] ss:$8 sps:$4 sm:$0xff]  }
  0x37   : > { %1054 = vmatprep.subr.bf16.mxu1 %v1993_v32  ;;  %v220_v21 = vcombine.low %v178_v8, %v190_v18  ;;  %v216_v32 = vrot.slane %v178_v8, 1  ;;  %v2081_v18 = vld [vmem:[%s2731_s1 + $0x334] ss:$8 sps:$4 sm:$0xff]   ;;  %v2106_v20 = vld [vmem:[%s2731_s1 + $0x440] ss:$8 sps:$4 sm:$0xff]  }
  0x39   : > { %707 = vmatpush2.bf16.msra.mxu0 %v1994_v36  ;;  %v227_v27 = vrot.slane %v220_v21, %v2286_v39  ;;  %v2079_v21 = vld [vmem:[%s2731_s1 + $0x330] ss:$8 sps:$4 sm:$0xff]  }
  0x3a   : > { %708 = vmatprep.subr.bf16.mxu0 %v1995_v37  ;;  %1055 = vmatpush1.bf16.msra.mxu1 %v1991_v40  ;;  %v2043_v37 = vld [vmem:[%s2731_s1 + $0xb0] ss:$8 sps:$4 sm:$0xff]   ;;  %v234_v40 = vrot.slane %v216_v32, %v2286_v39  ;;  %v2120_v32 = vld [vmem:[%s2731_s1 + $0x424] ss:$8 sps:$4 sm:$0xff]  }
  0x3b   : > { %1056 = vmatprep.subr.bf16.mxu1 %v1999_v41  ;;  %v1759_v29 = vcombine.low %v227_v27, %v2354_v23  ;;  %v2054_v23 = vld [vmem:[%s2731_s1 + $0x124] ss:$8 sps:$4 sm:$0xff]  }
  0x3c   : > { %v2051_v41 = vld [vmem:[%s2731_s1 + $0xa4] ss:$8 sps:$4 sm:$0xff]  }
  0x3d   : > { %709 = vmatpush2.bf16.msra.mxu0 %v2000_v44  ;;  %v780_v35 = vrot.slane %v1759_v29, %v2286_v39  ;;  %v2049_v44 = vld [vmem:[%s2731_s1 + $0xa0] ss:$8 sps:$4 sm:$0xff]   ;;  %v2112_v29 = vld [vmem:[%s2731_s1 + $0x430] ss:$8 sps:$4 sm:$0xff]  }
  0x3e   : > { %710 = vmatprep.subr.bf16.mxu0 %v2001_v45  ;;  %1057 = vmatpush1.bf16.msra.mxu1 %v1997_v47  ;;  %v1760_v45 = vcombine.low %v234_v40, %v2308_v53  ;;  %v2057_v47 = vld [vmem:[%s2731_s1 + $0x94] ss:$8 sps:$4 sm:$0xff]   ;;  %v2055_v53 = vld [vmem:[%s2731_s1 + $0x90] ss:$8 sps:$4 sm:$0xff]  }
  0x3f   : > { %1058 = vmatprep.subr.bf16.mxu1 %v2005_v48  ;;  %v803_v36 = vcombine.high %v780_v35, %v2493_v28  ;;  %v2058_v48 = vld [vmem:[%s2731_s1 + $0x110] ss:$8 sps:$4 sm:$0xff]  }
  0x40   : > { %v787_v54 = vrot.slane %v1760_v45, %v2286_v39  ;;  %v2130_v45 = vld [vmem:[%s2731_s1 + $0x400] ss:$8 sps:$4 sm:$0xff]  }
  0x41   : > { %711 = vmatpush2.bf16.msra.mxu0 %v2006_v50  ;;  %1080 = vmatprep.mubr.bf16.mxu1 %v803_v36  ;;  %v2063_v50 = vld [vmem:[%s2731_s1 + $0x84] ss:$8 sps:$4 sm:$0xff]   ;;  %v2126_v36 = vld [vmem:[%s2731_s1 + $0x414] ss:$8 sps:$4 sm:$0xff]  }
  0x42   : > { %712 = vmatprep.subr.bf16.mxu0 %v2007_v51  ;;  %1059 = vmatpush1.bf16.msra.mxu1 %v2003_v52  ;;  %v2064_v51 = vld [vmem:[%s2731_s1 + $0x100] ss:$8 sps:$4 sm:$0xff]   ;;  %v2069_v52 = vld [vmem:[%s2731_s1 + $0x374] ss:$8 sps:$4 sm:$0xff]  }
  0x43   : > { %1060 = vmatprep.subr.bf16.mxu1 %v2011_v57  ;;  %v2061_v57 = vld [vmem:[%s2731_s1 + $0x80] ss:$8 sps:$4 sm:$0xff]  }
  0x45   : > { %713 = vmatpush2.bf16.msra.mxu0 %v2012_v58  ;;  %v804_v58 = vcombine.low %v787_v54, %v2543_v55  ;;  %v2117_v54 = vld [vmem:[%s2731_s1 + $0x3c4] ss:$8 sps:$4 sm:$0xff]  }
  0x46   : > { %714 = vmatprep.subr.bf16.mxu0 %v2013_v59  ;;  %1061 = vmatpush1.bf16.msra.mxu1 %v2009_v60  ;;  %v2067_v59 = vld [vmem:[%s2731_s1 + $0x370] ss:$8 sps:$4 sm:$0xff]   ;;  %v2072_v60 = vld [vmem:[%s2731_s1 + $0x364] ss:$8 sps:$4 sm:$0xff]  }
  0x47   : > { %1062 = vmatprep.subr.bf16.mxu1 %v2017_v61  ;;  %v2090_v61 = vld [vmem:[%s2731_s1 + $0x474] ss:$8 sps:$4 sm:$0xff]  }
  0x49   : > { %715 = vmatpush2.bf16.msra.mxu0 %v2018_v62  ;;  %v177_v62 = vld [vmem:[%s2268_s19 + $0x28] sm:$0x3f] }
  0x4a   : > { %1091 = vmatprep.subr.bf16.mxu0 %v2024_v63  ;;  %1063 = vmatpush1.bf16.msra.mxu1 %v2015_v0  ;;  %v802_v63 = vcombine.low %v780_v35, %v2493_v28  ;;  %v183_v0 = vpack.c.bf16 %v177_v62, %v177_v62  ;;  %v2118_v35 = vld [vmem:[%s2731_s1 + $0x420] ss:$8 sps:$4 sm:$0xff]  }
  0x4b   : > { %1064 = vmatprep.subr.bf16.mxu1 %v2021_v3  ;;  %v2070_v3 = vld [vmem:[%s2731_s1 + $0x360] ss:$8 sps:$4 sm:$0xff]  }
  0x4c   : > { %717 = vmatmul.mubr.bf16.vlgmr.msra.gmra.mxu0 %v438_v1  ;;  %v2088_v1 = vld [vmem:[%s2731_s1 + $0x470] ss:$8 sps:$4 sm:$0xff]   ;;  %v1137_v6 = vshll.u32 %v183_v0, 16 }
  0x4d   : > { %1092 = vmatpush1.bf16.msra.mxu0 %v2022_v4  ;;  %1123 = vmatprep.mubr.bf16.mxu0 %v2147_v2  ;;  %v2096_v4 = vld [vmem:[%s2731_s1 + $0x464] ss:$8 sps:$4 sm:$0xff]  }
  0x4e   : > { %1093 = vmatprep.subr.bf16.mxu0 %v2030_v5  ;;  %1065 = vmatpush2.bf16.msra.mxu1 %v2019_v7  ;;  %v1135_v5 = vshrl.u32 %v183_v0, 16  ;;  %v2075_v7 = vld [vmem:[%s2731_s1 + $0x354] ss:$8 sps:$4 sm:$0xff]   ;;  %v1139_v8 = vrot.slane %v1137_v6, 1 }
  0x4f   : > { %1066 = vmatprep.subr.bf16.mxu1 %v2027_v9  ;;  %v2094_v9 = vld [vmem:[%s2731_s1 + $0x460] ss:$8 sps:$4 sm:$0xff]  }
  0x50   : > { %v1140_v12 = vor.u32 %v1139_v8, %v1135_v5 }
  0x51   : > { %1094 = vmatpush1.bf16.msra.mxu0 %v2028_v10  ;;  %v2073_v10 = vld [vmem:[%s2731_s1 + $0x350] ss:$8 sps:$4 sm:$0xff]  }
  0x52   : > { %1095 = vmatprep.subr.bf16.mxu0 %v2036_v13  ;;  %1067 = vmatpush2.bf16.msra.mxu1 %v2025_v15  ;;  %v2078_v13 = vld [vmem:[%s2731_s1 + $0x344] ss:$8 sps:$4 sm:$0xff]   ;;  %v1143_v14 = vcombine.low %v183_v0, %v1140_v12  ;;  %v2076_v15 = vld [vmem:[%s2731_s1 + $0x340] ss:$8 sps:$4 sm:$0xff]  }
  0x53   : > { %1068 = vmatprep.subr.bf16.mxu1 %v2033_v16  ;;  %v2108_v16 = vld [vmem:[%s2731_s1 + $0x444] ss:$8 sps:$4 sm:$0xff]  }
  0x55   : > { %1096 = vmatpush1.bf16.msra.mxu0 %v2034_v17  ;;  %v1150_v17 = vrot.slane %v1143_v14, %v2286_v39 }
  0x56   : > { %1097 = vmatprep.subr.bf16.mxu0 %v2042_v19  ;;  %1069 = vmatpush2.bf16.msra.mxu1 %v2031_v22  ;;  %v2114_v22 = vld [vmem:[%s2731_s1 + $0x434] ss:$8 sps:$4 sm:$0xff]  }
  0x57   : > { %1070 = vmatprep.subr.bf16.mxu1 %v2039_v24  ;;  %v1859_v19 = vcombine.low %v2385_v38, %v1150_v17  ;;  %v2084_v38 = vld [vmem:[%s2731_s1 + $0x324] ss:$8 sps:$4 sm:$0xff]   ;;  %v1560_v17 = vld [vmem:[%s2732_s2] sm:$0x3] }
  0x59   : > { %1098 = vmatpush1.bf16.msra.mxu0 %v2040_v25  ;;  %v2618_v24 = vrot.slane %v1859_v19, %v2286_v39  ;;  %v1142_v25 = vrot.slane %v183_v0, 1 }
  0x5a   : > { %1099 = vmatprep.subr.bf16.mxu0 %v2048_v26  ;;  %1071 = vmatpush2.bf16.msra.mxu1 %v2037_v31  ;;  %v2082_v31 = vld [vmem:[%s2731_s1 + $0x320] ss:$8 sps:$4 sm:$0xff]  }
  0x5b   : > { %1072 = vmatprep.subr.bf16.mxu1 %v2045_v33  ;;  %v1225_v27 = vcombine.high %v2493_v28, %v2618_v24  ;;  %v1224_v26 = vcombine.low %v2493_v28, %v2618_v24  ;;  %v2087_v33 = vld [vmem:[%s2731_s1 + $0x314] ss:$8 sps:$4 sm:$0xff]   ;;  %v1564_v28 = vsub.s32 0, %v2260_v30 }
  0x5d   : > { %1100 = vmatpush1.bf16.msra.mxu0 %v2046_v34  ;;  %v1157_v34 = vrot.slane %v1142_v25, %v2286_v39 }
  0x5e   : > { %1101 = vmatprep.subr.bf16.mxu0 %v2054_v23  ;;  %1073 = vmatpush2.bf16.msra.mxu1 %v2043_v37  ;;  %v2085_v23 = vld [vmem:[%s2731_s1 + $0x310] ss:$8 sps:$4 sm:$0xff]   ;;  %v2093_v37 = vld [vmem:[%s2731_s1 + $0x304] ss:$8 sps:$4 sm:$0xff]  }
  0x5f   : > { %1074 = vmatprep.subr.bf16.mxu1 %v2051_v41  ;;  %v1860_v40 = vcombine.low %v2317_v56, %v1157_v34  ;;  %v2124_v41 = vld [vmem:[%s2731_s1 + $0x410] ss:$8 sps:$4 sm:$0xff]   ;;  %v2099_v56 = vld [vmem:[%s2731_s1 + $0x3f4] ss:$8 sps:$4 sm:$0xff]  }
  0x61   : > { %1102 = vmatpush1.bf16.msra.mxu0 %v2052_v42  ;;  %v2091_v42 = vld [vmem:[%s2731_s1 + $0x300] ss:$8 sps:$4 sm:$0xff]  }
  0x62   : > { %1103 = vmatprep.subr.bf16.mxu0 %v2060_v43  ;;  %1075 = vmatpush2.bf16.msra.mxu1 %v2049_v44  ;;  %v2132_v43 = vld [vmem:[%s2731_s1 + $0x404] ss:$8 sps:$4 sm:$0xff]   ;;  %v1223_v44 = vrot.slane %v1860_v40, %v2286_v39  ;;  %v2103_v39 = vld [vmem:[%s2731_s1 + $0x3e0] ss:$8 sps:$4 sm:$0xff]  }
  0x63   : > { %1076 = vmatprep.subr.bf16.mxu1 %v2057_v47  ;;  %v2105_v47 = vld [vmem:[%s2731_s1 + $0x3e4] ss:$8 sps:$4 sm:$0xff]  }
  0x65   : > { %1104 = vmatpush1.bf16.msra.mxu0 %v2058_v48  ;;  %v1226_v48 = vcombine.low %v2543_v55, %v1223_v44  ;;  %v2115_v55 = vld [vmem:[%s2731_s1 + $0x3c0] ss:$8 sps:$4 sm:$0xff]  }
  0x66   : > { %1105 = vmatprep.subr.bf16.mxu0 %v2066_v49  ;;  %1077 = vmatpush2.bf16.msra.mxu1 %v2055_v53  ;;  %v2111_v49 = vld [vmem:[%s2731_s1 + $0x3d4] ss:$8 sps:$4 sm:$0xff]   ;;  %v2109_v53 = vld [vmem:[%s2731_s1 + $0x3d0] ss:$8 sps:$4 sm:$0xff]  }
  0x67   : > { %1078 = vmatprep.subr.bf16.mxu1 %v2063_v50  ;;  %v2123_v50 = vld [vmem:[%s2731_s1 + $0x3b4] ss:$8 sps:$4 sm:$0xff]  }
  0x69   : > { %1106 = vmatpush1.bf16.msra.mxu0 %v2064_v51  ;;  %v2121_v51 = vld [vmem:[%s2731_s1 + $0x3b0] ss:$8 sps:$4 sm:$0xff]  }
  0x6a   : > { %1470 = vmatprep.subr.bf16.mxu0 %v2069_v52  ;;  %1079 = vmatpush2.bf16.msra.mxu1 %v2061_v57  ;;  %v2129_v52 = vld [vmem:[%s2731_s1 + $0x3a4] ss:$8 sps:$4 sm:$0xff]   ;;  %v2127_v57 = vld [vmem:[%s2731_s1 + $0x3a0] ss:$8 sps:$4 sm:$0xff]  }
  0x6b   : > { %1513 = vmatprep.subr.bf16.mxu1 %v2090_v61  ;;  %v2136_v61 = vld [vmem:[%s2731_s1 + $0x380] ss:$8 sps:$4 sm:$0xff]  }
  0x6c   : > { %1124 = vmatmul.mubr.bf16.vlgmr.msra.gmra.mxu0 %v804_v58  ;;  %v2135_v58 = vld [vmem:[%s2731_s1 + $0x394] ss:$8 sps:$4 sm:$0xff]  }
  0x6d   : > { %1471 = vmatpush1.bf16.msra.mxu0 %v2067_v59  ;;  %1081 = vmatmul.mubr.bf16.vlgmr.msra.gmra.mxu1 %v802_v63  ;;  %v2133_v59 = vld [vmem:[%s2731_s1 + $0x390] ss:$8 sps:$4 sm:$0xff]  }
  0x6e   : > { %1472 = vmatprep.subr.bf16.mxu0 %v2072_v60  ;;  %1514 = vmatpush1.bf16.msra.mxu1 %v2088_v1  ;;  %v2138_v60 = vld [vmem:[%s2731_s1 + $0x384] ss:$8 sps:$4 sm:$0xff]  }
  0x6f   : > { %1545 = vmatprep.mubr.bf16.mxu1 %v2147_v2  ;;  %1515 = vmatprep.subr.bf16.mxu1 %v2096_v4  ;;  %v2100_v2 = vld [vmem:[%s2731_s1 + $0x450] ss:$8 sps:$4 sm:$0xff]  }
  0x70   : > { %1502 = vmatprep.mubr.bf16.mxu0 %v1225_v27 }
  0x71   : > { %1473 = vmatpush1.bf16.msra.mxu0 %v2070_v3 }
  0x72   : > { %1474 = vmatprep.subr.bf16.mxu0 %v2075_v7  ;;  %1516 = vmatpush1.bf16.msra.mxu1 %v2094_v9 }
  0x73   : > { %1517 = vmatprep.subr.bf16.mxu1 %v2102_v11 }
  0x75   : > { %1475 = vmatpush1.bf16.msra.mxu0 %v2073_v10 }
  0x76   : > { %1476 = vmatprep.subr.bf16.mxu0 %v2078_v13  ;;  %1518 = vmatpush1.bf16.msra.mxu1 %v2100_v2 }
  0x77   : > { %1519 = vmatprep.subr.bf16.mxu1 %v2108_v16 }
  0x79   : > { %1477 = vmatpush1.bf16.msra.mxu0 %v2076_v15 }
  0x7a   : > { %1478 = vmatprep.subr.bf16.mxu0 %v2081_v18  ;;  %1520 = vmatpush1.bf16.msra.mxu1 %v2106_v20  ;;  %v1568_v20 = vsub.s32 1, %v2260_v30 }
  0x7b   : > { %1521 = vmatprep.subr.bf16.mxu1 %v2114_v22 }
  0x7d   : > { %1479 = vmatpush1.bf16.msra.mxu0 %v2079_v21 }
  0x7e   : > { %1480 = vmatprep.subr.bf16.mxu0 %v2084_v38  ;;  %1522 = vmatpush1.bf16.msra.mxu1 %v2112_v29  ;;  %v1565_v38 = vrot.slane %v1560_v17, %v1564_v28 }
  0x7f   : > { %1523 = vmatprep.subr.bf16.mxu1 %v2120_v32 }
  0x81   : > { %1481 = vmatpush1.bf16.msra.mxu0 %v2082_v31 }
  0x82   : > { %1482 = vmatprep.subr.bf16.mxu0 %v2087_v33  ;;  %1524 = vmatpush1.bf16.msra.mxu1 %v2118_v35  ;;  %v1569_v33 = vrot.slane %v1560_v17, %v1568_v20 }
  0x83   : > { %1525 = vmatprep.subr.bf16.mxu1 %v2126_v36 }
  0x85   : > { %1483 = vmatpush1.bf16.msra.mxu0 %v2085_v23 }
  0x86   : > { %1484 = vmatprep.subr.bf16.mxu0 %v2093_v37  ;;  %1526 = vmatpush1.bf16.msra.mxu1 %v2124_v41 }
  0x87   : > { %1527 = vmatprep.subr.bf16.mxu1 %v2132_v43 }
  0x89   : > { %1485 = vmatpush1.bf16.msra.mxu0 %v2091_v42 }
  0x8a   : > { %1486 = vmatprep.subr.bf16.mxu0 %v2099_v56  ;;  %1528 = vmatpush1.bf16.msra.mxu1 %v2130_v45 }
  0x8d   : > { %1487 = vmatpush2.bf16.msra.mxu0 %v2097_v46  ;;  %1546 = vmatmul.mubr.bf16.vlgmr.msra.gmra.mxu1 %v1226_v48 }
  0x8e   : > { %1488 = vmatprep.subr.bf16.mxu0 %v2105_v47 }
  0x91   : > { %1489 = vmatpush2.bf16.msra.mxu0 %v2103_v39 }
  0x92   : > { %1490 = vmatprep.subr.bf16.mxu0 %v2111_v49 }
  0x95   : > { %1491 = vmatpush2.bf16.msra.mxu0 %v2109_v53 }
  0x96   : > { %1492 = vmatprep.subr.bf16.mxu0 %v2117_v54 }
  0x99   : > { %1493 = vmatpush2.bf16.msra.mxu0 %v2115_v55 }
  0x9a   : > { %1494 = vmatprep.subr.bf16.mxu0 %v2123_v50 }
  0x9d   : > { %1495 = vmatpush2.bf16.msra.mxu0 %v2121_v51 }
  0x9e   : > { %1496 = vmatprep.subr.bf16.mxu0 %v2129_v52 }
  0xa1   : > { %1497 = vmatpush2.bf16.msra.mxu0 %v2127_v57 }
  0xa2   : > { %1498 = vmatprep.subr.bf16.mxu0 %v2135_v58 }
  0xa5   : > { %1499 = vmatpush2.bf16.msra.mxu0 %v2133_v59 }
  0xa6   : > { %1500 = vmatprep.subr.bf16.mxu0 %v2138_v60 }
  0xa9   : > { %1501 = vmatpush2.bf16.msra.mxu0 %v2136_v61 }
  0xac   : > { %1503 = vmatmul.mubr.bf16.vlgmr.msra.gmra.mxu0 %v1224_v26 }
  0xed   : > { %v761_v62 = vpop.f32.mrf.mxu1 }
  0xef   : > { %v763_v63 = vpop.f32.mrf.mxu1 }
  0xf1   : > { %v765_v1 = vpop.f32.mrf.mxu1 }
  0xf3   : > { %v767_v4 = vpop.f32.mrf.mxu1 }
 0x10c   : > { %v718_v0 = vpop.f32.mrf.mxu0 }
 0x10d   : > { %v762_v2 = vadd.f32 %v761_v62, %v718_v0 }
 0x10e   : > { %v720_v3 = vpop.f32.mrf.mxu0 }
 0x10f   : > { %v764_v15 = vadd.f32 %v763_v63, %v720_v3 }
 0x110   : > { %v722_v5 = vpop.f32.mrf.mxu0 }
 0x111   : > { %v766_v21 = vadd.f32 %v765_v1, %v722_v5 }
 0x112   : > { %v724_v7 = vpop.f32.mrf.mxu0 }
 0x113   : > { %v768_v25 = vadd.f32 %v767_v4, %v724_v7 }
 0x12c   : > { %v1125_v9 = vpop.f32.mrf.mxu0 }
 0x12d   : > { %v1082_v6 = vpop.f32.mrf.mxu1 }
 0x12e   : > { %v1127_v11 = vpop.f32.mrf.mxu0  ;;  %v1083_v16 = vadd.f32 %v1082_v6, %v762_v2 }
 0x12f   : > { %v1084_v8 = vpop.f32.mrf.mxu1 }
 0x130   : > { %v1129_v13 = vpop.f32.mrf.mxu0  ;;  %v1085_v22 = vadd.f32 %v1084_v8, %v764_v15  ;;  %v1126_v27 = vadd.f32 %v1125_v9, %v1083_v16 }
 0x131   : > { %v1086_v10 = vpop.f32.mrf.mxu1 }
 0x132   : > { %v1131_v18 = vpop.f32.mrf.mxu0  ;;  %v1087_v26 = vadd.f32 %v1086_v10, %v766_v21  ;;  %v1128_v34 = vadd.f32 %v1127_v11, %v1085_v22 }
 0x133   : > { %v1088_v12 = vpop.f32.mrf.mxu1 }
 0x134   : > { %v1089_v35 = vadd.f32 %v1088_v12, %v768_v25  ;;  %v1130_v40 = vadd.f32 %v1129_v13, %v1087_v26 }
 0x136   : > { %v1132_v44 = vadd.f32 %v1131_v18, %v1089_v35 }
 0x14d   : > { %v1547_v14 = vpop.f32.mrf.mxu1 }
 0x14f   : > { %v1549_v19 = vpop.f32.mrf.mxu1 }
 0x151   : > { %v1551_v31 = vpop.f32.mrf.mxu1 }
 0x153   : > { %v1553_v43 = vpop.f32.mrf.mxu1 }
 0x16c   : > { %v1504_v24 = vpop.f32.mrf.mxu0 }
 0x16d   : > { %v1548_v29 = vadd.f32 %v1547_v14, %v1504_v24 }
 0x16e   : > { %v1506_v32 = vpop.f32.mrf.mxu0 }
 0x16f   : > { %v1556_v23 = vadd.f32 %v1548_v29, %v1126_v27  ;;  %v1550_v36 = vadd.f32 %v1549_v19, %v1506_v32 }
 0x170   : > { %v1508_v37 = vpop.f32.mrf.mxu0 }
 0x171   : > { %v1572_v41 = vadd.f32 %v1565_v38, %v1556_v23  ;;  %v1557_v30 = vadd.f32 %v1550_v36, %v1128_v34  ;;  %v1552_v42 = vadd.f32 %v1551_v31, %v1508_v37 }
 0x172   : > { %v1510_v56 = vpop.f32.mrf.mxu0 }
 0x173   : > { %v1573_v45 = vadd.f32 %v1569_v33, %v1557_v30  ;;  %v1558_v46 = vadd.f32 %v1552_v42, %v1130_v40  ;;  %v1554_v47 = vadd.f32 %v1553_v43, %v1510_v56  ;;  %v1576_v48 = vmax.f32 %v1572_v41, 0.0 }
 0x175   : > { %v1577_v39 = vmax.f32 %v1573_v45, 0.0  ;;  %v1574_v49 = vadd.f32 %v1565_v38, %v1558_v46  ;;  %v1559_v53 = vadd.f32 %v1554_v47, %v1132_v44 }
 0x177   : > { %v1584_v54 = vcombine.low %v1576_v48, %v1577_v39  ;;  %v1585_v55 = vcombine.high %v1576_v48, %v1577_v39  ;;  %v1575_v50 = vadd.f32 %v1569_v33, %v1559_v53  ;;  %v1578_v51 = vmax.f32 %v1574_v49, 0.0 }
 0x179   : > { %1592 = vst [vmem:[%s170_s16] sm:$0xff] %v1584_v54  ;;  %1593 = vst [vmem:[%s170_s16 + $0x8] sm:$0xff] %v1585_v55  ;;  %v1579_v52 = vmax.f32 %v1575_v50, 0.0 }
 0x17b   : > { %v1586_v57 = vcombine.low %v1578_v51, %v1579_v52  ;;  %v1587_v58 = vcombine.high %v1578_v51, %v1579_v52 }
 0x17d   : > { %1594 = vst [vmem:[%s170_s16 + $0x10] sm:$0xff] %v1586_v57  ;;  %1595 = vst [vmem:[%s170_s16 + $0x18] sm:$0xff] %v1587_v58 }
 0x17e PF: > { %s13_s12 = sadd.s32 1, %s2145_s12  }
 0x17f   : > { %p10_p4 = scmp.ge.s32.totalorder %s13_s12, 4  }
 0x181   :  { %12 = sbr.rel (!%p10_p4) target bundleno = 1 (0x1), region = 64 }

// kernel: vgg19_forward.5
= control target key start
LH: loop header
LB: loop body
LE: loop exit
PB: predicated region body
PF: predicated region fallthrough
CT: control target
= control target key end

     0   :  { %12 = vsyncpa [#allocation4], 0  ;;  %s8405_s0 = inlined_call_operand.vmem [shape: f32[2,18,18,8], index: 0, kind: input, shape index: {}]   ;;  %s8406_s1 = inlined_call_operand.vmem [shape: bf16[72,64], index: 1, kind: input, shape index: {}]   ;;  %s8407_s2 = inlined_call_operand.vmem [shape: f32[1,64], index: 2, kind: input, shape index: {}]   ;;  %s8408_s3 = inlined_call_operand.vmem [shape: bf16[3,192,64], index: 3, kind: input, shape index: {}]   ;;  %s8409_s4 = inlined_call_operand.vmem [shape: f32[1,64], index: 4, kind: input, shape index: {}]   ;;  %s8410_s5 = inlined_call_operand.hbm [shape: f32[2,16,16,64], index: 5, kind: output, shape index: {0}]   ;;  %s8411_s6 = inlined_call_operand.vmem [shape: f32[2,8,8,64], index: 6, kind: output, shape index: {1}]  }
   0x1   :  { %14 = vsyncpa [#allocation4 + $0x1], 0  ;;  %s5979_s21 = smov 0   ;;  %s5981_s22 = smov 0  }
   0x2   :  { %s5983_s23 = smov 0   ;;  %s5985_s24 = smov 0  }
   0x3 LB: > { %s6000_s25 = sadd.s32 4294967295, %s5933_s24   ;;  %s5387_s26 = sadd.s32 4294967294, %s5933_s24   ;;  %s5933_s24 = sphi %s5985_s24, %s8471_s24   ;;  %s5929_s23 = sphi %s5983_s23, %s8470_s23   ;;  %s5925_s22 = sphi %s5981_s22, %s8469_s22   ;;  %s5921_s21 = sphi %s5979_s21, %s8468_s21  }
   0x4   : > { %s6004_s27 = sadd.s32 1, %s5933_s24   ;;  %s137_s28 = sadd.s32 1, %s5929_s23 }
   0x5   : > { %s134_s29 = ssub.s32 %s5933_s24, %s6004_s27  ;;  %p147_p0 = scmp.ne.s32.totalorder %s5929_s23, %s5925_s22 }
   0x6   : > { %p135_p1 = scmp.eq.s32.totalorder %s134_s29, 0  ;;  %p148_p2 = scmp.eq.s32.totalorder %s6000_s25, 1 }
   0x7   : > { %p153_p3 = scmp.ne.s32.totalorder %s5925_s22, %s5921_s21  ;;  %p154_p4 = scmp.eq.s32.totalorder %s5387_s26, 1 }
   0x8   : > { %s6015_s30 = scalar_select %p135_p1, %s5929_s23, %s137_s28  }
   0x9   : > { %p6017_p5 = por %p148_p2, %p147_p0  ;;  %p6021_p6 = por %p154_p4, %p153_p3 }
   0xa   : > { %p5390_p7 = scmp.ge.s32.totalorder %s5933_s24, 1  ;;  %p218_p8 = scmp.lt.s32.totalorder %s5933_s24, 3 }
   0xc   : > { %p219_p9 = pnand %p5390_p7, %p218_p8 }
   0xe   : > { %222 = sbr.rel (%p219_p9) target bundleno = 1375 (0x55f), region = 40 }
  0x13   : > { %p253_p10 = scmp.lt.s32.totalorder %s6000_s25, 1  ;;  %vm611_vm0 = vcmask 1046528   ;;  %vm354_vm1 = vsmask.f32 7424  ;;  %s5935_s14 = smov 16   ;;  %vm1031_vm2 = vcmask 1043456  }
  0x14   : > { %s5936_s15 = smov 8   ;;  %vm692_vm3 = vcmask 64512   ;;  %vm725_vm4 = vcmask 130048   ;;  %s5937_s12 = smov 24   ;;  %vm889_vm5 = vcmask 195584   ;;  %vm922_vm6 = vcmask 392192  }
  0x15   : > { %s6029_s9 = scalar_select %p253_p10, %s6000_s25, 1  ;;  %vm998_vm7 = vcmask 588800   ;;  %vm1228_vm8 = vcmask 519168   ;;  %vm1231_vm9 = vcmask 516096   ;;  %vm1705_vm10 = vsmask.f32 7938 }
  0x16   : > { %s5938_s16 = smov 48   ;;  %vm6624_vm11 = vmand %vm1228_vm8, %vm1705_vm10  ;;  %vm1380_vm12 = vsmask.f32 256  ;;  %vm1381_vm13 = vsmask.f32 4368  ;;  %s5940_s11 = smov 64  }
  0x17   : > { %s5745_s10 = smul.u32 432, %s6029_s9  ;;  %vm6634_vm14 = vmor %vm1380_vm12, %vm1381_vm13  ;;  %s5623_s26 = sshll.u32 %s6029_s9, 6 }
  0x18   : > { %vm6641_vm15 = vmand %vm1231_vm9, %vm1380_vm12  ;;  %s7666_s29 = scalar_lea.vmem %s8411_s6, %s5623_s26  ;;  %s5942_s28 = smov [#allocation3]  }
  0x19   : > { %s6035_s13 = scalar_lea.vmem %s8405_s0, %s5745_s10  ;;  %s5877_s10 = sshll.u32 %s5942_s28, 4  ;;  %s5878_s10 = int_to_ptr.vmem [resolvable:$false] %s5877_s10 }
  0x1a   : > { %v267_v0 = vld [vmem:[%s6035_s13 + $0x18] sm:$0xff]  ;;  %v268_v1 = vld [vmem:[%s6035_s13 + $0x20] sm:$0xff]  ;;  %v269_v2 = vld [vmem:[%s6035_s13 + $0x28] sm:$0x3] }
  0x1b   : > { %v6040_v3 = vpack.c.bf16 %v268_v1, %v267_v0  ;;  %v321_v4 = vpack.c.bf16 %v269_v2, %v269_v2  ;;  %v270_v5 = vld [vmem:[%s6035_s13 + $0x30] sm:$0xff]  ;;  %v271_v6 = vld [vmem:[%s6035_s13 + $0x38] sm:$0xff]  ;;  %v272_v7 = vld [vmem:[%s6035_s13 + $0x40] sm:$0x3] }
  0x1c   : > { %v6045_v8 = vpack.c.bf16 %v271_v6, %v270_v5  ;;  %v323_v9 = vpack.c.bf16 %v272_v7, %v272_v7  ;;  %v273_v10 = vld [vmem:[%s6035_s13 + $0x48] sm:$0xff]  ;;  %v274_v11 = vld [vmem:[%s6035_s13 + $0x50] sm:$0xff]  ;;  %v275_v12 = vld [vmem:[%s6035_s13 + $0x58] sm:$0x3] }
  0x1d   : > { %v368_v13 = vshrl.u32 %v6040_v3, 16  ;;  %v370_v14 = vshll.u32 %v6040_v3, 16  ;;  %v375_v15 = vshll.u32 %v321_v4, 16  ;;  %v615_v16 = vrot.slane %v6040_v3, 1  ;;  %v276_v28 = vld [vmem:[%s6035_s13 + $0x60] sm:$0xff]  ;;  %v277_v29 = vld [vmem:[%s6035_s13 + $0x68] sm:$0xff] }
  0x1e   : > { %v616_v17 = vrot.slane %v321_v4, 1  ;;  %v380_v18 = vshrl.u32 %v6045_v8, 16  ;;  %v382_v19 = vshll.u32 %v6045_v8, 16  ;;  %v387_v20 = vshll.u32 %v323_v9, 16  ;;  %v278_v34 = vld [vmem:[%s6035_s13 + $0x70] sm:$0x3] }
  0x1f   : > { %v372_v21 = vrot.slane %v370_v14, 1  ;;  %v377_v22 = vrot.slane %v375_v15, 1  ;;  %v6055_v23 = vpack.c.bf16 %v274_v11, %v273_v10  ;;  %v325_v24 = vpack.c.bf16 %v275_v12, %v275_v12  ;;  %v279_v38 = vld [vmem:[%s6035_s13 + $0x78] sm:$0xff]  ;;  %v280_v39 = vld [vmem:[%s6035_s13 + $0x80] sm:$0xff]  ;;  %v281_v44 = vld [vmem:[%s6035_s13 + $0x88] sm:$0x3] }
  0x20   : > { %v617_v25 = vsel %vm611_vm0, %v615_v16, %v616_v17  ;;  %v384_v26 = vrot.slane %v382_v19, 1  ;;  %v389_v27 = vrot.slane %v387_v20, 1  ;;  %v618_v36 = vrot.slane %v6045_v8, 1  ;;  %v282_v53 = vld [vmem:[%s6035_s13 + $0x90] sm:$0xff]  ;;  %v283_v57 = vld [vmem:[%s6035_s13 + $0x98] sm:$0xff]  ;;  %v285_v59 = vld [vmem:[%s6035_s13 + $0xa8] sm:$0xff] }
  0x21   : > { %v373_v30 = vor.u32 %v372_v21, %v368_v13  ;;  %662 = vrot.lane.b32.xlu1 %v617_v25, %s5935_s14  ;;  %v392_v31 = vshrl.u32 %v6055_v23, 16  ;;  %v394_v32 = vshll.u32 %v6055_v23, 16  ;;  %v399_v33 = vshll.u32 %v325_v24, 16  ;;  %v284_v58 = vld [vmem:[%s6035_s13 + $0xa0] sm:$0x3]  ;;  %v286_v0 = vld [vmem:[%s6035_s13 + $0xb0] sm:$0xff] }
  0x22   : > { %v385_v35 = vor.u32 %v384_v26, %v380_v18  ;;  %v619_v37 = vrot.slane %v323_v9, 1  ;;  %v6068_v43 = vpack.c.bf16 %v277_v29, %v276_v28  ;;  %v621_v46 = vrot.slane %v6055_v23, 1  ;;  %v287_v1 = vld [vmem:[%s6035_s13 + $0xb8] sm:$0x3]  ;;  %v289_v25 = vld [vmem:[%s6035_s13 + $0xc8] sm:$0xff] }
  0x23   : > { %v378_v40 = vsel %vm354_vm1, %v373_v30, %v377_v22  ;;  %v396_v41 = vrot.slane %v394_v32, 1  ;;  %v401_v42 = vrot.slane %v399_v33, 1  ;;  %v622_v47 = vrot.slane %v325_v24, 1  ;;  %v288_v24 = vld [vmem:[%s6035_s13 + $0xc0] sm:$0xff]  ;;  %v290_v30 = vld [vmem:[%s6035_s13 + $0xd0] sm:$0x3] }
  0x24   : > { %549 = vrot.lane.b32.xlu0 %v378_v40, %s5936_s15  ;;  %v390_v45 = vsel %vm354_vm1, %v385_v35, %v389_v27  ;;  %v327_v48 = vpack.c.bf16 %v278_v34, %v278_v34  ;;  %v404_v50 = vshrl.u32 %v6068_v43, 16  ;;  %v406_v51 = vshll.u32 %v6068_v43, 16  ;;  %v291_v33 = vld [vmem:[%s6035_s13 + $0xd8] sm:$0xff]  ;;  %v292_v34 = vld [vmem:[%s6035_s13 + $0xe0] sm:$0xff] }
  0x25   : > { %v397_v49 = vor.u32 %v396_v41, %v392_v31  ;;  %v6076_v52 = vpack.c.bf16 %v280_v39, %v279_v38  ;;  %v620_v54 = vsel %vm611_vm0, %v618_v36, %v619_v37  ;;  %v329_v56 = vpack.c.bf16 %v281_v44, %v281_v44  ;;  %v293_v37 = vld [vmem:[%s6035_s13 + $0xe8] sm:$0x3] }
  0x26   : > { %v411_v55 = vshll.u32 %v327_v48, 16  ;;  %v408_v61 = vrot.slane %v406_v51, 1  ;;  %v623_v2 = vsel %vm611_vm0, %v621_v46, %v622_v47  ;;  %v624_v5 = vrot.slane %v6068_v43, 1  ;;  %v265_v44 = vld [vmem:[%s6035_s13 + $0x8] sm:$0xff] }
  0x27   : > { %v402_v60 = vsel %vm354_vm1, %v397_v49, %v401_v42  ;;  %v416_v62 = vshrl.u32 %v6076_v52, 16  ;;  %v418_v63 = vshll.u32 %v6076_v52, 16  ;;  %v423_v4 = vshll.u32 %v329_v56, 16  ;;  %v264_v42 = vld [vmem:[%s6035_s13] sm:$0xff] }
  0x28   : > { %551 = vrot.lane.b32.xlu0 %v390_v45, %s5936_s15  ;;  %553 = vrot.lane.b32.xlu1 %v402_v60, %s5936_s15  ;;  %v625_v6 = vrot.slane %v327_v48, 1  ;;  %v409_v7 = vor.u32 %v408_v61, %v404_v50  ;;  %v413_v9 = vrot.slane %v411_v55, 1  ;;  %v6092_v11 = vpack.c.bf16 %v283_v57, %v282_v53 }
  0x29   : > { %v420_v10 = vrot.slane %v418_v63, 1  ;;  %v425_v12 = vrot.slane %v423_v4, 1  ;;  %v331_v13 = vpack.c.bf16 %v284_v58, %v284_v58  ;;  %v6094_v14 = vpack.c.bf16 %v286_v0, %v285_v59 }
  0x2a   : > { %v333_v15 = vpack.c.bf16 %v287_v1, %v287_v1  ;;  %v627_v17 = vrot.slane %v6076_v52, 1  ;;  %v628_v18 = vrot.slane %v329_v56, 1  ;;  %v428_v19 = vshrl.u32 %v6092_v11, 16  ;;  %v266_v1 = vld [vmem:[%s6035_s13 + $0x10] sm:$0x3] }
  0x2b   : > { %v421_v16 = vor.u32 %v420_v10, %v416_v62  ;;  %v430_v20 = vshll.u32 %v6092_v11, 16  ;;  %v435_v21 = vshll.u32 %v331_v13, 16  ;;  %v442_v22 = vshll.u32 %v6094_v14, 16 }
  0x2c   : > { %664 = vrot.lane.b32.xlu0 %v620_v54, %s5935_s14  ;;  %666 = vrot.lane.b32.xlu1 %v623_v2, %s5935_s14  ;;  %v414_v26 = vsel %vm354_vm1, %v409_v7, %v413_v9  ;;  %v440_v28 = vshrl.u32 %v6094_v14, 16  ;;  %v447_v29 = vshll.u32 %v333_v15, 16  ;;  %v626_v35 = vsel %vm611_vm0, %v624_v5, %v625_v6 }
  0x2d   : > { %v426_v27 = vsel %vm354_vm1, %v421_v16, %v425_v12  ;;  %v432_v31 = vrot.slane %v430_v20, 1  ;;  %v444_v32 = vrot.slane %v442_v22, 1  ;;  %v6111_v36 = vpack.c.bf16 %v289_v25, %v288_v24 }
  0x2e   : > { %v629_v38 = vsel %vm611_vm0, %v627_v17, %v628_v18  ;;  %v437_v40 = vrot.slane %v435_v21, 1  ;;  %v335_v41 = vpack.c.bf16 %v290_v30, %v290_v30  ;;  %v449_v46 = vrot.slane %v447_v29, 1 }
  0x2f   : > { %v433_v39 = vor.u32 %v432_v31, %v428_v19  ;;  %v445_v45 = vor.u32 %v444_v32, %v440_v28  ;;  %v454_v47 = vshll.u32 %v6111_v36, 16  ;;  %v6120_v48 = vpack.c.bf16 %v292_v34, %v291_v33  ;;  %v5793_v32 = vld [vmem:[%s8406_s1 + $0x20] ss:$0 sps:$4 sm:$0xff]   ;;  %v5794_v33 = vld [vmem:[%s8406_s1 + $0x18] sm:$0xff]  }
  0x30   : > { %555 = vrot.lane.b32.xlu0 %v414_v26, %s5936_s15  ;;  %557 = vrot.lane.b32.xlu1 %v426_v27, %s5936_s15  ;;  %v630_v49 = vrot.slane %v6092_v11, 1  ;;  %v631_v50 = vrot.slane %v331_v13, 1  ;;  %v337_v51 = vpack.c.bf16 %v293_v37, %v293_v37  ;;  %v633_v53 = vrot.slane %v6094_v14, 1  ;;  %v5796_v37 = vld [vmem:[%s8406_s1 + $0x8] sm:$0xff]  }
  0x31   : > { %v634_v54 = vrot.slane %v333_v15, 1  ;;  %v452_v55 = vshrl.u32 %v6111_v36, 16  ;;  %v466_v56 = vshll.u32 %v6120_v48, 16  ;;  %v438_v57 = vsel %vm354_vm1, %v433_v39, %v437_v40  ;;  %5744 = vmatprep.subr.msk.bf16.mxu0 %vm1031_vm2, %v5793_v32  ;;  %v295_v39 = vld [vmem:[%s6035_s13 + $0xf8] sm:$0xff]  ;;  %v296_v40 = vld [vmem:[%s6035_s13 + $0x100] sm:$0x3] }
  0x32   : > { %v456_v58 = vrot.slane %v454_v47, 1  ;;  %v459_v59 = vshll.u32 %v335_v41, 16  ;;  %v464_v60 = vshrl.u32 %v6120_v48, 16  ;;  %v450_v61 = vsel %vm354_vm1, %v445_v45, %v449_v46  ;;  %v5797_v45 = vld [vmem:[%s8406_s1] sm:$0xff]  }
  0x33   : > { %v468_v62 = vrot.slane %v466_v56, 1  ;;  %v471_v63 = vshll.u32 %v337_v51, 16  ;;  %v6131_v0 = vpack.c.bf16 %v265_v44, %v264_v42  ;;  %v632_v2 = vsel %vm611_vm0, %v630_v49, %v631_v50  ;;  %v297_v42 = vld [vmem:[%s6035_s13 + $0x108] sm:$0xff]  ;;  %v298_v44 = vld [vmem:[%s6035_s13 + $0x110] sm:$0xff] }
  0x34   : > { %668 = vrot.lane.b32.xlu0 %v626_v35, %s5935_s14  ;;  %670 = vrot.lane.b32.xlu1 %v629_v38, %s5935_s14  ;;  %v635_v4 = vsel %vm611_vm0, %v633_v53, %v634_v54  ;;  %v457_v5 = vor.u32 %v456_v58, %v452_v55  ;;  %v461_v6 = vrot.slane %v459_v59, 1  ;;  %v319_v10 = vpack.c.bf16 %v266_v1, %v266_v1  ;;  %v5795_v35 = vld [vmem:[%s8406_s1 + $0x10] sm:$0xff]   ;;  %v299_v53 = vld [vmem:[%s6035_s13 + $0x118] sm:$0x3] }
  0x35   : > { %v469_v7 = vor.u32 %v468_v62, %v464_v60  ;;  %v473_v9 = vrot.slane %v471_v63, 1  ;;  %v358_v12 = vshll.u32 %v6131_v0, 16  ;;  %v636_v13 = vrot.slane %v6111_v36, 1  ;;  %v294_v38 = vld [vmem:[%s6035_s13 + $0xf0] sm:$0xff] }
  0x36   : > { %v462_v15 = vsel %vm354_vm1, %v457_v5, %v461_v6  ;;  %v637_v16 = vrot.slane %v335_v41, 1  ;;  %v639_v17 = vrot.slane %v6120_v48, 1  ;;  %v640_v18 = vrot.slane %v337_v51, 1 }
  0x37   : > { %v474_v19 = vsel %vm354_vm1, %v469_v7, %v473_v9  ;;  %v356_v20 = vshrl.u32 %v6131_v0, 16  ;;  %v360_v21 = vrot.slane %v358_v12, 1  ;;  %v363_v22 = vshll.u32 %v319_v10, 16  ;;  %v300_v7 = vld [vmem:[%s6035_s13 + $0x120] sm:$0xff]  ;;  %v301_v9 = vld [vmem:[%s6035_s13 + $0x128] sm:$0xff] }
  0x38   : > { %559 = vrot.lane.b32.xlu0 %v438_v57, %s5936_s15  ;;  %561 = vrot.lane.b32.xlu1 %v450_v61, %s5936_s15  ;;  %v638_v24 = vsel %vm611_vm0, %v636_v13, %v637_v16  ;;  %v641_v25 = vsel %vm611_vm0, %v639_v17, %v640_v18  ;;  %v612_v28 = vrot.slane %v6131_v0, 1  ;;  %v613_v29 = vrot.slane %v319_v10, 1 }
  0x39   : > { %v361_v26 = vor.u32 %v360_v21, %v356_v20  ;;  %v365_v27 = vrot.slane %v363_v22, 1  ;;  %v1033_v34 = vsel %vm1031_vm2, %v5793_v32, 0  ;;  %v6172_v41 = vpack.c.bf16 %v295_v39, %v294_v38  ;;  %v302_v20 = vld [vmem:[%s6035_s13 + $0x130] sm:$0x3]  ;;  %v304_v21 = vld [vmem:[%s6035_s13 + $0x140] sm:$0xff] }
  0x3a   : > { %v614_v31 = vsel %vm611_vm0, %v612_v28, %v613_v29  ;;  %5679 = vmatpush3.bf16.msra.mxu0 %v1033_v34  ;;  %v339_v47 = vpack.c.bf16 %v296_v40, %v296_v40  ;;  %v6180_v50 = vpack.c.bf16 %v298_v44, %v297_v42  ;;  %v341_v59 = vpack.c.bf16 %v299_v53, %v299_v53  ;;  %v305_v32 = vld [vmem:[%s6035_s13 + $0x148] sm:$0x3]  ;;  %v306_v53 = vld [vmem:[%s6035_s13 + $0x150] sm:$0xff] }
  0x3b   : > { %v366_v30 = vsel %vm354_vm1, %v361_v26, %v365_v27  ;;  %5680 = vmatprep.subr.bf16.mxu0 %v5794_v33  ;;  %v478_v49 = vshll.u32 %v6172_v41, 16  ;;  %v476_v56 = vshrl.u32 %v6172_v41, 16  ;;  %v343_v28 = vpack.c.bf16 %v302_v20, %v302_v20 }
  0x3c   : > { %672 = vrot.lane.b32.xlu0 %v632_v2, %s5935_s14  ;;  %674 = vrot.lane.b32.xlu1 %v635_v4, %s5935_s14  ;;  %v483_v58 = vshll.u32 %v339_v47, 16  ;;  %v490_v60 = vshll.u32 %v6180_v50, 16  ;;  %v495_v4 = vshll.u32 %v341_v59, 16  ;;  %v646_v26 = vrot.slane %v341_v59, 1 }
  0x3d   : > { %v480_v57 = vrot.slane %v478_v49, 1  ;;  %v345_v38 = vpack.c.bf16 %v305_v32, %v305_v32  ;;  %v649_v59 = vrot.slane %v343_v28, 1  ;;  %vm2275_vm2 = vcmask 523264  }
  0x3e   : > { %5681 = vmatpush3.bf16.msra.mxu0 %v5794_v33  ;;  %v485_v1 = vrot.slane %v483_v58, 1  ;;  %v492_v2 = vrot.slane %v490_v60, 1  ;;  %v497_v18 = vrot.slane %v495_v4, 1 }
  0x3f   : > { %5682 = vmatprep.subr.bf16.mxu0 %v5795_v35  ;;  %v481_v63 = vor.u32 %v480_v57, %v476_v56 }
  0x40   : > { %563 = vrot.lane.b32.xlu0 %v462_v15, %s5936_s15  ;;  %565 = vrot.lane.b32.xlu1 %v474_v19, %s5936_s15  ;;  %v643_v15 = vrot.slane %v339_v47, 1  ;;  %v6208_v19 = vpack.c.bf16 %v301_v9, %v300_v7 }
  0x41   : > { %v486_v16 = vsel %vm354_vm1, %v481_v63, %v485_v1  ;;  %v309_v1 = vld [vmem:[%s6035_s13 + $0x168] sm:$0xff] }
  0x42   : > { %5683 = vmatpush3.bf16.msra.mxu0 %v5795_v35  ;;  %v502_v29 = vshll.u32 %v6208_v19, 16  ;;  %v500_v34 = vshrl.u32 %v6208_v19, 16  ;;  %v648_v58 = vrot.slane %v6208_v19, 1 }
  0x43   : > { %5684 = vmatprep.subr.bf16.mxu0 %v5796_v37 }
  0x44   : > { %676 = vrot.lane.b32.xlu0 %v638_v24, %s5935_s14  ;;  %678 = vrot.lane.b32.xlu1 %v641_v25, %s5935_s14  ;;  %v645_v25 = vrot.slane %v6180_v50, 1  ;;  %v504_v35 = vrot.slane %v502_v29, 1  ;;  %v650_v9 = vsel %vm611_vm0, %v648_v58, %v649_v59 }
  0x46   : > { %5685 = vmatpush3.bf16.msra.mxu0 %v5796_v37  ;;  %v647_v33 = vsel %vm611_vm0, %v645_v25, %v646_v26  ;;  %v507_v37 = vshll.u32 %v343_v28, 16 }
  0x47   : > { %5686 = vmatprep.subr.bf16.mxu0 %v5797_v45 }
  0x48   : > { %547 = vrot.lane.b32.xlu0 %v366_v30, %s5936_s15  ;;  %660 = vrot.lane.b32.xlu1 %v614_v31, %s5935_s14  ;;  %v509_v47 = vrot.slane %v507_v37, 1 }
  0x4a   : > { %5687 = vmatpush3.bf16.msra.mxu0 %v5797_v45 }
  0x93   : > { %v663_v46 = vpop.permute.xlu1 %662 }
  0x96   : > { %v550_v51 = vpop.permute.xlu0 %549 }
  0x97   : > { %v696_v54 = vsel %vm692_vm3, %v6040_v3, %v550_v51  ;;  %v488_v3 = vshrl.u32 %v6180_v50, 16  ;;  %v519_v51 = vshll.u32 %v345_v38, 16 }
  0x98   : > { %v6186_v55 = vsel %vm725_vm4, %v696_v54, %v663_v46  ;;  %v505_v46 = vor.u32 %v504_v35, %v500_v34  ;;  %v307_v54 = vld [vmem:[%s6035_s13 + $0x158] sm:$0xff]  ;;  %v313_v34 = vld [vmem:[%s6035_s13 + $0x188] sm:$0xff] }
  0x99   : > { %824 = vrot.lane.b32.xlu0 %v6186_v55, %s5937_s12  ;;  %v493_v17 = vor.u32 %v492_v2, %v488_v3  ;;  %v308_v3 = vld [vmem:[%s6035_s13 + $0x160] sm:$0x3]  ;;  %v6251_v63 = vpack.c.bf16 %v307_v54, %v306_v53 }
  0x9a   : > { %v552_v61 = vpop.permute.xlu0 %551  ;;  %v554_v62 = vpop.permute.xlu1 %553  ;;  %v510_v60 = vsel %vm354_vm1, %v505_v46, %v509_v47  ;;  %v314_v46 = vld [vmem:[%s6035_s13 + $0x190] sm:$0x3]  ;;  %v315_v47 = vld [vmem:[%s6035_s13 + $0x198] sm:$0xff] }
  0x9b   : > { %v698_v5 = vsel %vm692_vm3, %v6045_v8, %v552_v61  ;;  %v700_v12 = vsel %vm692_vm3, %v6055_v23, %v554_v62  ;;  %v642_v8 = vrot.slane %v6172_v41, 1  ;;  %v303_v23 = vld [vmem:[%s6035_s13 + $0x138] sm:$0xff]  ;;  %v498_v27 = vsel %vm354_vm1, %v493_v17, %v497_v18 }
  0x9c   : > { %v6223_v30 = vpack.c.bf16 %v304_v21, %v303_v23  ;;  %v521_v62 = vrot.slane %v519_v51, 1  ;;  %v524_v18 = vshrl.u32 %v6251_v63, 16  ;;  %v351_v53 = vpack.c.bf16 %v314_v46, %v314_v46 }
  0x9d   : > { %v644_v24 = vsel %vm611_vm0, %v642_v8, %v643_v15  ;;  %v311_v15 = vld [vmem:[%s6035_s13 + $0x178] sm:$0x3] }
  0x9e   : > { %v665_v6 = vpop.permute.xlu0 %664  ;;  %v667_v13 = vpop.permute.xlu1 %666  ;;  %v514_v39 = vshll.u32 %v6223_v30, 16  ;;  %v512_v45 = vshrl.u32 %v6223_v30, 16  ;;  %v651_v4 = vrot.slane %v6223_v30, 1  ;;  %v349_v23 = vpack.c.bf16 %v311_v15, %v311_v15 }
  0x9f   : > { %v6198_v10 = vsel %vm725_vm4, %v698_v5, %v665_v6  ;;  %v6214_v22 = vsel %vm725_vm4, %v700_v12, %v667_v13  ;;  %v652_v5 = vrot.slane %v345_v38, 1  ;;  %v347_v6 = vpack.c.bf16 %v308_v3, %v308_v3 }
  0xa0   : > { %826 = vrot.lane.b32.xlu1 %v6198_v10, %s5937_s12  ;;  %857 = vrot.lane.b32.xlu0 %v6198_v10, %s5938_s16  ;;  %v516_v49 = vrot.slane %v514_v39, 1  ;;  %v526_v12 = vshll.u32 %v6251_v63, 16  ;;  %v543_v32 = vshll.u32 %v349_v23, 16  ;;  %v654_v38 = vrot.slane %v6251_v63, 1 }
  0xa1   : > { %v531_v17 = vshll.u32 %v347_v6, 16  ;;  %v655_v39 = vrot.slane %v347_v6, 1  ;;  %v658_v58 = vrot.slane %v349_v23, 1 }
  0xa2   : > { %v556_v31 = vpop.permute.xlu0 %555  ;;  %v558_v40 = vpop.permute.xlu1 %557  ;;  %v517_v61 = vor.u32 %v516_v49, %v512_v45  ;;  %v528_v20 = vrot.slane %v526_v12, 1  ;;  %v545_v45 = vrot.slane %v543_v32, 1 }
  0xa3   : > { %v702_v42 = vsel %vm692_vm3, %v6068_v43, %v556_v31  ;;  %v704_v43 = vsel %vm692_vm3, %v6076_v52, %v558_v40  ;;  %v310_v52 = vld [vmem:[%s6035_s13 + $0x170] sm:$0xff]  ;;  %v656_v51 = vsel %vm611_vm0, %v654_v38, %v655_v39 }
  0xa4   : > { %859 = vrot.lane.b32.xlu1 %v6214_v22, %s5938_s16  ;;  %567 = vrot.lane.b32.xlu0 %v486_v16, %s5936_s15  ;;  %v522_v7 = vsel %vm354_vm1, %v517_v61, %v521_v62  ;;  %v6265_v13 = vpack.c.bf16 %v310_v52, %v309_v1  ;;  %v653_v16 = vsel %vm611_vm0, %v651_v4, %v652_v5  ;;  %v317_v61 = vld [vmem:[%s6035_s13 + $0x1a8] sm:$0x3]  ;;  %v766_v1 = vshll.u32 %v351_v53, 16 }
  0xa5   : > { %v529_v28 = vor.u32 %v528_v20, %v524_v18  ;;  %v353_v4 = vpack.c.bf16 %v317_v61, %v317_v61 }
  0xa6   : > { %v669_v44 = vpop.permute.xlu0 %668  ;;  %v671_v57 = vpop.permute.xlu1 %670  ;;  %v538_v21 = vshll.u32 %v6265_v13, 16  ;;  %v536_v29 = vshrl.u32 %v6265_v13, 16 }
  0xa7   : > { %v6240_v56 = vsel %vm725_vm4, %v702_v42, %v669_v44  ;;  %v6256_v2 = vsel %vm725_vm4, %v704_v43, %v671_v57  ;;  %v657_v57 = vrot.slane %v6265_v13, 1 }
  0xa8   : > { %569 = vrot.lane.b32.xlu1 %v498_v27, %s5936_s15  ;;  %680 = vrot.lane.b32.xlu0 %v644_v24, %s5935_s14  ;;  %v533_v27 = vrot.slane %v531_v17, 1  ;;  %v540_v31 = vrot.slane %v538_v21, 1  ;;  %v791_v17 = vshll.u32 %v353_v4, 16 }
  0xa9   : > { %v659_v52 = vsel %vm611_vm0, %v657_v57, %v658_v58 }
  0xaa   : > { %v560_v8 = vpop.permute.xlu0 %559  ;;  %v562_v24 = vpop.permute.xlu1 %561  ;;  %v534_v42 = vsel %vm354_vm1, %v529_v28, %v533_v27  ;;  %v541_v44 = vor.u32 %v540_v31, %v536_v29  ;;  %v800_v31 = vrot.slane %v353_v4, 1 }
  0xab   : > { %v706_v25 = vsel %vm692_vm3, %v6092_v11, %v560_v8  ;;  %v708_v11 = vsel %vm692_vm3, %v6094_v14, %v562_v24  ;;  %v316_v14 = vld [vmem:[%s6035_s13 + $0x1a0] sm:$0xff]  ;;  %v768_v8 = vrot.slane %v766_v1, 1  ;;  %v775_v24 = vrot.slane %v351_v53, 1 }
  0xac   : > { %682 = vrot.lane.b32.xlu1 %v647_v33, %s5935_s14  ;;  %828 = vrot.lane.b32.xlu0 %v6214_v22, %s5937_s12  ;;  %v312_v33 = vld [vmem:[%s6035_s13 + $0x180] sm:$0xff]  ;;  %v546_v43 = vsel %vm354_vm1, %v541_v44, %v545_v45  ;;  %v6307_v59 = vpack.c.bf16 %v316_v14, %v315_v47 }
  0xad   : > { %v6291_v40 = vpack.c.bf16 %v313_v34, %v312_v33 }
  0xae   : > { %v673_v26 = vpop.permute.xlu0 %672  ;;  %v675_v37 = vpop.permute.xlu1 %674  ;;  %v786_v5 = vshll.u32 %v6307_v59, 16  ;;  %v784_v15 = vshrl.u32 %v6307_v59, 16  ;;  %v799_v29 = vrot.slane %v6307_v59, 1 }
  0xaf   : > { %v6282_v35 = vsel %vm725_vm4, %v706_v25, %v673_v26  ;;  %v6298_v49 = vsel %vm725_vm4, %v708_v11, %v675_v37  ;;  %v761_v54 = vshll.u32 %v6291_v40, 16  ;;  %v759_v62 = vshrl.u32 %v6291_v40, 16 }
  0xb0   : > { %830 = vrot.lane.b32.xlu1 %v6240_v56, %s5937_s12  ;;  %861 = vrot.lane.b32.xlu0 %v6240_v56, %s5938_s16  ;;  %v774_v21 = vrot.slane %v6291_v40, 1  ;;  %v793_v26 = vrot.slane %v791_v17, 1  ;;  %v801_v32 = vsel %vm611_vm0, %v799_v29, %v800_v31 }
  0xb1   : > { %v763_v3 = vrot.slane %v761_v54, 1 }
  0xb2   : > { %v566_v6 = vpop.permute.xlu1 %565 }
  0xb3   : > { %v764_v12 = vor.u32 %v763_v3, %v759_v62  ;;  %v712_v20 = vsel %vm692_vm3, %v6120_v48, %v566_v6  ;;  %v776_v48 = vsel %vm611_vm0, %v774_v21, %v775_v24 }
  0xb4   : > { %863 = vrot.lane.b32.xlu1 %v6256_v2, %s5938_s16  ;;  %571 = vrot.lane.b32.xlu0 %v510_v60, %s5936_s15  ;;  %v564_v60 = vpop.permute.xlu0 %563 }
  0xb6   : > { %v679_v23 = vpop.permute.xlu1 %678 }
  0xb7   : > { %v6333_v27 = vsel %vm725_vm4, %v712_v20, %v679_v23 }
  0xb8   : > { %573 = vrot.lane.b32.xlu1 %v522_v7, %s5936_s15  ;;  %684 = vrot.lane.b32.xlu0 %v650_v9, %s5935_s14  ;;  %v710_v7 = vsel %vm692_vm3, %v6111_v36, %v564_v60  ;;  %v677_v9 = vpop.permute.xlu0 %676  ;;  %v769_v36 = vsel %vm354_vm1, %v764_v12, %v768_v8 }
  0xb9   : > { %v6322_v18 = vsel %vm725_vm4, %v710_v7, %v677_v9 }
  0xba   : > { %v661_v11 = vpop.permute.xlu1 %660 }
  0xbc   : > { %686 = vrot.lane.b32.xlu1 %v653_v16, %s5935_s14  ;;  %832 = vrot.lane.b32.xlu0 %v6256_v2, %s5937_s12  ;;  %v788_v16 = vrot.slane %v786_v5, 1  ;;  %v548_v33 = vpop.permute.xlu0 %547 }
  0xbd   : > { %v694_v34 = vsel %vm692_vm3, %v6131_v0, %v548_v33 }
  0xbe   : > { %v789_v25 = vor.u32 %v788_v16, %v784_v15  ;;  %v727_v38 = vsel %vm725_vm4, %v694_v34, %v661_v11 }
  0xc0   : > { %834 = vrot.lane.b32.xlu1 %v6282_v35, %s5937_s12  ;;  %865 = vrot.lane.b32.xlu0 %v6282_v35, %s5938_s16  ;;  %v794_v28 = vsel %vm354_vm1, %v789_v25, %v793_v26 }
  0xc4   : > { %867 = vrot.lane.b32.xlu1 %v6298_v49, %s5938_s16  ;;  %575 = vrot.lane.b32.xlu0 %v534_v42, %s5936_s15 }
  0xc8   : > { %577 = vrot.lane.b32.xlu1 %v546_v43, %s5936_s15  ;;  %688 = vrot.lane.b32.xlu0 %v656_v51, %s5935_s14 }
  0xcc   : > { %690 = vrot.lane.b32.xlu1 %v659_v52, %s5935_s14  ;;  %836 = vrot.lane.b32.xlu0 %v6298_v49, %s5937_s12 }
  0xd0   : > { %838 = vrot.lane.b32.xlu1 %v6322_v18, %s5937_s12  ;;  %869 = vrot.lane.b32.xlu0 %v6322_v18, %s5938_s16 }
  0xd4   : > { %871 = vrot.lane.b32.xlu1 %v6333_v27, %s5938_s16  ;;  %770 = vrot.lane.b32.xlu0 %v769_v36, %s5936_s15 }
  0xd8   : > { %777 = vrot.lane.b32.xlu1 %v776_v48, %s5935_s14  ;;  %795 = vrot.lane.b32.xlu0 %v794_v28, %s5936_s15 }
  0xdc   : > { %802 = vrot.lane.b32.xlu1 %v801_v32, %s5935_s14  ;;  %840 = vrot.lane.b32.xlu0 %v6333_v27, %s5937_s12  ;;  %s5656_s14 = sshll.u32 %s6000_s25, 12 }
  0xdd   : > { %s8304_s19 = scalar_lea.hbm %s8410_s5, %s5656_s14 }
 0x10b   : > { %v825_v37 = vpop.permute.xlu0 %824 }
 0x10c   : > { %v891_v39 = vsel %vm889_vm5, %v727_v38, %v825_v37 }
 0x112   : > { %v827_v42 = vpop.permute.xlu1 %826  ;;  %v858_v44 = vpop.permute.xlu0 %857 }
 0x113   : > { %v924_v45 = vsel %vm922_vm6, %v891_v39, %v858_v44  ;;  %v893_v46 = vsel %vm889_vm5, %v6186_v55, %v827_v42 }
 0x114   : > { %5688 = vmatprep.mubr.msk.bf16.mxu0 %vm998_vm7, %v924_v45 }
 0x116   : > { %v860_v47 = vpop.permute.xlu1 %859  ;;  %v568_v0 = vpop.permute.xlu0 %567 }
 0x117   : > { %v926_v14 = vsel %vm922_vm6, %v893_v46, %v860_v47  ;;  %v714_v51 = vsel %vm692_vm3, %v6172_v41, %v568_v0 }
 0x118   : > { %5689 = vmatmul.mubr.msk.bf16.vlgmr.msra.gmra.mxu0 %vm998_vm7, %v926_v14 }
 0x11a   : > { %v570_v53 = vpop.permute.xlu1 %569  ;;  %v681_v54 = vpop.permute.xlu0 %680 }
 0x11b   : > { %v6360_v43 = vsel %vm725_vm4, %v714_v51, %v681_v54  ;;  %v716_v55 = vsel %vm692_vm3, %v6180_v50, %v570_v53 }
 0x11c   : > { %873 = vrot.lane.b32.xlu0 %v6360_v43, %s5938_s16  ;;  %842 = vrot.lane.b32.xlu1 %v6360_v43, %s5937_s12 }
 0x11e   : > { %v683_v57 = vpop.permute.xlu1 %682  ;;  %v829_v58 = vpop.permute.xlu0 %828 }
 0x11f   : > { %v6369_v60 = vsel %vm725_vm4, %v716_v55, %v683_v57  ;;  %v895_v41 = vsel %vm889_vm5, %v6198_v10, %v829_v58 }
 0x120   : > { %844 = vrot.lane.b32.xlu0 %v6369_v60, %s5937_s12  ;;  %875 = vrot.lane.b32.xlu1 %v6369_v60, %s5938_s16 }
 0x122   : > { %v831_v61 = vpop.permute.xlu1 %830  ;;  %v862_v62 = vpop.permute.xlu0 %861 }
 0x123   : > { %v928_v3 = vsel %vm922_vm6, %v895_v41, %v862_v62  ;;  %v897_v50 = vsel %vm889_vm5, %v6214_v22, %v831_v61 }
 0x124   : > { %5692 = vmatprep.mubr.msk.bf16.mxu0 %vm998_vm7, %v928_v3  ;;  %v5816_v3 = vld [vmem:[%s8408_s3 + $0x98] sm:$0xff]  }
 0x126   : > { %v864_v1 = vpop.permute.xlu1 %863  ;;  %v572_v52 = vpop.permute.xlu0 %571 }
 0x127   : > { %v930_v4 = vsel %vm922_vm6, %v897_v50, %v864_v1  ;;  %v718_v5 = vsel %vm692_vm3, %v6208_v19, %v572_v52 }
 0x128   : > { %5693 = vmatmul.mubr.msk.bf16.gmra.mxu0 %vm998_vm7, %v930_v4 }
 0x12a   : > { %v574_v6 = vpop.permute.xlu1 %573  ;;  %v685_v10 = vpop.permute.xlu0 %684 }
 0x12b   : > { %v6386_v7 = vsel %vm725_vm4, %v718_v5, %v685_v10  ;;  %v720_v22 = vsel %vm692_vm3, %v6223_v30, %v574_v6  ;;  %v5818_v10 = vld [vmem:[%s8408_s3 + $0x88] sm:$0xff]  }
 0x12c   : > { %877 = vrot.lane.b32.xlu0 %v6386_v7, %s5938_s16  ;;  %846 = vrot.lane.b32.xlu1 %v6386_v7, %s5937_s12 }
 0x12e   : > { %v687_v9 = vpop.permute.xlu1 %686  ;;  %v833_v12 = vpop.permute.xlu0 %832 }
 0x12f   : > { %v6395_v8 = vsel %vm725_vm4, %v720_v22, %v687_v9  ;;  %v899_v19 = vsel %vm889_vm5, %v6240_v56, %v833_v12  ;;  %v5820_v9 = vld [vmem:[%s8408_s3 + $0x78] sm:$0xff]  }
 0x130   : > { %848 = vrot.lane.b32.xlu0 %v6395_v8, %s5937_s12  ;;  %879 = vrot.lane.b32.xlu1 %v6395_v8, %s5938_s16 }
 0x132   : > { %v835_v15 = vpop.permute.xlu1 %834  ;;  %v866_v16 = vpop.permute.xlu0 %865 }
 0x133   : > { %v932_v17 = vsel %vm922_vm6, %v899_v19, %v866_v16  ;;  %v901_v30 = vsel %vm889_vm5, %v6256_v2, %v835_v15 }
 0x134   : > { %5696 = vmatprep.mubr.msk.bf16.mxu0 %vm998_vm7, %v932_v17 }
 0x136   : > { %v868_v20 = vpop.permute.xlu1 %867  ;;  %v576_v23 = vpop.permute.xlu0 %575 }
 0x137   : > { %v934_v36 = vsel %vm922_vm6, %v901_v30, %v868_v20  ;;  %v722_v21 = vsel %vm692_vm3, %v6251_v63, %v576_v23  ;;  %v6609_v20 = vld [vmem:[%s8407_s2] ss:$0 sm:$0xff] }
 0x138   : > { %5697 = vmatmul.mubr.msk.bf16.gmra.mxu0 %vm998_vm7, %v934_v36 }
 0x13a   : > { %v578_v24 = vpop.permute.xlu1 %577  ;;  %v689_v56 = vpop.permute.xlu0 %688 }
 0x13b   : > { %v6412_v25 = vsel %vm725_vm4, %v722_v21, %v689_v56  ;;  %v724_v2 = vsel %vm692_vm3, %v6265_v13, %v578_v24  ;;  %v5821_v24 = vld [vmem:[%s8408_s3 + $0x70] sm:$0xff]  }
 0x13c   : > { %881 = vrot.lane.b32.xlu0 %v6412_v25, %s5938_s16  ;;  %850 = vrot.lane.b32.xlu1 %v6412_v25, %s5937_s12 }
 0x13e   : > { %v691_v26 = vpop.permute.xlu1 %690  ;;  %v837_v48 = vpop.permute.xlu0 %836 }
 0x13f   : > { %v6421_v28 = vsel %vm725_vm4, %v724_v2, %v691_v26  ;;  %v903_v63 = vsel %vm889_vm5, %v6282_v35, %v837_v48 }
 0x140   : > { %852 = vrot.lane.b32.xlu0 %v6421_v28, %s5937_s12  ;;  %883 = vrot.lane.b32.xlu1 %v6421_v28, %s5938_s16 }
 0x142   : > { %v839_v29 = vpop.permute.xlu1 %838  ;;  %v870_v31 = vpop.permute.xlu0 %869 }
 0x143   : > { %v936_v32 = vsel %vm922_vm6, %v903_v63, %v870_v31  ;;  %v905_v13 = vsel %vm889_vm5, %v6298_v49, %v839_v29  ;;  %v5822_v29 = vld [vmem:[%s8408_s3 + $0x68] sm:$0xff]  }
 0x144   : > { %5700 = vmatprep.mubr.msk.bf16.mxu0 %vm998_vm7, %v936_v32 }
 0x146   : > { %v872_v33 = vpop.permute.xlu1 %871  ;;  %v771_v34 = vpop.permute.xlu0 %770 }
 0x147   : > { %v938_v11 = vsel %vm922_vm6, %v905_v13, %v872_v33  ;;  %v780_v37 = vsel %vm692_vm3, %v6291_v40, %v771_v34  ;;  %v5939_v40 = vmov 0  }
 0x148   : > { %5701 = vmatmul.mubr.msk.bf16.gmra.mxu0 %vm998_vm7, %v938_v11  ;;  %1236 = vst.msk [vmem:[#allocation2 + $0x18] sm:$0xf] %vm1228_vm8, %v5939_v40  ;;  %1229 = vst.msk [vmem:[#allocation2] sm:$0xf] %vm1228_vm8, %v5939_v40  ;;  %2521 = vmatprep.subr.bf16.mxu1 %v5939_v40 }
 0x149   : > { %1230 = vst.msk [vmem:[#allocation2 + $0x4] sm:$0xf] %vm1228_vm8, %v5939_v40  ;;  %1233 = vst.msk [vmem:[#allocation2 + $0xc] sm:$0xf] %vm1228_vm8, %v5939_v40  ;;  %2757 = vmatprep.subr.bf16.mxu0 %v5939_v40  ;;  %2522 = vmatpush1.bf16.msra.mxu1 %v5816_v3 }
 0x14a   : > { %v778_v38 = vpop.permute.xlu1 %777  ;;  %v796_v35 = vpop.permute.xlu0 %795  ;;  %1234 = vst.msk [vmem:[#allocation2 + $0x10] sm:$0xf] %vm1228_vm8, %v5939_v40  ;;  %1237 = vst.msk [vmem:[#allocation2 + $0x1c] sm:$0xf] %vm1228_vm8, %v5939_v40  ;;  %2523 = vmatprep.subr.bf16.mxu1 %v5939_v40 }
 0x14b   : > { %v782_v39 = vsel %vm725_vm4, %v780_v37, %v778_v38  ;;  %v805_v42 = vsel %vm692_vm3, %v6307_v59, %v796_v35  ;;  %1239 = vst.msk [vmem:[#allocation2 + $0x24] sm:$0xf] %vm1228_vm8, %v5939_v40  ;;  %1240 = vst.msk [vmem:[#allocation2 + $0x28] sm:$0xf] %vm1228_vm8, %v5939_v40  ;;  %vm5201_vm3 = vcmask 1042434  }
 0x14c   : > { %885 = vrot.lane.b32.xlu0 %v782_v39, %s5938_s16  ;;  %854 = vrot.lane.b32.xlu1 %v782_v39, %s5937_s12  ;;  %1242 = vst.msk [vmem:[#allocation2 + $0x30] sm:$0xf] %vm1228_vm8, %v5939_v40  ;;  %1243 = vst.msk [vmem:[#allocation2 + $0x34] sm:$0xf] %vm1228_vm8, %v5939_v40  ;;  %s5879_s12 = scalar_lea.vmem %s5878_s10, 8192 }
 0x14d   : > { %1245 = vst.msk [vmem:[#allocation2 + $0x3c] sm:$0xf] %vm1228_vm8, %v5939_v40  ;;  %1246 = vst.msk [vmem:[#allocation2 + $0x40] sm:$0xf] %vm1228_vm8, %v5939_v40 }
 0x14e   : > { %v803_v49 = vpop.permute.xlu1 %802  ;;  %1248 = vst.msk [vmem:[#allocation2 + $0x48] sm:$0xf] %vm1228_vm8, %v5939_v40  ;;  %1249 = vst.msk [vmem:[#allocation2 + $0x4c] sm:$0xf] %vm1228_vm8, %v5939_v40  ;;  %v841_v59 = vpop.permute.xlu0 %840 }
 0x14f   : > { %v807_v44 = vsel %vm725_vm4, %v805_v42, %v803_v49  ;;  %1251 = vst.msk [vmem:[#allocation2 + $0x54] sm:$0xf] %vm1228_vm8, %v5939_v40  ;;  %1252 = vst.msk [vmem:[#allocation2 + $0x58] sm:$0xf] %vm1228_vm8, %v5939_v40  ;;  %v907_v45 = vsel %vm889_vm5, %v6322_v18, %v841_v59  ;;  %v1716_v37 = vld [vmem:[#allocation2 + $0x18] sm:$0xf] }
 0x150   : > { %887 = vrot.lane.b32.xlu1 %v807_v44, %s5938_s16  ;;  %1254 = vst.msk [vmem:[#allocation2 + $0x60] sm:$0xf] %vm1228_vm8, %v5939_v40  ;;  %1255 = vst.msk [vmem:[#allocation2 + $0x64] sm:$0xf] %vm1228_vm8, %v5939_v40  ;;  %v5823_v49 = vld [vmem:[%s8408_s3 + $0x60] sm:$0xff]   ;;  %vm5203_vm4 = vcmask 1043459  }
 0x151   : > { %1257 = vst.msk [vmem:[#allocation2 + $0x6c] sm:$0xf] %vm1228_vm8, %v5939_v40  ;;  %1258 = vst.msk [vmem:[#allocation2 + $0x70] sm:$0xf] %vm1228_vm8, %v5939_v40 }
 0x152   : > { %1260 = vst.msk [vmem:[#allocation2 + $0x78] sm:$0xf] %vm1228_vm8, %v5939_v40  ;;  %1261 = vst.msk [vmem:[#allocation2 + $0x7c] sm:$0xf] %vm1228_vm8, %v5939_v40 }
 0x153   : > { %1263 = vst.msk [vmem:[#allocation2 + $0x84] sm:$0xf] %vm1228_vm8, %v5939_v40  ;;  %1264 = vst.msk [vmem:[#allocation2 + $0x88] sm:$0xf] %vm1228_vm8, %v5939_v40 }
 0x154   : > { %1266 = vst.msk [vmem:[#allocation2 + $0x90] sm:$0xf] %vm1228_vm8, %v5939_v40  ;;  %1267 = vst.msk [vmem:[#allocation2 + $0x94] sm:$0xf] %vm1228_vm8, %v5939_v40 }
 0x155   : > { %1269 = vst.msk [vmem:[#allocation2 + $0x9c] sm:$0xf] %vm1228_vm8, %v5939_v40  ;;  %1270 = vst.msk [vmem:[#allocation2 + $0xa0] sm:$0xf] %vm1228_vm8, %v5939_v40 }
 0x156   : > { %1272 = vst.msk [vmem:[#allocation2 + $0xa8] sm:$0xf] %vm1228_vm8, %v5939_v40  ;;  %1273 = vst.msk [vmem:[#allocation2 + $0xac] sm:$0xf] %vm1228_vm8, %v5939_v40 }
 0x157   : > { %1275 = vst.msk [vmem:[#allocation2 + $0xb4] sm:$0xf] %vm1228_vm8, %v5939_v40  ;;  %1276 = vst.msk [vmem:[#allocation2 + $0xb8] sm:$0xf] %vm1228_vm8, %v5939_v40 }
 0x158   : > { %1278 = vst.msk [vmem:[#allocation2 + $0xc0] sm:$0xf] %vm1228_vm8, %v5939_v40  ;;  %1279 = vst.msk [vmem:[#allocation2 + $0xc4] sm:$0xf] %vm1228_vm8, %v5939_v40 }
 0x159   : > { %1281 = vst.msk [vmem:[#allocation2 + $0xcc] sm:$0xf] %vm1228_vm8, %v5939_v40  ;;  %1282 = vst.msk [vmem:[#allocation2 + $0xd0] sm:$0xf] %vm1228_vm8, %v5939_v40 }
 0x15a   : > { %1238 = vst.msk [vmem:[#allocation2 + $0x20] sm:$0x1] %vm1231_vm9, %v5939_v40  ;;  %1232 = vst.msk [vmem:[#allocation2 + $0x8] sm:$0x1] %vm1231_vm9, %v5939_v40 }
 0x15b   : > { %1235 = vst.msk [vmem:[#allocation2 + $0x14] sm:$0x1] %vm1231_vm9, %v5939_v40  ;;  %1241 = vst.msk [vmem:[#allocation2 + $0x2c] sm:$0x1] %vm1231_vm9, %v5939_v40 }
 0x15c   : > { %1244 = vst.msk [vmem:[#allocation2 + $0x38] sm:$0x1] %vm1231_vm9, %v5939_v40  ;;  %1247 = vst.msk [vmem:[#allocation2 + $0x44] sm:$0x1] %vm1231_vm9, %v5939_v40 }
 0x15d   : > { %1250 = vst.msk [vmem:[#allocation2 + $0x50] sm:$0x1] %vm1231_vm9, %v5939_v40  ;;  %1253 = vst.msk [vmem:[#allocation2 + $0x5c] sm:$0x1] %vm1231_vm9, %v5939_v40 }
 0x15e   : > { %1256 = vst.msk [vmem:[#allocation2 + $0x68] sm:$0x1] %vm1231_vm9, %v5939_v40  ;;  %1259 = vst.msk [vmem:[#allocation2 + $0x74] sm:$0x1] %vm1231_vm9, %v5939_v40 }
 0x15f   : > { %1262 = vst.msk [vmem:[#allocation2 + $0x80] sm:$0x1] %vm1231_vm9, %v5939_v40  ;;  %1265 = vst.msk [vmem:[#allocation2 + $0x8c] sm:$0x1] %vm1231_vm9, %v5939_v40 }
 0x160   : > { %1268 = vst.msk [vmem:[#allocation2 + $0x98] sm:$0x1] %vm1231_vm9, %v5939_v40  ;;  %1271 = vst.msk [vmem:[#allocation2 + $0xa4] sm:$0x1] %vm1231_vm9, %v5939_v40 }
 0x161   : > { %1274 = vst.msk [vmem:[#allocation2 + $0xb0] sm:$0x1] %vm1231_vm9, %v5939_v40  ;;  %1277 = vst.msk [vmem:[#allocation2 + $0xbc] sm:$0x1] %vm1231_vm9, %v5939_v40 }
 0x162   : > { %1280 = vst.msk [vmem:[#allocation2 + $0xc8] sm:$0x1] %vm1231_vm9, %v5939_v40  ;;  %1283 = vst.msk [vmem:[#allocation2 + $0xd4] sm:$0x1] %vm1231_vm9, %v5939_v40 }
 0x18e   : > { %v843_v46 = vpop.permute.xlu1 %842  ;;  %v874_v47 = vpop.permute.xlu0 %873 }
 0x18f   : > { %v940_v0 = vsel %vm922_vm6, %v907_v45, %v874_v47  ;;  %v909_v14 = vsel %vm889_vm5, %v6333_v27, %v843_v46  ;;  %v1707_v47 = vld [vmem:[#allocation2 + $0xc] sm:$0xf] }
 0x190   : > { %5704 = vmatprep.mubr.msk.bf16.mxu0 %vm998_vm7, %v940_v0 }
 0x192   : > { %v876_v51 = vpop.permute.xlu1 %875  ;;  %v845_v54 = vpop.permute.xlu0 %844 }
 0x193   : > { %v942_v53 = vsel %vm922_vm6, %v909_v14, %v876_v51  ;;  %v911_v55 = vsel %vm889_vm5, %v6360_v43, %v845_v54 }
 0x194   : > { %5705 = vmatmul.mubr.msk.bf16.gmra.mxu0 %vm998_vm7, %v942_v53 }
 0x19e   : > { %v847_v57 = vpop.permute.xlu1 %846  ;;  %v878_v18 = vpop.permute.xlu0 %877 }
 0x19f   : > { %v944_v58 = vsel %vm922_vm6, %v911_v55, %v878_v18  ;;  %v913_v41 = vsel %vm889_vm5, %v6369_v60, %v847_v57  ;;  %v5817_v60 = vld [vmem:[%s8408_s3 + $0x90] sm:$0xff]   ;;  %v1720_v18 = vld [vmem:[#allocation2 + $0x20] sm:$0x1] }
 0x1a0   : > { %5708 = vmatprep.mubr.msk.bf16.mxu0 %vm998_vm7, %v944_v58  ;;  %2524 = vmatpush1.bf16.msra.mxu1 %v5817_v60  ;;  %v7131_v57 = vld [vmem:[#allocation2 + $0xcc] sm:$0xff]  }
 0x1a1   : > { %2525 = vmatprep.subr.bf16.mxu1 %v5939_v40 }
 0x1a2   : > { %v880_v61 = vpop.permute.xlu1 %879  ;;  %v849_v62 = vpop.permute.xlu0 %848 }
 0x1a3   : > { %v946_v27 = vsel %vm922_vm6, %v913_v41, %v880_v61  ;;  %v915_v43 = vsel %vm889_vm5, %v6386_v7, %v849_v62  ;;  %v5819_v7 = vld [vmem:[%s8408_s3 + $0x80] sm:$0xff]   ;;  %v5824_v41 = vld [vmem:[%s8408_s3 + $0xb8] sm:$0xff]  }
 0x1a4   : > { %5709 = vmatmul.mubr.msk.bf16.gmra.mxu0 %vm998_vm7, %v946_v27  ;;  %2526 = vmatpush1.bf16.msra.mxu1 %v5818_v10 }
 0x1a5   : > { %2527 = vmatprep.subr.bf16.mxu1 %v5939_v40 }
 0x1a8   : > { %2528 = vmatpush1.bf16.msra.mxu1 %v5819_v7 }
 0x1a9   : > { %2529 = vmatprep.subr.bf16.mxu1 %v5939_v40 }
 0x1ac   : > { %2530 = vmatpush1.bf16.msra.mxu1 %v5820_v9  ;;  %v5825_v9 = vld [vmem:[%s8408_s3 + $0xb0] sm:$0xff]  }
 0x1ad   : > { %2531 = vmatprep.subr.bf16.mxu1 %v5939_v40 }
 0x1ae   : > { %v851_v50 = vpop.permute.xlu1 %850  ;;  %v882_v1 = vpop.permute.xlu0 %881 }
 0x1af   : > { %v948_v52 = vsel %vm922_vm6, %v915_v43, %v882_v1  ;;  %v917_v4 = vsel %vm889_vm5, %v6395_v8, %v851_v50 }
 0x1b0   : > { %5712 = vmatprep.mubr.msk.bf16.mxu0 %vm998_vm7, %v948_v52  ;;  %2532 = vmatpush1.bf16.msra.mxu1 %v5821_v24  ;;  %v5827_v24 = vld [vmem:[%s8408_s3 + $0xa8] sm:$0xff]  }
 0x1b1   : > { %2533 = vmatprep.subr.bf16.mxu1 %v5939_v40 }
 0x1b2   : > { %v884_v5 = vpop.permute.xlu1 %883  ;;  %v853_v22 = vpop.permute.xlu0 %852 }
 0x1b3   : > { %v950_v6 = vsel %vm922_vm6, %v917_v4, %v884_v5  ;;  %v919_v12 = vsel %vm889_vm5, %v6412_v25, %v853_v22  ;;  %v1713_v4 = vld [vmem:[#allocation2 + $0x14] sm:$0x1] }
 0x1b4   : > { %5713 = vmatmul.mubr.msk.bf16.gmra.mxu0 %vm998_vm7, %v950_v6  ;;  %2534 = vmatpush1.bf16.msra.mxu1 %v5822_v29 }
 0x1b5   : > { %2535 = vmatprep.subr.bf16.mxu1 %v5939_v40 }
 0x1b8   : > { %2536 = vmatpush1.bf16.msra.mxu1 %v5823_v49  ;;  %v5829_v49 = vld [vmem:[%s8408_s3 + $0xa0] sm:$0xff]  }
 0x1b9   : > { %2545 = vmatprep.subr.bf16.mxu1 %v5939_v40 }
 0x1bc   : > { %2546 = vmatpush2.bf16.msra.mxu1 %v5824_v41 }
 0x1bd   : > { %2547 = vmatprep.subr.bf16.mxu1 %v5939_v40 }
 0x1be   : > { %v855_v8 = vpop.permute.xlu1 %854  ;;  %v886_v19 = vpop.permute.xlu0 %885 }
 0x1bf   : > { %v952_v15 = vsel %vm922_vm6, %v919_v12, %v886_v19  ;;  %v921_v16 = vsel %vm889_vm5, %v6421_v28, %v855_v8  ;;  %v5826_v12 = vld [vmem:[%s8408_s3 + $0x38] sm:$0xff]   ;;  %vm5205_vm5 = vcmask 1044484  }
 0x1c0   : > { %5716 = vmatprep.mubr.msk.bf16.mxu0 %vm998_vm7, %v952_v15  ;;  %2548 = vmatpush2.bf16.msra.mxu1 %v5825_v9 }
 0x1c1   : > { %2758 = vmatpush1.bf16.msra.mxu0 %v5826_v12  ;;  %2549 = vmatprep.subr.bf16.mxu1 %v5939_v40 }
 0x1c2   : > { %v888_v17 = vpop.permute.xlu1 %887  ;;  %2759 = vmatprep.subr.bf16.mxu0 %v5939_v40 }
 0x1c3   : > { %v954_v30 = vsel %vm922_vm6, %v921_v16, %v888_v17  ;;  %vm5207_vm6 = vcmask 1045509  }
 0x1c4   : > { %5717 = vmatmul.mubr.msk.bf16.gmra.mxu0 %vm998_vm7, %v954_v30  ;;  %2550 = vmatpush2.bf16.msra.mxu1 %v5827_v24  ;;  %vm5209_vm7 = vcmask 1046534  }
 0x1c5   : > { %2551 = vmatprep.subr.bf16.mxu1 %v5939_v40 }
 0x1c8   : > { %2552 = vmatpush2.bf16.msra.mxu1 %v5829_v49 }
 0x1c9   : > { %5720 = vmatprep.subr.bf16.mxu1 %v5939_v40 }
 0x1d8   : > { %v5690_v23 = vpop.f32.mrf.mxu0 }
 0x1d9   : > { %v1078_v36 = vadd.f32 %v5690_v23, %v6609_v20 }
 0x1da   : > { %v1069_v21 = vpop.f32.mrf.mxu0 }
 0x1db   : > { %v1198_v56 = vmax.f32 %v1078_v36, 0.0  ;;  %v1070_v25 = vadd.f32 %v6609_v20, %v1069_v21 }
 0x1dc   : > { %v5691_v2 = vpop.f32.mrf.mxu0 }
 0x1dd   : > { %v5626_v26 = vpack.c.bf16 %v1198_v56, %v1198_v56  ;;  %v1196_v48 = vmax.f32 %v1070_v25, 0.0  ;;  %v1081_v28 = vadd.f32 %v5691_v2, %v6609_v20  ;;  %v5828_v56 = vld [vmem:[%s8408_s3 + $0x30] sm:$0xff]  }
 0x1de   : > { %v1072_v63 = vpop.f32.mrf.mxu0  ;;  %2760 = vmatpush1.bf16.msra.mxu0 %v5828_v56 }
 0x1df   : > { %v1401_v31 = vshrl.u32 %v5626_v26, 16  ;;  %v5624_v32 = vpack.c.bf16 %v1196_v48, %v1196_v48  ;;  %v1199_v13 = vmax.f32 %v1081_v28, 0.0  ;;  %v1073_v33 = vadd.f32 %v6609_v20, %v1072_v63  ;;  %v1730_v48 = vld [vmem:[#allocation2 + $0x30] sm:$0xf]  ;;  %2761 = vmatprep.subr.bf16.mxu0 %v5939_v40 }
 0x1e0   : > { %v1404_v11 = vshll.u32 %v5626_v26, 16 }
 0x1e1   : > { %v1403_v34 = vrot.slane %v1401_v31, 7  ;;  %v1384_v38 = vshrl.u32 %v5624_v32, 16  ;;  %v5627_v35 = vpack.c.bf16 %v1199_v13, %v1199_v13  ;;  %v1197_v42 = vmax.f32 %v1073_v33, 0.0  ;;  %v1723_v33 = vld [vmem:[#allocation2 + $0x24] sm:$0xf] }
 0x1e2   : > { %v1387_v45 = vshll.u32 %v5624_v32, 16 }
 0x1e3   : > { %v1406_v44 = vor.u32 %v1404_v11, %v1403_v34  ;;  %v1386_v59 = vrot.slane %v1384_v38, 7  ;;  %v1409_v46 = vshrl.u32 %v5627_v35, 16  ;;  %v5625_v0 = vpack.c.bf16 %v1197_v42, %v1197_v42 }
 0x1e4   : > { %v1412_v55 = vshll.u32 %v5627_v35, 16  ;;  %v1407_v61 = vrot.slane %v1403_v34, 4 }
 0x1e5   : > { %v1717_v14 = vsel %vm6624_vm11, %v1406_v44, %v1716_v37  ;;  %v1389_v51 = vor.u32 %v1387_v45, %v1386_v59  ;;  %v1411_v54 = vrot.slane %v1409_v46, 7  ;;  %v1392_v58 = vshrl.u32 %v5625_v0, 16 }
 0x1e6   : > { %1718 = vst [vmem:[#allocation2 + $0x18] sm:$0xf] %v1717_v14  ;;  %v1395_v50 = vshll.u32 %v5625_v0, 16  ;;  %v1390_v6 = vrot.slane %v1386_v59, 4 }
 0x1e7   : > { %v1708_v27 = vsel %vm6624_vm11, %v1389_v51, %v1707_v47  ;;  %v1414_v62 = vor.u32 %v1412_v55, %v1411_v54  ;;  %v1416_v3 = vrot.slane %v1411_v54, 4  ;;  %v1394_v43 = vrot.slane %v1392_v58, 7  ;;  %v5830_v51 = vld [vmem:[%s8408_s3 + $0x28] sm:$0xff]  }
 0x1e8   : > { %1709 = vst [vmem:[#allocation2 + $0xc] sm:$0xf] %v1708_v27  ;;  %v5694_v1 = vpop.f32.mrf.mxu0  ;;  %2762 = vmatpush1.bf16.msra.mxu0 %v5830_v51 }
 0x1e9   : > { %v1415_v52 = vsel %vm6634_vm14, %v1407_v61, %v1414_v62  ;;  %v1721_v60 = vsel %vm6641_vm15, %v1416_v3, %v1720_v18  ;;  %v1094_v5 = vadd.f32 %v5694_v1, %v6609_v20  ;;  %v1397_v10 = vor.u32 %v1395_v50, %v1394_v43  ;;  %v1734_v18 = vld [vmem:[#allocation2 + $0x38] sm:$0x1]  ;;  %2763 = vmatprep.subr.bf16.mxu0 %v5939_v40 }
 0x1ea   : > { %1719 = vst.msk [vmem:[#allocation2 + $0x1c] sm:$0xf] %vm1228_vm8, %v1415_v52  ;;  %1722 = vst [vmem:[#allocation2 + $0x20] sm:$0x1] %v1721_v60  ;;  %v1399_v7 = vrot.slane %v1394_v43, 4  ;;  %v1085_v22 = vpop.f32.mrf.mxu0 }
 0x1eb   : > { %v1202_v8 = vmax.f32 %v1094_v5, 0.0  ;;  %v1086_v19 = vadd.f32 %v6609_v20, %v1085_v22  ;;  %v1398_v15 = vsel %vm6634_vm14, %v1390_v6, %v1397_v10  ;;  %v1727_v6 = vld [vmem:[#allocation2 + $0x2c] sm:$0x1]  ;;  %v5831_v22 = vld [vmem:[%s8408_s3 + $0x20] sm:$0xff]  }
 0x1ec   : > { %v1714_v16 = vsel %vm6641_vm15, %v1399_v7, %v1713_v4  ;;  %v5695_v17 = vpop.f32.mrf.mxu0  ;;  %1710 = vst.msk [vmem:[#allocation2 + $0x10] sm:$0xf] %vm1228_vm8, %v1398_v15  ;;  %2764 = vmatpush1.bf16.msra.mxu0 %v5831_v22 }
 0x1ed   : > { %1715 = vst [vmem:[#allocation2 + $0x14] sm:$0x1] %v1714_v16  ;;  %v5630_v30 = vpack.c.bf16 %v1202_v8, %v1202_v8  ;;  %v1200_v23 = vmax.f32 %v1086_v19, 0.0  ;;  %v1097_v36 = vadd.f32 %v5695_v17, %v6609_v20  ;;  %2765 = vmatprep.subr.bf16.mxu0 %v5939_v40 }
 0x1ee   : > { %v1088_v21 = vpop.f32.mrf.mxu0 }
 0x1ef   : > { %v1435_v25 = vshrl.u32 %v5630_v30, 16  ;;  %v5628_v2 = vpack.c.bf16 %v1200_v23, %v1200_v23  ;;  %v1203_v26 = vmax.f32 %v1097_v36, 0.0  ;;  %v1089_v28 = vadd.f32 %v6609_v20, %v1088_v21 }
 0x1f0   : > { %v1438_v29 = vshll.u32 %v5630_v30, 16 }
 0x1f1   : > { %v1437_v63 = vrot.slane %v1435_v25, 7  ;;  %v1418_v31 = vshrl.u32 %v5628_v2, 16  ;;  %v5631_v32 = vpack.c.bf16 %v1203_v26, %v1203_v26  ;;  %v1421_v13 = vshll.u32 %v5628_v2, 16  ;;  %v6681_v11 = vld [vmem:[#allocation2 + $0x18] sm:$0xff]  }
 0x1f2   : > { %v1201_v34 = vmax.f32 %v1089_v28, 0.0  ;;  %v6683_v42 = vld [vmem:[#allocation2 + $0x20] ss:$0 sps:$4 sm:$0x11]   ;;  %v2030_v52 = vshll.u32 %v6681_v11, 16  ;;  %v2028_v19 = vshrl.u32 %v6681_v11, 16 }
 0x1f3   : > { %v1440_v37 = vor.u32 %v1438_v29, %v1437_v63  ;;  %v1420_v38 = vrot.slane %v1418_v31, 7  ;;  %v1443_v35 = vshrl.u32 %v5631_v32, 16  ;;  %v6688_v59 = vld [vmem:[#allocation2 + $0xc] sm:$0xff]   ;;  %v1446_v0 = vshll.u32 %v5631_v32, 16  ;;  %v5832_v32 = vld [vmem:[%s8408_s3 + $0x18] sm:$0xff]  }
 0x1f4   : > { %v5629_v44 = vpack.c.bf16 %v1201_v34, %v1201_v34  ;;  %v6692_v14 = vld [vmem:[#allocation2 + $0x14] ss:$0 sps:$4 sm:$0x11]   ;;  %v1441_v54 = vrot.slane %v1437_v63, 4  ;;  %v2230_v41 = vrot.slane %v6688_v59, 1  ;;  %v2035_v60 = vshll.u32 %v6683_v42, 16  ;;  %2766 = vmatpush1.bf16.msra.mxu0 %v5832_v32 }
 0x1f5   : > { %v1731_v45 = vsel %vm6624_vm11, %v1440_v37, %v1730_v48  ;;  %v1423_v46 = vor.u32 %v1421_v13, %v1420_v38  ;;  %v1445_v47 = vrot.slane %v1443_v35, 7  ;;  %v1424_v55 = vrot.slane %v1420_v38, 4  ;;  %v1744_v38 = vld [vmem:[#allocation2 + $0x48] sm:$0xf]  ;;  %2767 = vmatprep.subr.bf16.mxu0 %v5939_v40 }
 0x1f6   : > { %1732 = vst [vmem:[#allocation2 + $0x30] sm:$0xf] %v1731_v45  ;;  %v1426_v58 = vshrl.u32 %v5629_v44, 16  ;;  %v2231_v3 = vrot.slane %v6692_v14, 1  ;;  %v1429_v50 = vshll.u32 %v5629_v44, 16  ;;  %v2032_v15 = vrot.slane %v2030_v52, 1 }
 0x1f7   : > { %v1724_v61 = vsel %vm6624_vm11, %v1423_v46, %v1723_v33  ;;  %v1448_v27 = vor.u32 %v1446_v0, %v1445_v47  ;;  %v1450_v62 = vrot.slane %v1445_v47, 4  ;;  %v2037_v30 = vrot.slane %v2035_v60, 1 }
 0x1f8   : > { %1725 = vst [vmem:[#allocation2 + $0x24] sm:$0xf] %v1724_v61  ;;  %v1428_v43 = vrot.slane %v1426_v58, 7  ;;  %v5698_v1 = vpop.f32.mrf.mxu0  ;;  %v6711_v7 = vsel %vm611_vm0, %v2230_v41, %v2231_v3  ;;  %v2018_v23 = vshll.u32 %v6688_v59, 16  ;;  %v2033_v24 = vor.u32 %v2032_v15, %v2028_v19  ;;  %v1737_v61 = vld [vmem:[#allocation2 + $0x3c] sm:$0xf] }
 0x1f9   : > { %v1449_v4 = vsel %vm6634_vm14, %v1441_v54, %v1448_v27  ;;  %v1735_v5 = vsel %vm6641_vm15, %v1450_v62, %v1734_v18  ;;  %v1110_v10 = vadd.f32 %v5698_v1, %v6609_v20  ;;  %5519 = vmatprep.mubr.msk.bf16.mxu1 %vm2275_vm2, %v6711_v7  ;;  %v2023_v25 = vshll.u32 %v6692_v14, 16  ;;  %v5837_v62 = vld [vmem:[%s8408_s3 + $0x10] sm:$0xff]   ;;  %v6754_v19 = vld [vmem:[#allocation2] sm:$0xff]  }
 0x1fa   : > { %1733 = vst.msk [vmem:[#allocation2 + $0x34] sm:$0xf] %vm1228_vm8, %v1449_v4  ;;  %1736 = vst [vmem:[#allocation2 + $0x38] sm:$0x1] %v1735_v5  ;;  %v1431_v9 = vor.u32 %v1429_v50, %v1428_v43  ;;  %v1433_v12 = vrot.slane %v1428_v43, 4  ;;  %v1101_v8 = vpop.f32.mrf.mxu0  ;;  %v2020_v28 = vrot.slane %v2018_v23, 1  ;;  %v2038_v63 = vsel %vm354_vm1, %v2033_v24, %v2037_v30  ;;  %2768 = vmatpush1.bf16.msra.mxu0 %v5837_v62 }
 0x1fb   : > { %v1206_v16 = vmax.f32 %v1110_v10, 0.0  ;;  %v1102_v17 = vadd.f32 %v6609_v20, %v1101_v8  ;;  %v2016_v29 = vshrl.u32 %v6688_v59, 16  ;;  %2199 = vrot.lane.b32.xlu1 %v2038_v63, %s5940_s11  ;;  %v2025_v49 = vrot.slane %v2023_v25, 1  ;;  %v1748_v10 = vld [vmem:[#allocation2 + $0x50] sm:$0x1]  ;;  %2769 = vmatprep.subr.bf16.mxu0 %v5939_v40 }
 0x1fc   : > { %v1432_v36 = vsel %vm6634_vm14, %v1424_v55, %v1431_v9  ;;  %v1728_v21 = vsel %vm6641_vm15, %v1433_v12, %v1727_v6  ;;  %v5699_v56 = vpop.f32.mrf.mxu0 }
 0x1fd   : > { %1726 = vst.msk [vmem:[#allocation2 + $0x28] sm:$0xf] %vm1228_vm8, %v1432_v36  ;;  %1729 = vst [vmem:[#allocation2 + $0x2c] sm:$0x1] %v1728_v21  ;;  %v5634_v2 = vpack.c.bf16 %v1206_v16, %v1206_v16  ;;  %v1204_v26 = vmax.f32 %v1102_v17, 0.0  ;;  %v1113_v48 = vadd.f32 %v5699_v56, %v6609_v20  ;;  %v2021_v35 = vor.u32 %v2020_v28, %v2016_v29  ;;  %v5838_v36 = vld [vmem:[%s8408_s3 + $0x8] sm:$0xff]  }
 0x1fe   : > { %v1104_v31 = vpop.f32.mrf.mxu0  ;;  %v1741_v28 = vld [vmem:[#allocation2 + $0x44] sm:$0x1]  ;;  %2770 = vmatpush1.bf16.msra.mxu0 %v5838_v36  ;;  %v1751_v36 = vld [vmem:[#allocation2 + $0x54] sm:$0xf] }
 0x1ff   : > { %v1469_v13 = vshrl.u32 %v5634_v2, 16  ;;  %v5632_v33 = vpack.c.bf16 %v1204_v26, %v1204_v26  ;;  %v1207_v34 = vmax.f32 %v1113_v48, 0.0  ;;  %v1472_v37 = vshll.u32 %v5634_v2, 16  ;;  %2771 = vmatprep.subr.bf16.mxu0 %v5939_v40 }
 0x200   : > { %v1105_v44 = vadd.f32 %v6609_v20, %v1104_v31  ;;  %v2026_v51 = vsel %vm354_vm1, %v2021_v35, %v2025_v49  ;;  %v5839_v31 = vld [vmem:[%s8408_s3] sm:$0xff]   ;;  %v2006_v49 = vshll.u32 %v6754_v19, 16 }
 0x201   : > { %v1471_v45 = vrot.slane %v1469_v13, 7  ;;  %v1452_v46 = vshrl.u32 %v5632_v33, 16  ;;  %v1455_v47 = vshll.u32 %v5632_v33, 16  ;;  %v5635_v0 = vpack.c.bf16 %v1207_v34, %v1207_v34  ;;  %v6737_v14 = vld [vmem:[#allocation2 + $0x30] sm:$0xff]   ;;  %2197 = vrot.lane.b32.xlu0 %v2026_v51, %s5940_s11 }
 0x202   : > { %v1205_v54 = vmax.f32 %v1105_v44, 0.0  ;;  %v6741_v55 = vld [vmem:[#allocation2 + $0x38] ss:$0 sps:$4 sm:$0x11]   ;;  %v2052_v50 = vshrl.u32 %v6737_v14, 16  ;;  %v2054_v1 = vshll.u32 %v6737_v14, 16  ;;  %2772 = vmatpush1.bf16.msra.mxu0 %v5839_v31 }
 0x203   : > { %v1474_v18 = vor.u32 %v1472_v37, %v1471_v45  ;;  %v1475_v58 = vrot.slane %v1471_v45, 4  ;;  %v1454_v41 = vrot.slane %v1452_v46, 7  ;;  %v1477_v27 = vshrl.u32 %v5635_v0, 16  ;;  %v6785_v51 = vld [vmem:[#allocation2 + $0x8] ss:$0 sps:$4 sm:$0x11]   ;;  %2781 = vmatprep.subr.bf16.mxu0 %v5939_v40 }
 0x204   : > { %v1480_v3 = vshll.u32 %v5635_v0, 16  ;;  %v5633_v43 = vpack.c.bf16 %v1205_v54, %v1205_v54  ;;  %v6749_v52 = vld [vmem:[#allocation2 + $0x24] sm:$0xff]   ;;  %v2056_v12 = vrot.slane %v2054_v1, 1  ;;  %v2059_v8 = vshll.u32 %v6741_v55, 16 }
 0x205   : > { %v1745_v60 = vsel %vm6624_vm11, %v1474_v18, %v1744_v38  ;;  %v1457_v4 = vor.u32 %v1455_v47, %v1454_v41  ;;  %v1458_v5 = vrot.slane %v1454_v41, 4  ;;  %v1479_v6 = vrot.slane %v1477_v27, 7  ;;  %v6759_v30 = vld [vmem:[#allocation2 + $0x2c] ss:$0 sps:$4 sm:$0x11]   ;;  %v5840_v27 = vld [vmem:[%s8408_s3 + $0x58] sm:$0xff]  }
 0x206   : > { %1746 = vst [vmem:[#allocation2 + $0x48] sm:$0xf] %v1745_v60  ;;  %v1460_v22 = vshrl.u32 %v5633_v43, 16  ;;  %v1463_v9 = vshll.u32 %v5633_v43, 16  ;;  %v2040_v23 = vshrl.u32 %v6749_v52, 16  ;;  %v2057_v56 = vor.u32 %v2056_v12, %v2052_v50  ;;  %2782 = vmatpush2.bf16.msra.mxu0 %v5840_v27 }
 0x207   : > { %v1738_v15 = vsel %vm6624_vm11, %v1457_v4, %v1737_v61  ;;  %v1482_v16 = vor.u32 %v1480_v3, %v1479_v6  ;;  %v1484_v17 = vrot.slane %v1479_v6, 4  ;;  %v2061_v25 = vrot.slane %v2059_v8, 1  ;;  %v1758_v50 = vld [vmem:[#allocation2 + $0x60] sm:$0xf]  ;;  %2783 = vmatprep.subr.bf16.mxu0 %v5939_v40 }
 0x208   : > { %1739 = vst [vmem:[#allocation2 + $0x3c] sm:$0xf] %v1738_v15  ;;  %v1462_v21 = vrot.slane %v1460_v22, 7  ;;  %v5702_v24 = vpop.f32.mrf.mxu0  ;;  %v2042_v2 = vshll.u32 %v6749_v52, 16  ;;  %v2047_v29 = vshll.u32 %v6759_v30, 16  ;;  %v2004_v60 = vshrl.u32 %v6754_v19, 16 }
 0x209   : > { %v1483_v26 = vsel %vm6634_vm14, %v1475_v58, %v1482_v16  ;;  %v1749_v48 = vsel %vm6641_vm15, %v1484_v17, %v1748_v10  ;;  %v1126_v63 = vadd.f32 %v5702_v24, %v6609_v20  ;;  %v2062_v34 = vsel %vm354_vm1, %v2057_v56, %v2061_v25  ;;  %v5845_v24 = vld [vmem:[%s8408_s3 + $0x50] sm:$0xff]  }
 0x20a   : > { %1747 = vst.msk [vmem:[#allocation2 + $0x4c] sm:$0xf] %vm1228_vm8, %v1483_v26  ;;  %1750 = vst [vmem:[#allocation2 + $0x50] sm:$0x1] %v1749_v48  ;;  %v1465_v32 = vor.u32 %v1463_v9, %v1462_v21  ;;  %v1467_v13 = vrot.slane %v1462_v21, 4  ;;  %v1117_v33 = vpop.f32.mrf.mxu0  ;;  %v2044_v37 = vrot.slane %v2042_v2, 1  ;;  %2203 = vrot.lane.b32.xlu1 %v2062_v34, %s5940_s11  ;;  %2784 = vmatpush2.bf16.msra.mxu0 %v5845_v24 }
 0x20b   : > { %v1210_v38 = vmax.f32 %v1126_v63, 0.0  ;;  %v1118_v35 = vadd.f32 %v6609_v20, %v1117_v33  ;;  %v2049_v0 = vrot.slane %v2047_v29, 1  ;;  %v2008_v4 = vrot.slane %v2006_v49, 1  ;;  %2785 = vmatprep.subr.bf16.mxu0 %v5939_v40 }
 0x20c   : > { %v1466_v44 = vsel %vm6634_vm14, %v1458_v5, %v1465_v32  ;;  %v1742_v45 = vsel %vm6641_vm15, %v1467_v13, %v1741_v28  ;;  %v5703_v46 = vpop.f32.mrf.mxu0  ;;  %v2045_v47 = vor.u32 %v2044_v37, %v2040_v23  ;;  %v2011_v5 = vshll.u32 %v6785_v51, 16  ;;  %v1762_v13 = vld [vmem:[#allocation2 + $0x68] sm:$0x1] }
 0x20d   : > { %1740 = vst.msk [vmem:[#allocation2 + $0x40] sm:$0xf] %vm1228_vm8, %v1466_v44  ;;  %1743 = vst [vmem:[#allocation2 + $0x44] sm:$0x1] %v1742_v45  ;;  %v5638_v54 = vpack.c.bf16 %v1210_v38, %v1210_v38  ;;  %v1208_v18 = vmax.f32 %v1118_v35, 0.0  ;;  %v1129_v58 = vadd.f32 %v5703_v46, %v6609_v20  ;;  %v5846_v46 = vld [vmem:[%s8408_s3 + $0x48] sm:$0xff]  }
 0x20e   : > { %v2050_v41 = vsel %vm354_vm1, %v2045_v47, %v2049_v0  ;;  %v1120_v61 = vpop.f32.mrf.mxu0  ;;  %2786 = vmatpush2.bf16.msra.mxu0 %v5846_v46 }
 0x20f   : > { %v1503_v62 = vshrl.u32 %v5638_v54, 16  ;;  %v5636_v3 = vpack.c.bf16 %v1208_v18, %v1208_v18  ;;  %v1211_v43 = vmax.f32 %v1129_v58, 0.0  ;;  %2201 = vrot.lane.b32.xlu0 %v2050_v41, %s5940_s11  ;;  %v1121_v1 = vadd.f32 %v6609_v20, %v1120_v61  ;;  %v1755_v61 = vld [vmem:[#allocation2 + $0x5c] sm:$0x1]  ;;  %2787 = vmatprep.subr.bf16.mxu0 %v5939_v40 }
 0x210   : > { %v1506_v10 = vshll.u32 %v5638_v54, 16 }
 0x211   : > { %v1505_v6 = vrot.slane %v1503_v62, 7  ;;  %v1486_v22 = vshrl.u32 %v5636_v3, 16  ;;  %v5639_v9 = vpack.c.bf16 %v1211_v43, %v1211_v43  ;;  %v6798_v12 = vld [vmem:[#allocation2 + $0x48] sm:$0xff]   ;;  %v1209_v8 = vmax.f32 %v1121_v1, 0.0 }
 0x212   : > { %v6800_v15 = vld [vmem:[#allocation2 + $0x50] ss:$0 sps:$4 sm:$0x11]   ;;  %v1489_v23 = vshll.u32 %v5636_v3, 16  ;;  %v2078_v26 = vshll.u32 %v6798_v12, 16  ;;  %v2076_v31 = vshrl.u32 %v6798_v12, 16 }
 0x213   : > { %v1508_v16 = vor.u32 %v1506_v10, %v1505_v6  ;;  %v1488_v17 = vrot.slane %v1486_v22, 7  ;;  %v1511_v21 = vshrl.u32 %v5639_v9, 16  ;;  %v1509_v56 = vrot.slane %v1505_v6, 4  ;;  %v5847_v3 = vld [vmem:[%s8408_s3 + $0x40] sm:$0xff]  }
 0x214   : > { %v1514_v25 = vshll.u32 %v5639_v9, 16  ;;  %v5637_v2 = vpack.c.bf16 %v1209_v8, %v1209_v8  ;;  %v6807_v48 = vld [vmem:[#allocation2 + $0x3c] sm:$0xff]   ;;  %v2080_v34 = vrot.slane %v2078_v26, 1  ;;  %v2083_v37 = vshll.u32 %v6800_v15, 16  ;;  %2788 = vmatpush2.bf16.msra.mxu0 %v5847_v3 }
 0x215   : > { %v1759_v28 = vsel %vm6624_vm11, %v1508_v16, %v1758_v50  ;;  %v1491_v63 = vor.u32 %v1489_v23, %v1488_v17  ;;  %v1513_v29 = vrot.slane %v1511_v21, 7  ;;  %v1492_v32 = vrot.slane %v1488_v17, 4  ;;  %v6816_v45 = vld [vmem:[#allocation2 + $0x44] ss:$0 sps:$4 sm:$0x11]   ;;  %3046 = vmatprep.subr.bf16.mxu0 %v5939_v40 }
 0x216   : > { %1760 = vst [vmem:[#allocation2 + $0x60] sm:$0xf] %v1759_v28  ;;  %v1494_v33 = vshrl.u32 %v5637_v2, 16  ;;  %v1497_v44 = vshll.u32 %v5637_v2, 16  ;;  %v2081_v0 = vor.u32 %v2080_v34, %v2076_v31  ;;  %v2085_v54 = vrot.slane %v2083_v37, 1 }
 0x217   : > { %v1752_v38 = vsel %vm6624_vm11, %v1491_v63, %v1751_v36  ;;  %v1516_v35 = vor.u32 %v1514_v25, %v1513_v29  ;;  %v1518_v49 = vrot.slane %v1513_v29, 4  ;;  %v2066_v18 = vshll.u32 %v6807_v48, 16 }
 0x218   : > { %1753 = vst [vmem:[#allocation2 + $0x54] sm:$0xf] %v1752_v38  ;;  %v1496_v47 = vrot.slane %v1494_v33, 7  ;;  %v2064_v27 = vshrl.u32 %v6807_v48, 16  ;;  %v2071_v62 = vshll.u32 %v6816_v45, 16  ;;  %v2086_v1 = vsel %vm354_vm1, %v2081_v0, %v2085_v54 }
 0x219   : > { %v1517_v58 = vsel %vm6634_vm14, %v1509_v56, %v1516_v35  ;;  %v1763_v41 = vsel %vm6641_vm15, %v1518_v49, %v1762_v13  ;;  %v2068_v6 = vrot.slane %v2066_v18, 1  ;;  %2207 = vrot.lane.b32.xlu1 %v2086_v1, %s5940_s11  ;;  %v2009_v22 = vor.u32 %v2008_v4, %v2004_v60 }
 0x21a   : > { %1761 = vst.msk [vmem:[#allocation2 + $0x64] sm:$0xf] %vm1228_vm8, %v1517_v58  ;;  %1764 = vst [vmem:[#allocation2 + $0x68] sm:$0x1] %v1763_v41  ;;  %v1499_v43 = vor.u32 %v1497_v44, %v1496_v47  ;;  %v1501_v50 = vrot.slane %v1496_v47, 4  ;;  %v2073_v10 = vrot.slane %v2071_v62, 1 }
 0x21b   : > { %v2013_v9 = vrot.slane %v2011_v5, 1  ;;  %v2069_v17 = vor.u32 %v2068_v6, %v2064_v27  ;;  %v2227_v23 = vrot.slane %v6754_v19, 1  ;;  %v2228_v36 = vrot.slane %v6785_v51, 1 }
 0x21c   : > { %v1500_v8 = vsel %vm6634_vm14, %v1492_v32, %v1499_v43  ;;  %v1756_v16 = vsel %vm6641_vm15, %v1501_v50, %v1755_v61 }
 0x21d   : > { %1754 = vst.msk [vmem:[#allocation2 + $0x58] sm:$0xf] %vm1228_vm8, %v1500_v8  ;;  %1757 = vst [vmem:[#allocation2 + $0x5c] sm:$0x1] %v1756_v16  ;;  %v2074_v21 = vsel %vm354_vm1, %v2069_v17, %v2073_v10  ;;  %v2229_v60 = vsel %vm611_vm0, %v2227_v23, %v2228_v36  ;;  %v2014_v4 = vsel %vm354_vm1, %v2009_v22, %v2013_v9  ;;  %v1772_v22 = vld [vmem:[#allocation2 + $0x78] sm:$0xf] }
 0x21e   : > { %2205 = vrot.lane.b32.xlu0 %v2074_v21, %s5940_s11  ;;  %5547 = vmatprep.mubr.msk.bf16.mxu0 %vm2275_vm2, %v2229_v60  ;;  %v1765_v36 = vld [vmem:[#allocation2 + $0x6c] sm:$0xf] }
 0x221   : > { %v6848_v5 = vld [vmem:[#allocation2 + $0x60] sm:$0xff]   ;;  %v6850_v24 = vld [vmem:[#allocation2 + $0x68] ss:$0 sps:$4 sm:$0x11]  }
 0x222   : > { %2195 = vrot.lane.b32.xlu0 %v2014_v4, %s5940_s11  ;;  %v2102_v51 = vshll.u32 %v6848_v5, 16  ;;  %v2107_v56 = vshll.u32 %v6850_v24, 16  ;;  %v2100_v2 = vshrl.u32 %v6848_v5, 16 }
 0x224   : > { %v6855_v25 = vld [vmem:[#allocation2 + $0x54] sm:$0xff]   ;;  %v2104_v26 = vrot.slane %v2102_v51, 1  ;;  %v6858_v28 = vld [vmem:[#allocation2 + $0x5c] ss:$0 sps:$4 sm:$0x11]   ;;  %v2109_v31 = vrot.slane %v2107_v56, 1 }
 0x225   : > { %v2090_v63 = vshll.u32 %v6855_v25, 16  ;;  %v2095_v32 = vshll.u32 %v6858_v28, 16  ;;  %v2088_v13 = vshrl.u32 %v6855_v25, 16 }
 0x226   : > { %v2105_v29 = vor.u32 %v2104_v26, %v2100_v2  ;;  %v1776_v2 = vld [vmem:[#allocation2 + $0x80] sm:$0x1] }
 0x227   : > { %v2092_v33 = vrot.slane %v2090_v63, 1  ;;  %v2097_v38 = vrot.slane %v2095_v32, 1 }
 0x228   : > { %v2110_v34 = vsel %vm354_vm1, %v2105_v29, %v2109_v31 }
 0x229   : > { %2211 = vrot.lane.b32.xlu0 %v2110_v34, %s5940_s11  ;;  %v2093_v37 = vor.u32 %v2092_v33, %v2088_v13 }
 0x22b   : > { %v2098_v35 = vsel %vm354_vm1, %v2093_v37, %v2097_v38 }
 0x22c   : > { %2209 = vrot.lane.b32.xlu1 %v2098_v35, %s5940_s11  ;;  %v1769_v35 = vld [vmem:[#allocation2 + $0x74] sm:$0x1] }
 0x254   : > { %v5706_v49 = vpop.f32.mrf.mxu0 }
 0x255   : > { %v1142_v44 = vadd.f32 %v5706_v49, %v6609_v20 }
 0x256   : > { %v1133_v46 = vpop.f32.mrf.mxu0 }
 0x257   : > { %v1214_v47 = vmax.f32 %v1142_v44, 0.0  ;;  %v1134_v0 = vadd.f32 %v6609_v20, %v1133_v46 }
 0x258   : > { %v5707_v54 = vpop.f32.mrf.mxu0 }
 0x259   : > { %v5642_v18 = vpack.c.bf16 %v1214_v47, %v1214_v47  ;;  %v1212_v58 = vmax.f32 %v1134_v0, 0.0  ;;  %v1145_v41 = vadd.f32 %v5707_v54, %v6609_v20 }
 0x25a   : > { %v1136_v61 = vpop.f32.mrf.mxu0 }
 0x25b   : > { %v1537_v27 = vshrl.u32 %v5642_v18, 16  ;;  %v5640_v62 = vpack.c.bf16 %v1212_v58, %v1212_v58  ;;  %v1215_v3 = vmax.f32 %v1145_v41, 0.0  ;;  %v1137_v43 = vadd.f32 %v6609_v20, %v1136_v61 }
 0x25c   : > { %v1540_v1 = vshll.u32 %v5642_v18, 16 }
 0x25d   : > { %v1539_v50 = vrot.slane %v1537_v27, 7  ;;  %v1520_v6 = vshrl.u32 %v5640_v62, 16  ;;  %v5643_v10 = vpack.c.bf16 %v1215_v3, %v1215_v3  ;;  %v1213_v9 = vmax.f32 %v1137_v43, 0.0 }
 0x25e   : > { %v1523_v17 = vshll.u32 %v5640_v62, 16 }
 0x25f   : > { %v1542_v8 = vor.u32 %v1540_v1, %v1539_v50  ;;  %v1522_v16 = vrot.slane %v1520_v6, 7  ;;  %v1545_v23 = vshrl.u32 %v5643_v10, 16  ;;  %v5641_v21 = vpack.c.bf16 %v1213_v9, %v1213_v9  ;;  %v1786_v9 = vld [vmem:[#allocation2 + $0x90] sm:$0xf] }
 0x260   : > { %v1548_v56 = vshll.u32 %v5643_v10, 16  ;;  %v1543_v63 = vrot.slane %v1539_v50, 4  ;;  %v2233_v50 = vrot.slane %v6681_v11, 1  ;;  %v2234_v1 = vrot.slane %v6683_v42, 1 }
 0x261   : > { %v1773_v60 = vsel %vm6624_vm11, %v1542_v8, %v1772_v22  ;;  %v1525_v4 = vor.u32 %v1523_v17, %v1522_v16  ;;  %v1547_v51 = vrot.slane %v1545_v23, 7  ;;  %v1528_v26 = vshrl.u32 %v5641_v21, 16 }
 0x262   : > { %1774 = vst [vmem:[#allocation2 + $0x78] sm:$0xf] %v1773_v60  ;;  %v1531_v33 = vshll.u32 %v5641_v21, 16  ;;  %v1526_v44 = vrot.slane %v1522_v16, 4 }
 0x263   : > { %v1766_v29 = vsel %vm6624_vm11, %v1525_v4, %v1765_v36  ;;  %v1550_v31 = vor.u32 %v1548_v56, %v1547_v51  ;;  %v1552_v32 = vrot.slane %v1547_v51, 4  ;;  %v1530_v13 = vrot.slane %v1528_v26, 7  ;;  %v1779_v26 = vld [vmem:[#allocation2 + $0x84] sm:$0xf] }
 0x264   : > { %1767 = vst [vmem:[#allocation2 + $0x6c] sm:$0xf] %v1766_v29  ;;  %v5710_v34 = vpop.f32.mrf.mxu0  ;;  %v6894_v4 = vsel %vm611_vm0, %v2233_v50, %v2234_v1 }
 0x265   : > { %v1551_v37 = vsel %vm6634_vm14, %v1543_v63, %v1550_v31  ;;  %v1777_v38 = vsel %vm6641_vm15, %v1552_v32, %v1776_v2  ;;  %v1158_v49 = vadd.f32 %v5710_v34, %v6609_v20  ;;  %v1533_v46 = vor.u32 %v1531_v33, %v1530_v13 }
 0x266   : > { %1775 = vst.msk [vmem:[#allocation2 + $0x7c] sm:$0xf] %vm1228_vm8, %v1551_v37  ;;  %1778 = vst [vmem:[#allocation2 + $0x80] sm:$0x1] %v1777_v38  ;;  %v1535_v47 = vrot.slane %v1530_v13, 4  ;;  %v1149_v0 = vpop.f32.mrf.mxu0 }
 0x267   : > { %v1218_v54 = vmax.f32 %v1158_v49, 0.0  ;;  %v1150_v18 = vadd.f32 %v6609_v20, %v1149_v0  ;;  %v1534_v58 = vsel %vm6634_vm14, %v1526_v44, %v1533_v46  ;;  %v1790_v49 = vld [vmem:[#allocation2 + $0x98] sm:$0x1] }
 0x268   : > { %v1770_v41 = vsel %vm6641_vm15, %v1535_v47, %v1769_v35  ;;  %v5711_v61 = vpop.f32.mrf.mxu0  ;;  %1768 = vst.msk [vmem:[#allocation2 + $0x70] sm:$0xf] %vm1228_vm8, %v1534_v58 }
 0x269   : > { %1771 = vst [vmem:[#allocation2 + $0x74] sm:$0x1] %v1770_v41  ;;  %v5646_v27 = vpack.c.bf16 %v1218_v54, %v1218_v54  ;;  %v1216_v62 = vmax.f32 %v1150_v18, 0.0  ;;  %v1161_v3 = vadd.f32 %v5711_v61, %v6609_v20 }
 0x26a   : > { %v1152_v43 = vpop.f32.mrf.mxu0 }
 0x26b   : > { %v1571_v6 = vshrl.u32 %v5646_v27, 16  ;;  %v5644_v10 = vpack.c.bf16 %v1216_v62, %v1216_v62  ;;  %v1219_v22 = vmax.f32 %v1161_v3, 0.0  ;;  %v1153_v8 = vadd.f32 %v6609_v20, %v1152_v43 }
 0x26c   : > { %v1574_v17 = vshll.u32 %v5646_v27, 16 }
 0x26d   : > { %v1573_v16 = vrot.slane %v1571_v6, 7  ;;  %v1554_v23 = vshrl.u32 %v5644_v10, 16  ;;  %v5647_v36 = vpack.c.bf16 %v1219_v22, %v1219_v22  ;;  %v6891_v21 = vld [vmem:[#allocation2 + $0x78] sm:$0xff]   ;;  %v1217_v60 = vmax.f32 %v1153_v8, 0.0  ;;  %v1783_v6 = vld [vmem:[#allocation2 + $0x8c] sm:$0x1] }
 0x26e   : > { %v6896_v51 = vld [vmem:[#allocation2 + $0x80] ss:$0 sps:$4 sm:$0x11]   ;;  %v1557_v2 = vshll.u32 %v5644_v10, 16  ;;  %v2126_v32 = vshll.u32 %v6891_v21, 16  ;;  %v2124_v38 = vshrl.u32 %v6891_v21, 16 }
 0x26f   : > { %v1576_v56 = vor.u32 %v1574_v17, %v1573_v16  ;;  %v1556_v42 = vrot.slane %v1554_v23, 7  ;;  %v1579_v63 = vshrl.u32 %v5647_v36, 16  ;;  %v1577_v29 = vrot.slane %v1573_v16, 4  ;;  %v6899_v13 = vld [vmem:[#allocation2 + $0x6c] sm:$0xff]   ;;  %v6917_v22 = vld [vmem:[%s8407_s2] ss:$0 sm:$0xff] }
 0x270   : > { %v1582_v31 = vshll.u32 %v5647_v36, 16  ;;  %v5645_v20 = vpack.c.bf16 %v1217_v60, %v1217_v60  ;;  %v2128_v46 = vrot.slane %v2126_v32, 1  ;;  %v2131_v47 = vshll.u32 %v6896_v51, 16  ;;  %v6907_v41 = vld [vmem:[#allocation2 + $0x74] ss:$0 sps:$4 sm:$0x11]  }
 0x271   : > { %v1787_v33 = vsel %vm6624_vm11, %v1576_v56, %v1786_v9  ;;  %v1559_v34 = vor.u32 %v1557_v2, %v1556_v42  ;;  %v1581_v37 = vrot.slane %v1579_v63, 7  ;;  %v1560_v35 = vrot.slane %v1556_v42, 4  ;;  %v6930_v56 = vld [vmem:[%s8408_s3 + $0xf8] sm:$0xff]  }
 0x272   : > { %1788 = vst [vmem:[#allocation2 + $0x90] sm:$0xf] %v1787_v33  ;;  %v1562_v44 = vshrl.u32 %v5645_v20, 16  ;;  %v1565_v58 = vshll.u32 %v5645_v20, 16  ;;  %v2129_v62 = vor.u32 %v2128_v46, %v2124_v38  ;;  %v2133_v3 = vrot.slane %v2131_v47, 1 }
 0x273   : > { %v1780_v0 = vsel %vm6624_vm11, %v1559_v34, %v1779_v26  ;;  %v1584_v54 = vor.u32 %v1582_v31, %v1581_v37  ;;  %v1586_v18 = vrot.slane %v1581_v37, 4  ;;  %v2114_v43 = vshll.u32 %v6899_v13, 16  ;;  %v2198_v10 = vpop.permute.xlu0 %2197 }
 0x274   : > { %1781 = vst [vmem:[#allocation2 + $0x84] sm:$0xf] %v1780_v0  ;;  %v1564_v61 = vrot.slane %v1562_v44, 7  ;;  %v5714_v27 = vpop.f32.mrf.mxu0  ;;  %v2119_v8 = vshll.u32 %v6907_v41, 16  ;;  %v6924_v23 = vsel %vm2275_vm2, %v6688_v59, %v2198_v10  ;;  %v2134_v60 = vsel %vm354_vm1, %v2129_v62, %v2133_v3  ;;  %v6951_v44 = vld [vmem:[%s8408_s3 + $0xf0] sm:$0xff]  }
 0x275   : > { %v1585_v50 = vsel %vm6634_vm14, %v1577_v29, %v1584_v54  ;;  %v1791_v1 = vsel %vm6641_vm15, %v1586_v18, %v1790_v49  ;;  %v1174_v9 = vadd.f32 %v6917_v22, %v5714_v27  ;;  %2554 = vmatmul.mubr.bf16.vlgmr.msra.gmra.mxu1 %v6924_v23  ;;  %2215 = vrot.lane.b32.xlu0 %v2134_v60, %s5940_s11  ;;  %v2112_v26 = vshrl.u32 %v6899_v13, 16  ;;  %v1800_v54 = vld [vmem:[#allocation2 + $0xa8] sm:$0xf]  ;;  %v1793_v10 = vld [vmem:[#allocation2 + $0x9c] sm:$0xf] }
 0x276   : > { %1789 = vst.msk [vmem:[#allocation2 + $0x94] sm:$0xf] %vm1228_vm8, %v1585_v50  ;;  %1792 = vst [vmem:[#allocation2 + $0x98] sm:$0x1] %v1791_v1  ;;  %v1567_v16 = vor.u32 %v1565_v58, %v1564_v61  ;;  %v1569_v17 = vrot.slane %v1564_v61, 4  ;;  %v1165_v36 = vpop.f32.mrf.mxu0  ;;  %v2116_v63 = vrot.slane %v2114_v43, 1  ;;  %5520 = vmatprep.mubr.msk.bf16.mxu1 %vm2275_vm2, %v6894_v4  ;;  %5732 = vmatpush1.bf16.msra.mxu1 %v6930_v56 }
 0x277   : > { %v1222_v42 = vmax.f32 %v1174_v9, 0.0  ;;  %v1166_v2 = vadd.f32 %v6917_v22, %v1165_v36  ;;  %v2236_v20 = vrot.slane %v6749_v52, 1  ;;  %v2237_v32 = vrot.slane %v6759_v30, 1  ;;  %5721 = vmatprep.subr.bf16.mxu1 %v5939_v40  ;;  %v2200_v30 = vpop.permute.xlu1 %2199 }
 0x278   : > { %v1568_v59 = vsel %vm6634_vm14, %v1560_v35, %v1567_v16  ;;  %v1784_v29 = vsel %vm6641_vm15, %v1569_v17, %v1783_v6  ;;  %v5715_v31 = vpop.f32.mrf.mxu0  ;;  %v2117_v38 = vor.u32 %v2116_v63, %v2112_v26  ;;  %v2121_v35 = vrot.slane %v2119_v8, 1  ;;  %v6972_v17 = vld [vmem:[%s8408_s3 + $0xe8] sm:$0xff]  }
 0x279   : > { %1782 = vst.msk [vmem:[#allocation2 + $0x88] sm:$0xf] %vm1228_vm8, %v1568_v59  ;;  %1785 = vst [vmem:[#allocation2 + $0x8c] sm:$0x1] %v1784_v29  ;;  %v5650_v33 = vpack.c.bf16 %v1222_v42, %v1222_v42  ;;  %v1220_v34 = vmax.f32 %v1166_v2, 0.0  ;;  %v1177_v37 = vadd.f32 %v6917_v22, %v5715_v31  ;;  %v6956_v61 = vsel %vm611_vm0, %v2236_v20, %v2237_v32 }
 0x27a   : > { %v1168_v49 = vpop.f32.mrf.mxu0  ;;  %v2122_v18 = vsel %vm354_vm1, %v2117_v38, %v2121_v35  ;;  %v2239_v27 = vrot.slane %v6737_v14, 1  ;;  %5733 = vmatpush1.bf16.msra.mxu1 %v6951_v44  ;;  %v6966_v9 = vsel %vm2275_vm2, %v6681_v11, %v2200_v30  ;;  %v2240_v16 = vrot.slane %v6741_v55, 1  ;;  %v1804_v59 = vld [vmem:[#allocation2 + $0xb0] sm:$0x1]  ;;  %v6990_v38 = vld [vmem:[%s8408_s3 + $0xe0] sm:$0xff]  }
 0x27b   : > { %v1605_v46 = vshrl.u32 %v5650_v33, 16  ;;  %v5648_v47 = vpack.c.bf16 %v1220_v34, %v1220_v34  ;;  %v1223_v0 = vmax.f32 %v1177_v37, 0.0  ;;  %v1169_v58 = vadd.f32 %v6917_v22, %v1168_v49  ;;  %2213 = vrot.lane.b32.xlu1 %v2122_v18, %s5940_s11  ;;  %5722 = vmatprep.subr.bf16.mxu1 %v5939_v40 }
 0x27c   : > { %v1608_v3 = vshll.u32 %v5650_v33, 16 }
 0x27d   : > { %v1607_v62 = vrot.slane %v1605_v46, 7  ;;  %v1588_v43 = vshrl.u32 %v5648_v47, 16  ;;  %v5651_v50 = vpack.c.bf16 %v1223_v0, %v1223_v0  ;;  %v6961_v1 = vld [vmem:[#allocation2 + $0x90] sm:$0xff]   ;;  %v1591_v6 = vshll.u32 %v5648_v47, 16  ;;  %2562 = vmatmul.mubr.bf16.gmra.mxu1 %v6966_v9 }
 0x27e   : > { %v1221_v8 = vmax.f32 %v1169_v58, 0.0  ;;  %v6975_v26 = vld [vmem:[#allocation2 + $0x98] ss:$0 sps:$4 sm:$0x11]   ;;  %5521 = vmatprep.mubr.msk.bf16.mxu1 %vm2275_vm2, %v6956_v61  ;;  %v2148_v55 = vshrl.u32 %v6961_v1, 16  ;;  %v2150_v29 = vshll.u32 %v6961_v1, 16  ;;  %5734 = vmatpush1.bf16.msra.mxu1 %v6972_v17 }
 0x27f   : > { %v1610_v36 = vor.u32 %v1608_v3, %v1607_v62  ;;  %v1611_v60 = vrot.slane %v1607_v62, 4  ;;  %v1590_v42 = vrot.slane %v1588_v43, 7  ;;  %v1613_v2 = vshrl.u32 %v5651_v50, 16  ;;  %5723 = vmatprep.subr.bf16.mxu1 %v5939_v40 }
 0x280   : > { %v1616_v63 = vshll.u32 %v5651_v50, 16  ;;  %v5649_v11 = vpack.c.bf16 %v1221_v8, %v1221_v8  ;;  %v6981_v31 = vld [vmem:[#allocation2 + $0x84] sm:$0xff]   ;;  %v2152_v46 = vrot.slane %v2150_v29, 1  ;;  %v6996_v47 = vld [vmem:[#allocation2 + $0x8c] ss:$0 sps:$4 sm:$0x11]  }
 0x281   : > { %v1801_v20 = vsel %vm6624_vm11, %v1610_v36, %v1800_v54  ;;  %v1593_v32 = vor.u32 %v1591_v6, %v1590_v42  ;;  %v1594_v33 = vrot.slane %v1590_v42, 4  ;;  %v1615_v34 = vrot.slane %v1613_v2, 7  ;;  %v2202_v37 = vpop.permute.xlu0 %2201  ;;  %v1797_v8 = vld [vmem:[#allocation2 + $0xa4] sm:$0x1] }
 0x282   : > { %1802 = vst [vmem:[#allocation2 + $0xa8] sm:$0xf] %v1801_v20  ;;  %v1596_v35 = vshrl.u32 %v5649_v11, 16  ;;  %v1599_v49 = vshll.u32 %v5649_v11, 16  ;;  %v6994_v30 = vsel %vm2275_vm2, %v6749_v52, %v2202_v37  ;;  %v2155_v58 = vshll.u32 %v6975_v26, 16  ;;  %5735 = vmatpush1.bf16.msra.mxu1 %v6990_v38 }
 0x283   : > { %v1794_v0 = vsel %vm6624_vm11, %v1593_v32, %v1793_v10  ;;  %v1618_v54 = vor.u32 %v1616_v63, %v1615_v34  ;;  %v1620_v18 = vrot.slane %v1615_v34, 4  ;;  %v2153_v43 = vor.u32 %v2152_v46, %v2148_v55  ;;  %5724 = vmatprep.subr.bf16.mxu1 %v5939_v40  ;;  %v7023_v34 = vld [vmem:[%s8408_s3 + $0xd8] sm:$0xff]  }
 0x284   : > { %1795 = vst [vmem:[#allocation2 + $0x9c] sm:$0xf] %v1794_v0  ;;  %v1598_v62 = vrot.slane %v1596_v35, 7  ;;  %v5718_v3 = vpop.f32.mrf.mxu0  ;;  %v2136_v50 = vshrl.u32 %v6981_v31, 16  ;;  %v2138_v6 = vshll.u32 %v6981_v31, 16  ;;  %v2157_v42 = vrot.slane %v2155_v58, 1 }
 0x285   : > { %v1619_v52 = vsel %vm6634_vm14, %v1611_v60, %v1618_v54  ;;  %v1805_v10 = vsel %vm6641_vm15, %v1620_v18, %v1804_v59  ;;  %v1190_v36 = vadd.f32 %v6917_v22, %v5718_v3  ;;  %v2143_v29 = vshll.u32 %v6996_v47, 16  ;;  %2570 = vmatmul.mubr.bf16.gmra.mxu1 %v6994_v30  ;;  %v2204_v3 = vpop.permute.xlu1 %2203 }
 0x286   : > { %1803 = vst.msk [vmem:[#allocation2 + $0xac] sm:$0xf] %vm1228_vm8, %v1619_v52  ;;  %1806 = vst [vmem:[#allocation2 + $0xb0] sm:$0x1] %v1805_v10  ;;  %v1601_v2 = vor.u32 %v1599_v49, %v1598_v62  ;;  %v1603_v63 = vrot.slane %v1598_v62, 4  ;;  %v1181_v11 = vpop.f32.mrf.mxu0  ;;  %v2140_v55 = vrot.slane %v2138_v6, 1  ;;  %v7016_v60 = vsel %vm611_vm0, %v2239_v27, %v2240_v16  ;;  %5736 = vmatpush1.bf16.msra.mxu1 %v7023_v34 }
 0x287   : > { %v1226_v59 = vmax.f32 %v1190_v36, 0.0  ;;  %v1182_v20 = vadd.f32 %v6917_v22, %v1181_v11  ;;  %v2158_v32 = vsel %vm354_vm1, %v2153_v43, %v2157_v42  ;;  %5522 = vmatprep.mubr.msk.bf16.mxu1 %vm2275_vm2, %v7016_v60  ;;  %v2145_v49 = vrot.slane %v2143_v29, 1  ;;  %5725 = vmatprep.subr.bf16.mxu1 %v5939_v40  ;;  %v7043_v52 = vld [vmem:[%s8408_s3 + $0xd0] sm:$0xff]   ;;  %v1814_v10 = vld [vmem:[#allocation2 + $0xc0] sm:$0xf] }
 0x288   : > { %v1602_v37 = vsel %vm6634_vm14, %v1594_v33, %v1601_v2  ;;  %v1798_v35 = vsel %vm6641_vm15, %v1603_v63, %v1797_v8  ;;  %2219 = vrot.lane.b32.xlu0 %v2158_v32, %s5940_s11  ;;  %v5719_v27 = vpop.f32.mrf.mxu0  ;;  %v2141_v16 = vor.u32 %v2140_v55, %v2136_v50  ;;  %v2242_v58 = vrot.slane %v6807_v48, 1 }
 0x289   : > { %1796 = vst.msk [vmem:[#allocation2 + $0xa0] sm:$0xf] %vm1228_vm8, %v1602_v37  ;;  %1799 = vst [vmem:[#allocation2 + $0xa4] sm:$0x1] %v1798_v35  ;;  %v5654_v46 = vpack.c.bf16 %v1226_v59, %v1226_v59  ;;  %v1224_v0 = vmax.f32 %v1182_v20, 0.0  ;;  %v1193_v54 = vadd.f32 %v6917_v22, %v5719_v27  ;;  %v2243_v62 = vrot.slane %v6816_v45, 1 }
 0x28a   : > { %v2146_v33 = vsel %vm354_vm1, %v2141_v16, %v2145_v49  ;;  %v1184_v18 = vpop.f32.mrf.mxu0  ;;  %v2245_v36 = vrot.slane %v6798_v12, 1  ;;  %v2246_v45 = vrot.slane %v6800_v15, 1  ;;  %5737 = vmatpush1.bf16.msra.mxu1 %v7043_v52  ;;  %v1807_v59 = vld [vmem:[#allocation2 + $0xb4] sm:$0xf]  ;;  %v7053_v20 = vsel %vm2275_vm2, %v6737_v14, %v2204_v3  ;;  %v7062_v37 = vld [vmem:[%s8408_s3 + $0xc8] sm:$0xff]  }
 0x28b   : > { %v1639_v43 = vshrl.u32 %v5654_v46, 16  ;;  %v5652_v50 = vpack.c.bf16 %v1224_v0, %v1224_v0  ;;  %v1227_v6 = vmax.f32 %v1193_v54, 0.0  ;;  %2217 = vrot.lane.b32.xlu1 %v2146_v33, %s5940_s11  ;;  %v1185_v8 = vadd.f32 %v6917_v22, %v1184_v18  ;;  %5726 = vmatprep.subr.bf16.mxu1 %v5939_v40 }
 0x28c   : > { %v1642_v2 = vshll.u32 %v5654_v46, 16  ;;  %v7056_v22 = vsel %vm611_vm0, %v2242_v58, %v2243_v62 }
 0x28d   : > { %v1641_v42 = vrot.slane %v1639_v43, 7  ;;  %v1622_v63 = vshrl.u32 %v5652_v50, 16  ;;  %v5655_v11 = vpack.c.bf16 %v1227_v6, %v1227_v6  ;;  %v7048_v55 = vld [vmem:[#allocation2 + $0xa8] sm:$0xff]   ;;  %v1625_v29 = vshll.u32 %v5652_v50, 16  ;;  %2578 = vmatmul.mubr.bf16.gmra.mxu1 %v7053_v20 }
 0x28e   : > { %v1225_v32 = vmax.f32 %v1185_v8, 0.0  ;;  %v7065_v46 = vld [vmem:[#allocation2 + $0xb0] ss:$0 sps:$4 sm:$0x11]   ;;  %5523 = vmatprep.mubr.msk.bf16.mxu1 %vm2275_vm2, %v7056_v22  ;;  %v2172_v54 = vshrl.u32 %v7048_v55, 16  ;;  %v2174_v33 = vshll.u32 %v7048_v55, 16  ;;  %5738 = vmatpush1.bf16.msra.mxu1 %v7062_v37 }
 0x28f   : > { %v1644_v35 = vor.u32 %v1642_v2, %v1641_v42  ;;  %v1645_v27 = vrot.slane %v1641_v42, 4  ;;  %v1624_v16 = vrot.slane %v1622_v63, 7  ;;  %v1647_v49 = vshrl.u32 %v5655_v11, 16  ;;  %v1818_v50 = vld [vmem:[#allocation2 + $0xc8] sm:$0x1]  ;;  %5727 = vmatprep.subr.bf16.mxu1 %v5939_v40 }
 0x290   : > { %v1650_v14 = vshll.u32 %v5655_v11, 16  ;;  %v5653_v0 = vpack.c.bf16 %v1225_v32, %v1225_v32  ;;  %v7071_v18 = vld [vmem:[#allocation2 + $0x9c] sm:$0xff]   ;;  %v2206_v6 = vpop.permute.xlu0 %2205  ;;  %v2176_v63 = vrot.slane %v2174_v33, 1  ;;  %v7080_v11 = vld [vmem:[#allocation2 + $0xa4] ss:$0 sps:$4 sm:$0x11]  }
 0x291   : > { %v1815_v58 = vsel %vm6624_vm11, %v1644_v35, %v1814_v10  ;;  %v1627_v62 = vor.u32 %v1625_v29, %v1624_v16  ;;  %v1628_v3 = vrot.slane %v1624_v16, 4  ;;  %v1649_v43 = vrot.slane %v1647_v49, 7  ;;  %v7089_v16 = vld [vmem:[%s8408_s3 + $0xc0] sm:$0xff]  }
 0x292   : > { %1816 = vst [vmem:[#allocation2 + $0xc0] sm:$0xf] %v1815_v58  ;;  %v1630_v8 = vshrl.u32 %v5653_v0, 16  ;;  %v1633_v42 = vshll.u32 %v5653_v0, 16  ;;  %v7078_v2 = vsel %vm2275_vm2, %v6807_v48, %v2206_v6  ;;  %v2179_v35 = vshll.u32 %v7065_v46, 16  ;;  %5739 = vmatpush1.bf16.msra.mxu1 %v7089_v16 }
 0x293   : > { %v1808_v10 = vsel %vm6624_vm11, %v1627_v62, %v1807_v59  ;;  %v1652_v29 = vor.u32 %v1650_v14, %v1649_v43  ;;  %v1654_v32 = vrot.slane %v1649_v43, 4  ;;  %v2177_v49 = vor.u32 %v2176_v63, %v2172_v54  ;;  %v1811_v14 = vld [vmem:[#allocation2 + $0xbc] sm:$0x1]  ;;  %5728 = vmatprep.subr.bf16.mxu1 %v5939_v40 }
 0x294   : > { %1809 = vst [vmem:[#allocation2 + $0xb4] sm:$0xf] %v1808_v10  ;;  %v1632_v48 = vrot.slane %v1630_v8, 7  ;;  %v2160_v0 = vshrl.u32 %v7071_v18, 16  ;;  %v2162_v33 = vshll.u32 %v7071_v18, 16  ;;  %v2196_v58 = vpop.permute.xlu0 %2195  ;;  %v2181_v62 = vrot.slane %v2179_v35, 1 }
 0x295   : > { %v1653_v39 = vsel %vm6634_vm14, %v1645_v27, %v1652_v29  ;;  %v1819_v59 = vsel %vm6641_vm15, %v1654_v32, %v1818_v50  ;;  %v2167_v43 = vshll.u32 %v7080_v11, 16  ;;  %v2277_v8 = vsel %vm2275_vm2, %v6754_v19, %v2196_v58  ;;  %2586 = vmatmul.mubr.bf16.gmra.mxu1 %v7078_v2  ;;  %v7137_v29 = vld [vmem:[#allocation2 + $0xd4] ss:$0 sps:$4 sm:$0x11]  }
 0x296   : > { %1817 = vst.msk [vmem:[#allocation2 + $0xc4] sm:$0xf] %vm1228_vm8, %v1653_v39  ;;  %1820 = vst [vmem:[#allocation2 + $0xc8] sm:$0x1] %v1819_v59  ;;  %v1635_v54 = vor.u32 %v1633_v42, %v1632_v48  ;;  %v1637_v6 = vrot.slane %v1632_v48, 4  ;;  %v2164_v63 = vrot.slane %v2162_v33, 1  ;;  %v7109_v27 = vsel %vm611_vm0, %v2245_v36, %v2246_v45  ;;  %2790 = vmatmul.mubr.bf16.vlgmr.msra.gmra.mxu0 %v2277_v8 }
 0x297   : > { %v2182_v50 = vsel %vm354_vm1, %v2177_v49, %v2181_v62  ;;  %5524 = vmatprep.mubr.msk.bf16.mxu1 %vm2275_vm2, %v7109_v27  ;;  %5548 = vmatprep.mubr.msk.bf16.mxu0 %vm2275_vm2, %v6711_v7  ;;  %v2169_v10 = vrot.slane %v2167_v43, 1  ;;  %v7123_v36 = vld [vmem:[%s8408_s3 + $0x118] sm:$0xff]   ;;  %v2208_v7 = vpop.permute.xlu1 %2207  ;;  %v2248_v45 = vrot.slane %v6855_v25, 1  ;;  %v2927_v43 = vshrl.u32 %v7131_v57, 16 }
 0x298   : > { %v1636_v42 = vsel %vm6634_vm14, %v1628_v3, %v1635_v54  ;;  %v1812_v19 = vsel %vm6641_vm15, %v1637_v6, %v1811_v14  ;;  %v2165_v15 = vor.u32 %v2164_v63, %v2160_v0  ;;  %2223 = vrot.lane.b32.xlu0 %v2182_v50, %s5940_s11  ;;  %3047 = vmatpush1.bf16.msra.mxu0 %v6930_v56  ;;  %v2249_v3 = vrot.slane %v6858_v28, 1  ;;  %v7142_v56 = vld [vmem:[%s8408_s3 + $0x110] sm:$0xff]  }
 0x299   : > { %1810 = vst.msk [vmem:[#allocation2 + $0xb8] sm:$0xf] %vm1228_vm8, %v1636_v42  ;;  %1813 = vst [vmem:[#allocation2 + $0xbc] sm:$0x1] %v1812_v19  ;;  %3048 = vmatprep.subr.bf16.mxu0 %v5939_v40  ;;  %5740 = vmatpush2.bf16.msra.mxu1 %v7123_v36  ;;  %v7149_v35 = vsel %vm2275_vm2, %v6798_v12, %v2208_v7  ;;  %v2929_v28 = vshll.u32 %v7131_v57, 16  ;;  %v7165_v12 = vld [vmem:[%s8408_s3 + $0x108] sm:$0xff]  }
 0x29a   : > { %v2170_v53 = vsel %vm354_vm1, %v2165_v15, %v2169_v10  ;;  %5729 = vmatprep.subr.bf16.mxu1 %v5939_v40  ;;  %v7158_v49 = vsel %vm611_vm0, %v2248_v45, %v2249_v3  ;;  %v2934_v6 = vshll.u32 %v7137_v29, 16  ;;  %v2252_v8 = vrot.slane %v6850_v24, 1  ;;  %v5869_v3 = vld [vmem:[%s8408_s3 + $0x100] sm:$0xff]  }
 0x29b   : > { %2221 = vrot.lane.b32.xlu1 %v2170_v53, %s5940_s11  ;;  %v2931_v54 = vrot.slane %v2929_v28, 1  ;;  %vm5211_vm8 = vcmask 1047559  }
 0x29c   : > { %3049 = vmatpush1.bf16.msra.mxu0 %v6951_v44  ;;  %v2936_v45 = vrot.slane %v2934_v6, 1 }
 0x29d   : > { %v7144_v32 = vld [vmem:[#allocation2 + $0xc0] sm:$0xff]   ;;  %v7151_v48 = vld [vmem:[#allocation2 + $0xc8] ss:$0 sps:$4 sm:$0x11]   ;;  %3050 = vmatprep.subr.bf16.mxu0 %v5939_v40  ;;  %5741 = vmatpush2.bf16.msra.mxu1 %v7142_v56  ;;  %v2932_v7 = vor.u32 %v2931_v54, %v2927_v43  ;;  %v2267_v43 = vrot.slane %v7080_v11, 1  ;;  %v2269_v11 = vrot.slane %v7048_v55, 1 }
 0x29e   : > { %2594 = vmatmul.mubr.bf16.gmra.mxu1 %v7149_v35  ;;  %2798 = vmatmul.mubr.bf16.gmra.mxu0 %v6924_v23  ;;  %v2359_v44 = vshll.u32 %v7144_v32, 16  ;;  %v2364_v0 = vshll.u32 %v7151_v48, 16  ;;  %v2210_v39 = vpop.permute.xlu1 %2209  ;;  %v2251_v23 = vrot.slane %v6848_v5, 1  ;;  %v2357_v59 = vshrl.u32 %v7144_v32, 16 }
 0x29f   : > { %5525 = vmatprep.mubr.msk.bf16.mxu1 %vm2275_vm2, %v7158_v49  ;;  %5549 = vmatprep.mubr.msk.bf16.mxu0 %vm2275_vm2, %v6894_v4  ;;  %v2937_v28 = vsel %vm354_vm1, %v2932_v7, %v2936_v45 }
 0x2a0   : > { %v7172_v33 = vld [vmem:[#allocation2 + $0xb4] sm:$0xff]   ;;  %v2361_v14 = vrot.slane %v2359_v44, 1  ;;  %v7176_v58 = vld [vmem:[#allocation2 + $0xbc] ss:$0 sps:$4 sm:$0x11]   ;;  %3051 = vmatpush1.bf16.msra.mxu0 %v6972_v17  ;;  %5730 = vmatprep.subr.bf16.mxu1 %v5939_v40  ;;  %v2366_v50 = vrot.slane %v2364_v0, 1  ;;  %v7190_v17 = vsel %vm2275_vm2, %v6855_v25, %v2210_v39  ;;  %v7199_v25 = vsel %vm611_vm0, %v2251_v23, %v2252_v8  ;;  %v2212_v44 = vpop.permute.xlu0 %2211 }
 0x2a1   : > { %v2186_v62 = vshll.u32 %v7172_v33, 16  ;;  %3052 = vmatprep.subr.bf16.mxu0 %v5939_v40  ;;  %5742 = vmatpush2.bf16.msra.mxu1 %v7165_v12  ;;  %v2191_v42 = vshll.u32 %v7176_v58, 16  ;;  %v2184_v19 = vshrl.u32 %v7172_v33, 16  ;;  %v2254_v0 = vrot.slane %v6899_v13, 1 }
 0x2a2   : > { %v2362_v63 = vor.u32 %v2361_v14, %v2357_v59  ;;  %5731 = vmatprep.subr.bf16.mxu1 %v5939_v40  ;;  %v2255_v39 = vrot.slane %v6907_v41, 1  ;;  %v7220_v23 = vsel %vm2275_vm2, %v6848_v5, %v2212_v44  ;;  %v2257_v5 = vrot.slane %v6891_v21, 1 }
 0x2a3   : > { %v2188_v15 = vrot.slane %v2186_v62, 1  ;;  %v2193_v53 = vrot.slane %v2191_v42, 1  ;;  %v2264_v59 = vrot.slane %v6975_v26, 1  ;;  %v2266_v26 = vrot.slane %v7071_v18, 1 }
 0x2a4   : > { %v2367_v10 = vsel %vm354_vm1, %v2362_v63, %v2366_v50  ;;  %3053 = vmatpush1.bf16.msra.mxu0 %v6990_v38  ;;  %v2270_v8 = vrot.slane %v7065_v46, 1  ;;  %v2272_v46 = vrot.slane %v7172_v33, 1  ;;  %v2273_v42 = vrot.slane %v7176_v58, 1 }
 0x2a5   : > { %2368 = vrot.lane.b32.xlu0 %v2367_v10, %s5940_s11  ;;  %v2189_v24 = vor.u32 %v2188_v15, %v2184_v19  ;;  %3054 = vmatprep.subr.bf16.mxu0 %v5939_v40  ;;  %v7311_v54 = vsel %vm611_vm0, %v2266_v26, %v2267_v43  ;;  %v2370_v58 = vrot.slane %v7144_v32, 1  ;;  %v2371_v10 = vrot.slane %v7151_v48, 1 }
 0x2a6   : > { %2602 = vmatmul.mubr.bf16.gmra.mxu1 %v7190_v17  ;;  %2806 = vmatmul.mubr.bf16.gmra.mxu0 %v6966_v9  ;;  %v7326_v63 = vsel %vm611_vm0, %v2269_v11, %v2270_v8  ;;  %v7341_v19 = vsel %vm611_vm0, %v2272_v46, %v2273_v42 }
 0x2a7   : > { %5526 = vmatprep.mubr.msk.bf16.mxu1 %vm2275_vm2, %v7199_v25  ;;  %5550 = vmatprep.mubr.msk.bf16.mxu0 %vm2275_vm2, %v6956_v61  ;;  %v2194_v38 = vsel %vm354_vm1, %v2189_v24, %v2193_v53  ;;  %v7356_v24 = vsel %vm611_vm0, %v2370_v58, %v2371_v10  ;;  %vm5199_vm1 = vcmask 1041409  }
 0x2a8   : > { %2225 = vrot.lane.b32.xlu1 %v2194_v38, %s5940_s11  ;;  %3055 = vmatpush1.bf16.msra.mxu0 %v7023_v34  ;;  %v7225_v34 = vsel %vm611_vm0, %v2254_v0, %v2255_v39 }
 0x2a9   : > { %3056 = vmatprep.subr.bf16.mxu0 %v5939_v40  ;;  %5743 = vmatpush2.bf16.msra.mxu1 %v5869_v3 }
 0x2ac   : > { %2938 = vrot.lane.b32.xlu1 %v2937_v28, %s5940_s11  ;;  %3057 = vmatpush1.bf16.msra.mxu0 %v7043_v52  ;;  %s243_s11 = sand.u32 1, %s5925_s22  }
 0x2ad   : > { %3058 = vmatprep.subr.bf16.mxu0 %v5939_v40  ;;  %s5391_s17 = sshll.u32 %s243_s11, 8  ;;  %s8321_s26 = scalar_lea.sflag [#allocation4], %s243_s11 }
 0x2ae   : > { %2610 = vmatmul.mubr.bf16.gmra.mxu1 %v7220_v23  ;;  %2814 = vmatmul.mubr.bf16.gmra.mxu0 %v6994_v30  ;;  %s7490_s20 = scalar_lea.vmem [#allocation3], %s5391_s17 }
 0x2af   : > { %5527 = vmatprep.mubr.msk.bf16.mxu1 %vm2275_vm2, %v7225_v34  ;;  %5551 = vmatprep.mubr.msk.bf16.mxu0 %vm2275_vm2, %v7016_v60  ;;  %s5297_s17 = sshll.u32 %s7490_s20, 4  ;;  %s8311_s17 = int_to_ptr.vmem [resolvable:$true] %s5297_s17 }
 0x2b0   : > { %3059 = vmatpush1.bf16.msra.mxu0 %v7062_v37  ;;  %s5873_s9 = scalar_lea.vmem %s8311_s17, 4096  ;;  %p5880_p0 = scmp.lt.s32.totalorder %s8311_s17, %s5878_s10 }
 0x2b1   : > { %3060 = vmatprep.subr.bf16.mxu0 %v5939_v40  ;;  %p5874_p11 = scmp.ne.s32.totalorder %s8311_s17, %s5873_s9  ;;  %p5881_p1 = scmp.lt.s32.totalorder %s5879_s12, %s5873_s9 }
 0x2b3   : > { %p5875_p12 = pnand %p5874_p11, %p6017_p5  ;;  %p5882_p2 = por %p5881_p1, %p5880_p0 }
 0x2b4   : > { %3061 = vmatpush1.bf16.msra.mxu0 %v7089_v16 }
 0x2b5   : > { %3070 = vmatprep.subr.bf16.mxu0 %v5939_v40  ;;  %p5876_p13 = pneg %p5875_p12 }
 0x2b6   : > { %2822 = vmatmul.mubr.bf16.gmra.mxu0 %v7053_v20 }
 0x2b7   : > { %5552 = vmatprep.mubr.msk.bf16.mxu0 %vm2275_vm2, %v7056_v22  ;;  %p5883_p3 = pnand %p5882_p2, %p5876_p13 }
 0x2b8   : > { %3071 = vmatpush2.bf16.msra.mxu0 %v7123_v36  ;;  %v2261_v36 = vrot.slane %v6996_v47, 1  ;;  %v2263_v47 = vrot.slane %v6961_v1, 1 }
 0x2b9   : > { %3072 = vmatprep.subr.bf16.mxu0 %v5939_v40 }
 0x2ba   : > { %v7296_v14 = vsel %vm611_vm0, %v2263_v47, %v2264_v59 }
 0x2bc   : > { %3073 = vmatpush2.bf16.msra.mxu0 %v7142_v56 }
 0x2bd   : > { %3074 = vmatprep.subr.bf16.mxu0 %v5939_v40 }
 0x2be   : > { %2830 = vmatmul.mubr.bf16.gmra.mxu0 %v7078_v2 }
 0x2bf   : > { %5553 = vmatprep.mubr.msk.bf16.mxu0 %vm2275_vm2, %v7109_v27 }
 0x2c0   : > { %3075 = vmatpush2.bf16.msra.mxu0 %v7165_v12 }
 0x2c1   : > { %3076 = vmatprep.subr.bf16.mxu0 %v5939_v40  ;;  %v2258_v40 = vrot.slane %v6896_v51, 1  ;;  %v2260_v51 = vrot.slane %v6981_v31, 1 }
 0x2c3   : > { %v7266_v37 = vsel %vm611_vm0, %v2257_v5, %v2258_v40  ;;  %v7281_v56 = vsel %vm611_vm0, %v2260_v51, %v2261_v36 }
 0x2c4   : > { %3077 = vmatpush2.bf16.msra.mxu0 %v5869_v3 }
 0x2c6   : > { %2838 = vmatmul.mubr.bf16.gmra.mxu0 %v7149_v35 }
 0x2c7   : > { %5554 = vmatprep.mubr.msk.bf16.mxu0 %vm2275_vm2, %v7158_v49 }
 0x2ce   : > { %2846 = vmatmul.mubr.bf16.gmra.mxu0 %v7190_v17 }
 0x2cf   : > { %5555 = vmatprep.mubr.msk.bf16.mxu0 %vm2275_vm2, %v7199_v25 }
 0x2d6   : > { %2854 = vmatmul.mubr.bf16.gmra.mxu0 %v7220_v23 }
 0x2d7   : > { %5556 = vmatprep.mubr.msk.bf16.mxu0 %vm2275_vm2, %v7225_v34 }
 0x2e7   : > { %v2216_v16 = vpop.permute.xlu0 %2215 }
 0x2ed   : > { %v2214_v41 = vpop.permute.xlu1 %2213 }
 0x2ee   : > { %v7261_v52 = vsel %vm2275_vm2, %v6899_v13, %v2214_v41  ;;  %v7276_v13 = vsel %vm2275_vm2, %v6891_v21, %v2216_v16 }
 0x2ef   : > { %2618 = vmatmul.mubr.bf16.gmra.mxu1 %v7261_v52  ;;  %2862 = vmatmul.mubr.bf16.gmra.mxu0 %v7261_v52 }
 0x2f0   : > { %5528 = vmatprep.mubr.msk.bf16.mxu1 %vm2275_vm2, %v7266_v37  ;;  %5557 = vmatprep.mubr.msk.bf16.mxu0 %vm2275_vm2, %v7266_v37 }
 0x2f7   : > { %2626 = vmatmul.mubr.bf16.gmra.mxu1 %v7276_v13  ;;  %2870 = vmatmul.mubr.bf16.gmra.mxu0 %v7276_v13 }
 0x2f8   : > { %5529 = vmatprep.mubr.msk.bf16.mxu1 %vm2275_vm2, %v7281_v56  ;;  %5558 = vmatprep.mubr.msk.bf16.mxu0 %vm2275_vm2, %v7281_v56 }
 0x2fa   : > { %v2220_v62 = vpop.permute.xlu0 %2219 }
 0x2fd   : > { %v2218_v12 = vpop.permute.xlu1 %2217 }
 0x2fe   : > { %v7291_v21 = vsel %vm2275_vm2, %v6981_v31, %v2218_v12  ;;  %v7306_v31 = vsel %vm2275_vm2, %v6961_v1, %v2220_v62 }
 0x2ff   : > { %2634 = vmatmul.mubr.bf16.gmra.mxu1 %v7291_v21  ;;  %2878 = vmatmul.mubr.bf16.gmra.mxu0 %v7291_v21 }
 0x300   : > { %5530 = vmatprep.mubr.msk.bf16.mxu1 %vm2275_vm2, %v7296_v14  ;;  %5559 = vmatprep.mubr.msk.bf16.mxu0 %vm2275_vm2, %v7296_v14 }
 0x307   : > { %2642 = vmatmul.mubr.bf16.gmra.mxu1 %v7306_v31  ;;  %2886 = vmatmul.mubr.bf16.gmra.mxu0 %v7306_v31 }
 0x308   : > { %5531 = vmatprep.mubr.msk.bf16.mxu1 %vm2275_vm2, %v7311_v54  ;;  %5560 = vmatprep.mubr.msk.bf16.mxu0 %vm2275_vm2, %v7311_v54 }
 0x30a   : > { %v2224_v50 = vpop.permute.xlu0 %2223 }
 0x30d   : > { %v2222_v6 = vpop.permute.xlu1 %2221 }
 0x30e   : > { %v7321_v1 = vsel %vm2275_vm2, %v7071_v18, %v2222_v6  ;;  %v7336_v18 = vsel %vm2275_vm2, %v7048_v55, %v2224_v50 }
 0x30f   : > { %2650 = vmatmul.mubr.bf16.gmra.mxu1 %v7321_v1  ;;  %2894 = vmatmul.mubr.bf16.gmra.mxu0 %v7321_v1 }
 0x310   : > { %5532 = vmatprep.mubr.msk.bf16.mxu1 %vm2275_vm2, %v7326_v63  ;;  %5561 = vmatprep.mubr.msk.bf16.mxu0 %vm2275_vm2, %v7326_v63 }
 0x317   : > { %2658 = vmatmul.mubr.bf16.gmra.mxu1 %v7336_v18  ;;  %2902 = vmatmul.mubr.bf16.gmra.mxu0 %v7336_v18  ;;  %v2369_v53 = vpop.permute.xlu0 %2368 }
 0x318   : > { %5533 = vmatprep.mubr.msk.bf16.mxu1 %vm2275_vm2, %v7341_v19  ;;  %5562 = vmatprep.mubr.msk.bf16.mxu0 %vm2275_vm2, %v7341_v19  ;;  %v7364_v48 = vsel %vm2275_vm2, %v7144_v32, %v2369_v53 }
 0x31a   : > { %v2226_v15 = vpop.permute.xlu1 %2225 }
 0x31b   : > { %v7351_v55 = vsel %vm2275_vm2, %v7172_v33, %v2226_v15 }
 0x31f   : > { %2666 = vmatmul.mubr.bf16.gmra.mxu1 %v7351_v55  ;;  %2910 = vmatmul.mubr.bf16.gmra.mxu0 %v7351_v55 }
 0x320   : > { %5534 = vmatprep.mubr.msk.bf16.mxu1 %vm2275_vm2, %v7356_v24  ;;  %5601 = vmatprep.mubr.msk.bf16.mxu0 %vm2275_vm2, %v6894_v4 }
 0x327   : > { %2674 = vmatmul.mubr.bf16.gmra.mxu1 %v7364_v48  ;;  %3079 = vmatmul.mubr.bf16.vlgmr.msra.gmra.mxu0 %v6966_v9 }
 0x328   : > { %5602 = vmatprep.mubr.msk.bf16.mxu0 %vm2275_vm2, %v6956_v61  ;;  %5606 = vmatprep.mubr.msk.bf16.mxu1 %vm2275_vm2, %v7158_v49 }
 0x32f   : > { %3087 = vmatmul.mubr.bf16.gmra.mxu0 %v6994_v30  ;;  %3119 = vmatmul.mubr.bf16.vlgmr.msra.gmra.mxu1 %v7190_v17 }
 0x330   : > { %5603 = vmatprep.mubr.msk.bf16.mxu0 %vm2275_vm2, %v7016_v60  ;;  %5607 = vmatprep.mubr.msk.bf16.mxu1 %vm2275_vm2, %v7199_v25 }
 0x335   : > { %v2555_v4 = vpop.f32.mrf.mxu1 }
 0x337   : > { %v2557_v32 = vpop.f32.mrf.mxu1  ;;  %3095 = vmatmul.mubr.bf16.gmra.mxu0 %v7053_v20  ;;  %3127 = vmatmul.mubr.bf16.gmra.mxu1 %v7220_v23 }
 0x338   : > { %5604 = vmatprep.mubr.msk.bf16.mxu0 %vm2275_vm2, %v7056_v22  ;;  %5608 = vmatprep.mubr.msk.bf16.mxu1 %vm2275_vm2, %v7225_v34 }
 0x339   : > { %v2558_v61 = vpop.f32.mrf.mxu1 }
 0x33b   : > { %v2560_v9 = vpop.f32.mrf.mxu1 }
 0x33d   : > { %v2563_v30 = vpop.f32.mrf.mxu1 }
 0x33f   : > { %v2565_v49 = vpop.f32.mrf.mxu1  ;;  %3103 = vmatmul.mubr.bf16.gmra.mxu0 %v7078_v2  ;;  %3135 = vmatmul.mubr.bf16.gmra.mxu1 %v7261_v52 }
 0x340   : > { %5605 = vmatprep.mubr.msk.bf16.mxu0 %vm2275_vm2, %v7109_v27  ;;  %5609 = vmatprep.mubr.msk.bf16.mxu1 %vm2275_vm2, %v7266_v37 }
 0x341   : > { %v2566_v60 = vpop.f32.mrf.mxu1 }
 0x343   : > { %v2568_v20 = vpop.f32.mrf.mxu1 }
 0x345   : > { %v2571_v22 = vpop.f32.mrf.mxu1 }
 0x347   : > { %v2573_v33 = vpop.f32.mrf.mxu1  ;;  %3111 = vmatmul.mubr.bf16.gmra.mxu0 %v7149_v35  ;;  %3143 = vmatmul.mubr.bf16.gmra.mxu1 %v7276_v13 }
 0x348   : > { %5610 = vmatprep.mubr.msk.bf16.mxu1 %vm2275_vm2, %v7281_v56 }
 0x349   : > { %v2574_v2 = vpop.f32.mrf.mxu1 }
 0x34b   : > { %v2576_v17 = vpop.f32.mrf.mxu1 }
 0x34d   : > { %v2579_v7 = vpop.f32.mrf.mxu1 }
 0x34f   : > { %v2581_v45 = vpop.f32.mrf.mxu1  ;;  %3151 = vmatmul.mubr.bf16.gmra.mxu1 %v7291_v21 }
 0x350   : > { %5611 = vmatprep.mubr.msk.bf16.mxu1 %vm2275_vm2, %v7296_v14 }
 0x351   : > { %v2582_v27 = vpop.f32.mrf.mxu1 }
 0x353   : > { %v2584_v25 = vpop.f32.mrf.mxu1 }
 0x355   : > { %v2587_v38 = vpop.f32.mrf.mxu1 }
 0x356   : > { %v2791_v3 = vpop.f32.mrf.mxu0 }
 0x357   : > { %v7397_v28 = vadd.f32 %v2791_v3, %v2555_v4  ;;  %v2589_v35 = vpop.f32.mrf.mxu1  ;;  %3159 = vmatmul.mubr.bf16.gmra.mxu1 %v7306_v31 }
 0x358   : > { %v2793_v44 = vpop.f32.mrf.mxu0  ;;  %5612 = vmatprep.mubr.msk.bf16.mxu1 %vm2275_vm2, %v7311_v54 }
 0x359   : > { %v2590_v0 = vpop.f32.mrf.mxu1 }
 0x35a   : > { %v2794_v39 = vpop.f32.mrf.mxu0 }
 0x35b   : > { %v7402_v23 = vadd.f32 %v2794_v39, %v2558_v61  ;;  %v2592_v34 = vpop.f32.mrf.mxu1  ;;  %v2939_v61 = vpop.permute.xlu1 %2938 }
 0x35c   : > { %v2796_v5 = vpop.f32.mrf.mxu0 }
 0x35e   : > { %v2595_v40 = vpop.f32.mrf.mxu1  ;;  %v2799_v41 = vpop.f32.mrf.mxu0 }
 0x35f   : > { %v7404_v52 = vadd.f32 %v2799_v41, %v2563_v30  ;;  %3167 = vmatmul.mubr.bf16.gmra.mxu1 %v7321_v1 }
 0x360   : > { %v2597_v37 = vpop.f32.mrf.mxu1  ;;  %v2801_v16 = vpop.f32.mrf.mxu0  ;;  %5613 = vmatprep.mubr.msk.bf16.mxu1 %vm2275_vm2, %v7326_v63 }
 0x362   : > { %v2598_v51 = vpop.f32.mrf.mxu1  ;;  %v2802_v36 = vpop.f32.mrf.mxu0 }
 0x363   : > { %v7409_v13 = vadd.f32 %v2802_v36, %v2566_v60 }
 0x364   : > { %v2600_v56 = vpop.f32.mrf.mxu1  ;;  %v2804_v12 = vpop.f32.mrf.mxu0 }
 0x366   : > { %v2603_v47 = vpop.f32.mrf.mxu1  ;;  %v2807_v59 = vpop.f32.mrf.mxu0 }
 0x367   : > { %v7411_v21 = vadd.f32 %v2807_v59, %v2571_v22  ;;  %3175 = vmatmul.mubr.bf16.gmra.mxu1 %v7336_v18  ;;  %v2940_v18 = vrot.slane %v7131_v57, 1 }
 0x368   : > { %v2605_v14 = vpop.f32.mrf.mxu1  ;;  %v2809_v62 = vpop.f32.mrf.mxu0  ;;  %5614 = vmatprep.mubr.msk.bf16.mxu1 %vm2275_vm2, %v7341_v19  ;;  %v2941_v19 = vrot.slane %v7137_v29, 1  ;;  %v2944_v29 = vsel %vm2275_vm2, %v7131_v57, %v2939_v61 }
 0x36a   : > { %v2606_v26 = vpop.f32.mrf.mxu1  ;;  %v2810_v43 = vpop.f32.mrf.mxu0  ;;  %v2942_v4 = vsel %vm611_vm0, %v2940_v18, %v2941_v19  ;;  %vm4046_vm0 = vcmask 517120  }
 0x36b   : > { %v7416_v31 = vadd.f32 %v2810_v43, %v2574_v2 }
 0x36c   : > { %v2608_v54 = vpop.f32.mrf.mxu1  ;;  %v2812_v6 = vpop.f32.mrf.mxu0 }
 0x36e   : > { %v2611_v11 = vpop.f32.mrf.mxu1  ;;  %v2815_v8 = vpop.f32.mrf.mxu0 }
 0x36f   : > { %v7418_v1 = vadd.f32 %v2815_v8, %v2579_v7  ;;  %3183 = vmatmul.mubr.bf16.gmra.mxu1 %v7351_v55 }
 0x370   : > { %v2613_v63 = vpop.f32.mrf.mxu1  ;;  %v2817_v50 = vpop.f32.mrf.mxu0  ;;  %5615 = vmatprep.mubr.msk.bf16.mxu1 %vm2275_vm2, %v7356_v24 }
 0x372   : > { %v2614_v46 = vpop.f32.mrf.mxu1  ;;  %v2818_v42 = vpop.f32.mrf.mxu0 }
 0x373   : > { %v7425_v15 = vadd.f32 %v2818_v42, %v2582_v27 }
 0x374   : > { %v2616_v58 = vpop.f32.mrf.mxu1  ;;  %v2820_v10 = vpop.f32.mrf.mxu0 }
 0x376   : > { %v2823_v53 = vpop.f32.mrf.mxu0 }
 0x377   : > { %v7428_v32 = vadd.f32 %v2823_v53, %v2587_v38  ;;  %3191 = vmatmul.mubr.bf16.gmra.mxu1 %v7364_v48 }
 0x378   : > { %v2825_v55 = vpop.f32.mrf.mxu0  ;;  %5616 = vmatprep.mubr.msk.bf16.mxu1 %vm2275_vm2, %v2942_v4 }
 0x37a   : > { %v2826_v24 = vpop.f32.mrf.mxu0 }
 0x37b   : > { %v7432_v9 = vadd.f32 %v2826_v24, %v2590_v0 }
 0x37c   : > { %v2828_v30 = vpop.f32.mrf.mxu0 }
 0x37d   : > { %8420 = vst [vmem:[#allocation6_spill] sm:$0xff] %v7432_v9 }
 0x37e   : > { %v2831_v49 = vpop.f32.mrf.mxu0 }
 0x37f   : > { %v7436_v60 = vadd.f32 %v2831_v49, %v2595_v40  ;;  %3199 = vmatmul.mubr.bf16.gmra.mxu1 %v2944_v29 }
 0x380   : > { %v2833_v20 = vpop.f32.mrf.mxu0 }
 0x382   : > { %v2834_v22 = vpop.f32.mrf.mxu0 }
 0x383   : > { %v7438_v33 = vadd.f32 %v2834_v22, %v2598_v51 }
 0x384   : > { %v2836_v48 = vpop.f32.mrf.mxu0 }
 0x386   : > { %v2839_v2 = vpop.f32.mrf.mxu0 }
 0x387   : > { %v7440_v17 = vadd.f32 %v2839_v2, %v2603_v47 }
 0x388   : > { %v2841_v7 = vpop.f32.mrf.mxu0 }
 0x38a   : > { %v2842_v45 = vpop.f32.mrf.mxu0 }
 0x38b   : > { %v7442_v27 = vadd.f32 %v2842_v45, %v2606_v26 }
 0x38c   : > { %v2844_v25 = vpop.f32.mrf.mxu0 }
 0x38e   : > { %v2847_v38 = vpop.f32.mrf.mxu0 }
 0x38f   : > { %v7444_v3 = vadd.f32 %v2847_v38, %v2611_v11 }
 0x390   : > { %v2849_v57 = vpop.f32.mrf.mxu0 }
 0x392   : > { %v2850_v35 = vpop.f32.mrf.mxu0 }
 0x393   : > { %v7446_v44 = vadd.f32 %v2850_v35, %v2614_v46 }
 0x394   : > { %v2852_v0 = vpop.f32.mrf.mxu0 }
 0x396   : > { %v2855_v39 = vpop.f32.mrf.mxu0 }
 0x398   : > { %v2857_v34 = vpop.f32.mrf.mxu0 }
 0x39a   : > { %v2858_v5 = vpop.f32.mrf.mxu0 }
 0x39c   : > { %v2860_v40 = vpop.f32.mrf.mxu0 }
 0x3af   : > { %v2619_v41 = vpop.f32.mrf.mxu1  ;;  %v2863_v37 = vpop.f32.mrf.mxu0 }
 0x3b0   : > { %v7448_v16 = vadd.f32 %v2855_v39, %v2619_v41 }
 0x3b1   : > { %v2621_v51 = vpop.f32.mrf.mxu1  ;;  %v2865_v36 = vpop.f32.mrf.mxu0 }
 0x3b3   : > { %v2622_v56 = vpop.f32.mrf.mxu1  ;;  %v2866_v12 = vpop.f32.mrf.mxu0 }
 0x3b4   : > { %v7450_v47 = vadd.f32 %v2858_v5, %v2622_v56 }
 0x3b5   : > { %v2624_v59 = vpop.f32.mrf.mxu1  ;;  %v2868_v14 = vpop.f32.mrf.mxu0 }
 0x3b6   : > { %8421 = vst [vmem:[#allocation7_spill] sm:$0xff] %v7450_v47 }
 0x3b7   : > { %v2627_v62 = vpop.f32.mrf.mxu1  ;;  %v2871_v26 = vpop.f32.mrf.mxu0 }
 0x3b8   : > { %v7452_v43 = vadd.f32 %v2863_v37, %v2627_v62 }
 0x3b9   : > { %v2629_v54 = vpop.f32.mrf.mxu1  ;;  %v2873_v6 = vpop.f32.mrf.mxu0 }
 0x3ba   : > { %8422 = vst [vmem:[#allocation8_spill] sm:$0xff] %v7452_v43 }
 0x3bb   : > { %v2630_v11 = vpop.f32.mrf.mxu1  ;;  %v2874_v8 = vpop.f32.mrf.mxu0 }
 0x3bc   : > { %v7454_v63 = vadd.f32 %v2866_v12, %v2630_v11 }
 0x3bd   : > { %v2632_v50 = vpop.f32.mrf.mxu1  ;;  %v2876_v46 = vpop.f32.mrf.mxu0 }
 0x3be   : > { %8423 = vst [vmem:[#allocation9_spill] sm:$0xff] %v7454_v63 }
 0x3bf   : > { %v2635_v42 = vpop.f32.mrf.mxu1  ;;  %v2879_v18 = vpop.f32.mrf.mxu0 }
 0x3c0   : > { %v7456_v19 = vadd.f32 %v2871_v26, %v2635_v42 }
 0x3c1   : > { %v2637_v58 = vpop.f32.mrf.mxu1  ;;  %v2881_v10 = vpop.f32.mrf.mxu0 }
 0x3c2   : > { %8424 = vst [vmem:[#allocation10_spill] sm:$0xff] %v7456_v19  ;;  %v3378_v10 = vlaneseq }
 0x3c3   : > { %v2638_v53 = vpop.f32.mrf.mxu1  ;;  %v2882_v4 = vpop.f32.mrf.mxu0 }
 0x3c4   : > { %v7458_v55 = vadd.f32 %v2874_v8, %v2638_v53 }
 0x3c5   : > { %v2640_v24 = vpop.f32.mrf.mxu1  ;;  %v2884_v61 = vpop.f32.mrf.mxu0 }
 0x3c6   : > { %8425 = vst [vmem:[#allocation11_spill] sm:$0xff] %v7458_v55 }
 0x3c7   : > { %v2643_v30 = vpop.f32.mrf.mxu1  ;;  %v2887_v29 = vpop.f32.mrf.mxu0 }
 0x3c8   : > { %v7460_v49 = vadd.f32 %v2879_v18, %v2643_v30  ;;  %v5941_v18 = vmov 1983009808  }
 0x3c9   : > { %v2645_v20 = vpop.f32.mrf.mxu1  ;;  %v2889_v22 = vpop.f32.mrf.mxu0  ;;  %v3376_v58 = vunpack.c.l.s4 %v5941_v18 }
 0x3ca   : > { %8426 = vst [vmem:[#allocation12_spill] sm:$0xff] %v7460_v49  ;;  %v3379_v20 = vshrl.u32 %v3378_v10, 7 }
 0x3cb   : > { %v2646_v48 = vpop.f32.mrf.mxu1  ;;  %v2890_v2 = vpop.f32.mrf.mxu0 }
 0x3cc   : > { %v7462_v7 = vadd.f32 %v2882_v4, %v2646_v48 }
 0x3cd   : > { %v2648_v45 = vpop.f32.mrf.mxu1  ;;  %v2892_v25 = vpop.f32.mrf.mxu0 }
 0x3ce   : > { %8427 = vst [vmem:[#allocation13_spill] sm:$0xff] %v7462_v7 }
 0x3cf   : > { %v2651_v38 = vpop.f32.mrf.mxu1  ;;  %v2895_v57 = vpop.f32.mrf.mxu0 }
 0x3d0   : > { %v7464_v35 = vadd.f32 %v2887_v29, %v2651_v38  ;;  %v3377_v29 = vunpack.c.0.s8 %v3376_v58 }
 0x3d1   : > { %v2653_v0 = vpop.f32.mrf.mxu1  ;;  %v2897_v39 = vpop.f32.mrf.mxu0 }
 0x3d2   : > { %8428 = vst [vmem:[#allocation14_spill] sm:$0xff] %v7464_v35  ;;  %v7488_v39 = vsub.s32 %v3377_v29, %v3379_v20 }
 0x3d3   : > { %v2654_v34 = vpop.f32.mrf.mxu1  ;;  %v2898_v5 = vpop.f32.mrf.mxu0 }
 0x3d4   : > { %v7466_v40 = vadd.f32 %v2890_v2, %v2654_v34  ;;  %v7482_v2 = vld [vmem:[%s8409_s4] ss:$0 sm:$0xff] }
 0x3d5   : > { %v2656_v41 = vpop.f32.mrf.mxu1  ;;  %v2900_v37 = vpop.f32.mrf.mxu0 }
 0x3d6   : > { %8429 = vst [vmem:[#allocation15_spill] sm:$0xff] %v7466_v40 }
 0x3d7   : > { %v2659_v51 = vpop.f32.mrf.mxu1  ;;  %v2903_v36 = vpop.f32.mrf.mxu0 }
 0x3d8   : > { %v7468_v56 = vadd.f32 %v2895_v57, %v2659_v51 }
 0x3d9   : > { %v2661_v12 = vpop.f32.mrf.mxu1  ;;  %v2905_v59 = vpop.f32.mrf.mxu0 }
 0x3da   : > { %8430 = vst [vmem:[#allocation16_spill] sm:$0xff] %v7468_v56 }
 0x3db   : > { %v2662_v14 = vpop.f32.mrf.mxu1  ;;  %v2906_v62 = vpop.f32.mrf.mxu0 }
 0x3dc   : > { %v7470_v26 = vadd.f32 %v2898_v5, %v2662_v14 }
 0x3dd   : > { %v2664_v54 = vpop.f32.mrf.mxu1  ;;  %v2908_v6 = vpop.f32.mrf.mxu0 }
 0x3de   : > { %8431 = vst [vmem:[#allocation17_spill] sm:$0xff] %v7470_v26 }
 0x3df   : > { %v2667_v11 = vpop.f32.mrf.mxu1  ;;  %v2911_v8 = vpop.f32.mrf.mxu0 }
 0x3e0   : > { %v7472_v50 = vadd.f32 %v2903_v36, %v2667_v11 }
 0x3e1   : > { %v2669_v46 = vpop.f32.mrf.mxu1  ;;  %v2913_v42 = vpop.f32.mrf.mxu0 }
 0x3e2   : > { %8432 = vst [vmem:[#allocation18_spill] sm:$0xff] %v7472_v50 }
 0x3e3   : > { %v2670_v53 = vpop.f32.mrf.mxu1  ;;  %v2914_v4 = vpop.f32.mrf.mxu0 }
 0x3e4   : > { %v7475_v24 = vadd.f32 %v2906_v62, %v2670_v53 }
 0x3e5   : > { %v2672_v61 = vpop.f32.mrf.mxu1  ;;  %v2916_v30 = vpop.f32.mrf.mxu0 }
 0x3e6   : > { %8433 = vst [vmem:[#allocation19_spill] sm:$0xff] %v7475_v24 }
 0x3e7   : > { %v2675_v22 = vpop.f32.mrf.mxu1  ;;  %v3080_v48 = vpop.f32.mrf.mxu0 }
 0x3e8   : > { %v7484_v45 = vadd.f32 %v2911_v8, %v2675_v22  ;;  %v3207_v25 = vadd.f32 %v3080_v48, %v7397_v28 }
 0x3e9   : > { %v2677_v38 = vpop.f32.mrf.mxu1  ;;  %v3082_v57 = vpop.f32.mrf.mxu0 }
 0x3ea   : > { %8434 = vst [vmem:[#allocation20_spill] sm:$0xff] %v7484_v45  ;;  %v3246_v0 = vadd.f32 %v7482_v2, %v3207_v25 }
 0x3eb   : > { %v2678_v34 = vpop.f32.mrf.mxu1  ;;  %v3083_v5 = vpop.f32.mrf.mxu0 }
 0x3ec   : > { %3278 = vst.msk [vmem:[%s7490_s20] sm:$0xff] %vm2275_vm2, %v3246_v0  ;;  %v3310_v41 = vmax.f32 %v3246_v0, 0.0  ;;  %v7494_v37 = vadd.f32 %v2914_v4, %v2678_v34  ;;  %v3208_v51 = vadd.f32 %v3083_v5, %v7402_v23 }
 0x3ed   : > { %v2680_v28 = vpop.f32.mrf.mxu1  ;;  %v3085_v36 = vpop.f32.mrf.mxu0 }
 0x3ee   : > { %8435 = vst [vmem:[#allocation21_spill] sm:$0xff] %v7494_v37  ;;  %v3374_v12 = vcombine.high %v3310_v41, %v3310_v41  ;;  %v3381_v59 = vrot.slane %v3310_v41, %v7488_v39  ;;  %v3247_v14 = vadd.f32 %v7482_v2, %v3208_v51 }
 0x3ef   : > { %v3088_v62 = vpop.f32.mrf.mxu0  ;;  %v3120_v54 = vpop.f32.mrf.mxu1 }
 0x3f0   : > { %v3388_v6 = vrot.slane %v3374_v12, %v7488_v39  ;;  %v3389_v11 = vcombine.high %v3381_v59, %v3381_v59  ;;  %v4047_v8 = vsel %vm4046_vm0, %v3381_v59, -inf  ;;  %3279 = vst.msk [vmem:[%s7490_s20 + $0x8] sm:$0xff] %vm2275_vm2, %v3247_v14  ;;  %v3311_v46 = vmax.f32 %v3247_v14, 0.0 }
 0x3f1   : > { %v4048_v42 = vrot.slane %v4047_v8, 4  ;;  %v3209_v23 = vadd.f32 %v3088_v62, %v7404_v52  ;;  %v3217_v18 = vadd.f32 %v3120_v54, %v7436_v60  ;;  %v3090_v58 = vpop.f32.mrf.mxu0  ;;  %v3122_v10 = vpop.f32.mrf.mxu1 }
 0x3f2   : > { %v3390_v53 = vcombine.high %v3388_v6, %v3388_v6  ;;  %v4054_v4 = vsel %vm4046_vm0, %v3389_v11, -inf  ;;  %v4061_v61 = vsel %vm4046_vm0, %v3388_v6, -inf  ;;  %v3391_v30 = vcombine.high %v3311_v46, %v3311_v46 }
 0x3f3   : > { %v4049_v29 = vmax.f32 %v4047_v8, %v4048_v42  ;;  %v4055_v20 = vrot.slane %v4054_v4, 4  ;;  %v4062_v22 = vrot.slane %v4061_v61, 4  ;;  %v3398_v48 = vrot.slane %v3311_v46, %v7488_v39  ;;  %v7508_v25 = vpop.f32.mrf.mxu0  ;;  %v7510_v38 = vpop.f32.mrf.mxu1 }
 0x3f4   : > { %v4068_v52 = vsel %vm4046_vm0, %v3390_v53, -inf  ;;  %v3405_v60 = vrot.slane %v3391_v30, %v7488_v39  ;;  %v3248_v57 = vadd.f32 %v7482_v2, %v3209_v23  ;;  %v7516_v0 = vadd.f32 %v7482_v2, %v3217_v18 }
 0x3f5   : > { %v4050_v34 = vrot.slane %v4049_v29, 2  ;;  %v4056_v5 = vmax.f32 %v4054_v4, %v4055_v20  ;;  %v4063_v41 = vmax.f32 %v4061_v61, %v4062_v22  ;;  %v4069_v51 = vrot.slane %v4068_v52, 4  ;;  %v3093_v28 = vpop.f32.mrf.mxu0  ;;  %v3125_v36 = vpop.f32.mrf.mxu1 }
 0x3f6   : > { %v3406_v12 = vcombine.high %v3398_v48, %v3398_v48  ;;  %v3407_v59 = vcombine.high %v3405_v60, %v3405_v60  ;;  %v4075_v14 = vsel %vm4046_vm0, %v3398_v48, -inf  ;;  %v4089_v62 = vsel %vm4046_vm0, %v3405_v60, -inf  ;;  %3280 = vst.msk [vmem:[%s7490_s20 + $0x10] sm:$0xff] %vm2275_vm2, %v3248_v57  ;;  %3288 = vst.msk [vmem:[%s7490_s20 + $0x50] sm:$0xff] %vm2275_vm2, %v7516_v0 }
 0x3f7   : > { %v4051_v54 = vmax.f32 %v4049_v29, %v4050_v34  ;;  %v4057_v6 = vrot.slane %v4056_v5, 2  ;;  %v4064_v11 = vrot.slane %v4063_v41, 2  ;;  %v4070_v8 = vmax.f32 %v4068_v52, %v4069_v51  ;;  %v7525_v46 = vpop.f32.mrf.mxu0  ;;  %v7527_v42 = vpop.f32.mrf.mxu1 }
 0x3f8   : > { %v4076_v23 = vrot.slane %v4075_v14, 4  ;;  %v4082_v18 = vsel %vm4046_vm0, %v3406_v12, -inf  ;;  %v4090_v58 = vrot.slane %v4089_v62, 4  ;;  %v4096_v10 = vsel %vm4046_vm0, %v3407_v59, -inf }
 0x3f9   : > { %v4052_v53 = vrot.slane %v4051_v54, 1  ;;  %v4058_v4 = vmax.f32 %v4056_v5, %v4057_v6  ;;  %v4065_v61 = vmax.f32 %v4063_v41, %v4064_v11  ;;  %v4071_v30 = vrot.slane %v4070_v8, 2  ;;  %v3098_v20 = vpop.f32.mrf.mxu0  ;;  %v3130_v22 = vpop.f32.mrf.mxu1 }
 0x3fa   : > { %v4077_v29 = vmax.f32 %v4075_v14, %v4076_v23  ;;  %v4083_v48 = vrot.slane %v4082_v18, 4  ;;  %v4091_v60 = vmax.f32 %v4089_v62, %v4090_v58  ;;  %v4097_v52 = vrot.slane %v4096_v10, 4 }
 0x3fb   : > { %v4053_v34 = vmax.f32 %v4051_v54, %v4052_v53  ;;  %v4059_v51 = vrot.slane %v4058_v4, 1  ;;  %v4066_v28 = vrot.slane %v4065_v61, 1  ;;  %v4072_v36 = vmax.f32 %v4070_v8, %v4071_v30  ;;  %v7531_v37 = vpop.f32.mrf.mxu0  ;;  %v7533_v12 = vpop.f32.mrf.mxu1 }
 0x3fc   : > { %v4078_v45 = vrot.slane %v4077_v29, 2  ;;  %v4084_v59 = vmax.f32 %v4082_v18, %v4083_v48  ;;  %v4092_v24 = vrot.slane %v4091_v60, 2  ;;  %v4098_v5 = vmax.f32 %v4096_v10, %v4097_v52 }
 0x3fd   : > { %v4060_v41 = vmax.f32 %v4058_v4, %v4059_v51  ;;  %v4067_v6 = vmax.f32 %v4065_v61, %v4066_v28  ;;  %v4073_v11 = vrot.slane %v4072_v36, 1  ;;  %v7536_v14 = vsel %vm2275_vm2, %v4053_v34, -inf  ;;  %v3101_v62 = vpop.f32.mrf.mxu0  ;;  %v3133_v23 = vpop.f32.mrf.mxu1 }
 0x3fe   : > { %v4079_v54 = vmax.f32 %v4077_v29, %v4078_v45  ;;  %v4085_v58 = vrot.slane %v4084_v59, 2  ;;  %v4093_v53 = vmax.f32 %v4091_v60, %v4092_v24  ;;  %v4099_v8 = vrot.slane %v4098_v5, 2 }
 0x3ff   : > { %v4074_v30 = vmax.f32 %v4072_v36, %v4073_v11  ;;  %v7539_v20 = vsel %vm2275_vm2, %v4060_v41, -inf  ;;  %v7542_v18 = vsel %vm2275_vm2, %v4067_v6, -inf  ;;  %v3312_v10 = vmax.f32 %v3248_v57, 0.0  ;;  %v7544_v4 = vpop.f32.mrf.mxu0  ;;  %v7546_v61 = vpop.f32.mrf.mxu1 }
 0x400   : > { %v4080_v22 = vrot.slane %v4079_v54, 1  ;;  %v4086_v48 = vmax.f32 %v4084_v59, %v4085_v58  ;;  %v4094_v52 = vrot.slane %v4093_v53, 1  ;;  %v4100_v34 = vmax.f32 %v4098_v5, %v4099_v8 }
 0x401   : > { %v7549_v45 = vsel %vm2275_vm2, %v4074_v30, -inf  ;;  %v3408_v24 = vcombine.high %v3312_v10, %v3312_v10  ;;  %v3415_v29 = vrot.slane %v3312_v10, %v7488_v39  ;;  %v3320_v60 = vmax.f32 %v7516_v0, 0.0  ;;  %v3106_v51 = vpop.f32.mrf.mxu0  ;;  %v3138_v28 = vpop.f32.mrf.mxu1 }
 0x402   : > { %v4081_v36 = vmax.f32 %v4079_v54, %v4080_v22  ;;  %v4087_v57 = vrot.slane %v4086_v48, 1  ;;  %v4095_v41 = vmax.f32 %v4093_v53, %v4094_v52  ;;  %v4101_v6 = vrot.slane %v4100_v34, 1 }
 0x403   : > { %v3422_v11 = vrot.slane %v3408_v24, %v7488_v39  ;;  %v3423_v62 = vcombine.high %v3415_v29, %v3415_v29  ;;  %v4103_v59 = vsel %vm4046_vm0, %v3415_v29, -inf  ;;  %v3544_v5 = vcombine.high %v3320_v60, %v3320_v60  ;;  %v7555_v23 = vpop.f32.mrf.mxu0  ;;  %v7557_v58 = vpop.f32.mrf.mxu1 }
 0x404   : > { %v4088_v8 = vmax.f32 %v4086_v48, %v4087_v57  ;;  %v4102_v30 = vmax.f32 %v4100_v34, %v4101_v6  ;;  %v7560_v0 = vsel %vm2275_vm2, %v4081_v36, -inf  ;;  %v7563_v54 = vsel %vm2275_vm2, %v4095_v41, -inf }
 0x405   : > { %v3424_v53 = vcombine.high %v3422_v11, %v3422_v11  ;;  %v4104_v10 = vrot.slane %v4103_v59, 4  ;;  %v4110_v22 = vsel %vm4046_vm0, %v3423_v62, -inf  ;;  %v4117_v52 = vsel %vm4046_vm0, %v3422_v11, -inf  ;;  %v3109_v24 = vpop.f32.mrf.mxu0  ;;  %v3141_v29 = vpop.f32.mrf.mxu1 }
 0x406   : > { %v7568_v51 = vsel %vm2275_vm2, %v4088_v8, -inf  ;;  %v7571_v48 = vsel %vm2275_vm2, %v4102_v30, -inf  ;;  %v4111_v34 = vrot.slane %v4110_v22, 4  ;;  %v4118_v28 = vrot.slane %v4117_v52, 4 }
 0x407   : > { %v4105_v36 = vmax.f32 %v4103_v59, %v4104_v10  ;;  %v4124_v57 = vsel %vm4046_vm0, %v3424_v53, -inf  ;;  %v3551_v41 = vrot.slane %v3320_v60, %v7488_v39  ;;  %v3558_v6 = vrot.slane %v3544_v5, %v7488_v39  ;;  %v7576_v62 = vpop.f32.mrf.mxu0  ;;  %v7578_v11 = vpop.f32.mrf.mxu1 }
 0x408   : > { %8436 = vst [vmem:[#allocation22_spill] sm:$0xff] %v7578_v11  ;;  %v4112_v24 = vmax.f32 %v4110_v22, %v4111_v34  ;;  %v4119_v29 = vmax.f32 %v4117_v52, %v4118_v28  ;;  %v4125_v8 = vrot.slane %v4124_v57, 4  ;;  %v3210_v30 = vadd.f32 %v7508_v25, %v7409_v13 }
 0x409   : > { %v4106_v50 = vrot.slane %v4105_v36, 2  ;;  %v3559_v26 = vcombine.high %v3551_v41, %v3551_v41  ;;  %v3560_v56 = vcombine.high %v3558_v6, %v3558_v6  ;;  %v4327_v59 = vsel %vm4046_vm0, %v3551_v41, -inf  ;;  %v3114_v53 = vpop.f32.mrf.mxu0  ;;  %v3146_v10 = vpop.f32.mrf.mxu1 }
 0x40a   : > { %v4113_v60 = vrot.slane %v4112_v24, 2  ;;  %v4120_v40 = vrot.slane %v4119_v29, 2  ;;  %v4126_v5 = vmax.f32 %v4124_v57, %v4125_v8  ;;  %v4328_v35 = vrot.slane %v4327_v59, 4 }
 0x40b   : > { %v4107_v7 = vmax.f32 %v4105_v36, %v4106_v50  ;;  %v4334_v22 = vsel %vm4046_vm0, %v3559_v26, -inf  ;;  %v4341_v52 = vsel %vm4046_vm0, %v3558_v6, -inf  ;;  %v4348_v13 = vsel %vm4046_vm0, %v3560_v56, -inf  ;;  %v7586_v25 = vpop.f32.mrf.mxu0 }
 0x40c   : > { %8437 = vst [vmem:[#allocation23_spill] sm:$0xff] %v7586_v25  ;;  %v4114_v34 = vmax.f32 %v4112_v24, %v4113_v60  ;;  %v4121_v28 = vmax.f32 %v4119_v29, %v4120_v40  ;;  %v4127_v41 = vrot.slane %v4126_v5, 2  ;;  %v4329_v53 = vmax.f32 %v4327_v59, %v4328_v35 }
 0x40d   : > { %v4108_v10 = vrot.slane %v4107_v7, 1  ;;  %v4335_v49 = vrot.slane %v4334_v22, 4  ;;  %v4342_v57 = vrot.slane %v4341_v52, 4  ;;  %v4349_v8 = vrot.slane %v4348_v13, 4  ;;  %v3117_v55 = vpop.f32.mrf.mxu0 }
 0x40e   : > { %v4115_v50 = vrot.slane %v4114_v34, 1  ;;  %v4122_v36 = vrot.slane %v4121_v28, 1  ;;  %v4128_v19 = vmax.f32 %v4126_v5, %v4127_v41  ;;  %v4330_v26 = vrot.slane %v4329_v53, 2 }
 0x40f   : > { %v4109_v63 = vmax.f32 %v4107_v7, %v4108_v10  ;;  %v4336_v6 = vmax.f32 %v4334_v22, %v4335_v49  ;;  %v4343_v43 = vmax.f32 %v4341_v52, %v4342_v57  ;;  %v4350_v56 = vmax.f32 %v4348_v13, %v4349_v8  ;;  %v7594_v13 = vpop.f32.mrf.mxu1 }
 0x410   : > { %v4116_v47 = vmax.f32 %v4114_v34, %v4115_v50  ;;  %v4123_v25 = vmax.f32 %v4121_v28, %v4122_v36  ;;  %v4129_v24 = vrot.slane %v4128_v19, 1  ;;  %v4331_v40 = vmax.f32 %v4329_v53, %v4330_v26 }
 0x411   : > { %v4944_v35 = vsel %vm2275_vm2, %v4109_v63, -inf  ;;  %v4337_v29 = vrot.slane %v4336_v6, 2  ;;  %v4344_v59 = vrot.slane %v4343_v43, 2  ;;  %v4351_v60 = vrot.slane %v4350_v56, 2 }
 0x412   : > { %v4130_v9 = vmax.f32 %v4128_v19, %v4129_v24  ;;  %v4945_v55 = vmax.f32 %v7536_v14, %v4944_v35  ;;  %v4947_v11 = vsel %vm2275_vm2, %v4116_v47, -inf  ;;  %v4950_v5 = vsel %vm2275_vm2, %v4123_v25, -inf }
 0x413   : > { %v4948_v49 = vmax.f32 %v7539_v20, %v4947_v11  ;;  %v4951_v7 = vmax.f32 %v7542_v18, %v4950_v5  ;;  %v4332_v22 = vrot.slane %v4331_v40, 1  ;;  %v4338_v52 = vmax.f32 %v4336_v6, %v4337_v29  ;;  %v3149_v20 = vpop.f32.mrf.mxu1 }
 0x414   : > { %v4953_v63 = vsel %vm2275_vm2, %v4130_v9, -inf  ;;  %v4345_v34 = vmax.f32 %v4343_v43, %v4344_v59  ;;  %v4352_v28 = vmax.f32 %v4350_v56, %v4351_v60  ;;  %v3249_v19 = vadd.f32 %v7482_v2, %v3210_v30 }
 0x415   : > { %v4954_v14 = vmax.f32 %v7549_v45, %v4953_v63  ;;  %v5200_v47 = vsel %vm5199_vm1, %v4948_v49, %v4945_v55  ;;  %v4333_v25 = vmax.f32 %v4331_v40, %v4332_v22  ;;  %v4339_v41 = vrot.slane %v4338_v52, 1 }
 0x416   : > { %v5202_v18 = vsel %vm5201_vm3, %v4951_v7, %v5200_v47  ;;  %v4346_v11 = vrot.slane %v4345_v34, 1  ;;  %v4353_v53 = vrot.slane %v4352_v28, 1  ;;  %3281 = vst.msk [vmem:[%s7490_s20 + $0x18] sm:$0xff] %vm2275_vm2, %v3249_v19  ;;  %v3313_v10 = vmax.f32 %v3249_v19, 0.0 }
 0x417   : > { %v4340_v57 = vmax.f32 %v4338_v52, %v4339_v41  ;;  %v7604_v9 = vsel %vm2275_vm2, %v4333_v25, -inf  ;;  %v7607_v43 = vsel %vm5203_vm4, %v4954_v14, %v5202_v18  ;;  %v3218_v45 = vadd.f32 %v7510_v38, %v7438_v33 }
 0x418   : > { %v4347_v30 = vmax.f32 %v4345_v34, %v4346_v11  ;;  %v4354_v8 = vmax.f32 %v4352_v28, %v4353_v53  ;;  %v3425_v50 = vcombine.high %v3313_v10, %v3313_v10  ;;  %v3432_v36 = vrot.slane %v3313_v10, %v7488_v39 }
 0x419   : > { %v7613_v26 = vsel %vm2275_vm2, %v4340_v57, -inf  ;;  %v3257_v6 = vadd.f32 %v7482_v2, %v3218_v45  ;;  %v3211_v56 = vadd.f32 %v7525_v46, %v7411_v21  ;;  %v3219_v24 = vadd.f32 %v7527_v42, %v7440_v17 }
 0x41a   : > { %v7621_v40 = vsel %vm2275_vm2, %v4347_v30, -inf  ;;  %v7624_v33 = vsel %vm2275_vm2, %v4354_v8, -inf  ;;  %v3439_v38 = vrot.slane %v3425_v50, %v7488_v39  ;;  %v3440_v35 = vcombine.high %v3432_v36, %v3432_v36 }
 0x41b   : > { %v4131_v29 = vsel %vm4046_vm0, %v3432_v36, -inf  ;;  %3289 = vst.msk [vmem:[%s7490_s20 + $0x58] sm:$0xff] %vm2275_vm2, %v3257_v6  ;;  %v3321_v59 = vmax.f32 %v3257_v6, 0.0  ;;  %v3250_v21 = vadd.f32 %v7482_v2, %v3211_v56  ;;  %v3258_v17 = vadd.f32 %v7482_v2, %v3219_v24  ;;  %v7650_v6 = vpop.f32.mrf.mxu1 }
 0x41c   : > { %v3441_v46 = vcombine.high %v3439_v38, %v3439_v38  ;;  %v4132_v42 = vrot.slane %v4131_v29, 4  ;;  %v4138_v60 = vsel %vm4046_vm0, %v3440_v35, -inf  ;;  %v4145_v55 = vsel %vm4046_vm0, %v3439_v38, -inf }
 0x41d   : > { %v4139_v5 = vrot.slane %v4138_v60, 4  ;;  %v4146_v49 = vrot.slane %v4145_v55, 4  ;;  %v3561_v7 = vcombine.high %v3321_v59, %v3321_v59  ;;  %v3568_v22 = vrot.slane %v3321_v59, %v7488_v39  ;;  %3282 = vst.msk [vmem:[%s7490_s20 + $0x20] sm:$0xff] %vm2275_vm2, %v3250_v21  ;;  %3290 = vst.msk [vmem:[%s7490_s20 + $0x60] sm:$0xff] %vm2275_vm2, %v3258_v17 }
 0x41e   : > { %v4133_v52 = vmax.f32 %v4131_v29, %v4132_v42  ;;  %v4152_v63 = vsel %vm4046_vm0, %v3441_v46, -inf  ;;  %v7640_v34 = vmax.f32 %v3250_v21, 0.0  ;;  %v7642_v28 = vmax.f32 %v3258_v17, 0.0  ;;  %v3154_v46 = vpop.f32.mrf.mxu1 }
 0x41f   : > { %v4140_v19 = vmax.f32 %v4138_v60, %v4139_v5  ;;  %v4147_v14 = vmax.f32 %v4145_v55, %v4146_v49  ;;  %v4153_v47 = vrot.slane %v4152_v63, 4  ;;  %v3575_v25 = vrot.slane %v3561_v7, %v7488_v39 }
 0x420   : > { %v4134_v41 = vrot.slane %v4133_v52, 2  ;;  %v3576_v20 = vcombine.high %v3568_v22, %v3568_v22  ;;  %v4355_v18 = vsel %vm4046_vm0, %v3568_v22, -inf  ;;  %v3442_v11 = vcombine.high %v7640_v34, %v7640_v34 }
 0x421   : > { %v4141_v53 = vrot.slane %v4140_v19, 2  ;;  %v4148_v10 = vrot.slane %v4147_v14, 2  ;;  %v4154_v57 = vmax.f32 %v4152_v63, %v4153_v47  ;;  %v3577_v45 = vcombine.high %v3575_v25, %v3575_v25 }
 0x422   : > { %v4135_v30 = vmax.f32 %v4133_v52, %v4134_v41  ;;  %v4356_v8 = vrot.slane %v4355_v18, 4  ;;  %v4362_v50 = vsel %vm4046_vm0, %v3576_v20, -inf  ;;  %v4369_v36 = vsel %vm4046_vm0, %v3575_v25, -inf }
 0x423   : > { %v4142_v56 = vmax.f32 %v4140_v19, %v4141_v53  ;;  %v4149_v24 = vmax.f32 %v4147_v14, %v4148_v10  ;;  %v4155_v38 = vrot.slane %v4154_v57, 2  ;;  %v4363_v35 = vrot.slane %v4362_v50, 4 }
 0x424   : > { %v4136_v29 = vrot.slane %v4135_v30, 1  ;;  %v4357_v59 = vmax.f32 %v4355_v18, %v4356_v8  ;;  %v4370_v21 = vrot.slane %v4369_v36, 4  ;;  %v4376_v17 = vsel %vm4046_vm0, %v3577_v45, -inf }
 0x425   : > { %v4143_v42 = vrot.slane %v4142_v56, 1  ;;  %v4150_v60 = vrot.slane %v4149_v24, 1  ;;  %v4156_v55 = vmax.f32 %v4154_v57, %v4155_v38  ;;  %v4364_v5 = vmax.f32 %v4362_v50, %v4363_v35 }
 0x426   : > { %v4137_v49 = vmax.f32 %v4135_v30, %v4136_v29  ;;  %v4358_v7 = vrot.slane %v4357_v59, 2  ;;  %v4371_v22 = vmax.f32 %v4369_v36, %v4370_v21  ;;  %v4377_v52 = vrot.slane %v4376_v17, 4 }
 0x427   : > { %v4144_v63 = vmax.f32 %v4142_v56, %v4143_v42  ;;  %v4151_v19 = vmax.f32 %v4149_v24, %v4150_v60  ;;  %v4157_v14 = vrot.slane %v4156_v55, 1  ;;  %v4365_v47 = vrot.slane %v4364_v5, 2 }
 0x428   : > { %v4956_v25 = vsel %vm2275_vm2, %v4137_v49, -inf  ;;  %v4359_v41 = vmax.f32 %v4357_v59, %v4358_v7  ;;  %v4372_v20 = vrot.slane %v4371_v22, 2  ;;  %v4378_v18 = vmax.f32 %v4376_v17, %v4377_v52  ;;  %v7670_v59 = vpop.f32.mrf.mxu1 }
 0x429   : > { %v4158_v53 = vmax.f32 %v4156_v55, %v4157_v14  ;;  %v4957_v10 = vmax.f32 %v7560_v0, %v4956_v25  ;;  %v4959_v57 = vsel %vm2275_vm2, %v4144_v63, -inf  ;;  %v4962_v45 = vsel %vm2275_vm2, %v4151_v19, -inf }
 0x42a   : > { %v4960_v30 = vmax.f32 %v7568_v51, %v4959_v57  ;;  %v4963_v8 = vmax.f32 %v7563_v54, %v4962_v45  ;;  %v4360_v50 = vrot.slane %v4359_v41, 1  ;;  %v4366_v36 = vmax.f32 %v4364_v5, %v4365_v47  ;;  %v3157_v5 = vpop.f32.mrf.mxu1 }
 0x42b   : > { %v4965_v56 = vsel %vm2275_vm2, %v4158_v53, -inf  ;;  %v5206_v24 = vsel %vm5205_vm5, %v4957_v10, %v7607_v43  ;;  %v4373_v38 = vmax.f32 %v4371_v22, %v4372_v20  ;;  %v4379_v35 = vrot.slane %v4378_v18, 2 }
 0x42c   : > { %v4966_v0 = vmax.f32 %v7571_v48, %v4965_v56  ;;  %v5208_v51 = vsel %vm5207_vm6, %v4960_v30, %v5206_v24  ;;  %v4361_v54 = vmax.f32 %v4359_v41, %v4360_v50  ;;  %v4367_v29 = vrot.slane %v4366_v36, 1 }
 0x42d   : > { %v5210_v21 = vsel %vm5209_vm7, %v4963_v8, %v5208_v51  ;;  %v4374_v17 = vrot.slane %v4373_v38, 1  ;;  %v4380_v43 = vmax.f32 %v4378_v18, %v4379_v35  ;;  %v3449_v46 = vrot.slane %v7640_v34, %v7488_v39 }
 0x42e   : > { %v5212_v42 = vsel %vm5211_vm8, %v4966_v0, %v5210_v21  ;;  %v4368_v60 = vmax.f32 %v4366_v36, %v4367_v29  ;;  %v7677_v55 = vsel %vm2275_vm2, %v4361_v54, -inf  ;;  %v3456_v48 = vrot.slane %v3442_v11, %v7488_v39 }
 0x42f   : > { %5270 = vst.msk [vmem:[%s7666_s29] sm:$0xff] %vm2275_vm2, %v5212_v42  ;;  %v4375_v49 = vmax.f32 %v4373_v38, %v4374_v17  ;;  %v4381_v7 = vrot.slane %v4380_v43, 1  ;;  %v3457_v22 = vcombine.high %v3449_v46, %v3449_v46  ;;  %v4159_v52 = vsel %vm4046_vm0, %v3449_v46, -inf }
 0x430   : > { %v7687_v63 = vsel %vm2275_vm2, %v4368_v60, -inf  ;;  %v3458_v19 = vcombine.high %v3456_v48, %v3456_v48  ;;  %v4160_v14 = vrot.slane %v4159_v52, 4  ;;  %v4173_v47 = vsel %vm4046_vm0, %v3456_v48, -inf }
 0x431   : > { %v4382_v25 = vmax.f32 %v4380_v43, %v4381_v7  ;;  %v7691_v41 = vsel %vm2275_vm2, %v4375_v49, -inf  ;;  %v4166_v34 = vsel %vm4046_vm0, %v3457_v22, -inf  ;;  %v4174_v11 = vrot.slane %v4173_v47, 4 }
 0x432   : > { %8438 = vst [vmem:[#allocation24_spill] sm:$0xff] %v7691_v41  ;;  %v4161_v20 = vmax.f32 %v4159_v52, %v4160_v14  ;;  %v4167_v18 = vrot.slane %v4166_v34, 4  ;;  %v4180_v53 = vsel %vm4046_vm0, %v3458_v19, -inf  ;;  %v3578_v10 = vcombine.high %v7642_v28, %v7642_v28  ;;  %v7709_v52 = vpop.f32.mrf.mxu1 }
 0x433   : > { %v7698_v57 = vsel %vm2275_vm2, %v4382_v25, -inf  ;;  %v4175_v45 = vmax.f32 %v4173_v47, %v4174_v11  ;;  %v4181_v30 = vrot.slane %v4180_v53, 4  ;;  %v3585_v8 = vrot.slane %v7642_v28, %v7488_v39  ;;  %8440 = vst [vmem:[#allocation26_spill] sm:$0xff] %v7709_v52 }
 0x434   : > { %8439 = vst [vmem:[#allocation25_spill] sm:$0xff] %v7698_v57  ;;  %v4162_v50 = vrot.slane %v4161_v20, 2  ;;  %v4168_v36 = vmax.f32 %v4166_v34, %v4167_v18  ;;  %v3592_v56 = vrot.slane %v3578_v10, %v7488_v39  ;;  %v3212_v24 = vadd.f32 %v7531_v37, %v7416_v31 }
 0x435   : > { %v4176_v38 = vrot.slane %v4175_v45, 2  ;;  %v4182_v35 = vmax.f32 %v4180_v53, %v4181_v30  ;;  %v3593_v0 = vcombine.high %v3585_v8, %v3585_v8  ;;  %v4383_v51 = vsel %vm4046_vm0, %v3585_v8, -inf  ;;  %v3162_v53 = vpop.f32.mrf.mxu1 }
 0x436   : > { %v4163_v54 = vmax.f32 %v4161_v20, %v4162_v50  ;;  %v4169_v29 = vrot.slane %v4168_v36, 2  ;;  %v3594_v21 = vcombine.high %v3592_v56, %v3592_v56  ;;  %v4384_v17 = vrot.slane %v4383_v51, 4 }
 0x437   : > { %v4177_v43 = vmax.f32 %v4175_v45, %v4176_v38  ;;  %v4183_v46 = vrot.slane %v4182_v35, 2  ;;  %v4390_v28 = vsel %vm4046_vm0, %v3593_v0, -inf  ;;  %v4397_v42 = vsel %vm4046_vm0, %v3592_v56, -inf }
 0x438   : > { %v4164_v60 = vrot.slane %v4163_v54, 1  ;;  %v4170_v48 = vmax.f32 %v4168_v36, %v4169_v29  ;;  %v4385_v5 = vmax.f32 %v4383_v51, %v4384_v17  ;;  %v4391_v49 = vrot.slane %v4390_v28, 4 }
 0x439   : > { %v4178_v31 = vrot.slane %v4177_v43, 1  ;;  %v4184_v37 = vmax.f32 %v4182_v35, %v4183_v46  ;;  %v4398_v7 = vrot.slane %v4397_v42, 4  ;;  %v4404_v22 = vsel %vm4046_vm0, %v3594_v21, -inf }
 0x43a   : > { %v4165_v19 = vmax.f32 %v4163_v54, %v4164_v60  ;;  %v4171_v14 = vrot.slane %v4170_v48, 1  ;;  %v4386_v47 = vrot.slane %v4385_v5, 2  ;;  %v4392_v25 = vmax.f32 %v4390_v28, %v4391_v49 }
 0x43b   : > { %v4179_v34 = vmax.f32 %v4177_v43, %v4178_v31  ;;  %v4185_v11 = vrot.slane %v4184_v37, 1  ;;  %v4399_v20 = vmax.f32 %v4397_v42, %v4398_v7  ;;  %v4405_v18 = vrot.slane %v4404_v22, 4 }
 0x43c   : > { %v4172_v10 = vmax.f32 %v4170_v48, %v4171_v14  ;;  %v7712_v45 = vsel %vm2275_vm2, %v4165_v19, -inf  ;;  %v4387_v30 = vmax.f32 %v4385_v5, %v4386_v47  ;;  %v4393_v8 = vrot.slane %v4392_v25, 2 }
 0x43d   : > { %v4186_v50 = vmax.f32 %v4184_v37, %v4185_v11  ;;  %v7715_v36 = vsel %vm2275_vm2, %v4179_v34, -inf  ;;  %v4400_v56 = vrot.slane %v4399_v20, 2  ;;  %v4406_v38 = vmax.f32 %v4404_v22, %v4405_v18 }
 0x43e   : > { %v7718_v35 = vsel %vm2275_vm2, %v4172_v10, -inf  ;;  %v4388_v0 = vrot.slane %v4387_v30, 1  ;;  %v4394_v51 = vmax.f32 %v4392_v25, %v4393_v8  ;;  %v3251_v54 = vadd.f32 %v7482_v2, %v3212_v24 }
 0x43f   : > { %v7722_v29 = vsel %vm2275_vm2, %v4186_v50, -inf  ;;  %v4401_v21 = vmax.f32 %v4399_v20, %v4400_v56  ;;  %v4407_v17 = vrot.slane %v4406_v38, 2  ;;  %v3220_v43 = vadd.f32 %v7533_v12, %v7442_v27  ;;  %v7755_v20 = vpop.f32.mrf.mxu1 }
 0x440   : > { %v4389_v46 = vmax.f32 %v4387_v30, %v4388_v0  ;;  %v4395_v28 = vrot.slane %v4394_v51, 1  ;;  %3283 = vst.msk [vmem:[%s7490_s20 + $0x28] sm:$0xff] %vm2275_vm2, %v3251_v54  ;;  %v3315_v42 = vmax.f32 %v3251_v54, 0.0  ;;  %v3213_v60 = vadd.f32 %v7544_v4, %v7418_v1  ;;  %8441 = vst [vmem:[#allocation27_spill] sm:$0xff] %v7755_v20 }
 0x441   : > { %v4402_v48 = vrot.slane %v4401_v21, 1  ;;  %v4408_v5 = vmax.f32 %v4406_v38, %v4407_v17  ;;  %v3259_v24 = vadd.f32 %v7482_v2, %v3220_v43  ;;  %v7733_v49 = vadd.f32 %v7546_v61, %v7444_v3  ;;  %v3165_v0 = vpop.f32.mrf.mxu1 }
 0x442   : > { %v4396_v31 = vmax.f32 %v4394_v51, %v4395_v28  ;;  %v7736_v27 = vsel %vm2275_vm2, %v4389_v46, -inf  ;;  %v3459_v12 = vcombine.high %v3315_v42, %v3315_v42  ;;  %v3466_v37 = vrot.slane %v3315_v42, %v7488_v39 }
 0x443   : > { %v4403_v7 = vmax.f32 %v4401_v21, %v4402_v48  ;;  %v4409_v22 = vrot.slane %v4408_v5, 1  ;;  %3291 = vst.msk [vmem:[%s7490_s20 + $0x68] sm:$0xff] %vm2275_vm2, %v3259_v24  ;;  %v3323_v1 = vmax.f32 %v3259_v24, 0.0  ;;  %v7742_v4 = vadd.f32 %v7482_v2, %v3213_v60 }
 0x444   : > { %v7745_v19 = vsel %vm2275_vm2, %v4396_v31, -inf  ;;  %v3473_v3 = vrot.slane %v3459_v12, %v7488_v39  ;;  %v3474_v61 = vcombine.high %v3466_v37, %v3466_v37  ;;  %v4187_v14 = vsel %vm4046_vm0, %v3466_v37, -inf }
 0x445   : > { %v4410_v47 = vmax.f32 %v4408_v5, %v4409_v22  ;;  %v7750_v25 = vsel %vm2275_vm2, %v4403_v7, -inf  ;;  %v4188_v34 = vrot.slane %v4187_v14, 4  ;;  %v3595_v11 = vcombine.high %v3323_v1, %v3323_v1  ;;  %3284 = vst.msk [vmem:[%s7490_s20 + $0x30] sm:$0xff] %vm2275_vm2, %v7742_v4 }
 0x446   : > { %v3475_v18 = vcombine.high %v3473_v3, %v3473_v3  ;;  %v4194_v53 = vsel %vm4046_vm0, %v3474_v61, -inf  ;;  %v4201_v10 = vsel %vm4046_vm0, %v3473_v3, -inf  ;;  %v3602_v30 = vrot.slane %v3323_v1, %v7488_v39 }
 0x447   : > { %v7761_v8 = vsel %vm2275_vm2, %v4410_v47, -inf  ;;  %v4189_v50 = vmax.f32 %v4187_v14, %v4188_v34  ;;  %v4195_v56 = vrot.slane %v4194_v53, 4  ;;  %v4202_v38 = vrot.slane %v4201_v10, 4  ;;  %v7769_v14 = vpop.f32.mrf.mxu1 }
 0x448   : > { %v4208_v51 = vsel %vm4046_vm0, %v3475_v18, -inf  ;;  %v3609_v54 = vrot.slane %v3595_v11, %v7488_v39  ;;  %v3610_v21 = vcombine.high %v3602_v30, %v3602_v30  ;;  %v4411_v17 = vsel %vm4046_vm0, %v3602_v30, -inf  ;;  %8442 = vst [vmem:[#allocation28_spill] sm:$0xff] %v7769_v14 }
 0x449   : > { %v4190_v43 = vrot.slane %v4189_v50, 2  ;;  %v4196_v46 = vmax.f32 %v4194_v53, %v4195_v56  ;;  %v4203_v28 = vmax.f32 %v4201_v10, %v4202_v38  ;;  %v4209_v42 = vrot.slane %v4208_v51, 4  ;;  %v3170_v38 = vpop.f32.mrf.mxu1 }
 0x44a   : > { %v3611_v60 = vcombine.high %v3609_v54, %v3609_v54  ;;  %v4412_v48 = vrot.slane %v4411_v17, 4  ;;  %v4418_v5 = vsel %vm4046_vm0, %v3610_v21, -inf  ;;  %v4425_v24 = vsel %vm4046_vm0, %v3609_v54, -inf }
 0x44b   : > { %v4191_v31 = vmax.f32 %v4189_v50, %v4190_v43  ;;  %v4197_v12 = vrot.slane %v4196_v46, 2  ;;  %v4204_v37 = vrot.slane %v4203_v28, 2  ;;  %v4210_v7 = vmax.f32 %v4208_v51, %v4209_v42 }
 0x44c   : > { %v4413_v22 = vmax.f32 %v4411_v17, %v4412_v48  ;;  %v4419_v1 = vrot.slane %v4418_v5, 4  ;;  %v4426_v3 = vrot.slane %v4425_v24, 4  ;;  %v4432_v61 = vsel %vm4046_vm0, %v3611_v60, -inf }
 0x44d   : > { %v4192_v47 = vrot.slane %v4191_v31, 1  ;;  %v4198_v34 = vmax.f32 %v4196_v46, %v4197_v12  ;;  %v4205_v11 = vmax.f32 %v4203_v28, %v4204_v37  ;;  %v4211_v18 = vrot.slane %v4210_v7, 2 }
 0x44e   : > { %v4414_v53 = vrot.slane %v4413_v22, 2  ;;  %v4420_v10 = vmax.f32 %v4418_v5, %v4419_v1  ;;  %v4427_v30 = vmax.f32 %v4425_v24, %v4426_v3  ;;  %v4433_v56 = vrot.slane %v4432_v61, 4 }
 0x44f   : > { %v4193_v50 = vmax.f32 %v4191_v31, %v4192_v47  ;;  %v4199_v0 = vrot.slane %v4198_v34, 1  ;;  %v4206_v54 = vrot.slane %v4205_v11, 1  ;;  %v4212_v51 = vmax.f32 %v4210_v7, %v4211_v18 }
 0x450   : > { %v4415_v21 = vmax.f32 %v4413_v22, %v4414_v53  ;;  %v4421_v17 = vrot.slane %v4420_v10, 2  ;;  %v4428_v43 = vrot.slane %v4427_v30, 2  ;;  %v4434_v42 = vmax.f32 %v4432_v61, %v4433_v56 }
 0x451   : > { %v4200_v60 = vmax.f32 %v4198_v34, %v4199_v0  ;;  %v4207_v48 = vmax.f32 %v4205_v11, %v4206_v54  ;;  %v4213_v14 = vrot.slane %v4212_v51, 1  ;;  %v7772_v46 = vsel %vm2275_vm2, %v4193_v50, -inf }
 0x452   : > { %v4416_v28 = vrot.slane %v4415_v21, 1  ;;  %v4422_v12 = vmax.f32 %v4420_v10, %v4421_v17  ;;  %v4429_v5 = vmax.f32 %v4427_v30, %v4428_v43  ;;  %v4435_v24 = vrot.slane %v4434_v42, 2 }
 0x453   : > { %v4214_v37 = vmax.f32 %v4212_v51, %v4213_v14  ;;  %v7775_v31 = vsel %vm2275_vm2, %v4200_v60, -inf  ;;  %v7778_v7 = vsel %vm2275_vm2, %v4207_v48, -inf  ;;  %v3316_v22 = vmax.f32 %v7742_v4, 0.0 }
 0x454   : > { %v4417_v1 = vmax.f32 %v4415_v21, %v4416_v28  ;;  %v4423_v3 = vrot.slane %v4422_v12, 1  ;;  %v4430_v61 = vrot.slane %v4429_v5, 1  ;;  %v4436_v47 = vmax.f32 %v4434_v42, %v4435_v24 }
 0x455   : > { %v7782_v34 = vsel %vm2275_vm2, %v4214_v37, -inf  ;;  %v3476_v11 = vcombine.high %v3316_v22, %v3316_v22  ;;  %v3483_v18 = vrot.slane %v3316_v22, %v7488_v39  ;;  %v3260_v14 = vadd.f32 %v7482_v2, %v7733_v49 }
 0x456   : > { %v4424_v53 = vmax.f32 %v4422_v12, %v4423_v3  ;;  %v4431_v10 = vmax.f32 %v4429_v5, %v4430_v61  ;;  %v4437_v30 = vrot.slane %v4436_v47, 1  ;;  %v7788_v56 = vsel %vm2275_vm2, %v4417_v1, -inf  ;;  %v7810_v1 = vpop.f32.mrf.mxu1 }
 0x457   : > { %v3490_v4 = vrot.slane %v3476_v11, %v7488_v39  ;;  %v3491_v38 = vcombine.high %v3483_v18, %v3483_v18  ;;  %v4215_v50 = vsel %vm4046_vm0, %v3483_v18, -inf  ;;  %3292 = vst.msk [vmem:[%s7490_s20 + $0x70] sm:$0xff] %vm2275_vm2, %v3260_v14  ;;  %v3324_v0 = vmax.f32 %v3260_v14, 0.0  ;;  %8443 = vst [vmem:[#allocation29_spill] sm:$0xff] %v7810_v1 }
 0x458   : > { %v4438_v54 = vmax.f32 %v4436_v47, %v4437_v30  ;;  %v7795_v51 = vsel %vm2275_vm2, %v4424_v53, -inf  ;;  %v7798_v2 = vsel %vm2275_vm2, %v4431_v10, -inf  ;;  %v4216_v49 = vrot.slane %v4215_v50, 4  ;;  %v3173_v30 = vpop.f32.mrf.mxu1 }
 0x459   : > { %v3492_v21 = vcombine.high %v3490_v4, %v3490_v4  ;;  %v4222_v17 = vsel %vm4046_vm0, %v3491_v38, -inf  ;;  %v4229_v43 = vsel %vm4046_vm0, %v3490_v4, -inf  ;;  %v3612_v42 = vcombine.high %v3324_v0, %v3324_v0 }
 0x45a   : > { %v7803_v60 = vsel %vm2275_vm2, %v4438_v54, -inf  ;;  %v4217_v48 = vmax.f32 %v4215_v50, %v4216_v49  ;;  %v4223_v28 = vrot.slane %v4222_v17, 4  ;;  %v4230_v12 = vrot.slane %v4229_v43, 4 }
 0x45b   : > { %v4236_v5 = vsel %vm4046_vm0, %v3492_v21, -inf  ;;  %v3619_v24 = vrot.slane %v3324_v0, %v7488_v39  ;;  %v3626_v37 = vrot.slane %v3612_v42, %v7488_v39  ;;  %v3214_v22 = vadd.f32 %v7555_v23, %v7425_v15 }
 0x45c   : > { %v4218_v3 = vrot.slane %v4217_v48, 2  ;;  %v4224_v61 = vmax.f32 %v4222_v17, %v4223_v28  ;;  %v4231_v47 = vmax.f32 %v4229_v43, %v4230_v12  ;;  %v4237_v11 = vrot.slane %v4236_v5, 4 }
 0x45d   : > { %v3627_v18 = vcombine.high %v3619_v24, %v3619_v24  ;;  %v3628_v14 = vcombine.high %v3626_v37, %v3626_v37  ;;  %v4439_v53 = vsel %vm4046_vm0, %v3619_v24, -inf  ;;  %v4453_v10 = vsel %vm4046_vm0, %v3626_v37, -inf  ;;  %v7816_v37 = vpop.f32.mrf.mxu1 }
 0x45e   : > { %v4219_v4 = vmax.f32 %v4217_v48, %v4218_v3  ;;  %v4225_v38 = vrot.slane %v4224_v61, 2  ;;  %v4232_v50 = vrot.slane %v4231_v47, 2  ;;  %v4238_v0 = vmax.f32 %v4236_v5, %v4237_v11 }
 0x45f   : > { %v4440_v54 = vrot.slane %v4439_v53, 4  ;;  %v4446_v15 = vsel %vm4046_vm0, %v3627_v18, -inf  ;;  %v4454_v23 = vrot.slane %v4453_v10, 4  ;;  %v4460_v49 = vsel %vm4046_vm0, %v3628_v14, -inf  ;;  %v3178_v57 = vpop.f32.mrf.mxu1 }
 0x460   : > { %v4220_v21 = vrot.slane %v4219_v4, 1  ;;  %v4226_v17 = vmax.f32 %v4224_v61, %v4225_v38  ;;  %v4233_v43 = vmax.f32 %v4231_v47, %v4232_v50  ;;  %v4239_v42 = vrot.slane %v4238_v0, 2 }
 0x461   : > { %v4441_v28 = vmax.f32 %v4439_v53, %v4440_v54  ;;  %v4447_v12 = vrot.slane %v4446_v15, 4  ;;  %v4455_v24 = vmax.f32 %v4453_v10, %v4454_v23  ;;  %v4461_v1 = vrot.slane %v4460_v49, 4 }
 0x462   : > { %v4221_v48 = vmax.f32 %v4219_v4, %v4220_v21  ;;  %v4227_v3 = vrot.slane %v4226_v17, 1  ;;  %v4234_v30 = vrot.slane %v4233_v43, 1  ;;  %v4240_v5 = vmax.f32 %v4238_v0, %v4239_v42 }
 0x463   : > { %v4442_v11 = vrot.slane %v4441_v28, 2  ;;  %v4448_v20 = vmax.f32 %v4446_v15, %v4447_v12  ;;  %v4456_v18 = vrot.slane %v4455_v24, 2  ;;  %v4462_v52 = vmax.f32 %v4460_v49, %v4461_v1 }
 0x464   : > { %v4228_v14 = vmax.f32 %v4226_v17, %v4227_v3  ;;  %v4235_v41 = vmax.f32 %v4233_v43, %v4234_v30  ;;  %v4241_v61 = vrot.slane %v4240_v5, 1  ;;  %v4968_v47 = vsel %vm2275_vm2, %v4221_v48, -inf  ;;  %v7828_v43 = vld [vmem:[%s8409_s4] ss:$0 sm:$0xff] }
 0x465   : > { %v4969_v53 = vmax.f32 %v7712_v45, %v4968_v47  ;;  %v4443_v10 = vmax.f32 %v4441_v28, %v4442_v11  ;;  %v4449_v38 = vrot.slane %v4448_v20, 2  ;;  %v4457_v50 = vmax.f32 %v4455_v24, %v4456_v18 }
 0x466   : > { %v4242_v54 = vmax.f32 %v4240_v5, %v4241_v61  ;;  %v4971_v4 = vsel %vm2275_vm2, %v4228_v14, -inf  ;;  %v4974_v0 = vsel %vm2275_vm2, %v4235_v41, -inf  ;;  %v4463_v23 = vrot.slane %v4462_v52, 2 }
 0x467   : > { %v4972_v15 = vmax.f32 %v7718_v35, %v4971_v4  ;;  %v4975_v57 = vmax.f32 %v7715_v36, %v4974_v0  ;;  %v4444_v1 = vrot.slane %v4443_v10, 1  ;;  %v4450_v49 = vmax.f32 %v4448_v20, %v4449_v38 }
 0x468   : > { %v4977_v21 = vsel %vm2275_vm2, %v4242_v54, -inf  ;;  %v4458_v17 = vrot.slane %v4457_v50, 1  ;;  %v4464_v45 = vmax.f32 %v4462_v52, %v4463_v23  ;;  %v3253_v42 = vadd.f32 %v7828_v43, %v3214_v22 }
 0x469   : > { %v4978_v41 = vmax.f32 %v7722_v29, %v4977_v21  ;;  %v5213_v35 = vsel %vm5199_vm1, %v4972_v15, %v4969_v53  ;;  %v4445_v28 = vmax.f32 %v4443_v10, %v4444_v1  ;;  %v4451_v12 = vrot.slane %v4450_v49, 1  ;;  %v7863_v1 = vpop.f32.mrf.mxu1 }
 0x46a   : > { %v5214_v36 = vsel %vm5201_vm3, %v4975_v57, %v5213_v35  ;;  %v4459_v20 = vmax.f32 %v4457_v50, %v4458_v17  ;;  %v4465_v24 = vrot.slane %v4464_v45, 1  ;;  %3285 = vst.msk [vmem:[%s7490_s20 + $0x38] sm:$0xff] %vm2275_vm2, %v3253_v42  ;;  %v3317_v52 = vmax.f32 %v3253_v42, 0.0 }
 0x46b   : > { %v4452_v48 = vmax.f32 %v4450_v49, %v4451_v12  ;;  %v5016_v3 = vsel %vm2275_vm2, %v4445_v28, -inf  ;;  %v7838_v30 = vsel %vm5203_vm4, %v4978_v41, %v5214_v36  ;;  %v3222_v29 = vadd.f32 %v7557_v58, %v7446_v44  ;;  %v3181_v28 = vpop.f32.mrf.mxu1 }
 0x46c   : > { %v4466_v22 = vmax.f32 %v4464_v45, %v4465_v24  ;;  %v5017_v5 = vmax.f32 %v7736_v27, %v5016_v3  ;;  %v5022_v11 = vsel %vm2275_vm2, %v4459_v20, -inf  ;;  %v3493_v18 = vcombine.high %v3317_v52, %v3317_v52 }
 0x46d   : > { %v5019_v14 = vsel %vm2275_vm2, %v4452_v48, -inf  ;;  %v5023_v61 = vmax.f32 %v7750_v25, %v5022_v11  ;;  %v3500_v47 = vrot.slane %v3317_v52, %v7488_v39  ;;  %v3261_v53 = vadd.f32 %v7828_v43, %v3222_v29 }
 0x46e   : > { %v5020_v10 = vmax.f32 %v7745_v19, %v5019_v14  ;;  %v5025_v38 = vsel %vm2275_vm2, %v4466_v22, -inf  ;;  %v3507_v44 = vrot.slane %v3493_v18, %v7488_v39  ;;  %v7853_v58 = vadd.f32 %v7576_v62, %v7428_v32 }
 0x46f   : > { %v5026_v27 = vmax.f32 %v7761_v8, %v5025_v38  ;;  %v3508_v50 = vcombine.high %v3500_v47, %v3500_v47  ;;  %v4243_v54 = vsel %vm4046_vm0, %v3500_v47, -inf  ;;  %3293 = vst.msk [vmem:[%s7490_s20 + $0x78] sm:$0xff] %vm2275_vm2, %v3261_v53  ;;  %v3325_v25 = vmax.f32 %v3261_v53, 0.0 }
 0x470   : > { %v5227_v4 = vsel %vm5199_vm1, %v5020_v10, %v5017_v5  ;;  %v3509_v0 = vcombine.high %v3507_v44, %v3507_v44  ;;  %v4244_v19 = vrot.slane %v4243_v54, 4  ;;  %v4257_v23 = vsel %vm4046_vm0, %v3507_v44, -inf }
 0x471   : > { %v5228_v15 = vsel %vm5201_vm3, %v5023_v61, %v5227_v4  ;;  %v4250_v57 = vsel %vm4046_vm0, %v3508_v50, -inf  ;;  %v4258_v32 = vrot.slane %v4257_v23, 4  ;;  %v3629_v62 = vcombine.high %v3325_v25, %v3325_v25 }
 0x472   : > { %v4245_v8 = vmax.f32 %v4243_v54, %v4244_v19  ;;  %v4251_v49 = vrot.slane %v4250_v57, 4  ;;  %v4264_v21 = vsel %vm4046_vm0, %v3509_v0, -inf  ;;  %v3636_v17 = vrot.slane %v3325_v25, %v7488_v39 }
 0x473   : > { %v4259_v45 = vmax.f32 %v4257_v23, %v4258_v32  ;;  %v4265_v42 = vrot.slane %v4264_v21, 4  ;;  %v3643_v41 = vrot.slane %v3629_v62, %v7488_v39  ;;  %v7869_v35 = vsel %vm5203_vm4, %v5026_v27, %v5228_v15 }
 0x474   : > { %v4246_v12 = vrot.slane %v4245_v8, 2  ;;  %v4252_v36 = vmax.f32 %v4250_v57, %v4251_v49  ;;  %v3644_v20 = vcombine.high %v3636_v17, %v3636_v17  ;;  %v4467_v24 = vsel %vm4046_vm0, %v3636_v17, -inf  ;;  %v7875_v57 = vpop.f32.mrf.mxu1 }
 0x475   : > { %v4260_v52 = vrot.slane %v4259_v45, 2  ;;  %v4266_v48 = vmax.f32 %v4264_v21, %v4265_v42  ;;  %v3645_v3 = vcombine.high %v3643_v41, %v3643_v41  ;;  %v4468_v29 = vrot.slane %v4467_v24, 4 }
 0x476   : > { %v4247_v22 = vmax.f32 %v4245_v8, %v4246_v12  ;;  %v4253_v5 = vrot.slane %v4252_v36, 2  ;;  %v4474_v11 = vsel %vm4046_vm0, %v3644_v20, -inf  ;;  %v4481_v18 = vsel %vm4046_vm0, %v3643_v41, -inf  ;;  %v3186_v41 = vpop.f32.mrf.mxu1 }
 0x477   : > { %v4261_v14 = vmax.f32 %v4259_v45, %v4260_v52  ;;  %v4267_v61 = vrot.slane %v4266_v48, 2  ;;  %v4469_v47 = vmax.f32 %v4467_v24, %v4468_v29  ;;  %v4475_v53 = vrot.slane %v4474_v11, 4 }
 0x478   : > { %v4248_v10 = vrot.slane %v4247_v22, 1  ;;  %v4254_v38 = vmax.f32 %v4252_v36, %v4253_v5  ;;  %v4482_v44 = vrot.slane %v4481_v18, 4  ;;  %v4488_v27 = vsel %vm4046_vm0, %v3645_v3, -inf }
 0x479   : > { %v4262_v50 = vrot.slane %v4261_v14, 1  ;;  %v4268_v54 = vmax.f32 %v4266_v48, %v4267_v61  ;;  %v4470_v25 = vrot.slane %v4469_v47, 2  ;;  %v4476_v4 = vmax.f32 %v4474_v11, %v4475_v53  ;;  %v8444_v53 = vld [vmem:[#allocation22_spill] sm:$0xff] }
 0x47a   : > { %v4249_v0 = vmax.f32 %v4247_v22, %v4248_v10  ;;  %v4255_v19 = vrot.slane %v4254_v38, 1  ;;  %v4483_v23 = vmax.f32 %v4481_v18, %v4482_v44  ;;  %v4489_v15 = vrot.slane %v4488_v27, 4 }
 0x47b   : > { %v4263_v32 = vmax.f32 %v4261_v14, %v4262_v50  ;;  %v4269_v62 = vrot.slane %v4268_v54, 1  ;;  %v4471_v8 = vmax.f32 %v4469_v47, %v4470_v25  ;;  %v4477_v49 = vrot.slane %v4476_v4, 2 }
 0x47c   : > { %v4256_v21 = vmax.f32 %v4254_v38, %v4255_v19  ;;  %v4980_v17 = vsel %vm2275_vm2, %v4249_v0, -inf  ;;  %v4484_v45 = vrot.slane %v4483_v23, 2  ;;  %v4490_v42 = vmax.f32 %v4488_v27, %v4489_v15  ;;  %v8445_v19 = vld [vmem:[#allocation6_spill] sm:$0xff] }
 0x47d   : > { %v4270_v28 = vmax.f32 %v4268_v54, %v4269_v62  ;;  %v4981_v12 = vmax.f32 %v7772_v46, %v4980_v17  ;;  %v4986_v36 = vsel %vm2275_vm2, %v4263_v32, -inf  ;;  %v4472_v20 = vrot.slane %v4471_v8, 1 }
 0x47e   : > { %v4983_v24 = vsel %vm2275_vm2, %v4256_v21, -inf  ;;  %v4987_v52 = vmax.f32 %v7778_v7, %v4986_v36  ;;  %v4478_v48 = vmax.f32 %v4476_v4, %v4477_v49  ;;  %v4485_v3 = vmax.f32 %v4483_v23, %v4484_v45  ;;  %v7899_v4 = vpop.f32.mrf.mxu1  ;;  %v8446_v23 = vld [vmem:[#allocation23_spill] sm:$0xff] }
 0x47f   : > { %v4984_v29 = vmax.f32 %v7775_v31, %v4983_v24  ;;  %v4989_v22 = vsel %vm2275_vm2, %v4270_v28, -inf  ;;  %v5216_v5 = vsel %vm5205_vm5, %v4981_v12, %v7838_v30  ;;  %v4473_v11 = vmax.f32 %v4471_v8, %v4472_v20  ;;  %v8447_v28 = vld [vmem:[#allocation7_spill] sm:$0xff] }
 0x480   : > { %v4990_v46 = vmax.f32 %v7782_v34, %v4989_v22  ;;  %v4479_v18 = vrot.slane %v4478_v48, 1  ;;  %v4486_v14 = vrot.slane %v4485_v3, 1  ;;  %v4491_v61 = vrot.slane %v4490_v42, 2  ;;  %v3189_v49 = vpop.f32.mrf.mxu1 }
 0x481   : > { %v5217_v47 = vsel %vm5207_vm6, %v4984_v29, %v5216_v5  ;;  %v5028_v7 = vsel %vm2275_vm2, %v4473_v11, -inf  ;;  %v3254_v31 = vadd.f32 %v7828_v43, %v7853_v58  ;;  %v3223_v10 = vadd.f32 %v8444_v53, %v7448_v16 }
 0x482   : > { %v5218_v30 = vsel %vm5209_vm7, %v4987_v52, %v5217_v47  ;;  %v4480_v38 = vmax.f32 %v4478_v48, %v4479_v18  ;;  %v4487_v44 = vmax.f32 %v4485_v3, %v4486_v14  ;;  %v4492_v27 = vmax.f32 %v4490_v42, %v4491_v61 }
 0x483   : > { %v5219_v34 = vsel %vm5211_vm8, %v4990_v46, %v5218_v30  ;;  %v5029_v50 = vmax.f32 %v7788_v56, %v5028_v7  ;;  %3286 = vst.msk [vmem:[%s7490_s20 + $0x40] sm:$0xff] %vm2275_vm2, %v3254_v31  ;;  %v3318_v54 = vmax.f32 %v3254_v31, 0.0  ;;  %v3262_v25 = vadd.f32 %v7828_v43, %v3223_v10 }
 0x484   : > { %5271 = vst.msk [vmem:[%s7666_s29 + $0x8] sm:$0xff] %vm2275_vm2, %v5219_v34  ;;  %v4493_v16 = vrot.slane %v4492_v27, 1  ;;  %v5031_v58 = vsel %vm2275_vm2, %v4480_v38, -inf  ;;  %v5034_v0 = vsel %vm2275_vm2, %v4487_v44, -inf  ;;  %v3216_v15 = vadd.f32 %v8446_v23, %v8445_v19 }
 0x485   : > { %v5032_v32 = vmax.f32 %v7795_v51, %v5031_v58  ;;  %v5035_v56 = vmax.f32 %v7798_v2, %v5034_v0  ;;  %v5230_v62 = vsel %vm5205_vm5, %v5029_v50, %v7869_v35  ;;  %v3510_v8 = vcombine.high %v3318_v54, %v3318_v54  ;;  %3294 = vst.msk [vmem:[%s7490_s20 + $0x80] sm:$0xff] %vm2275_vm2, %v3262_v25  ;;  %v8448_v35 = vld [vmem:[#allocation8_spill] sm:$0xff] }
 0x486   : > { %v4494_v21 = vmax.f32 %v4492_v27, %v4493_v16  ;;  %v3517_v17 = vrot.slane %v3318_v54, %v7488_v39  ;;  %v3326_v45 = vmax.f32 %v3262_v25, 0.0  ;;  %v3255_v42 = vadd.f32 %v7828_v43, %v3216_v15  ;;  %v7940_v54 = vpop.f32.mrf.mxu1 }
 0x487   : > { %v5231_v41 = vsel %vm5207_vm6, %v5032_v32, %v5230_v62  ;;  %v3524_v51 = vrot.slane %v3510_v8, %v7488_v39  ;;  %v7919_v2 = vadd.f32 %v7594_v13, %v8447_v28  ;;  %v7923_v12 = vadd.f32 %v7650_v6, %v8448_v35 }
 0x488   : > { %v5037_v36 = vsel %vm2275_vm2, %v4494_v21, -inf  ;;  %v5232_v20 = vsel %vm5209_vm7, %v5035_v56, %v5231_v41  ;;  %v3525_v24 = vcombine.high %v3517_v17, %v3517_v17  ;;  %v4271_v52 = vsel %vm4046_vm0, %v3517_v17, -inf  ;;  %3287 = vst.msk [vmem:[%s7490_s20 + $0x48] sm:$0xff] %vm2275_vm2, %v3255_v42  ;;  %v3194_v56 = vpop.f32.mrf.mxu1 }
 0x489   : > { %v5038_v48 = vmax.f32 %v7803_v60, %v5037_v36  ;;  %v3526_v3 = vcombine.high %v3524_v51, %v3524_v51  ;;  %v4272_v29 = vrot.slane %v4271_v52, 4  ;;  %v4285_v13 = vsel %vm4046_vm0, %v3524_v51, -inf }
 0x48a   : > { %v4278_v22 = vsel %vm4046_vm0, %v3525_v24, -inf  ;;  %v4286_v6 = vrot.slane %v4285_v13, 4  ;;  %v3646_v5 = vcombine.high %v3326_v45, %v3326_v45  ;;  %v3653_v11 = vrot.slane %v3326_v45, %v7488_v39 }
 0x48b   : > { %v5233_v46 = vsel %vm5211_vm8, %v5038_v48, %v5232_v20  ;;  %v4273_v18 = vmax.f32 %v4271_v52, %v4272_v29  ;;  %v4279_v14 = vrot.slane %v4278_v22, 4  ;;  %v4292_v61 = vsel %vm4046_vm0, %v3526_v3, -inf }
 0x48c   : > { %5273 = vst.msk [vmem:[%s7666_s29 + $0x18] sm:$0xff] %vm2275_vm2, %v5233_v46  ;;  %v4287_v47 = vmax.f32 %v4285_v13, %v4286_v6  ;;  %v4293_v60 = vrot.slane %v4292_v61, 4  ;;  %v3660_v7 = vrot.slane %v3646_v5, %v7488_v39  ;;  %v3661_v31 = vcombine.high %v3653_v11, %v3653_v11 }
 0x48d   : > { %v4274_v53 = vrot.slane %v4273_v18, 2  ;;  %v4280_v10 = vmax.f32 %v4278_v22, %v4279_v14  ;;  %v4495_v30 = vsel %vm4046_vm0, %v3653_v11, -inf  ;;  %v3319_v38 = vmax.f32 %v3255_v42, 0.0 }
 0x48e   : > { %v4288_v44 = vrot.slane %v4287_v47, 2  ;;  %v4294_v27 = vmax.f32 %v4292_v61, %v4293_v60  ;;  %v3662_v34 = vcombine.high %v3660_v7, %v3660_v7  ;;  %v4496_v50 = vrot.slane %v4495_v30, 4 }
 0x48f   : > { %v4275_v25 = vmax.f32 %v4273_v18, %v4274_v53  ;;  %v4281_v16 = vrot.slane %v4280_v10, 2  ;;  %v4502_v58 = vsel %vm4046_vm0, %v3661_v31, -inf  ;;  %v4509_v0 = vsel %vm4046_vm0, %v3660_v7, -inf }
 0x490   : > { %v4289_v19 = vmax.f32 %v4287_v47, %v4288_v44  ;;  %v4295_v23 = vrot.slane %v4294_v27, 2  ;;  %v4497_v15 = vmax.f32 %v4495_v30, %v4496_v50  ;;  %v4503_v32 = vrot.slane %v4502_v58, 4 }
 0x491   : > { %v4276_v62 = vrot.slane %v4275_v25, 1  ;;  %v4282_v8 = vmax.f32 %v4280_v10, %v4281_v16  ;;  %v4510_v49 = vrot.slane %v4509_v0, 4  ;;  %v4516_v21 = vsel %vm4046_vm0, %v3662_v34, -inf }
 0x492   : > { %v4290_v17 = vrot.slane %v4289_v19, 1  ;;  %v4296_v45 = vmax.f32 %v4294_v27, %v4295_v23  ;;  %v4498_v42 = vrot.slane %v4497_v15, 2  ;;  %v4504_v41 = vmax.f32 %v4502_v58, %v4503_v32 }
 0x493   : > { %v4277_v51 = vmax.f32 %v4275_v25, %v4276_v62  ;;  %v4283_v28 = vrot.slane %v4282_v8, 1  ;;  %v4511_v35 = vmax.f32 %v4509_v0, %v4510_v49  ;;  %v4517_v36 = vrot.slane %v4516_v21, 4  ;;  %v7960_v0 = vpop.f32.mrf.mxu1 }
 0x494   : > { %v4291_v20 = vmax.f32 %v4289_v19, %v4290_v17  ;;  %v4297_v24 = vrot.slane %v4296_v45, 1  ;;  %v4499_v52 = vmax.f32 %v4497_v15, %v4498_v42  ;;  %v4505_v48 = vrot.slane %v4504_v41, 2 }
 0x495   : > { %v4284_v3 = vmax.f32 %v4282_v8, %v4283_v28  ;;  %v4991_v29 = vsel %vm2275_vm2, %v4277_v51, -inf  ;;  %v4512_v13 = vrot.slane %v4511_v35, 2  ;;  %v4518_v22 = vmax.f32 %v4516_v21, %v4517_v36  ;;  %v3197_v8 = vpop.f32.mrf.mxu1 }
 0x496   : > { %v4298_v6 = vmax.f32 %v4296_v45, %v4297_v24  ;;  %v4993_v5 = vmax.f32 %v4991_v29, %v7604_v9  ;;  %v4997_v11 = vsel %vm2275_vm2, %v4291_v20, -inf  ;;  %v4500_v46 = vrot.slane %v4499_v52, 1 }
 0x497   : > { %v4994_v18 = vsel %vm2275_vm2, %v4284_v3, -inf  ;;  %v4999_v14 = vmax.f32 %v4997_v11, %v7621_v40  ;;  %v4506_v61 = vmax.f32 %v4504_v41, %v4505_v48  ;;  %v4513_v47 = vmax.f32 %v4511_v35, %v4512_v13 }
 0x498   : > { %v4996_v60 = vmax.f32 %v4994_v18, %v7613_v26  ;;  %v5000_v7 = vsel %vm2275_vm2, %v4298_v6, -inf  ;;  %v4501_v31 = vmax.f32 %v4499_v52, %v4500_v46  ;;  %v4519_v53 = vrot.slane %v4518_v22, 2 }
 0x499   : > { %v5002_v10 = vmax.f32 %v5000_v7, %v7624_v33  ;;  %v4507_v30 = vrot.slane %v4506_v61, 1  ;;  %v4514_v44 = vrot.slane %v4513_v47, 1  ;;  %v3527_v9 = vcombine.high %v3319_v38, %v3319_v38 }
 0x49a   : > { %v5220_v27 = vsel %vm5199_vm1, %v4996_v60, %v4993_v5  ;;  %v4520_v34 = vmax.f32 %v4518_v22, %v4519_v53  ;;  %v7955_v50 = vsel %vm2275_vm2, %v4501_v31, -inf  ;;  %v3534_v40 = vrot.slane %v3319_v38, %v7488_v39 }
 0x49b   : > { %v5221_v25 = vsel %vm5201_vm3, %v4999_v14, %v5220_v27  ;;  %v4508_v26 = vmax.f32 %v4506_v61, %v4507_v30  ;;  %v4515_v16 = vmax.f32 %v4513_v47, %v4514_v44  ;;  %v3541_v58 = vrot.slane %v3527_v9, %v7488_v39 }
 0x49c   : > { %v4521_v33 = vrot.slane %v4520_v34, 1  ;;  %v3542_v19 = vcombine.high %v3534_v40, %v3534_v40  ;;  %v4299_v23 = vsel %vm4046_vm0, %v3534_v40, -inf  ;;  %v7964_v15 = vsel %vm5203_vm4, %v5002_v10, %v5221_v25 }
 0x49d   : > { %v7967_v32 = vsel %vm2275_vm2, %v4508_v26, -inf  ;;  %v7970_v38 = vsel %vm2275_vm2, %v4515_v16, -inf  ;;  %v3543_v56 = vcombine.high %v3541_v58, %v3541_v58  ;;  %v4300_v62 = vrot.slane %v4299_v23, 4  ;;  %v7999_v26 = vpop.f32.mrf.mxu1 }
 0x49e   : > { %v4522_v49 = vmax.f32 %v4520_v34, %v4521_v33  ;;  %v4306_v21 = vsel %vm4046_vm0, %v3542_v19, -inf  ;;  %v4313_v17 = vsel %vm4046_vm0, %v3541_v58, -inf  ;;  %v3263_v45 = vadd.f32 %v7828_v43, %v7919_v2  ;;  %v8449_v2 = vld [vmem:[#allocation9_spill] sm:$0xff] }
 0x49f   : > { %v4301_v42 = vmax.f32 %v4299_v23, %v4300_v62  ;;  %v4307_v41 = vrot.slane %v4306_v21, 4  ;;  %v4314_v51 = vrot.slane %v4313_v17, 4  ;;  %v4320_v28 = vsel %vm4046_vm0, %v3543_v56, -inf }
 0x4a0   : > { %v7978_v35 = vsel %vm2275_vm2, %v4522_v49, -inf  ;;  %v4321_v36 = vrot.slane %v4320_v28, 4  ;;  %3295 = vst.msk [vmem:[%s7490_s20 + $0x88] sm:$0xff] %vm2275_vm2, %v3263_v45  ;;  %v3327_v20 = vmax.f32 %v3263_v45, 0.0  ;;  %v3264_v24 = vadd.f32 %v7828_v43, %v7923_v12  ;;  %v3202_v49 = vpop.f32.mrf.mxu1 }
 0x4a1   : > { %v4302_v52 = vrot.slane %v4301_v42, 2  ;;  %v4308_v48 = vmax.f32 %v4306_v21, %v4307_v41  ;;  %v4315_v3 = vmax.f32 %v4313_v17, %v4314_v51  ;;  %v3226_v29 = vadd.f32 %v7670_v59, %v8449_v2  ;;  %v8451_v2 = vld [vmem:[#allocation25_spill] sm:$0xff] }
 0x4a2   : > { %v4322_v13 = vmax.f32 %v4320_v28, %v4321_v36  ;;  %v3663_v22 = vcombine.high %v3327_v20, %v3327_v20  ;;  %v3670_v6 = vrot.slane %v3327_v20, %v7488_v39  ;;  %3296 = vst.msk [vmem:[%s7490_s20 + $0x90] sm:$0xff] %vm2275_vm2, %v3264_v24  ;;  %v3328_v5 = vmax.f32 %v3264_v24, 0.0  ;;  %v8450_v24 = vld [vmem:[#allocation24_spill] sm:$0xff] }
 0x4a3   : > { %v4303_v11 = vmax.f32 %v4301_v42, %v4302_v52  ;;  %v4309_v46 = vrot.slane %v4308_v48, 2  ;;  %v4316_v18 = vrot.slane %v4315_v3, 2  ;;  %v7990_v14 = vadd.f32 %v7828_v43, %v3226_v29 }
 0x4a4   : > { %v4323_v12 = vrot.slane %v4322_v13, 2  ;;  %v3677_v61 = vrot.slane %v3663_v22, %v7488_v39  ;;  %v3678_v47 = vcombine.high %v3670_v6, %v3670_v6  ;;  %v4523_v59 = vsel %vm4046_vm0, %v3670_v6, -inf }
 0x4a5   : > { %v4304_v60 = vrot.slane %v4303_v11, 1  ;;  %v4310_v7 = vmax.f32 %v4308_v48, %v4309_v46  ;;  %v4317_v31 = vmax.f32 %v4315_v3, %v4316_v18  ;;  %v4524_v53 = vrot.slane %v4523_v59, 4  ;;  %3297 = vst.msk [vmem:[%s7490_s20 + $0x98] sm:$0xff] %vm2275_vm2, %v7990_v14 }
 0x4a6   : > { %v4324_v10 = vmax.f32 %v4322_v13, %v4323_v12  ;;  %v3679_v30 = vcombine.high %v3677_v61, %v3677_v61  ;;  %v4530_v44 = vsel %vm4046_vm0, %v3678_v47, -inf  ;;  %v4537_v9 = vsel %vm4046_vm0, %v3677_v61, -inf }
 0x4a7   : > { %v4305_v27 = vmax.f32 %v4303_v11, %v4304_v60  ;;  %v4311_v34 = vrot.slane %v4310_v7, 1  ;;  %v4318_v40 = vrot.slane %v4317_v31, 1  ;;  %v4525_v25 = vmax.f32 %v4523_v59, %v4524_v53 }
 0x4a8   : > { %v4325_v16 = vrot.slane %v4324_v10, 1  ;;  %v4531_v58 = vrot.slane %v4530_v44, 4  ;;  %v4538_v33 = vrot.slane %v4537_v9, 4  ;;  %v4544_v19 = vsel %vm4046_vm0, %v3679_v30, -inf }
 0x4a9   : > { %v4312_v23 = vmax.f32 %v4310_v7, %v4311_v34  ;;  %v4319_v56 = vmax.f32 %v4317_v31, %v4318_v40  ;;  %v5003_v62 = vsel %vm2275_vm2, %v4305_v27, -inf  ;;  %v4526_v8 = vrot.slane %v4525_v25, 2 }
 0x4aa   : > { %v4326_v21 = vmax.f32 %v4324_v10, %v4325_v16  ;;  %v5005_v17 = vmax.f32 %v5003_v62, %v7677_v55  ;;  %v4532_v45 = vmax.f32 %v4530_v44, %v4531_v58  ;;  %v4539_v42 = vmax.f32 %v4537_v9, %v4538_v33 }
 0x4ab   : > { %v5006_v41 = vsel %vm2275_vm2, %v4312_v23, -inf  ;;  %v5009_v51 = vsel %vm2275_vm2, %v4319_v56, -inf  ;;  %v4527_v28 = vmax.f32 %v4525_v25, %v4526_v8  ;;  %v4545_v36 = vrot.slane %v4544_v19, 4 }
 0x4ac   : > { %v5008_v20 = vmax.f32 %v5006_v41, %v7687_v63  ;;  %v5011_v52 = vmax.f32 %v5009_v51, %v8450_v24  ;;  %v5012_v48 = vsel %vm2275_vm2, %v4326_v21, -inf  ;;  %v5223_v3 = vsel %vm5205_vm5, %v5005_v17, %v7964_v15  ;;  %v8014_v63 = vpop.f32.mrf.mxu1  ;;  %v8453_v24 = vld [vmem:[#allocation26_spill] sm:$0xff] }
 0x4ad   : > { %v5014_v29 = vmax.f32 %v5012_v48, %v8451_v2  ;;  %v4528_v55 = vrot.slane %v4527_v28, 1  ;;  %v4533_v13 = vrot.slane %v4532_v45, 2  ;;  %v4540_v22 = vrot.slane %v4539_v42, 2  ;;  %v8454_v48 = vld [vmem:[#allocation11_spill] sm:$0xff] }
 0x4ae   : > { %v5224_v6 = vsel %vm5207_vm6, %v5008_v20, %v5223_v3  ;;  %v4546_v11 = vmax.f32 %v4544_v19, %v4545_v36  ;;  %v3680_v46 = vcombine.high %v3328_v5, %v3328_v5  ;;  %v3687_v18 = vrot.slane %v3328_v5, %v7488_v39  ;;  %v3205_v53 = vpop.f32.mrf.mxu1  ;;  %v8452_v20 = vld [vmem:[#allocation10_spill] sm:$0xff]  ;;  %v8455_v3 = vld [vmem:[#allocation27_spill] sm:$0xff] }
 0x4af   : > { %v5225_v12 = vsel %vm5209_vm7, %v5011_v52, %v5224_v6  ;;  %v4529_v61 = vmax.f32 %v4527_v28, %v4528_v55  ;;  %v4534_v47 = vmax.f32 %v4532_v45, %v4533_v13  ;;  %v4541_v59 = vmax.f32 %v4539_v42, %v4540_v22 }
 0x4b0   : > { %v5226_v15 = vsel %vm5211_vm8, %v5014_v29, %v5225_v12  ;;  %v4547_v60 = vrot.slane %v4546_v11, 2  ;;  %v3694_v7 = vrot.slane %v3680_v46, %v7488_v39  ;;  %v3695_v31 = vcombine.high %v3687_v18, %v3687_v18 }
 0x4b1   : > { %5272 = vst.msk [vmem:[%s7666_s29 + $0x10] sm:$0xff] %vm2275_vm2, %v5226_v15  ;;  %v4535_v10 = vrot.slane %v4534_v47, 1  ;;  %v4542_v30 = vrot.slane %v4541_v59, 1  ;;  %v8022_v5 = vsel %vm2275_vm2, %v4529_v61, -inf  ;;  %v4551_v44 = vsel %vm4046_vm0, %v3687_v18, -inf }
 0x4b2   : > { %v4548_v9 = vmax.f32 %v4546_v11, %v4547_v60  ;;  %v3696_v27 = vcombine.high %v3694_v7, %v3694_v7  ;;  %v4552_v34 = vrot.slane %v4551_v44, 4  ;;  %v4558_v40 = vsel %vm4046_vm0, %v3695_v31, -inf }
 0x4b3   : > { %v4536_v25 = vmax.f32 %v4534_v47, %v4535_v10  ;;  %v4543_v16 = vmax.f32 %v4541_v59, %v4542_v30  ;;  %v4559_v58 = vrot.slane %v4558_v40, 4  ;;  %v4565_v33 = vsel %vm4046_vm0, %v3694_v7, -inf }
 0x4b4   : > { %v4549_v19 = vrot.slane %v4548_v9, 1  ;;  %v4553_v23 = vmax.f32 %v4551_v44, %v4552_v34  ;;  %v4566_v56 = vrot.slane %v4565_v33, 4  ;;  %v4572_v62 = vsel %vm4046_vm0, %v3696_v27, -inf }
 0x4b5   : > { %v8029_v8 = vsel %vm2275_vm2, %v4536_v25, -inf  ;;  %v8032_v49 = vsel %vm2275_vm2, %v4543_v16, -inf  ;;  %v4560_v21 = vmax.f32 %v4558_v40, %v4559_v58  ;;  %v4573_v17 = vrot.slane %v4572_v62, 4 }
 0x4b6   : > { %v4550_v45 = vmax.f32 %v4548_v9, %v4549_v19  ;;  %v4554_v42 = vrot.slane %v4553_v23, 2  ;;  %v4567_v41 = vmax.f32 %v4565_v33, %v4566_v56  ;;  %v3329_v51 = vmax.f32 %v7990_v14, 0.0 }
 0x4b7   : > { %v4561_v28 = vrot.slane %v4560_v21, 2  ;;  %v4574_v36 = vmax.f32 %v4572_v62, %v4573_v17  ;;  %v3227_v52 = vadd.f32 %v8453_v24, %v8452_v20  ;;  %v3228_v2 = vadd.f32 %v8455_v3, %v8454_v48 }
 0x4b8   : > { %v8040_v29 = vsel %vm2275_vm2, %v4550_v45, -inf  ;;  %v4555_v55 = vmax.f32 %v4553_v23, %v4554_v42  ;;  %v4568_v13 = vrot.slane %v4567_v41, 2  ;;  %v3697_v22 = vcombine.high %v3329_v51, %v3329_v51 }
 0x4b9   : > { %v4562_v6 = vmax.f32 %v4560_v21, %v4561_v28  ;;  %v4575_v11 = vrot.slane %v4574_v36, 2  ;;  %v3704_v14 = vrot.slane %v3329_v51, %v7488_v39  ;;  %v3266_v46 = vadd.f32 %v7828_v43, %v3227_v52 }
 0x4ba   : > { %v4556_v18 = vrot.slane %v4555_v55, 1  ;;  %v4569_v12 = vmax.f32 %v4567_v41, %v4568_v13  ;;  %v3711_v61 = vrot.slane %v3697_v22, %v7488_v39  ;;  %v3267_v47 = vadd.f32 %v7828_v43, %v3228_v2 }
 0x4bb   : > { %v4563_v59 = vrot.slane %v4562_v6, 1  ;;  %v4576_v15 = vmax.f32 %v4574_v36, %v4575_v11  ;;  %v3712_v60 = vcombine.high %v3704_v14, %v3704_v14  ;;  %v4579_v7 = vsel %vm4046_vm0, %v3704_v14, -inf  ;;  %3298 = vst.msk [vmem:[%s7490_s20 + $0xa0] sm:$0xff] %vm2275_vm2, %v3266_v46 }
 0x4bc   : > { %v4557_v31 = vmax.f32 %v4555_v55, %v4556_v18  ;;  %v4570_v53 = vrot.slane %v4569_v12, 1  ;;  %v3713_v10 = vcombine.high %v3711_v61, %v3711_v61  ;;  %v4580_v30 = vrot.slane %v4579_v7, 4  ;;  %3299 = vst.msk [vmem:[%s7490_s20 + $0xa8] sm:$0xff] %vm2275_vm2, %v3267_v47 }
 0x4bd   : > { %v4564_v44 = vmax.f32 %v4562_v6, %v4563_v59  ;;  %v4577_v9 = vrot.slane %v4576_v15, 1  ;;  %v4586_v27 = vsel %vm4046_vm0, %v3712_v60, -inf  ;;  %v4593_v34 = vsel %vm4046_vm0, %v3711_v61, -inf }
 0x4be   : > { %v4571_v40 = vmax.f32 %v4569_v12, %v4570_v53  ;;  %v5040_v25 = vsel %vm2275_vm2, %v4557_v31, -inf  ;;  %v4581_v16 = vmax.f32 %v4579_v7, %v4580_v30  ;;  %v4587_v58 = vrot.slane %v4586_v27, 4 }
 0x4bf   : > { %v4578_v33 = vmax.f32 %v4576_v15, %v4577_v9  ;;  %v5041_v19 = vmax.f32 %v7955_v50, %v5040_v25  ;;  %v5043_v23 = vsel %vm2275_vm2, %v4564_v44, -inf  ;;  %v4594_v56 = vrot.slane %v4593_v34, 4 }
 0x4c0   : > { %v5044_v62 = vmax.f32 %v7967_v32, %v5043_v23  ;;  %v5046_v21 = vsel %vm2275_vm2, %v4571_v40, -inf  ;;  %v4582_v17 = vrot.slane %v4581_v16, 2  ;;  %v4588_v45 = vmax.f32 %v4586_v27, %v4587_v58 }
 0x4c1   : > { %v5047_v42 = vmax.f32 %v7970_v38, %v5046_v21  ;;  %v5049_v41 = vsel %vm2275_vm2, %v4578_v33, -inf  ;;  %v4595_v51 = vmax.f32 %v4593_v34, %v4594_v56  ;;  %v4600_v28 = vsel %vm4046_vm0, %v3713_v10, -inf }
 0x4c2   : > { %v5050_v36 = vmax.f32 %v7978_v35, %v5049_v41  ;;  %v5234_v50 = vsel %vm5199_vm1, %v5044_v62, %v5041_v19  ;;  %v4583_v20 = vmax.f32 %v4581_v16, %v4582_v17  ;;  %v4589_v24 = vrot.slane %v4588_v45, 2 }
 0x4c3   : > { %v5235_v52 = vsel %vm5201_vm3, %v5047_v42, %v5234_v50  ;;  %v4596_v32 = vrot.slane %v4595_v51, 2  ;;  %v4601_v48 = vrot.slane %v4600_v28, 4  ;;  %v3330_v3 = vmax.f32 %v3266_v46, 0.0 }
 0x4c4   : > { %v4584_v2 = vrot.slane %v4583_v20, 1  ;;  %v4590_v55 = vmax.f32 %v4588_v45, %v4589_v24  ;;  %v5236_v38 = vsel %vm5203_vm4, %v5050_v36, %v5235_v52  ;;  %v3331_v13 = vmax.f32 %v3267_v47, 0.0 }
 0x4c5   : > { %v4597_v22 = vmax.f32 %v4595_v51, %v4596_v32  ;;  %v4602_v6 = vmax.f32 %v4600_v28, %v4601_v48  ;;  %v3714_v11 = vcombine.high %v3330_v3, %v3330_v3  ;;  %v3721_v14 = vrot.slane %v3330_v3, %v7488_v39 }
 0x4c6   : > { %v4585_v35 = vmax.f32 %v4583_v20, %v4584_v2  ;;  %v4591_v18 = vrot.slane %v4590_v55, 1  ;;  %v3731_v12 = vcombine.high %v3331_v13, %v3331_v13  ;;  %v3738_v61 = vrot.slane %v3331_v13, %v7488_v39 }
 0x4c7   : > { %v4598_v59 = vrot.slane %v4597_v22, 1  ;;  %v4603_v15 = vrot.slane %v4602_v6, 2  ;;  %v3728_v60 = vrot.slane %v3714_v11, %v7488_v39  ;;  %v3729_v46 = vcombine.high %v3721_v14, %v3721_v14 }
 0x4c8   : > { %v4592_v7 = vmax.f32 %v4590_v55, %v4591_v18  ;;  %v5052_v31 = vsel %vm2275_vm2, %v4585_v35, -inf  ;;  %v4607_v47 = vsel %vm4046_vm0, %v3721_v14, -inf  ;;  %v3745_v53 = vrot.slane %v3731_v12, %v7488_v39 }
 0x4c9   : > { %v4599_v10 = vmax.f32 %v4597_v22, %v4598_v59  ;;  %v4604_v30 = vmax.f32 %v4602_v6, %v4603_v15  ;;  %v5053_v44 = vmax.f32 %v8022_v5, %v5052_v31  ;;  %v3730_v9 = vcombine.high %v3728_v60, %v3728_v60 }
 0x4ca   : > { %v5055_v27 = vsel %vm2275_vm2, %v4592_v7, -inf  ;;  %v4608_v34 = vrot.slane %v4607_v47, 4  ;;  %v4614_v40 = vsel %vm4046_vm0, %v3729_v46, -inf  ;;  %v4621_v25 = vsel %vm4046_vm0, %v3728_v60, -inf }
 0x4cb   : > { %v4605_v16 = vrot.slane %v4604_v30, 1  ;;  %v5056_v58 = vmax.f32 %v8029_v8, %v5055_v27  ;;  %v5058_v33 = vsel %vm2275_vm2, %v4599_v10, -inf  ;;  %v5237_v19 = vsel %vm5205_vm5, %v5053_v44, %v5236_v38 }
 0x4cc   : > { %v5059_v23 = vmax.f32 %v8032_v49, %v5058_v33  ;;  %v4609_v56 = vmax.f32 %v4607_v47, %v4608_v34  ;;  %v4615_v62 = vrot.slane %v4614_v40, 4  ;;  %v4622_v5 = vrot.slane %v4621_v25, 4  ;;  %v8457_v33 = vld [vmem:[#allocation28_spill] sm:$0xff] }
 0x4cd   : > { %v4606_v21 = vmax.f32 %v4604_v30, %v4605_v16  ;;  %v5238_v17 = vsel %vm5207_vm6, %v5056_v58, %v5237_v19  ;;  %v4628_v45 = vsel %vm4046_vm0, %v3730_v9, -inf  ;;  %v3746_v42 = vcombine.high %v3738_v61, %v3738_v61  ;;  %v8456_v58 = vld [vmem:[#allocation12_spill] sm:$0xff] }
 0x4ce   : > { %v5239_v41 = vsel %vm5209_vm7, %v5059_v23, %v5238_v17  ;;  %v4610_v51 = vrot.slane %v4609_v56, 2  ;;  %v4616_v28 = vmax.f32 %v4614_v40, %v4615_v62  ;;  %v4623_v8 = vmax.f32 %v4621_v25, %v4622_v5 }
 0x4cf   : > { %v5061_v36 = vsel %vm2275_vm2, %v4606_v21, -inf  ;;  %v4629_v50 = vrot.slane %v4628_v45, 4  ;;  %v3747_v20 = vcombine.high %v3745_v53, %v3745_v53  ;;  %v4635_v49 = vsel %vm4046_vm0, %v3738_v61, -inf }
 0x4d0   : > { %v5062_v24 = vmax.f32 %v8040_v29, %v5061_v36  ;;  %v4611_v52 = vmax.f32 %v4609_v56, %v4610_v51  ;;  %v4617_v32 = vrot.slane %v4616_v28, 2  ;;  %v4624_v48 = vrot.slane %v4623_v8, 2  ;;  %v8460_v51 = vld [vmem:[#allocation14_spill] sm:$0xff] }
 0x4d1   : > { %v4630_v3 = vmax.f32 %v4628_v45, %v4629_v50  ;;  %v4636_v2 = vrot.slane %v4635_v49, 4  ;;  %v4642_v55 = vsel %vm4046_vm0, %v3746_v42, -inf  ;;  %v4649_v38 = vsel %vm4046_vm0, %v3745_v53, -inf  ;;  %v8458_v45 = vld [vmem:[#allocation13_spill] sm:$0xff] }
 0x4d2   : > { %v5240_v13 = vsel %vm5211_vm8, %v5062_v24, %v5239_v41  ;;  %v4612_v22 = vrot.slane %v4611_v52, 1  ;;  %v4618_v6 = vmax.f32 %v4616_v28, %v4617_v32  ;;  %v4625_v11 = vmax.f32 %v4623_v8, %v4624_v48  ;;  %v8459_v42 = vld [vmem:[#allocation29_spill] sm:$0xff] }
 0x4d3   : > { %5274 = vst.msk [vmem:[%s7666_s29 + $0x20] sm:$0xff] %vm2275_vm2, %v5240_v13  ;;  %v4631_v14 = vrot.slane %v4630_v3, 2  ;;  %v4637_v35 = vmax.f32 %v4635_v49, %v4636_v2  ;;  %v4643_v18 = vrot.slane %v4642_v55, 4  ;;  %v4650_v29 = vrot.slane %v4649_v38, 4  ;;  %v8461_v2 = vld [vmem:[#allocation15_spill] sm:$0xff] }
 0x4d4   : > { %v4613_v12 = vmax.f32 %v4611_v52, %v4612_v22  ;;  %v4619_v61 = vrot.slane %v4618_v6, 1  ;;  %v4626_v59 = vrot.slane %v4625_v11, 1  ;;  %v4656_v15 = vsel %vm4046_vm0, %v3747_v20, -inf }
 0x4d5   : > { %v4632_v60 = vmax.f32 %v4630_v3, %v4631_v14  ;;  %v4638_v46 = vrot.slane %v4637_v35, 2  ;;  %v4644_v7 = vmax.f32 %v4642_v55, %v4643_v18  ;;  %v4651_v31 = vmax.f32 %v4649_v38, %v4650_v29 }
 0x4d6   : > { %v4620_v47 = vmax.f32 %v4618_v6, %v4619_v61  ;;  %v4627_v53 = vmax.f32 %v4625_v11, %v4626_v59  ;;  %v8092_v10 = vsel %vm2275_vm2, %v4613_v12, -inf  ;;  %v4657_v30 = vrot.slane %v4656_v15, 4 }
 0x4d7   : > { %v4633_v44 = vrot.slane %v4632_v60, 1  ;;  %v4639_v9 = vmax.f32 %v4637_v35, %v4638_v46  ;;  %v4645_v27 = vrot.slane %v4644_v7, 2  ;;  %v4652_v34 = vrot.slane %v4651_v31, 2 }
 0x4d8   : > { %v8095_v40 = vsel %vm2275_vm2, %v4620_v47, -inf  ;;  %v8098_v25 = vsel %vm2275_vm2, %v4627_v53, -inf  ;;  %v4658_v16 = vmax.f32 %v4656_v15, %v4657_v30  ;;  %v3229_v19 = vadd.f32 %v8457_v33, %v8456_v58 }
 0x4d9   : > { %v4634_v23 = vmax.f32 %v4632_v60, %v4633_v44  ;;  %v4640_v56 = vrot.slane %v4639_v9, 1  ;;  %v4646_v62 = vmax.f32 %v4644_v7, %v4645_v27  ;;  %v4653_v5 = vmax.f32 %v4651_v31, %v4652_v34 }
 0x4da   : > { %v4659_v21 = vrot.slane %v4658_v16, 2  ;;  %v3268_v17 = vadd.f32 %v7828_v43, %v3229_v19  ;;  %v3230_v41 = vadd.f32 %v8459_v42, %v8458_v45  ;;  %v3231_v28 = vadd.f32 %v7816_v37, %v8460_v51 }
 0x4db   : > { %v8108_v8 = vsel %vm2275_vm2, %v4634_v23, -inf  ;;  %v4641_v36 = vmax.f32 %v4639_v9, %v4640_v56  ;;  %v4647_v50 = vrot.slane %v4646_v62, 1  ;;  %v4654_v20 = vrot.slane %v4653_v5, 1 }
 0x4dc   : > { %v4660_v49 = vmax.f32 %v4658_v16, %v4659_v21  ;;  %3300 = vst.msk [vmem:[%s7490_s20 + $0xb0] sm:$0xff] %vm2275_vm2, %v3268_v17  ;;  %v3332_v24 = vmax.f32 %v3268_v17, 0.0  ;;  %v3269_v52 = vadd.f32 %v7828_v43, %v3230_v41  ;;  %v3270_v32 = vadd.f32 %v7828_v43, %v3231_v28 }
 0x4dd   : > { %v4648_v48 = vmax.f32 %v4646_v62, %v4647_v50  ;;  %v4655_v3 = vmax.f32 %v4653_v5, %v4654_v20  ;;  %v8115_v37 = vsel %vm2275_vm2, %v4641_v36, -inf  ;;  %v3232_v55 = vadd.f32 %v7863_v1, %v8461_v2 }
 0x4de   : > { %v4661_v38 = vrot.slane %v4660_v49, 1  ;;  %v3748_v13 = vcombine.high %v3332_v24, %v3332_v24  ;;  %v3755_v22 = vrot.slane %v3332_v24, %v7488_v39  ;;  %3301 = vst.msk [vmem:[%s7490_s20 + $0xb8] sm:$0xff] %vm2275_vm2, %v3269_v52  ;;  %v3333_v6 = vmax.f32 %v3269_v52, 0.0  ;;  %3302 = vst.msk [vmem:[%s7490_s20 + $0xc0] sm:$0xff] %vm2275_vm2, %v3270_v32 }
 0x4df   : > { %v8125_v11 = vsel %vm2275_vm2, %v4648_v48, -inf  ;;  %v8128_v14 = vsel %vm2275_vm2, %v4655_v3, -inf  ;;  %v8130_v35 = vmax.f32 %v3270_v32, 0.0  ;;  %v8133_v1 = vadd.f32 %v7828_v43, %v3232_v55 }
 0x4e0   : > { %v4662_v18 = vmax.f32 %v4660_v49, %v4661_v38  ;;  %v3762_v29 = vrot.slane %v3748_v13, %v7488_v39  ;;  %v3763_v12 = vcombine.high %v3755_v22, %v3755_v22  ;;  %v4663_v61 = vsel %vm4046_vm0, %v3755_v22, -inf }
 0x4e1   : > { %v4664_v59 = vrot.slane %v4663_v61, 4  ;;  %v3765_v15 = vcombine.high %v3333_v6, %v3333_v6  ;;  %v3772_v60 = vrot.slane %v3333_v6, %v7488_v39  ;;  %v3782_v46 = vcombine.high %v8130_v35, %v8130_v35  ;;  %3303 = vst.msk [vmem:[%s7490_s20 + $0xc8] sm:$0xff] %vm2275_vm2, %v8133_v1 }
 0x4e2   : > { %v8144_v7 = vsel %vm2275_vm2, %v4662_v18, -inf  ;;  %v3764_v43 = vcombine.high %v3762_v29, %v3762_v29  ;;  %v4670_v31 = vsel %vm4046_vm0, %v3763_v12, -inf  ;;  %v4677_v47 = vsel %vm4046_vm0, %v3762_v29, -inf }
 0x4e3   : > { %v4665_v53 = vmax.f32 %v4663_v61, %v4664_v59  ;;  %v4671_v30 = vrot.slane %v4670_v31, 4  ;;  %v4678_v44 = vrot.slane %v4677_v47, 4  ;;  %v3779_v9 = vrot.slane %v3765_v15, %v7488_v39 }
 0x4e4   : > { %v4684_v27 = vsel %vm4046_vm0, %v3764_v43, -inf  ;;  %v3780_v34 = vcombine.high %v3772_v60, %v3772_v60  ;;  %v4691_v16 = vsel %vm4046_vm0, %v3772_v60, -inf  ;;  %v8153_v58 = vrot.slane %v8130_v35, %v7488_v39 }
 0x4e5   : > { %v4666_v33 = vrot.slane %v4665_v53, 2  ;;  %v4672_v19 = vmax.f32 %v4670_v31, %v4671_v30  ;;  %v4679_v23 = vmax.f32 %v4677_v47, %v4678_v44  ;;  %v4685_v56 = vrot.slane %v4684_v27, 4 }
 0x4e6   : > { %v3781_v62 = vcombine.high %v3779_v9, %v3779_v9  ;;  %v4692_v5 = vrot.slane %v4691_v16, 4  ;;  %v4698_v21 = vsel %vm4046_vm0, %v3780_v34, -inf  ;;  %v4705_v17 = vsel %vm4046_vm0, %v3779_v9, -inf }
 0x4e7   : > { %v4667_v45 = vmax.f32 %v4665_v53, %v4666_v33  ;;  %v4673_v42 = vrot.slane %v4672_v19, 2  ;;  %v4680_v41 = vrot.slane %v4679_v23, 2  ;;  %v4686_v51 = vmax.f32 %v4684_v27, %v4685_v56 }
 0x4e8   : > { %v4693_v28 = vmax.f32 %v4691_v16, %v4692_v5  ;;  %v4699_v36 = vrot.slane %v4698_v21, 4  ;;  %v4706_v50 = vrot.slane %v4705_v17, 4  ;;  %v4712_v20 = vsel %vm4046_vm0, %v3781_v62, -inf }
 0x4e9   : > { %v4668_v49 = vrot.slane %v4667_v45, 1  ;;  %v4674_v24 = vmax.f32 %v4672_v19, %v4673_v42  ;;  %v4681_v52 = vmax.f32 %v4679_v23, %v4680_v41  ;;  %v4687_v32 = vrot.slane %v4686_v51, 2 }
 0x4ea   : > { %v4694_v48 = vrot.slane %v4693_v28, 2  ;;  %v4700_v3 = vmax.f32 %v4698_v21, %v4699_v36  ;;  %v4707_v2 = vmax.f32 %v4705_v17, %v4706_v50  ;;  %v4713_v55 = vrot.slane %v4712_v20, 4 }
 0x4eb   : > { %v4669_v38 = vmax.f32 %v4667_v45, %v4668_v49  ;;  %v4675_v13 = vrot.slane %v4674_v24, 1  ;;  %v4682_v22 = vrot.slane %v4681_v52, 1  ;;  %v4688_v6 = vmax.f32 %v4686_v51, %v4687_v32 }
 0x4ec   : > { %v4695_v18 = vmax.f32 %v4693_v28, %v4694_v48  ;;  %v4701_v29 = vrot.slane %v4700_v3, 2  ;;  %v4708_v12 = vrot.slane %v4707_v2, 2  ;;  %v4714_v61 = vmax.f32 %v4712_v20, %v4713_v55 }
 0x4ed   : > { %v4676_v59 = vmax.f32 %v4674_v24, %v4675_v13  ;;  %v4683_v15 = vmax.f32 %v4681_v52, %v4682_v22  ;;  %v4689_v60 = vrot.slane %v4688_v6, 1  ;;  %v5064_v43 = vsel %vm2275_vm2, %v4669_v38, -inf }
 0x4ee   : > { %v5065_v31 = vmax.f32 %v8092_v10, %v5064_v43  ;;  %v4696_v47 = vrot.slane %v4695_v18, 1  ;;  %v4702_v53 = vmax.f32 %v4700_v3, %v4701_v29  ;;  %v4709_v30 = vmax.f32 %v4707_v2, %v4708_v12 }
 0x4ef   : > { %v4690_v44 = vmax.f32 %v4688_v6, %v4689_v60  ;;  %v5067_v9 = vsel %vm2275_vm2, %v4676_v59, -inf  ;;  %v5070_v27 = vsel %vm2275_vm2, %v4683_v15, -inf  ;;  %v4715_v34 = vrot.slane %v4714_v61, 2  ;;  %v8463_v15 = vld [vmem:[#allocation17_spill] sm:$0xff] }
 0x4f0   : > { %v5068_v16 = vmax.f32 %v8095_v40, %v5067_v9  ;;  %v5071_v33 = vmax.f32 %v8098_v25, %v5070_v27  ;;  %v4697_v19 = vmax.f32 %v4695_v18, %v4696_v47  ;;  %v4703_v23 = vrot.slane %v4702_v53, 1 }
 0x4f1   : > { %v5073_v56 = vsel %vm2275_vm2, %v4690_v44, -inf  ;;  %v4710_v62 = vrot.slane %v4709_v30, 1  ;;  %v4716_v5 = vmax.f32 %v4714_v61, %v4715_v34  ;;  %v3796_v10 = vrot.slane %v3782_v46, %v7488_v39  ;;  %v8462_v61 = vld [vmem:[#allocation16_spill] sm:$0xff] }
 0x4f2   : > { %v5074_v21 = vmax.f32 %v8108_v8, %v5073_v56  ;;  %v5241_v17 = vsel %vm5199_vm1, %v5068_v16, %v5065_v31  ;;  %v4704_v45 = vmax.f32 %v4702_v53, %v4703_v23  ;;  %v5076_v40 = vsel %vm2275_vm2, %v4697_v19, -inf }
 0x4f3   : > { %v5242_v25 = vsel %vm5201_vm3, %v5071_v33, %v5241_v17  ;;  %v4711_v42 = vmax.f32 %v4709_v30, %v4710_v62  ;;  %v4717_v41 = vrot.slane %v4716_v5, 1  ;;  %v5077_v51 = vmax.f32 %v8115_v37, %v5076_v40  ;;  %v8203_v30 = vld [vmem:[%s8409_s4] ss:$0 sm:$0xff] }
 0x4f4   : > { %v5079_v28 = vsel %vm2275_vm2, %v4704_v45, -inf  ;;  %v5243_v36 = vsel %vm5203_vm4, %v5074_v21, %v5242_v25  ;;  %v3797_v35 = vcombine.high %v8153_v58, %v8153_v58  ;;  %v3798_v46 = vcombine.high %v3796_v10, %v3796_v10 }
 0x4f5   : > { %v4718_v8 = vmax.f32 %v4716_v5, %v4717_v41  ;;  %v5080_v50 = vmax.f32 %v8125_v11, %v5079_v28  ;;  %v5082_v20 = vsel %vm2275_vm2, %v4711_v42, -inf  ;;  %v5244_v49 = vsel %vm5205_vm5, %v5077_v51, %v5243_v36 }
 0x4f6   : > { %v5083_v24 = vmax.f32 %v8128_v14, %v5082_v20  ;;  %v4719_v37 = vsel %vm4046_vm0, %v8153_v58, -inf  ;;  %v4726_v52 = vsel %vm4046_vm0, %v3797_v35, -inf  ;;  %v4733_v32 = vsel %vm4046_vm0, %v3796_v10, -inf }
 0x4f7   : > { %v5085_v48 = vsel %vm2275_vm2, %v4718_v8, -inf  ;;  %v5245_v3 = vsel %vm5207_vm6, %v5080_v50, %v5244_v49  ;;  %v4720_v2 = vrot.slane %v4719_v37, 4  ;;  %v4727_v11 = vrot.slane %v4726_v52, 4 }
 0x4f8   : > { %v5086_v55 = vmax.f32 %v8144_v7, %v5085_v48  ;;  %v5246_v38 = vsel %vm5209_vm7, %v5083_v24, %v5245_v3  ;;  %v4734_v13 = vrot.slane %v4733_v32, 4  ;;  %v4740_v14 = vsel %vm4046_vm0, %v3798_v46, -inf }
 0x4f9   : > { %v4721_v22 = vmax.f32 %v4719_v37, %v4720_v2  ;;  %v4728_v58 = vmax.f32 %v4726_v52, %v4727_v11  ;;  %v4741_v6 = vrot.slane %v4740_v14, 4  ;;  %v3335_v18 = vmax.f32 %v8133_v1, 0.0 }
 0x4fa   : > { %v5247_v29 = vsel %vm5211_vm8, %v5086_v55, %v5246_v38  ;;  %v4735_v12 = vmax.f32 %v4733_v32, %v4734_v13  ;;  %v3233_v59 = vadd.f32 %v7875_v57, %v8462_v61  ;;  %v3234_v60 = vadd.f32 %v7899_v4, %v8463_v15 }
 0x4fb   : > { %5275 = vst.msk [vmem:[%s7666_s29 + $0x28] sm:$0xff] %vm2275_vm2, %v5247_v29  ;;  %v4722_v7 = vrot.slane %v4721_v22, 2  ;;  %v4729_v43 = vrot.slane %v4728_v58, 2  ;;  %v4742_v31 = vmax.f32 %v4740_v14, %v4741_v6  ;;  %v3799_v47 = vcombine.high %v3335_v18, %v3335_v18 }
 0x4fc   : > { %v4736_v53 = vrot.slane %v4735_v12, 2  ;;  %v3806_v1 = vrot.slane %v3335_v18, %v7488_v39  ;;  %v3272_v57 = vadd.f32 %v8203_v30, %v3233_v59  ;;  %v3273_v4 = vadd.f32 %v8203_v30, %v3234_v60 }
 0x4fd   : > { %v4723_v44 = vmax.f32 %v4721_v22, %v4722_v7  ;;  %v4730_v9 = vmax.f32 %v4728_v58, %v4729_v43  ;;  %v4743_v27 = vrot.slane %v4742_v31, 2  ;;  %v3813_v34 = vrot.slane %v3799_v47, %v7488_v39 }
 0x4fe   : > { %v4737_v16 = vmax.f32 %v4735_v12, %v4736_v53  ;;  %v3814_v33 = vcombine.high %v3806_v1, %v3806_v1  ;;  %v4747_v19 = vsel %vm4046_vm0, %v3806_v1, -inf  ;;  %3304 = vst.msk [vmem:[%s7490_s20 + $0xd0] sm:$0xff] %vm2275_vm2, %v3272_v57  ;;  %v3336_v23 = vmax.f32 %v3272_v57, 0.0  ;;  %3305 = vst.msk [vmem:[%s7490_s20 + $0xd8] sm:$0xff] %vm2275_vm2, %v3273_v4 }
 0x4ff   : > { %v4724_v56 = vrot.slane %v4723_v44, 1  ;;  %v4731_v62 = vrot.slane %v4730_v9, 1  ;;  %v4744_v5 = vmax.f32 %v4742_v31, %v4743_v27  ;;  %v3815_v10 = vcombine.high %v3813_v34, %v3813_v34 }
 0x500   : > { %v4738_v21 = vrot.slane %v4737_v16, 1  ;;  %v4748_v17 = vrot.slane %v4747_v19, 4  ;;  %v4754_v45 = vsel %vm4046_vm0, %v3814_v33, -inf  ;;  %v4761_v40 = vsel %vm4046_vm0, %v3813_v34, -inf }
 0x501   : > { %v4725_v25 = vmax.f32 %v4723_v44, %v4724_v56  ;;  %v4732_v42 = vmax.f32 %v4730_v9, %v4731_v62  ;;  %v4745_v41 = vrot.slane %v4744_v5, 1  ;;  %v4755_v51 = vrot.slane %v4754_v45, 4 }
 0x502   : > { %v4739_v28 = vmax.f32 %v4737_v16, %v4738_v21  ;;  %v4749_v36 = vmax.f32 %v4747_v19, %v4748_v17  ;;  %v4762_v35 = vrot.slane %v4761_v40, 4  ;;  %v4768_v46 = vsel %vm4046_vm0, %v3815_v10, -inf }
 0x503   : > { %v4746_v8 = vmax.f32 %v4744_v5, %v4745_v41  ;;  %v8217_v50 = vsel %vm2275_vm2, %v4725_v25, -inf  ;;  %v8220_v20 = vsel %vm2275_vm2, %v4732_v42, -inf  ;;  %v4756_v49 = vmax.f32 %v4754_v45, %v4755_v51 }
 0x504   : > { %v8223_v24 = vsel %vm2275_vm2, %v4739_v28, -inf  ;;  %v4750_v37 = vrot.slane %v4749_v36, 2  ;;  %v4763_v52 = vmax.f32 %v4761_v40, %v4762_v35  ;;  %v4769_v32 = vrot.slane %v4768_v46, 4 }
 0x505   : > { %v8226_v48 = vsel %vm2275_vm2, %v4746_v8, -inf  ;;  %v4757_v3 = vrot.slane %v4756_v49, 2  ;;  %v3816_v2 = vcombine.high %v3336_v23, %v3336_v23  ;;  %v3823_v11 = vrot.slane %v3336_v23, %v7488_v39 }
 0x506   : > { %v4751_v55 = vmax.f32 %v4749_v36, %v4750_v37  ;;  %v4764_v38 = vrot.slane %v4763_v52, 2  ;;  %v4770_v13 = vmax.f32 %v4768_v46, %v4769_v32  ;;  %v3337_v14 = vmax.f32 %v3273_v4, 0.0  ;;  %v8464_v36 = vld [vmem:[#allocation18_spill] sm:$0xff] }
 0x507   : > { %v4758_v22 = vmax.f32 %v4756_v49, %v4757_v3  ;;  %v3830_v58 = vrot.slane %v3816_v2, %v7488_v39  ;;  %v3831_v6 = vcombine.high %v3823_v11, %v3823_v11  ;;  %v4775_v18 = vsel %vm4046_vm0, %v3823_v11, -inf }
 0x508   : > { %v4752_v29 = vrot.slane %v4751_v55, 1  ;;  %v4765_v12 = vmax.f32 %v4763_v52, %v4764_v38  ;;  %v4771_v61 = vrot.slane %v4770_v13, 2  ;;  %v4776_v59 = vrot.slane %v4775_v18, 4 }
 0x509   : > { %v4759_v15 = vrot.slane %v4758_v22, 1  ;;  %v3832_v60 = vcombine.high %v3830_v58, %v3830_v58  ;;  %v4782_v7 = vsel %vm4046_vm0, %v3831_v6, -inf  ;;  %v4789_v43 = vsel %vm4046_vm0, %v3830_v58, -inf }
 0x50a   : > { %v4753_v31 = vmax.f32 %v4751_v55, %v4752_v29  ;;  %v4766_v47 = vrot.slane %v4765_v12, 1  ;;  %v4772_v53 = vmax.f32 %v4770_v13, %v4771_v61  ;;  %v4777_v1 = vmax.f32 %v4775_v18, %v4776_v59 }
 0x50b   : > { %v4760_v57 = vmax.f32 %v4758_v22, %v4759_v15  ;;  %v4783_v4 = vrot.slane %v4782_v7, 4  ;;  %v4790_v44 = vrot.slane %v4789_v43, 4  ;;  %v4796_v9 = vsel %vm4046_vm0, %v3832_v60, -inf }
 0x50c   : > { %v4767_v27 = vmax.f32 %v4765_v12, %v4766_v47  ;;  %v4773_v34 = vrot.slane %v4772_v53, 1  ;;  %v8235_v16 = vsel %vm2275_vm2, %v4753_v31, -inf  ;;  %v4778_v33 = vrot.slane %v4777_v1, 2 }
 0x50d   : > { %v8238_v19 = vsel %vm2275_vm2, %v4760_v57, -inf  ;;  %v4784_v23 = vmax.f32 %v4782_v7, %v4783_v4  ;;  %v4791_v56 = vmax.f32 %v4789_v43, %v4790_v44  ;;  %v4797_v62 = vrot.slane %v4796_v9, 4 }
 0x50e   : > { %v4774_v5 = vmax.f32 %v4772_v53, %v4773_v34  ;;  %v8241_v10 = vsel %vm2275_vm2, %v4767_v27, -inf  ;;  %v4779_v21 = vmax.f32 %v4777_v1, %v4778_v33  ;;  %v3833_v17 = vcombine.high %v3337_v14, %v3337_v14 }
 0x50f   : > { %v4785_v45 = vrot.slane %v4784_v23, 2  ;;  %v4792_v40 = vrot.slane %v4791_v56, 2  ;;  %v4798_v25 = vmax.f32 %v4796_v9, %v4797_v62  ;;  %v3840_v42 = vrot.slane %v3337_v14, %v7488_v39 }
 0x510   : > { %v8245_v41 = vsel %vm2275_vm2, %v4774_v5, -inf  ;;  %v4780_v51 = vrot.slane %v4779_v21, 1  ;;  %v3847_v28 = vrot.slane %v3833_v17, %v7488_v39  ;;  %v3235_v35 = vadd.f32 %v7940_v54, %v8464_v36 }
 0x511   : > { %v4786_v46 = vmax.f32 %v4784_v23, %v4785_v45  ;;  %v4793_v8 = vmax.f32 %v4791_v56, %v4792_v40  ;;  %v4799_v49 = vrot.slane %v4798_v25, 2  ;;  %v3848_v37 = vcombine.high %v3840_v42, %v3840_v42 }
 0x512   : > { %v4781_v52 = vmax.f32 %v4779_v21, %v4780_v51  ;;  %v3849_v32 = vcombine.high %v3847_v28, %v3847_v28  ;;  %v4803_v3 = vsel %vm4046_vm0, %v3840_v42, -inf  ;;  %v4817_v2 = vsel %vm4046_vm0, %v3847_v28, -inf }
 0x513   : > { %v4787_v11 = vrot.slane %v4786_v46, 1  ;;  %v4794_v55 = vrot.slane %v4793_v8, 1  ;;  %v4800_v38 = vmax.f32 %v4798_v25, %v4799_v49  ;;  %v4804_v13 = vrot.slane %v4803_v3, 4 }
 0x514   : > { %v5088_v14 = vsel %vm2275_vm2, %v4781_v52, -inf  ;;  %v4810_v22 = vsel %vm4046_vm0, %v3848_v37, -inf  ;;  %v4818_v58 = vrot.slane %v4817_v2, 4  ;;  %v4824_v54 = vsel %vm4046_vm0, %v3849_v32, -inf }
 0x515   : > { %v4788_v6 = vmax.f32 %v4786_v46, %v4787_v11  ;;  %v4795_v18 = vmax.f32 %v4793_v8, %v4794_v55  ;;  %v4801_v29 = vrot.slane %v4800_v38, 1  ;;  %v5089_v12 = vmax.f32 %v8217_v50, %v5088_v14 }
 0x516   : > { %v4805_v61 = vmax.f32 %v4803_v3, %v4804_v13  ;;  %v4811_v59 = vrot.slane %v4810_v22, 4  ;;  %v4819_v15 = vmax.f32 %v4817_v2, %v4818_v58  ;;  %v4825_v60 = vrot.slane %v4824_v54, 4 }
 0x517   : > { %v4802_v7 = vmax.f32 %v4800_v38, %v4801_v29  ;;  %v5091_v43 = vsel %vm2275_vm2, %v4788_v6, -inf  ;;  %v5094_v31 = vsel %vm2275_vm2, %v4795_v18, -inf  ;;  %v3274_v47 = vadd.f32 %v8203_v30, %v3235_v35 }
 0x518   : > { %v5092_v53 = vmax.f32 %v8220_v20, %v5091_v43  ;;  %v5095_v1 = vmax.f32 %v8223_v24, %v5094_v31  ;;  %v4806_v57 = vrot.slane %v4805_v61, 2  ;;  %v4812_v4 = vmax.f32 %v4810_v22, %v4811_v59 }
 0x519   : > { %v5097_v50 = vsel %vm2275_vm2, %v4802_v7, -inf  ;;  %v4820_v44 = vrot.slane %v4819_v15, 2  ;;  %v4826_v9 = vmax.f32 %v4824_v54, %v4825_v60  ;;  %3306 = vst.msk [vmem:[%s7490_s20 + $0xe0] sm:$0xff] %vm2275_vm2, %v3274_v47  ;;  %v3338_v27 = vmax.f32 %v3274_v47, 0.0  ;;  %v8466_v47 = vld [vmem:[#allocation20_spill] sm:$0xff] }
 0x51a   : > { %v5098_v34 = vmax.f32 %v8226_v48, %v5097_v50  ;;  %v5248_v33 = vsel %vm5199_vm1, %v5092_v53, %v5089_v12  ;;  %v4807_v23 = vmax.f32 %v4805_v61, %v4806_v57  ;;  %v4813_v56 = vrot.slane %v4812_v4, 2  ;;  %v8465_v48 = vld [vmem:[#allocation19_spill] sm:$0xff] }
 0x51b   : > { %v5249_v62 = vsel %vm5201_vm3, %v5095_v1, %v5248_v33  ;;  %v4821_v20 = vmax.f32 %v4819_v15, %v4820_v44  ;;  %v4827_v5 = vrot.slane %v4826_v9, 2  ;;  %v3850_v24 = vcombine.high %v3338_v27, %v3338_v27  ;;  %v8467_v44 = vld [vmem:[#allocation21_spill] sm:$0xff] }
 0x51c   : > { %v4808_v21 = vrot.slane %v4807_v23, 1  ;;  %v4814_v17 = vmax.f32 %v4812_v4, %v4813_v56  ;;  %v5250_v45 = vsel %vm5203_vm4, %v5098_v34, %v5249_v62  ;;  %v3857_v40 = vrot.slane %v3338_v27, %v7488_v39 }
 0x51d   : > { %v4822_v25 = vrot.slane %v4821_v20, 1  ;;  %v4828_v42 = vmax.f32 %v4826_v9, %v4827_v5  ;;  %v3864_v51 = vrot.slane %v3850_v24, %v7488_v39  ;;  %v3236_v28 = vadd.f32 %v7960_v0, %v8465_v48 }
 0x51e   : > { %v4809_v36 = vmax.f32 %v4807_v23, %v4808_v21  ;;  %v4815_v35 = vrot.slane %v4814_v17, 1  ;;  %v3865_v46 = vcombine.high %v3857_v40, %v3857_v40  ;;  %v4831_v8 = vsel %vm4046_vm0, %v3857_v40, -inf }
 0x51f   : > { %v4823_v49 = vmax.f32 %v4821_v20, %v4822_v25  ;;  %v4829_v37 = vrot.slane %v4828_v42, 1  ;;  %v3866_v52 = vcombine.high %v3864_v51, %v3864_v51  ;;  %v4832_v32 = vrot.slane %v4831_v8, 4 }
 0x520   : > { %v4816_v3 = vmax.f32 %v4814_v17, %v4815_v35  ;;  %v5100_v2 = vsel %vm2275_vm2, %v4809_v36, -inf  ;;  %v4838_v11 = vsel %vm4046_vm0, %v3865_v46, -inf  ;;  %v4845_v55 = vsel %vm4046_vm0, %v3864_v51, -inf }
 0x521   : > { %v4830_v38 = vmax.f32 %v4828_v42, %v4829_v37  ;;  %v5101_v13 = vmax.f32 %v8235_v16, %v5100_v2  ;;  %v5106_v0 = vsel %vm2275_vm2, %v4823_v49, -inf  ;;  %v4833_v14 = vmax.f32 %v4831_v8, %v4832_v32 }
 0x522   : > { %v5103_v22 = vsel %vm2275_vm2, %v4816_v3, -inf  ;;  %v5107_v58 = vmax.f32 %v8241_v10, %v5106_v0  ;;  %v4839_v54 = vrot.slane %v4838_v11, 4  ;;  %v4846_v6 = vrot.slane %v4845_v55, 4 }
 0x523   : > { %v5104_v18 = vmax.f32 %v8238_v19, %v5103_v22  ;;  %v5109_v29 = vsel %vm2275_vm2, %v4830_v38, -inf  ;;  %v5251_v12 = vsel %vm5205_vm5, %v5101_v13, %v5250_v45  ;;  %v4834_v61 = vrot.slane %v4833_v14, 2 }
 0x524   : > { %v5110_v16 = vmax.f32 %v8245_v41, %v5109_v29  ;;  %v4840_v59 = vmax.f32 %v4838_v11, %v4839_v54  ;;  %v4852_v15 = vsel %vm4046_vm0, %v3866_v52, -inf  ;;  %v4847_v60 = vmax.f32 %v4845_v55, %v4846_v6 }
 0x525   : > { %v5252_v10 = vsel %vm5207_vm6, %v5104_v18, %v5251_v12  ;;  %v4853_v7 = vrot.slane %v4852_v15, 4  ;;  %v3275_v43 = vadd.f32 %v8203_v30, %v3236_v28  ;;  %v4835_v31 = vmax.f32 %v4833_v14, %v4834_v61 }
 0x526   : > { %v5253_v19 = vsel %vm5209_vm7, %v5107_v58, %v5252_v10  ;;  %v3237_v53 = vadd.f32 %v7999_v26, %v8466_v47  ;;  %v4841_v1 = vrot.slane %v4840_v59, 2  ;;  %v3238_v9 = vadd.f32 %v8014_v63, %v8467_v44 }
 0x527   : > { %v5254_v41 = vsel %vm5211_vm8, %v5110_v16, %v5253_v19  ;;  %v4854_v57 = vmax.f32 %v4852_v15, %v4853_v7  ;;  %3307 = vst.msk [vmem:[%s7490_s20 + $0xe8] sm:$0xff] %vm2275_vm2, %v3275_v43  ;;  %v3339_v4 = vmax.f32 %v3275_v43, 0.0  ;;  %v4848_v27 = vrot.slane %v4847_v60, 2 }
 0x528   : > { %5276 = vst.msk [vmem:[%s7666_s29 + $0x30] sm:$0xff] %vm2275_vm2, %v5254_v41  ;;  %v3276_v50 = vadd.f32 %v8203_v30, %v3237_v53  ;;  %v8309_v56 = vadd.f32 %v8203_v30, %v3238_v9  ;;  %v4836_v63 = vrot.slane %v4835_v31, 1  ;;  %v4842_v62 = vmax.f32 %v4840_v59, %v4841_v1 }
 0x529   : > { %v3867_v26 = vcombine.high %v3339_v4, %v3339_v4  ;;  %v3874_v34 = vrot.slane %v3339_v4, %v7488_v39  ;;  %v4855_v33 = vrot.slane %v4854_v57, 2  ;;  %v4849_v17 = vmax.f32 %v4847_v60, %v4848_v27 }
 0x52a   : > { %3308 = vst.msk [vmem:[%s7490_s20 + $0xf0] sm:$0xff] %vm2275_vm2, %v3276_v50  ;;  %v3340_v23 = vmax.f32 %v3276_v50, 0.0  ;;  %3309 = vst.msk [vmem:[%s7490_s20 + $0xf8] sm:$0xff] %vm2275_vm2, %v8309_v56 }
 0x52b   : > { %v3881_v20 = vrot.slane %v3867_v26, %v7488_v39  ;;  %v3882_v5 = vcombine.high %v3874_v34, %v3874_v34  ;;  %v4859_v24 = vsel %vm4046_vm0, %v3874_v34, -inf }
 0x52c   : > { %v3884_v21 = vcombine.high %v3340_v23, %v3340_v23  ;;  %v4860_v45 = vrot.slane %v4859_v24, 4 }
 0x52d   : > { %v3883_v30 = vcombine.high %v3881_v20, %v3881_v20  ;;  %v4866_v40 = vsel %vm4046_vm0, %v3882_v5, -inf }
 0x52e   : > { %5886 = shalt.err (!%p5883_p3)
}
 0x52f   : > { %s5887_s11 = scalar_lea.hbm %s8304_s19, 4096  ;;  %s5891_s13 = scalar_lea.hbm %s8410_s5, 8192 }
 0x530   : > { %p5888_p4 = scmp.ne.s32.totalorder %s8304_s19, %s5887_s11  ;;  %p5892_p9 = scmp.lt.s32.totalorder %s8304_s19, %s8410_s5 }
 0x531   : > { %p5893_p10 = scmp.lt.s32.totalorder %s5891_s13, %s5887_s11 }
 0x532   : > { %p5889_p7 = pnand %p5888_p4, %p6017_p5 }
 0x533   : > { %p5894_p11 = por %p5893_p10, %p5892_p9 }
 0x534   : > { %p5890_p8 = pneg %p5889_p7 }
 0x536   : > { %p5895_p12 = pnand %p5894_p11, %p5890_p8 }
 0x538   : > { %5898 = shalt.err (!%p5895_p12)
}
 0x539   : > { %s5943_s18 = smov 128   ;;  %v4856_v25 = vmax.f32 %v4854_v57, %v4855_v33  ;;  %v4867_v42 = vrot.slane %v4866_v40, 4  ;;  %v4873_v51 = vsel %vm4046_vm0, %v3881_v20, -inf  ;;  %v4837_v48 = vmax.f32 %v4835_v31, %v4836_v63 }
 0x53a   : > { %5746 = dma.vmem_to_hbm [thread:$0]  (%p6017_p5), %s8311_s17, 4096, %s8304_s19, %s8321_s26, %s5943_s18, %s5943_s18, %s5936_s15   ;;  %v4843_v28 = vrot.slane %v4842_v62, 1  ;;  %v4861_v36 = vmax.f32 %v4859_v24, %v4860_v45  ;;  %v4880_v35 = vsel %vm4046_vm0, %v3883_v30, -inf  ;;  %v3891_v46 = vrot.slane %v3340_v23, %v7488_v39 }
 0x53b   : > { %v3898_v8 = vrot.slane %v3884_v21, %v7488_v39  ;;  %v4850_v49 = vrot.slane %v4849_v17, 1  ;;  %v4874_v37 = vrot.slane %v4873_v51, 4  ;;  %v4857_v52 = vrot.slane %v4856_v25, 1 }
 0x53c   : > { %v4868_v32 = vmax.f32 %v4866_v40, %v4867_v42  ;;  %v3899_v3 = vcombine.high %v3891_v46, %v3891_v46  ;;  %v8350_v11 = vsel %vm2275_vm2, %v4837_v48, -inf  ;;  %v4881_v55 = vrot.slane %v4880_v35, 4 }
 0x53d   : > { %v3900_v2 = vcombine.high %v3898_v8, %v3898_v8  ;;  %v4887_v38 = vsel %vm4046_vm0, %v3891_v46, -inf  ;;  %v4901_v13 = vsel %vm4046_vm0, %v3898_v8, -inf  ;;  %v4844_v0 = vmax.f32 %v4842_v62, %v4843_v28 }
 0x53e   : > { %v4862_v14 = vrot.slane %v4861_v36, 2  ;;  %v4888_v22 = vrot.slane %v4887_v38, 4  ;;  %v4894_v58 = vsel %vm4046_vm0, %v3899_v3, -inf  ;;  %v4851_v54 = vmax.f32 %v4849_v17, %v4850_v49 }
 0x53f   : > { %v4875_v6 = vmax.f32 %v4873_v51, %v4874_v37  ;;  %v4895_v18 = vrot.slane %v4894_v58, 4  ;;  %v4902_v29 = vrot.slane %v4901_v13, 4  ;;  %v4858_v12 = vmax.f32 %v4856_v25, %v4857_v52 }
 0x540   : > { %v4869_v61 = vrot.slane %v4868_v32, 2  ;;  %v4889_v16 = vmax.f32 %v4887_v38, %v4888_v22  ;;  %v4908_v59 = vsel %vm4046_vm0, %v3900_v2, -inf  ;;  %v4882_v15 = vmax.f32 %v4880_v35, %v4881_v55 }
 0x541   : > { %v4896_v10 = vmax.f32 %v4894_v58, %v4895_v18  ;;  %v4903_v60 = vmax.f32 %v4901_v13, %v4902_v29  ;;  %v3341_v7 = vmax.f32 %v8309_v56, 0.0  ;;  %v5114_v43 = vsel %vm2275_vm2, %v4844_v0, -inf }
 0x542   : > { %v4863_v19 = vmax.f32 %v4861_v36, %v4862_v14  ;;  %v4890_v31 = vrot.slane %v4889_v16, 2  ;;  %v4909_v47 = vrot.slane %v4908_v59, 4  ;;  %v5117_v53 = vsel %vm2275_vm2, %v4851_v54, -inf }
 0x543   : > { %v4876_v41 = vrot.slane %v4875_v6, 2  ;;  %v4897_v1 = vrot.slane %v4896_v10, 2  ;;  %v4904_v57 = vrot.slane %v4903_v60, 2  ;;  %v5120_v4 = vsel %vm2275_vm2, %v4858_v12, -inf }
 0x544   : > { %v4870_v50 = vmax.f32 %v4868_v32, %v4869_v61  ;;  %v4891_v44 = vmax.f32 %v4889_v16, %v4890_v31  ;;  %v4910_v9 = vmax.f32 %v4908_v59, %v4909_v47  ;;  %v4883_v27 = vrot.slane %v4882_v15, 2 }
 0x545   : > { %v4898_v26 = vmax.f32 %v4896_v10, %v4897_v1  ;;  %v4905_v34 = vmax.f32 %v4903_v60, %v4904_v57  ;;  %v3901_v33 = vcombine.high %v3341_v7, %v3341_v7  ;;  %v4864_v23 = vrot.slane %v4863_v19, 1 }
 0x546   : > { %v4892_v56 = vrot.slane %v4891_v44, 1  ;;  %v4911_v63 = vrot.slane %v4910_v9, 2  ;;  %v3908_v62 = vrot.slane %v3341_v7, %v7488_v39  ;;  %v4877_v20 = vmax.f32 %v4875_v6, %v4876_v41 }
 0x547   : > { %v4899_v5 = vrot.slane %v4898_v26, 1  ;;  %v4906_v24 = vrot.slane %v4905_v34, 1  ;;  %v3915_v21 = vrot.slane %v3901_v33, %v7488_v39  ;;  %v4884_v55 = vmax.f32 %v4882_v15, %v4883_v27 }
 0x548   : > { %v4893_v17 = vmax.f32 %v4891_v44, %v4892_v56  ;;  %v4912_v30 = vmax.f32 %v4910_v9, %v4911_v63  ;;  %v3916_v45 = vcombine.high %v3908_v62, %v3908_v62  ;;  %v4915_v40 = vsel %vm4046_vm0, %v3908_v62, -inf }
 0x549   : > { %v4900_v25 = vmax.f32 %v4898_v26, %v4899_v5  ;;  %v4907_v42 = vmax.f32 %v4905_v34, %v4906_v24  ;;  %v3917_v51 = vcombine.high %v3915_v21, %v3915_v21  ;;  %v4916_v48 = vrot.slane %v4915_v40, 4 }
 0x54a   : > { %v4913_v28 = vrot.slane %v4912_v30, 1  ;;  %v5112_v36 = vsel %vm2275_vm2, %v4893_v17, -inf  ;;  %v4922_v35 = vsel %vm4046_vm0, %v3916_v45, -inf  ;;  %v4929_v46 = vsel %vm4046_vm0, %v3915_v21, -inf }
 0x54b   : > { %v5113_v8 = vmax.f32 %v8350_v11, %v5112_v36  ;;  %v5115_v39 = vsel %vm2275_vm2, %v4900_v25, -inf  ;;  %v5118_v49 = vsel %vm2275_vm2, %v4907_v42, -inf  ;;  %v4917_v37 = vmax.f32 %v4915_v40, %v4916_v48 }
 0x54c   : > { %v4914_v52 = vmax.f32 %v4912_v30, %v4913_v28  ;;  %v5116_v32 = vmax.f32 %v5114_v43, %v5115_v39  ;;  %v5119_v3 = vmax.f32 %v5117_v53, %v5118_v49  ;;  %v4923_v2 = vrot.slane %v4922_v35, 4 }
 0x54d   : > { %v4918_v38 = vrot.slane %v4917_v37, 2  ;;  %v4930_v13 = vrot.slane %v4929_v46, 4  ;;  %v4936_v0 = vsel %vm4046_vm0, %v3917_v51, -inf  ;;  %v4865_v12 = vmax.f32 %v4863_v19, %v4864_v23 }
 0x54e   : > { %v5121_v14 = vsel %vm2275_vm2, %v4914_v52, -inf  ;;  %v5255_v22 = vsel %vm5199_vm1, %v5116_v32, %v5113_v8  ;;  %v4924_v58 = vmax.f32 %v4922_v35, %v4923_v2  ;;  %v4937_v11 = vrot.slane %v4936_v0, 4 }
 0x54f   : > { %v5122_v54 = vmax.f32 %v5120_v4, %v5121_v14  ;;  %v5256_v6 = vsel %vm5201_vm3, %v5119_v3, %v5255_v22  ;;  %v4919_v18 = vmax.f32 %v4917_v37, %v4918_v38  ;;  %v4931_v29 = vmax.f32 %v4929_v46, %v4930_v13 }
 0x550   : > { %v4871_v61 = vrot.slane %v4870_v50, 1  ;;  %v4925_v16 = vrot.slane %v4924_v58, 2  ;;  %v4938_v59 = vmax.f32 %v4936_v0, %v4937_v11  ;;  %v4878_v15 = vrot.slane %v4877_v20, 1 }
 0x551   : > { %v4920_v10 = vrot.slane %v4919_v18, 1  ;;  %v4932_v60 = vrot.slane %v4931_v29, 2  ;;  %v5257_v7 = vsel %vm5203_vm4, %v5122_v54, %v5256_v6  ;;  %v4885_v43 = vrot.slane %v4884_v55, 1 }
 0x552   : > { %v4926_v31 = vmax.f32 %v4924_v58, %v4925_v16  ;;  %v4939_v47 = vrot.slane %v4938_v59, 2  ;;  %v4872_v1 = vmax.f32 %v4870_v50, %v4871_v61  ;;  %v4879_v44 = vmax.f32 %v4877_v20, %v4878_v15 }
 0x553   : > { %v4921_v53 = vmax.f32 %v4919_v18, %v4920_v10  ;;  %v4933_v41 = vmax.f32 %v4931_v29, %v4932_v60  ;;  %v5123_v9 = vsel %vm2275_vm2, %v4865_v12, -inf  ;;  %v4886_v26 = vmax.f32 %v4884_v55, %v4885_v43 }
 0x554   : > { %v4927_v57 = vrot.slane %v4926_v31, 1  ;;  %v4940_v4 = vmax.f32 %v4938_v59, %v4939_v47  ;;  %v5126_v63 = vsel %vm2275_vm2, %v4872_v1, -inf  ;;  %v5129_v20 = vsel %vm2275_vm2, %v4879_v44, -inf }
 0x555   : > { %v4934_v19 = vrot.slane %v4933_v41, 1  ;;  %v5124_v27 = vsel %vm2275_vm2, %v4921_v53, -inf  ;;  %v5132_v17 = vsel %vm2275_vm2, %v4886_v26, -inf }
 0x556   : > { %v4928_v34 = vmax.f32 %v4926_v31, %v4927_v57  ;;  %v4941_v33 = vrot.slane %v4940_v4, 1  ;;  %v5125_v23 = vmax.f32 %v5123_v9, %v5124_v27 }
 0x557   : > { %v4935_v56 = vmax.f32 %v4933_v41, %v4934_v19 }
 0x558   : > { %v4942_v62 = vmax.f32 %v4940_v4, %v4941_v33  ;;  %v5127_v5 = vsel %vm2275_vm2, %v4928_v34, -inf  ;;  %v5258_v50 = vsel %vm5205_vm5, %v5125_v23, %v5257_v7 }
 0x559   : > { %v5128_v24 = vmax.f32 %v5126_v63, %v5127_v5  ;;  %v5130_v21 = vsel %vm2275_vm2, %v4935_v56, -inf }
 0x55a   : > { %v5131_v30 = vmax.f32 %v5129_v20, %v5130_v21  ;;  %v5133_v45 = vsel %vm2275_vm2, %v4942_v62, -inf }
 0x55b   : > { %v5134_v40 = vmax.f32 %v5132_v17, %v5133_v45  ;;  %v5259_v25 = vsel %vm5207_vm6, %v5128_v24, %v5258_v50 }
 0x55c   : > { %v5260_v42 = vsel %vm5209_vm7, %v5131_v30, %v5259_v25 }
 0x55d   : > { %v5261_v51 = vsel %vm5211_vm8, %v5134_v40, %v5260_v42 }
 0x55e   : > { %5277 = vst.msk [vmem:[%s7666_s29 + $0x38] sm:$0xff] %vm2275_vm2, %v5261_v51 }
 0x55f PF: > { %p5752_p5 = scmp.ge.s32.totalorder %s5933_s24, 2  ;;  %s5315_s7 = sand.u32 1, %s5921_s21  }
 0x560   : > { %s5316_s15 = scalar_lea.sflag [#allocation4], %s5315_s7 }
 0x561   : > { %p5749_p13 = pnand %p5752_p5, %p6021_p6 }
 0x563   : > { %p5750_p0 = pneg %p5749_p13 }
 0x565   : > { %5916 = dma.done.wait (%p5750_p0), %s5316_s15, 4096  }
 0x566   : > { %5918 = vsyncadd (%p5750_p0), %s5316_s15, 4294963200  ;;  %p17_p1 = scmp.ge.s32.totalorder %s6004_s27, 4   ;;  %s8468_s21 = smov %s5925_s22 }
 0x567   : > { %s8469_s22 = smov %s5929_s23  ;;  %s8470_s23 = smov %s6015_s30 }
 0x568   : > { %s8471_s24 = smov %s6004_s27  ;;  %19 = sbr.rel (!%p17_p1) target bundleno = 3 (0x3), region = 90 }
 0x56d   :  { %5329 = vsyncpa [#allocation4], 1 }
 0x56e   :  { %5331 = vsyncpa [#allocation4 + $0x1], 1 }

// kernel: vgg19_forward.9
= control target key start
LH: loop header
LB: loop body
LE: loop exit
PB: predicated region body
PF: predicated region fallthrough
CT: control target
= control target key end

     0   :  { %8 = vsyncpa [#allocation3], 0  ;;  %s5092_s0 = inlined_call_operand.vmem [shape: f32[2,6,6,256], index: 0, kind: input, shape index: {}]   ;;  %s5093_s1 = inlined_call_operand.vmem [shape: bf16[3,768,256], index: 1, kind: input, shape index: {}]   ;;  %s5094_s2 = inlined_call_operand.vmem [shape: f32[1,256], index: 2, kind: input, shape index: {}]   ;;  %s5095_s3 = inlined_call_operand.hbm [shape: f32[2,4,4,256], index: 3, kind: output, shape index: {}]  }
   0x1   :  { %10 = vsyncpa [#allocation3 + $0x1], 0  ;;  %s3909_s12 = smov 0   ;;  %s3911_s13 = smov 0  }
   0x2   :  { %s3913_s14 = smov 0   ;;  %s3915_s15 = smov 0  }
   0x3 LB: > { %s3930_s16 = sadd.s32 4294967295, %s3883_s15   ;;  %s2840_s17 = sadd.s32 4294967294, %s3883_s15   ;;  %s3883_s15 = sphi %s3915_s15, %s5101_s15   ;;  %s3879_s14 = sphi %s3913_s14, %s5100_s14   ;;  %s3875_s13 = sphi %s3911_s13, %s5099_s13   ;;  %s3871_s12 = sphi %s3909_s12, %s5098_s12  }
   0x4   : > { %s3934_s18 = sadd.s32 1, %s3883_s15   ;;  %s91_s19 = sadd.s32 1, %s3879_s14 }
   0x5   : > { %s88_s20 = ssub.s32 %s3883_s15, %s3934_s18  ;;  %p101_p0 = scmp.ne.s32.totalorder %s3879_s14, %s3875_s13 }
   0x6   : > { %p89_p1 = scmp.eq.s32.totalorder %s88_s20, 0  ;;  %p102_p2 = scmp.eq.s32.totalorder %s3930_s16, 1 }
   0x7   : > { %p107_p3 = scmp.ne.s32.totalorder %s3875_s13, %s3871_s12  ;;  %p108_p4 = scmp.eq.s32.totalorder %s2840_s17, 1 }
   0x8   : > { %s3945_s21 = scalar_select %p89_p1, %s3879_s14, %s91_s19  }
   0x9   : > { %p3947_p5 = por %p102_p2, %p101_p0  ;;  %p3951_p6 = por %p108_p4, %p107_p3 }
   0xa   : > { %p2843_p7 = scmp.ge.s32.totalorder %s3883_s15, 1  ;;  %p140_p8 = scmp.lt.s32.totalorder %s3883_s15, 3 }
   0xc   : > { %p141_p9 = pnand %p2843_p7, %p140_p8 }
   0xd   : > { %p164_p10 = scmp.lt.s32.totalorder (!%p141_p9), %s3930_s16, 1  ;;  %s161_s28 = sand.u32 (!%p141_p9), 1, %s3875_s13  }
   0xe   : > { %144 = sbr.rel (%p141_p9) target bundleno = 563 (0x233), region = 32  ;;  %s2844_s29 = sshll.u32 (!%p141_p9), %s161_s28, 5 }
   0xf   : > { %s3347_s30 = sshll.u32 (!%p141_p9), %s3930_s16, 9  ;;  %s3886_s10 = smov (!%p141_p9), [#allocation2]  }
  0x10   : > { %s5046_s8 = scalar_lea.hbm (!%p141_p9), %s5095_s3, %s3347_s30  ;;  %s3827_s11 = sshll.u32 (!%p141_p9), %s3886_s10, 4  ;;  %s3828_s11 = int_to_ptr.vmem [resolvable:$false] %s3827_s11 }
  0x11   : > { %s3829_s17 = scalar_lea.vmem (!%p141_p9), %s3828_s11, 1024 }
  0x13   : > { %v3391_v0 = vld [vmem:[%s5093_s1 + $0x374] ss:$8 sps:$4 sm:$0xff]   ;;  %v3395_v2 = vld [vmem:[%s5093_s1 + $0x370] ss:$8 sps:$4 sm:$0xff]   ;;  %v3397_v4 = vld [vmem:[%s5093_s1 + $0x364] ss:$8 sps:$4 sm:$0xff]   ;;  %v270_v43 = vlaneseq }
  0x14   : > { %v3393_v1 = vld [vmem:[%s5093_s1 + $0x474] ss:$8 sps:$4 sm:$0xff]   ;;  %1141 = vmatprep.subr.bf16.mxu0 %v3391_v0  ;;  %v3396_v3 = vld [vmem:[%s5093_s1 + $0x470] ss:$8 sps:$4 sm:$0xff]   ;;  %v3399_v5 = vld [vmem:[%s5093_s1 + $0x464] ss:$8 sps:$4 sm:$0xff]  }
  0x15   : > { %1184 = vmatprep.subr.bf16.mxu1 %v3393_v1  ;;  %1142 = vmatpush1.bf16.msra.mxu0 %v3395_v2  ;;  %v3401_v6 = vld [vmem:[%s5093_s1 + $0x360] ss:$8 sps:$4 sm:$0xff]   ;;  %v3403_v8 = vld [vmem:[%s5093_s1 + $0x354] ss:$8 sps:$4 sm:$0xff]   ;;  %v3407_v10 = vld [vmem:[%s5093_s1 + $0x350] ss:$8 sps:$4 sm:$0xff]  }
  0x16   : > { %1185 = vmatpush1.bf16.msra.mxu1 %v3396_v3  ;;  %1143 = vmatprep.subr.bf16.mxu0 %v3397_v4  ;;  %v3402_v7 = vld [vmem:[%s5093_s1 + $0x460] ss:$8 sps:$4 sm:$0xff]   ;;  %v3405_v9 = vld [vmem:[%s5093_s1 + $0x454] ss:$8 sps:$4 sm:$0xff]   ;;  %v3408_v11 = vld [vmem:[%s5093_s1 + $0x450] ss:$8 sps:$4 sm:$0xff]  }
  0x17   : > { %1186 = vmatprep.subr.bf16.mxu1 %v3399_v5  ;;  %v3409_v12 = vld [vmem:[%s5093_s1 + $0x344] ss:$8 sps:$4 sm:$0xff]   ;;  %v3413_v14 = vld [vmem:[%s5093_s1 + $0x340] ss:$8 sps:$4 sm:$0xff]   ;;  %v3415_v16 = vld [vmem:[%s5093_s1 + $0x334] ss:$8 sps:$4 sm:$0xff]  }
  0x18   : > { %v3411_v13 = vld [vmem:[%s5093_s1 + $0x444] ss:$8 sps:$4 sm:$0xff]   ;;  %v3414_v15 = vld [vmem:[%s5093_s1 + $0x440] ss:$8 sps:$4 sm:$0xff]   ;;  %v3417_v17 = vld [vmem:[%s5093_s1 + $0x434] ss:$8 sps:$4 sm:$0xff]  }
  0x19   : > { %1144 = vmatpush1.bf16.msra.mxu0 %v3401_v6  ;;  %v3419_v18 = vld [vmem:[%s5093_s1 + $0x330] ss:$8 sps:$4 sm:$0xff]   ;;  %v3421_v20 = vld [vmem:[%s5093_s1 + $0x324] ss:$8 sps:$4 sm:$0xff]   ;;  %v3425_v22 = vld [vmem:[%s5093_s1 + $0x320] ss:$8 sps:$4 sm:$0xff]  }
  0x1a   : > { %1187 = vmatpush1.bf16.msra.mxu1 %v3402_v7  ;;  %1145 = vmatprep.subr.bf16.mxu0 %v3403_v8  ;;  %v3420_v19 = vld [vmem:[%s5093_s1 + $0x430] ss:$8 sps:$4 sm:$0xff]   ;;  %v3423_v21 = vld [vmem:[%s5093_s1 + $0x424] ss:$8 sps:$4 sm:$0xff]   ;;  %v3426_v23 = vld [vmem:[%s5093_s1 + $0x420] ss:$8 sps:$4 sm:$0xff]  }
  0x1b   : > { %1188 = vmatprep.subr.bf16.mxu1 %v3405_v9  ;;  %v3427_v24 = vld [vmem:[%s5093_s1 + $0x314] ss:$8 sps:$4 sm:$0xff]   ;;  %v3431_v26 = vld [vmem:[%s5093_s1 + $0x310] ss:$8 sps:$4 sm:$0xff]   ;;  %v3433_v28 = vld [vmem:[%s5093_s1 + $0x304] ss:$8 sps:$4 sm:$0xff]  }
  0x1c   : > { %v3429_v25 = vld [vmem:[%s5093_s1 + $0x414] ss:$8 sps:$4 sm:$0xff]   ;;  %v3432_v27 = vld [vmem:[%s5093_s1 + $0x410] ss:$8 sps:$4 sm:$0xff]   ;;  %v3435_v29 = vld [vmem:[%s5093_s1 + $0x404] ss:$8 sps:$4 sm:$0xff]  }
  0x1d   : > { %1146 = vmatpush1.bf16.msra.mxu0 %v3407_v10  ;;  %v3437_v30 = vld [vmem:[%s5093_s1 + $0x300] ss:$8 sps:$4 sm:$0xff]   ;;  %v3439_v32 = vld [vmem:[%s5093_s1 + $0x3f4] ss:$8 sps:$4 sm:$0xff]   ;;  %v3443_v34 = vld [vmem:[%s5093_s1 + $0x3f0] ss:$8 sps:$4 sm:$0xff]  }
  0x1e   : > { %1189 = vmatpush1.bf16.msra.mxu1 %v3408_v11  ;;  %1147 = vmatprep.subr.bf16.mxu0 %v3409_v12  ;;  %v3438_v31 = vld [vmem:[%s5093_s1 + $0x400] ss:$8 sps:$4 sm:$0xff]   ;;  %v3441_v33 = vld [vmem:[%s5093_s1 + $0x4f4] ss:$8 sps:$4 sm:$0xff]   ;;  %v3444_v35 = vld [vmem:[%s5093_s1 + $0x4f0] ss:$8 sps:$4 sm:$0xff]  }
  0x1f   : > { %1190 = vmatprep.subr.bf16.mxu1 %v3411_v13  ;;  %s165_s24 = scalar_select %p164_p10, %s3930_s16, 1  ;;  %v3445_v36 = vld [vmem:[%s5093_s1 + $0x3e4] ss:$8 sps:$4 sm:$0xff]   ;;  %v3449_v38 = vld [vmem:[%s5093_s1 + $0x3e0] ss:$8 sps:$4 sm:$0xff]   ;;  %v4099_v49 = vshrl.u32 %v270_v43, 7 }
  0x20   : > { %v3447_v37 = vld [vmem:[%s5093_s1 + $0x4e4] ss:$8 sps:$4 sm:$0xff]   ;;  %v3450_v39 = vld [vmem:[%s5093_s1 + $0x4e0] ss:$8 sps:$4 sm:$0xff]   ;;  %v3451_v40 = vld [vmem:[%s5093_s1 + $0x3d4] ss:$8 sps:$4 sm:$0xff]  }
  0x21   : > { %1148 = vmatpush1.bf16.msra.mxu0 %v3413_v14  ;;  %s3348_s4 = smul.u32 96, %s165_s24  ;;  %v3885_v41 = vmov 1983009808   ;;  %v3453_v44 = vld [vmem:[%s5093_s1 + $0x4d4] ss:$8 sps:$4 sm:$0xff]   ;;  %s5052_s16 = scalar_lea.sflag [#allocation3], %s161_s28 }
  0x22   : > { %1191 = vmatpush1.bf16.msra.mxu1 %v3414_v15  ;;  %1149 = vmatprep.subr.bf16.mxu0 %v3415_v16  ;;  %v268_v42 = vunpack.c.l.s4 %v3885_v41  ;;  %v3455_v45 = vld [vmem:[%s5093_s1 + $0x3d0] ss:$8 sps:$4 sm:$0xff]   ;;  %v3457_v47 = vld [vmem:[%s5093_s1 + $0x3c4] ss:$8 sps:$4 sm:$0xff]   ;;  %v3461_v51 = vld [vmem:[%s5093_s1 + $0x3c0] ss:$8 sps:$4 sm:$0xff]  }
  0x23   : > { %1192 = vmatprep.subr.bf16.mxu1 %v3417_v17  ;;  %v3456_v46 = vld [vmem:[%s5093_s1 + $0x4d0] ss:$8 sps:$4 sm:$0xff]   ;;  %s4094_s26 = scalar_lea.vmem %s5092_s0, %s3348_s4  ;;  %v3459_v50 = vld [vmem:[%s5093_s1 + $0x4c4] ss:$8 sps:$4 sm:$0xff]   ;;  %v3462_v52 = vld [vmem:[%s5093_s1 + $0x4c0] ss:$8 sps:$4 sm:$0xff]  }
  0x24   : > { %v269_v48 = vunpack.c.0.s8 %v268_v42  ;;  %v171_v53 = vld [vmem:[%s4094_s26 + $0x10] sm:$0x3f]  ;;  %v172_v54 = vld [vmem:[%s4094_s26 + $0x18] sm:$0x3f]  ;;  %v173_v55 = vld [vmem:[%s4094_s26 + $0x20] sm:$0x3f] }
  0x25   : > { %1150 = vmatpush1.bf16.msra.mxu0 %v3419_v18  ;;  %v174_v56 = vld [vmem:[%s4094_s26 + $0x28] sm:$0x3f]  ;;  %v4114_v57 = vpack.c.bf16 %v171_v53, %v171_v53  ;;  %v3463_v58 = vld [vmem:[%s5093_s1 + $0x3b4] ss:$8 sps:$4 sm:$0xff]   ;;  %v4121_v61 = vpack.c.bf16 %v172_v54, %v172_v54  ;;  %v4123_v62 = vpack.c.bf16 %v173_v55, %v173_v55  ;;  %v3467_v4 = vld [vmem:[%s5093_s1 + $0x3b0] ss:$8 sps:$4 sm:$0xff]   ;;  %v2847_v7 = vpack.c.bf16 %v172_v54, %v171_v53 }
  0x26   : > { %1193 = vmatpush1.bf16.msra.mxu1 %v3420_v19  ;;  %1151 = vmatprep.subr.bf16.mxu0 %v3421_v20  ;;  %v175_v59 = vld [vmem:[%s4094_s26 + $0x30] sm:$0x3f]  ;;  %v176_v60 = vld [vmem:[%s4094_s26 + $0x38] sm:$0x3f]  ;;  %v4126_v63 = vsub.s32 %v269_v48, %v4099_v49  ;;  %v4131_v1 = vpack.c.bf16 %v174_v56, %v174_v56  ;;  %v177_v5 = vld [vmem:[%s4094_s26 + $0x40] sm:$0x3f]  ;;  %v2848_v8 = vpack.c.bf16 %v174_v56, %v173_v55 }
  0x27   : > { %1194 = vmatprep.subr.bf16.mxu1 %v3423_v21  ;;  %v3465_v0 = vld [vmem:[%s5093_s1 + $0x4b4] ss:$8 sps:$4 sm:$0xff]   ;;  %v4133_v2 = vpack.c.bf16 %v175_v59, %v175_v59  ;;  %v4135_v3 = vpack.c.bf16 %v176_v60, %v176_v60  ;;  %v178_v6 = vld [vmem:[%s4094_s26 + $0x48] sm:$0x3f]  ;;  %v2849_v9 = vpack.c.bf16 %v176_v60, %v175_v59  ;;  %v208_v10 = vshrl.u32 %v4114_v57, 16  ;;  %s163_s4 = scalar_lea.vmem [#allocation2], %s2844_s29 }
  0x28   : > { %v3468_v11 = vld [vmem:[%s5093_s1 + $0x4b0] ss:$8 sps:$4 sm:$0xff]   ;;  %v2850_v12 = vpack.c.bf16 %v178_v6, %v177_v5  ;;  %v210_v13 = vshll.u32 %v4114_v57, 16  ;;  %v215_v14 = vshrl.u32 %v4121_v61, 16  ;;  %v217_v15 = vshll.u32 %v4121_v61, 16  ;;  %s2778_s5 = sshll.u32 %s163_s4, 4  ;;  %s5048_s5 = int_to_ptr.vmem [resolvable:$true] %s2778_s5 }
  0x29   : > { %1152 = vmatpush1.bf16.msra.mxu0 %v3425_v22  ;;  %v3469_v16 = vld [vmem:[%s5093_s1 + $0x3a4] ss:$8 sps:$4 sm:$0xff]   ;;  %v4153_v17 = vrot.slane %v2847_v7, %v4126_v63  ;;  %v4156_v18 = vrot.slane %v2848_v8, %v4126_v63  ;;  %v4159_v19 = vrot.slane %v2849_v9, %v4126_v63  ;;  %v222_v20 = vshrl.u32 %v4123_v62, 16  ;;  %s3823_s9 = scalar_lea.vmem %s5048_s5, 512  ;;  %p3830_p0 = scmp.lt.s32.totalorder %s5048_s5, %s3828_s11 }
  0x2a   : > { %1195 = vmatpush1.bf16.msra.mxu1 %v3426_v23  ;;  %1153 = vmatprep.subr.bf16.mxu0 %v3427_v24  ;;  %v3471_v21 = vld [vmem:[%s5093_s1 + $0x4a4] ss:$8 sps:$4 sm:$0xff]   ;;  %v4166_v22 = vrot.slane %v2850_v12, %v4126_v63  ;;  %v212_v23 = vrot.slane %v210_v13, 1  ;;  %v219_v24 = vrot.slane %v217_v15, 1  ;;  %v236_v43 = vshrl.u32 %v4133_v2, 16  ;;  %p3824_p11 = scmp.ne.s32.totalorder %s5048_s5, %s3823_s9  ;;  %p3831_p1 = scmp.lt.s32.totalorder %s3829_s17, %s3823_s9 }
  0x2b   : > { %1196 = vmatprep.subr.bf16.mxu1 %v3429_v25  ;;  %v224_v25 = vshll.u32 %v4123_v62, 16  ;;  %v245_v48 = vshll.u32 %v4135_v3, 16  ;;  %v3486_v12 = vld [vmem:[%s5093_s1 + $0x480] ss:$8 sps:$4 sm:$0xff]  }
  0x2c   : > { %p3825_p12 = pnand %p3824_p11, %p3947_p5  ;;  %p3832_p2 = por %p3831_p1, %p3830_p0 }
  0x2d   : > { %1154 = vmatpush1.bf16.msra.mxu0 %v3431_v26  ;;  %v4169_v26 = vpack.c.bf16 %v177_v5, %v177_v5  ;;  %v247_v56 = vrot.slane %v245_v48, 1 }
  0x2e   : > { %1197 = vmatpush1.bf16.msra.mxu1 %v3432_v27  ;;  %1155 = vmatprep.subr.bf16.mxu0 %v3433_v28  ;;  %v2947_v27 = vcombine.low %v4153_v17, %v4156_v18  ;;  %v229_v28 = vshrl.u32 %v4131_v1, 16  ;;  %p3826_p13 = pneg %p3825_p12 }
  0x2f   : > { %1198 = vmatprep.subr.bf16.mxu1 %v3435_v29  ;;  %v231_v29 = vshll.u32 %v4131_v1, 16  ;;  %v462_v54 = vshrl.u32 %v4169_v26, 16  ;;  %v464_v55 = vshll.u32 %v4169_v26, 16 }
  0x30   : > { %p3833_p3 = pnand %p3832_p2, %p3826_p13 }
  0x31   : > { %1156 = vmatpush1.bf16.msra.mxu0 %v3437_v30  ;;  %v3473_v30 = vld [vmem:[%s5093_s1 + $0x3a0] ss:$8 sps:$4 sm:$0xff]  }
  0x32   : > { %1199 = vmatpush1.bf16.msra.mxu1 %v3438_v31  ;;  %1157 = vmatprep.subr.bf16.mxu0 %v3439_v32  ;;  %v2949_v31 = vcombine.low %v4159_v19, %v4166_v22  ;;  %v213_v32 = vor.u32 %v212_v23, %v208_v10  ;;  %v3492_v23 = vld [vmem:[%s5093_s1 + $0x74] ss:$8 sps:$4 sm:$0xff]  }
  0x33   : > { %1200 = vmatprep.subr.bf16.mxu1 %v3441_v33  ;;  %v220_v33 = vor.u32 %v219_v24, %v215_v14  ;;  %v259_v14 = vrot.slane %v4114_v57, 1  ;;  %v261_v24 = vrot.slane %v4123_v62, 1  ;;  %v262_v57 = vrot.slane %v4131_v1, 1  ;;  %v3487_v1 = vld [vmem:[%s5093_s1 + $0x570] ss:$8 sps:$4 sm:$0xff]  }
  0x34   : > { %v4195_v41 = vrot.slane %v2949_v31, %v4126_v63 }
  0x35   : > { %1158 = vmatpush2.bf16.msra.mxu0 %v3443_v34  ;;  %v226_v34 = vrot.slane %v224_v25, 1 }
  0x36   : > { %1201 = vmatpush2.bf16.msra.mxu1 %v3444_v35  ;;  %1159 = vmatprep.subr.bf16.mxu0 %v3445_v36  ;;  %v3474_v35 = vld [vmem:[%s5093_s1 + $0x4a0] ss:$8 sps:$4 sm:$0xff]   ;;  %v3475_v36 = vld [vmem:[%s5093_s1 + $0x394] ss:$8 sps:$4 sm:$0xff]  }
  0x37   : > { %1202 = vmatprep.subr.bf16.mxu1 %v3447_v37  ;;  %v4186_v37 = vpack.c.bf16 %v178_v6, %v178_v6  ;;  %v227_v42 = vor.u32 %v226_v34, %v222_v20  ;;  %v466_v6 = vrot.slane %v464_v55, 1  ;;  %v3489_v20 = vld [vmem:[%s5093_s1 + $0x574] ss:$8 sps:$4 sm:$0xff]   ;;  %v3496_v55 = vld [vmem:[%s5093_s1 + $0x60] ss:$8 sps:$4 sm:$0xff]  }
  0x39   : > { %1160 = vmatpush2.bf16.msra.mxu0 %v3449_v38  ;;  %v4189_v38 = vrot.slane %v2947_v27, %v4126_v63  ;;  %v469_v59 = vshrl.u32 %v4186_v37, 16  ;;  %v471_v60 = vshll.u32 %v4186_v37, 16  ;;  %v467_v13 = vor.u32 %v466_v6, %v462_v54  ;;  %v3507_v54 = vld [vmem:[%s5093_s1 + $0x544] ss:$8 sps:$4 sm:$0xff]  }
  0x3a   : > { %1203 = vmatpush2.bf16.msra.mxu1 %v3450_v39  ;;  %1161 = vmatprep.subr.bf16.mxu0 %v3451_v40  ;;  %v233_v39 = vrot.slane %v231_v29, 1  ;;  %v3477_v40 = vld [vmem:[%s5093_s1 + $0x494] ss:$8 sps:$4 sm:$0xff]   ;;  %v263_v29 = vrot.slane %v4133_v2, 1  ;;  %v3519_v6 = vld [vmem:[%s5093_s1 + $0x524] ss:$8 sps:$4 sm:$0xff]  }
  0x3b   : > { %1204 = vmatprep.subr.bf16.mxu1 %v3453_v44  ;;  %v238_v44 = vshll.u32 %v4133_v2, 16  ;;  %v473_v10 = vrot.slane %v471_v60, 1  ;;  %v478_v2 = vrot.slane %v4186_v37, 1  ;;  %v3513_v60 = vld [vmem:[%s5093_s1 + $0x534] ss:$8 sps:$4 sm:$0xff]  }
  0x3d   : > { %1162 = vmatpush2.bf16.msra.mxu0 %v3455_v45  ;;  %v3479_v45 = vld [vmem:[%s5093_s1 + $0x390] ss:$8 sps:$4 sm:$0xff]   ;;  %v240_v53 = vrot.slane %v238_v44, 1  ;;  %v3501_v44 = vld [vmem:[%s5093_s1 + $0x554] ss:$8 sps:$4 sm:$0xff]  }
  0x3e   : > { %1205 = vmatpush2.bf16.msra.mxu1 %v3456_v46  ;;  %1163 = vmatprep.subr.bf16.mxu0 %v3457_v47  ;;  %v234_v46 = vor.u32 %v233_v39, %v229_v28  ;;  %v243_v47 = vshrl.u32 %v4135_v3, 16 }
  0x3f   : > { %1206 = vmatprep.subr.bf16.mxu1 %v3459_v50  ;;  %v291_v50 = vcombine.low %v213_v32, %v220_v33  ;;  %v241_v5 = vor.u32 %v240_v53, %v236_v43  ;;  %v332_v32 = vcombine.low %v261_v24, %v262_v57  ;;  %v477_v33 = vrot.slane %v4169_v26, 1  ;;  %v3520_v24 = vld [vmem:[%s5093_s1 + $0x20] ss:$8 sps:$4 sm:$0xff]  }
  0x40   : > { %v248_v7 = vor.u32 %v247_v56, %v243_v47  ;;  %v3490_v47 = vld [vmem:[%s5093_s1 + $0x70] ss:$8 sps:$4 sm:$0xff]  }
  0x41   : > { %1164 = vmatpush2.bf16.msra.mxu0 %v3461_v51  ;;  %v3480_v51 = vld [vmem:[%s5093_s1 + $0x490] ss:$8 sps:$4 sm:$0xff]   ;;  %v4220_v8 = vrot.slane %v291_v50, %v4126_v63  ;;  %v496_v39 = vcombine.low %v477_v33, %v478_v2 }
  0x42   : > { %1207 = vmatpush2.bf16.msra.mxu1 %v3462_v52  ;;  %1165 = vmatprep.subr.bf16.mxu0 %v3463_v58  ;;  %v634_v52 = vcombine.high %v4189_v38, %v4195_v41  ;;  %v316_v58 = vcombine.low %v227_v42, %v234_v46  ;;  %v341_v15 = vcombine.low %v241_v5, %v248_v7  ;;  %v3493_v42 = vld [vmem:[%s5093_s1 + $0x560] ss:$8 sps:$4 sm:$0xff]   ;;  %v3511_v5 = vld [vmem:[%s5093_s1 + $0x530] ss:$8 sps:$4 sm:$0xff]  }
  0x43   : > { %1208 = vmatprep.subr.bf16.mxu1 %v3465_v0  ;;  %v3481_v0 = vld [vmem:[%s5093_s1 + $0x384] ss:$8 sps:$4 sm:$0xff]   ;;  %v4280_v43 = vrot.slane %v496_v39, %v4126_v63  ;;  %v3508_v7 = vld [vmem:[%s5093_s1 + $0x40] ss:$8 sps:$4 sm:$0xff]  }
  0x44   : > { %1173 = vmatprep.mubr.bf16.mxu0 %v634_v52  ;;  %v4223_v9 = vrot.slane %v316_v58, %v4126_v63  ;;  %v4242_v25 = vrot.slane %v341_v15, %v4126_v63  ;;  %v3499_v52 = vld [vmem:[%s5093_s1 + $0x550] ss:$8 sps:$4 sm:$0xff]   ;;  %v3504_v58 = vld [vmem:[%s5093_s1 + $0x54] ss:$8 sps:$4 sm:$0xff]  }
  0x45   : > { %1166 = vmatpush2.bf16.msra.mxu0 %v3467_v4  ;;  %v3483_v4 = vld [vmem:[%s5093_s1 + $0x484] ss:$8 sps:$4 sm:$0xff]   ;;  %v3523_v15 = vld [vmem:[%s5093_s1 + $0x510] ss:$8 sps:$4 sm:$0xff]  }
  0x46   : > { %1209 = vmatpush2.bf16.msra.mxu1 %v3468_v11  ;;  %1167 = vmatprep.subr.bf16.mxu0 %v3469_v16  ;;  %v3485_v11 = vld [vmem:[%s5093_s1 + $0x380] ss:$8 sps:$4 sm:$0xff]   ;;  %v474_v16 = vor.u32 %v473_v10, %v469_v59  ;;  %v2948_v28 = vcombine.low %v4220_v8, %v4223_v9  ;;  %v3516_v10 = vld [vmem:[%s5093_s1 + $0x34] ss:$8 sps:$4 sm:$0xff]  }
  0x47   : > { %1210 = vmatprep.subr.bf16.mxu1 %v3471_v21  ;;  %v260_v21 = vrot.slane %v4121_v61, 1  ;;  %v633_v61 = vcombine.low %v4189_v38, %v4195_v41  ;;  %v3505_v59 = vld [vmem:[%s5093_s1 + $0x540] ss:$8 sps:$4 sm:$0xff]  }
  0x48   : > { %v480_v27 = vcombine.low %v467_v13, %v474_v16  ;;  %v618_v26 = vrot.slane %v2948_v28, %v4126_v63  ;;  %v3514_v13 = vld [vmem:[%s5093_s1 + $0x30] ss:$8 sps:$4 sm:$0xff]   ;;  %v3531_v16 = vld [vmem:[%s5093_s1 + $0x504] ss:$8 sps:$4 sm:$0xff]   ;;  %v3529_v28 = vld [vmem:[%s5093_s1 + $0x500] ss:$8 sps:$4 sm:$0xff]  }
  0x49   : > { %1168 = vmatpush2.bf16.msra.mxu0 %v3473_v30  ;;  %v264_v30 = vrot.slane %v4135_v3, 1  ;;  %v307_v31 = vcombine.low %v259_v14, %v260_v21  ;;  %v3495_v3 = vld [vmem:[%s5093_s1 + $0x564] ss:$8 sps:$4 sm:$0xff]  }
  0x4a   : > { %1211 = vmatpush2.bf16.msra.mxu1 %v3474_v35  ;;  %1169 = vmatprep.subr.bf16.mxu0 %v3475_v36  ;;  %v4251_v62 = vrot.slane %v480_v27, %v4126_v63  ;;  %v4265_v35 = vrot.slane %v332_v32, %v4126_v63  ;;  %v3522_v14 = vld [vmem:[%s5093_s1 + $0x24] ss:$8 sps:$4 sm:$0xff]   ;;  %v3528_v27 = vld [vmem:[%s5093_s1 + $0x14] ss:$8 sps:$4 sm:$0xff]   ;;  %v3535_v32 = vld [vmem:[%s5093_s1 + $0x5f0] ss:$8 sps:$4 sm:$0xff]  }
  0x4b   : > { %1212 = vmatprep.subr.bf16.mxu1 %v3477_v40  ;;  %v4262_v34 = vrot.slane %v307_v31, %v4126_v63  ;;  %v357_v36 = vcombine.low %v263_v29, %v264_v30  ;;  %v170_v21 = vld [vmem:[%s4094_s26 + $0x8] sm:$0x3f] }
  0x4c   : > { %v2950_v38 = vcombine.low %v4242_v25, %v4251_v62  ;;  %v3534_v31 = vld [vmem:[%s5093_s1 + $0x4] ss:$8 sps:$4 sm:$0xff]   ;;  %v182_v33 = vpack.c.bf16 %v170_v21, %v170_v21 }
  0x4d   : > { %1170 = vmatpush2.bf16.msra.mxu0 %v3479_v45  ;;  %v4271_v37 = vrot.slane %v357_v36, %v4126_v63  ;;  %v637_v40 = vcombine.low %v4262_v34, %v4265_v35 }
  0x4e   : > { %1213 = vmatpush2.bf16.msra.mxu1 %v3480_v51  ;;  %1171 = vmatprep.subr.bf16.mxu0 %v3481_v0  ;;  %v632_v41 = vrot.slane %v2950_v38, %v4126_v63  ;;  %v3498_v51 = vld [vmem:[%s5093_s1 + $0x64] ss:$8 sps:$4 sm:$0xff]   ;;  %v3502_v0 = vld [vmem:[%s5093_s1 + $0x50] ss:$8 sps:$4 sm:$0xff]   ;;  %v3540_v38 = vld [vmem:[%s5093_s1 + $0xf4] ss:$8 sps:$4 sm:$0xff]  }
  0x4f   : > { %1214 = vmatprep.subr.bf16.mxu1 %v3483_v4  ;;  %v638_v48 = vcombine.low %v4271_v37, %v4280_v43  ;;  %v4291_v50 = vrot.slane %v637_v40, %v4126_v63  ;;  %v3510_v4 = vld [vmem:[%s5093_s1 + $0x44] ss:$8 sps:$4 sm:$0xff]   ;;  %v203_v40 = vshll.u32 %v182_v33, 16 }
  0x50   : > { %v636_v45 = vcombine.high %v618_v26, %v632_v41  ;;  %v635_v46 = vcombine.low %v618_v26, %v632_v41  ;;  %v3541_v26 = vld [vmem:[%s5093_s1 + $0x5e0] ss:$8 sps:$4 sm:$0xff]   ;;  %v3538_v41 = vld [vmem:[%s5093_s1 + $0xf0] ss:$8 sps:$4 sm:$0xff]  }
  0x51   : > { %1172 = vmatpush2.bf16.msra.mxu0 %v3485_v11  ;;  %v4300_v53 = vrot.slane %v638_v48, %v4126_v63  ;;  %v3517_v11 = vld [vmem:[%s5093_s1 + $0x520] ss:$8 sps:$4 sm:$0xff]   ;;  %v201_v48 = vshrl.u32 %v182_v33, 16 }
  0x52   : > { %1215 = vmatpush2.bf16.msra.mxu1 %v3486_v12  ;;  %1227 = vmatprep.subr.bf16.mxu0 %v3489_v20  ;;  %v3525_v12 = vld [vmem:[%s5093_s1 + $0x514] ss:$8 sps:$4 sm:$0xff]   ;;  %v169_v20 = vld [vmem:[%s4094_s26] sm:$0x3f] }
  0x53   : > { %1810 = vmatprep.subr.bf16.mxu1 %v3492_v23  ;;  %1216 = vmatprep.mubr.bf16.mxu1 %v636_v45  ;;  %v654_v56 = vcombine.high %v4291_v50, %v4300_v53  ;;  %v3049_v23 = vcombine.low %v4156_v18, %v4159_v19  ;;  %v2846_v57 = vpack.c.bf16 %v170_v21, %v169_v20  ;;  %v3537_v18 = vld [vmem:[%s5093_s1 + $0x5f4] ss:$8 sps:$4 sm:$0xff]   ;;  %v3547_v45 = vld [vmem:[%s5093_s1 + $0x5d0] ss:$8 sps:$4 sm:$0xff]  }
  0x54   : > { %1174 = vmatmul.mubr.bf16.vlgmr.msra.gmra.mxu0 %v633_v61  ;;  %v3526_v61 = vld [vmem:[%s5093_s1 + $0x10] ss:$8 sps:$4 sm:$0xff]  }
  0x55   : > { %1228 = vmatpush1.bf16.msra.mxu0 %v3487_v1  ;;  %1217 = vmatmul.mubr.bf16.vlgmr.msra.gmra.mxu1 %v635_v46  ;;  %v273_v29 = vrot.slane %v2846_v57, %v4126_v63  ;;  %v4373_v19 = vrot.slane %v3049_v23, %v4126_v63  ;;  %v181_v1 = vpack.c.bf16 %v169_v20, %v169_v20  ;;  %v3562_v20 = vld [vmem:[%s5093_s1 + $0xb0] ss:$8 sps:$4 sm:$0xff]   ;;  %v3570_v23 = vld [vmem:[%s5093_s1 + $0xa4] ss:$8 sps:$4 sm:$0xff]  }
  0x56   : > { %1229 = vmatprep.subr.bf16.mxu0 %v3495_v3  ;;  %1811 = vmatpush1.bf16.msra.mxu1 %v3490_v47  ;;  %v3532_v3 = vld [vmem:[%s5093_s1] ss:$8 sps:$4 sm:$0xff]   ;;  %v3571_v57 = vld [vmem:[%s5093_s1 + $0x590] ss:$8 sps:$4 sm:$0xff]  }
  0x57   : > { %1812 = vmatprep.subr.bf16.mxu1 %v3498_v51  ;;  %1259 = vmatprep.mubr.bf16.mxu0 %v654_v56  ;;  %v3047_v30 = vcombine.low %v273_v29, %v4153_v17  ;;  %v3543_v17 = vld [vmem:[%s5093_s1 + $0x5e4] ss:$8 sps:$4 sm:$0xff]   ;;  %v196_v39 = vshll.u32 %v181_v1, 16  ;;  %v194_v46 = vshrl.u32 %v181_v1, 16  ;;  %v205_v51 = vrot.slane %v203_v40, 1 }
  0x58   : > { %v3553_v56 = vld [vmem:[%s5093_s1 + $0x5c0] ss:$8 sps:$4 sm:$0xff]   ;;  %v3586_v40 = vld [vmem:[%s5093_s1 + $0x270] ss:$8 sps:$4 sm:$0xff]  }
  0x59   : > { %1230 = vmatpush1.bf16.msra.mxu0 %v3493_v42  ;;  %v4386_v2 = vrot.slane %v3047_v30, %v4126_v63  ;;  %v3549_v42 = vld [vmem:[%s5093_s1 + $0x5d4] ss:$8 sps:$4 sm:$0xff]   ;;  %v198_v47 = vrot.slane %v196_v39, 1  ;;  %v3568_v29 = vld [vmem:[%s5093_s1 + $0xa0] ss:$8 sps:$4 sm:$0xff]  }
  0x5a   : > { %1231 = vmatprep.subr.bf16.mxu0 %v3501_v44  ;;  %1813 = vmatpush1.bf16.msra.mxu1 %v3496_v55  ;;  %v3546_v44 = vld [vmem:[%s5093_s1 + $0xe4] ss:$8 sps:$4 sm:$0xff]   ;;  %v3552_v55 = vld [vmem:[%s5093_s1 + $0xd4] ss:$8 sps:$4 sm:$0xff]  }
  0x5b   : > { %1814 = vmatprep.subr.bf16.mxu1 %v3504_v58  ;;  %v1303_v36 = vcombine.high %v4386_v2, %v4373_v19  ;;  %v199_v58 = vor.u32 %v198_v47, %v194_v46  ;;  %v3585_v30 = vld [vmem:[%s5093_s1 + $0x174] ss:$8 sps:$4 sm:$0xff]   ;;  %v3601_v47 = vld [vmem:[%s5093_s1 + $0x140] ss:$8 sps:$4 sm:$0xff]  }
  0x5c   : > { %v3597_v39 = vld [vmem:[%s5093_s1 + $0x154] ss:$8 sps:$4 sm:$0xff]  }
  0x5d   : > { %1232 = vmatpush1.bf16.msra.mxu0 %v3499_v52  ;;  %1842 = vmatprep.mubr.bf16.mxu1 %v1303_v36  ;;  %v3555_v52 = vld [vmem:[%s5093_s1 + $0x5c4] ss:$8 sps:$4 sm:$0xff]   ;;  %v3600_v46 = vld [vmem:[%s5093_s1 + $0x254] ss:$8 sps:$4 sm:$0xff]  }
  0x5e   : > { %1233 = vmatprep.subr.bf16.mxu0 %v3507_v54  ;;  %1815 = vmatpush1.bf16.msra.mxu1 %v3502_v0  ;;  %v3544_v54 = vld [vmem:[%s5093_s1 + $0xe0] ss:$8 sps:$4 sm:$0xff]   ;;  %v3550_v0 = vld [vmem:[%s5093_s1 + $0xd0] ss:$8 sps:$4 sm:$0xff]  }
  0x5f   : > { %1816 = vmatprep.subr.bf16.mxu1 %v3510_v4  ;;  %v3558_v4 = vld [vmem:[%s5093_s1 + $0xc4] ss:$8 sps:$4 sm:$0xff]  }
  0x61   : > { %1234 = vmatpush1.bf16.msra.mxu0 %v3505_v59  ;;  %v206_v59 = vor.u32 %v205_v51, %v201_v48  ;;  %v3609_v48 = vld [vmem:[%s5093_s1 + $0x134] ss:$8 sps:$4 sm:$0xff]   ;;  %v3598_v51 = vld [vmem:[%s5093_s1 + $0x250] ss:$8 sps:$4 sm:$0xff]  }
  0x62   : > { %1235 = vmatprep.subr.bf16.mxu0 %v3513_v60  ;;  %1817 = vmatpush1.bf16.msra.mxu1 %v3508_v7  ;;  %v3561_v60 = vld [vmem:[%s5093_s1 + $0x5b4] ss:$8 sps:$4 sm:$0xff]   ;;  %v3567_v7 = vld [vmem:[%s5093_s1 + $0x5a4] ss:$8 sps:$4 sm:$0xff]  }
  0x63   : > { %1818 = vmatprep.subr.bf16.mxu1 %v3516_v10  ;;  %v3556_v10 = vld [vmem:[%s5093_s1 + $0xc0] ss:$8 sps:$4 sm:$0xff]  }
  0x65   : > { %1236 = vmatpush1.bf16.msra.mxu0 %v3511_v5  ;;  %v3559_v5 = vld [vmem:[%s5093_s1 + $0x5b0] ss:$8 sps:$4 sm:$0xff]  }
  0x66   : > { %1237 = vmatprep.subr.bf16.mxu0 %v3519_v6  ;;  %1819 = vmatpush1.bf16.msra.mxu1 %v3514_v13  ;;  %v266_v6 = vcombine.low %v199_v58, %v206_v59  ;;  %v3564_v13 = vld [vmem:[%s5093_s1 + $0xb4] ss:$8 sps:$4 sm:$0xff]   ;;  %v3613_v59 = vld [vmem:[%s5093_s1 + $0x120] ss:$8 sps:$4 sm:$0xff]  }
  0x67   : > { %1820 = vmatprep.subr.bf16.mxu1 %v3522_v14  ;;  %v3565_v14 = vld [vmem:[%s5093_s1 + $0x5a0] ss:$8 sps:$4 sm:$0xff]   ;;  %v3612_v58 = vld [vmem:[%s5093_s1 + $0x234] ss:$8 sps:$4 sm:$0xff]  }
  0x69   : > { %1238 = vmatpush1.bf16.msra.mxu0 %v3517_v11  ;;  %v257_v11 = vrot.slane %v181_v1, 1 }
  0x6a   : > { %1239 = vmatprep.subr.bf16.mxu0 %v3525_v12  ;;  %1821 = vmatpush1.bf16.msra.mxu1 %v3520_v24  ;;  %v258_v12 = vrot.slane %v182_v33, 1  ;;  %v3050_v24 = vcombine.low %v4223_v9, %v4242_v25  ;;  %v3576_v9 = vld [vmem:[%s5093_s1 + $0x94] ss:$8 sps:$4 sm:$0xff]   ;;  %v3582_v33 = vld [vmem:[%s5093_s1 + $0x84] ss:$8 sps:$4 sm:$0xff]  }
  0x6b   : > { %1822 = vmatprep.subr.bf16.mxu1 %v3528_v27 }
  0x6c   : > { %v282_v21 = vcombine.low %v257_v11, %v258_v12  ;;  %v4477_v25 = vrot.slane %v3050_v24, %v4126_v63  ;;  %v3625_v11 = vld [vmem:[%s5093_s1 + $0x100] ss:$8 sps:$4 sm:$0xff]   ;;  %v3633_v12 = vld [vmem:[%s5093_s1 + $0x1f4] ss:$8 sps:$4 sm:$0xff]  }
  0x6d   : > { %1240 = vmatpush1.bf16.msra.mxu0 %v3523_v15  ;;  %v280_v15 = vrot.slane %v266_v6, %v4126_v63  ;;  %v3627_v6 = vld [vmem:[%s5093_s1 + $0x104] ss:$8 sps:$4 sm:$0xff]   ;;  %v3645_v24 = vld [vmem:[%s5093_s1 + $0x1d4] ss:$8 sps:$4 sm:$0xff]  }
  0x6e   : > { %1241 = vmatprep.subr.bf16.mxu0 %v3531_v16  ;;  %1823 = vmatpush1.bf16.msra.mxu1 %v3526_v61  ;;  %v3573_v16 = vld [vmem:[%s5093_s1 + $0x594] ss:$8 sps:$4 sm:$0xff]  }
  0x6f   : > { %1824 = vmatprep.subr.bf16.mxu1 %v3534_v31  ;;  %v3048_v27 = vcombine.low %v280_v15, %v4220_v8  ;;  %v3577_v8 = vld [vmem:[%s5093_s1 + $0x580] ss:$8 sps:$4 sm:$0xff]   ;;  %v3574_v31 = vld [vmem:[%s5093_s1 + $0x90] ss:$8 sps:$4 sm:$0xff]  }
  0x70   : > { %v3631_v15 = vld [vmem:[%s5093_s1 + $0x1f0] ss:$8 sps:$4 sm:$0xff]  }
  0x71   : > { %1242 = vmatpush1.bf16.msra.mxu0 %v3529_v28  ;;  %v3579_v28 = vld [vmem:[%s5093_s1 + $0x584] ss:$8 sps:$4 sm:$0xff]   ;;  %v4483_v61 = vrot.slane %v3048_v27, %v4126_v63 }
  0x72   : > { %1243 = vmatprep.subr.bf16.mxu0 %v3537_v18  ;;  %1825 = vmatpush1.bf16.msra.mxu1 %v3532_v3  ;;  %v289_v18 = vrot.slane %v282_v21, %v4126_v63  ;;  %v3583_v3 = vld [vmem:[%s5093_s1 + $0x170] ss:$8 sps:$4 sm:$0xff]   ;;  %v3636_v21 = vld [vmem:[%s5093_s1 + $0x2f4] ss:$8 sps:$4 sm:$0xff]   ;;  %v3642_v27 = vld [vmem:[%s5093_s1 + $0x2e4] ss:$8 sps:$4 sm:$0xff]  }
  0x73   : > { %1826 = vmatprep.subr.bf16.mxu1 %v3540_v38  ;;  %v1305_v36 = vcombine.high %v4483_v61, %v4477_v25  ;;  %v3589_v38 = vld [vmem:[%s5093_s1 + $0x160] ss:$8 sps:$4 sm:$0xff]  }
  0x74   : > { %v1306_v1 = vcombine.low %v289_v18, %v4262_v34  ;;  %v3591_v34 = vld [vmem:[%s5093_s1 + $0x164] ss:$8 sps:$4 sm:$0xff]   ;;  %v3640_v18 = vld [vmem:[%s5093_s1 + $0x2e0] ss:$8 sps:$4 sm:$0xff]  }
  0x75   : > { %1244 = vmatpush2.bf16.msra.mxu0 %v3535_v32  ;;  %v1307_v32 = vcombine.low %v4265_v35, %v4271_v37  ;;  %v3580_v35 = vld [vmem:[%s5093_s1 + $0x80] ss:$8 sps:$4 sm:$0xff]  }
  0x76   : > { %1245 = vmatprep.subr.bf16.mxu0 %v3543_v17  ;;  %1827 = vmatpush2.bf16.msra.mxu1 %v3538_v41  ;;  %v653_v17 = vcombine.low %v4291_v50, %v4300_v53  ;;  %v4511_v37 = vrot.slane %v1306_v1, %v4126_v63  ;;  %v3588_v53 = vld [vmem:[%s5093_s1 + $0x274] ss:$8 sps:$4 sm:$0xff]  }
  0x77   : > { %1828 = vmatprep.subr.bf16.mxu1 %v3546_v44  ;;  %v4514_v50 = vrot.slane %v1307_v32, %v4126_v63  ;;  %v3603_v44 = vld [vmem:[%s5093_s1 + $0x144] ss:$8 sps:$4 sm:$0xff]   ;;  %v179_v1 = vld [vmem:[%s4094_s26 + $0x50] sm:$0x3f] }
  0x78   : > { %v3654_v32 = vld [vmem:[%s5093_s1 + $0x2c4] ss:$8 sps:$4 sm:$0xff]  }
  0x79   : > { %1246 = vmatpush2.bf16.msra.mxu0 %v3541_v26  ;;  %v1302_v26 = vcombine.low %v4386_v2, %v4373_v19  ;;  %v1323_v41 = vcombine.high %v4511_v37, %v4514_v50  ;;  %v3595_v2 = vld [vmem:[%s5093_s1 + $0x150] ss:$8 sps:$4 sm:$0xff]  }
  0x7a   : > { %1247 = vmatprep.subr.bf16.mxu0 %v3549_v42  ;;  %1829 = vmatpush2.bf16.msra.mxu1 %v3544_v54  ;;  %v3594_v42 = vld [vmem:[%s5093_s1 + $0x264] ss:$8 sps:$4 sm:$0xff]   ;;  %v3607_v54 = vld [vmem:[%s5093_s1 + $0x130] ss:$8 sps:$4 sm:$0xff]  }
  0x7b   : > { %1830 = vmatprep.subr.bf16.mxu1 %v3552_v55  ;;  %v3615_v55 = vld [vmem:[%s5093_s1 + $0x124] ss:$8 sps:$4 sm:$0xff]  }
  0x7d   : > { %1248 = vmatpush2.bf16.msra.mxu0 %v3547_v45  ;;  %v3592_v45 = vld [vmem:[%s5093_s1 + $0x260] ss:$8 sps:$4 sm:$0xff]  }
  0x7e   : > { %1249 = vmatprep.subr.bf16.mxu0 %v3555_v52  ;;  %1831 = vmatpush2.bf16.msra.mxu1 %v3550_v0  ;;  %v3606_v52 = vld [vmem:[%s5093_s1 + $0x244] ss:$8 sps:$4 sm:$0xff]   ;;  %v3610_v0 = vld [vmem:[%s5093_s1 + $0x230] ss:$8 sps:$4 sm:$0xff]  }
  0x7f   : > { %1832 = vmatprep.subr.bf16.mxu1 %v3558_v4  ;;  %v3618_v4 = vld [vmem:[%s5093_s1 + $0x224] ss:$8 sps:$4 sm:$0xff]  }
  0x81   : > { %1250 = vmatpush2.bf16.msra.mxu0 %v3553_v56  ;;  %v3604_v56 = vld [vmem:[%s5093_s1 + $0x240] ss:$8 sps:$4 sm:$0xff]  }
  0x82   : > { %1251 = vmatprep.subr.bf16.mxu0 %v3561_v60  ;;  %1833 = vmatpush2.bf16.msra.mxu1 %v3556_v10  ;;  %v3621_v60 = vld [vmem:[%s5093_s1 + $0x114] ss:$8 sps:$4 sm:$0xff]  }
  0x83   : > { %1834 = vmatprep.subr.bf16.mxu1 %v3564_v13  ;;  %v3624_v10 = vld [vmem:[%s5093_s1 + $0x214] ss:$8 sps:$4 sm:$0xff]   ;;  %v3622_v13 = vld [vmem:[%s5093_s1 + $0x210] ss:$8 sps:$4 sm:$0xff]  }
  0x85   : > { %1252 = vmatpush2.bf16.msra.mxu0 %v3559_v5  ;;  %v3619_v5 = vld [vmem:[%s5093_s1 + $0x110] ss:$8 sps:$4 sm:$0xff]  }
  0x86   : > { %1253 = vmatprep.subr.bf16.mxu0 %v3567_v7  ;;  %1835 = vmatpush2.bf16.msra.mxu1 %v3562_v20  ;;  %v3616_v7 = vld [vmem:[%s5093_s1 + $0x220] ss:$8 sps:$4 sm:$0xff]  }
  0x87   : > { %1836 = vmatprep.subr.bf16.mxu1 %v3570_v23  ;;  %v3628_v20 = vld [vmem:[%s5093_s1 + $0x200] ss:$8 sps:$4 sm:$0xff]  }
  0x88   : > { %v3637_v23 = vld [vmem:[%s5093_s1 + $0x1e0] ss:$8 sps:$4 sm:$0xff]  }
  0x89   : > { %1254 = vmatpush2.bf16.msra.mxu0 %v3565_v14  ;;  %v3630_v14 = vld [vmem:[%s5093_s1 + $0x204] ss:$8 sps:$4 sm:$0xff]  }
  0x8a   : > { %1255 = vmatprep.subr.bf16.mxu0 %v3573_v16  ;;  %1837 = vmatpush2.bf16.msra.mxu1 %v3568_v29  ;;  %v3639_v16 = vld [vmem:[%s5093_s1 + $0x1e4] ss:$8 sps:$4 sm:$0xff]  }
  0x8b   : > { %1838 = vmatprep.subr.bf16.mxu1 %v3576_v9  ;;  %v3651_v29 = vld [vmem:[%s5093_s1 + $0x1c4] ss:$8 sps:$4 sm:$0xff]   ;;  %v3648_v9 = vld [vmem:[%s5093_s1 + $0x2d4] ss:$8 sps:$4 sm:$0xff]  }
  0x8d   : > { %1256 = vmatpush2.bf16.msra.mxu0 %v3571_v57  ;;  %v3634_v57 = vld [vmem:[%s5093_s1 + $0x2f0] ss:$8 sps:$4 sm:$0xff]  }
  0x8e   : > { %1257 = vmatprep.subr.bf16.mxu0 %v3579_v28  ;;  %1839 = vmatpush2.bf16.msra.mxu1 %v3574_v31  ;;  %v3643_v28 = vld [vmem:[%s5093_s1 + $0x1d0] ss:$8 sps:$4 sm:$0xff]  }
  0x8f   : > { %1840 = vmatprep.subr.bf16.mxu1 %v3582_v33  ;;  %v3646_v31 = vld [vmem:[%s5093_s1 + $0x2d0] ss:$8 sps:$4 sm:$0xff]  }
  0x90   : > { %v180_v33 = vld [vmem:[%s4094_s26 + $0x58] sm:$0x3f] }
  0x91   : > { %1258 = vmatpush2.bf16.msra.mxu0 %v3577_v8  ;;  %v3649_v8 = vld [vmem:[%s5093_s1 + $0x1c0] ss:$8 sps:$4 sm:$0xff]  }
  0x92   : > { %1853 = vmatprep.subr.bf16.mxu0 %v3585_v30  ;;  %1841 = vmatpush2.bf16.msra.mxu1 %v3580_v35  ;;  %v3657_v30 = vld [vmem:[%s5093_s1 + $0x1b4] ss:$8 sps:$4 sm:$0xff]   ;;  %v3663_v35 = vld [vmem:[%s5093_s1 + $0x1a4] ss:$8 sps:$4 sm:$0xff]  }
  0x93   : > { %1896 = vmatprep.subr.bf16.mxu1 %v3588_v53  ;;  %v3652_v53 = vld [vmem:[%s5093_s1 + $0x2c0] ss:$8 sps:$4 sm:$0xff]  }
  0x94   : > { %1260 = vmatmul.mubr.bf16.vlgmr.msra.gmra.mxu0 %v653_v17  ;;  %v3655_v17 = vld [vmem:[%s5093_s1 + $0x1b0] ss:$8 sps:$4 sm:$0xff]  }
  0x95   : > { %1854 = vmatpush1.bf16.msra.mxu0 %v3583_v3  ;;  %1885 = vmatprep.mubr.bf16.mxu0 %v1305_v36  ;;  %v4660_v3 = vpack.c.bf16 %v179_v1, %v179_v1  ;;  %v4662_v36 = vpack.c.bf16 %v180_v33, %v180_v33 }
  0x96   : > { %1855 = vmatprep.subr.bf16.mxu0 %v3591_v34  ;;  %1843 = vmatmul.mubr.bf16.vlgmr.msra.gmra.mxu1 %v1302_v26  ;;  %v3147_v34 = vpack.c.bf16 %v180_v33, %v179_v1  ;;  %v3700_v1 = vld [vmem:[%s5093_s1 + $0x740] ss:$8 sps:$4 sm:$0xff]   ;;  %v3708_v33 = vld [vmem:[%s5093_s1 + $0x734] ss:$8 sps:$4 sm:$0xff]  }
  0x97   : > { %1897 = vmatpush1.bf16.msra.mxu1 %v3586_v40  ;;  %1928 = vmatprep.mubr.bf16.mxu1 %v1323_v41  ;;  %v1942_v26 = vshll.u32 %v4660_v3, 16  ;;  %v1947_v40 = vshrl.u32 %v4662_v36, 16  ;;  %v1949_v41 = vshll.u32 %v4662_v36, 16 }
  0x98   : > { %1898 = vmatprep.subr.bf16.mxu1 %v3594_v42  ;;  %v3661_v42 = vld [vmem:[%s5093_s1 + $0x1a0] ss:$8 sps:$4 sm:$0xff]  }
  0x99   : > { %1856 = vmatpush1.bf16.msra.mxu0 %v3589_v38  ;;  %v1940_v38 = vshrl.u32 %v4660_v3, 16 }
  0x9a   : > { %1857 = vmatprep.subr.bf16.mxu0 %v3597_v39  ;;  %v3660_v39 = vld [vmem:[%s5093_s1 + $0x2b4] ss:$8 sps:$4 sm:$0xff]  }
  0x9b   : > { %1899 = vmatpush1.bf16.msra.mxu1 %v3592_v45  ;;  %v3669_v45 = vld [vmem:[%s5093_s1 + $0x194] ss:$8 sps:$4 sm:$0xff]  }
  0x9c   : > { %1900 = vmatprep.subr.bf16.mxu1 %v3600_v46  ;;  %v1951_v46 = vrot.slane %v1949_v41, 1  ;;  %v3721_v41 = vld [vmem:[%s5093_s1 + $0x600] ss:$8 sps:$4 sm:$0xff]  }
  0x9d   : > { %1858 = vmatpush1.bf16.msra.mxu0 %v3595_v2  ;;  %v1965_v2 = vrot.slane %v3147_v34, %v4126_v63  ;;  %v3717_v34 = vld [vmem:[%s5093_s1 + $0x614] ss:$8 sps:$4 sm:$0xff]  }
  0x9e   : > { %1859 = vmatprep.subr.bf16.mxu0 %v3603_v44  ;;  %v1944_v44 = vrot.slane %v1942_v26, 1  ;;  %v3723_v26 = vld [vmem:[%s5093_s1 + $0x604] ss:$8 sps:$4 sm:$0xff]  }
  0x9f   : > { %1901 = vmatpush1.bf16.msra.mxu1 %v3598_v51  ;;  %v3666_v51 = vld [vmem:[%s5093_s1 + $0x2a4] ss:$8 sps:$4 sm:$0xff]  }
  0xa0   : > { %1902 = vmatprep.subr.bf16.mxu1 %v3606_v52  ;;  %v1952_v52 = vor.u32 %v1951_v46, %v1947_v40  ;;  %v3720_v40 = vld [vmem:[%s5093_s1 + $0x714] ss:$8 sps:$4 sm:$0xff]   ;;  %v3735_v46 = vld [vmem:[%s5093_s1 + $0x6e4] ss:$8 sps:$4 sm:$0xff]  }
  0xa1   : > { %1860 = vmatpush1.bf16.msra.mxu0 %v3601_v47  ;;  %v3658_v47 = vld [vmem:[%s5093_s1 + $0x2b0] ss:$8 sps:$4 sm:$0xff]  }
  0xa2   : > { %1861 = vmatprep.subr.bf16.mxu0 %v3609_v48  ;;  %v1945_v48 = vor.u32 %v1944_v44, %v1940_v38  ;;  %v3715_v38 = vld [vmem:[%s5093_s1 + $0x610] ss:$8 sps:$4 sm:$0xff]   ;;  %v3726_v44 = vld [vmem:[%s5093_s1 + $0x704] ss:$8 sps:$4 sm:$0xff]  }
  0xa3   : > { %1903 = vmatpush1.bf16.msra.mxu1 %v3604_v56  ;;  %v3675_v56 = vld [vmem:[%s5093_s1 + $0x184] ss:$8 sps:$4 sm:$0xff]  }
  0xa4   : > { %1904 = vmatprep.subr.bf16.mxu1 %v3612_v58  ;;  %v1958_v58 = vcombine.low %v1945_v48, %v1952_v52  ;;  %v3732_v48 = vld [vmem:[%s5093_s1 + $0x7f4] ss:$8 sps:$4 sm:$0xff]  }
  0xa5   : > { %1862 = vmatpush1.bf16.msra.mxu0 %v3607_v54  ;;  %v3667_v54 = vld [vmem:[%s5093_s1 + $0x190] ss:$8 sps:$4 sm:$0xff]   ;;  %v3741_v52 = vld [vmem:[%s5093_s1 + $0x6d4] ss:$8 sps:$4 sm:$0xff]  }
  0xa6   : > { %1863 = vmatprep.subr.bf16.mxu0 %v3615_v55  ;;  %v3244_v55 = vcombine.low %v4166_v22, %v1965_v2  ;;  %v3673_v22 = vld [vmem:[%s5093_s1 + $0x180] ss:$8 sps:$4 sm:$0xff]   ;;  %v3718_v2 = vld [vmem:[%s5093_s1 + $0x710] ss:$8 sps:$4 sm:$0xff]  }
  0xa7   : > { %1905 = vmatpush1.bf16.msra.mxu1 %v3610_v0  ;;  %v1972_v0 = vrot.slane %v1958_v58, %v4126_v63  ;;  %v3747_v58 = vld [vmem:[%s5093_s1 + $0x6c4] ss:$8 sps:$4 sm:$0xff]  }
  0xa8   : > { %1906 = vmatprep.subr.bf16.mxu1 %v3618_v4  ;;  %v4708_v4 = vrot.slane %v3244_v55, %v4126_v63  ;;  %v3738_v55 = vld [vmem:[%s5093_s1 + $0x7e4] ss:$8 sps:$4 sm:$0xff]  }
  0xa9   : > { %1864 = vmatpush1.bf16.msra.mxu0 %v3613_v59  ;;  %v3664_v59 = vld [vmem:[%s5093_s1 + $0x2a0] ss:$8 sps:$4 sm:$0xff]  }
  0xaa   : > { %1865 = vmatprep.subr.bf16.mxu0 %v3621_v60  ;;  %v3672_v60 = vld [vmem:[%s5093_s1 + $0x294] ss:$8 sps:$4 sm:$0xff]  }
  0xab   : > { %1907 = vmatpush1.bf16.msra.mxu1 %v3616_v7  ;;  %v3245_v7 = vcombine.low %v4251_v62, %v1972_v0  ;;  %v3687_v62 = vld [vmem:[%s5093_s1 + $0x664] ss:$8 sps:$4 sm:$0xff]   ;;  %v3745_v0 = vld [vmem:[%s5093_s1 + $0x6c0] ss:$8 sps:$4 sm:$0xff]  }
  0xac   : > { %1908 = vmatprep.subr.bf16.mxu1 %v3624_v10  ;;  %v3678_v10 = vld [vmem:[%s5093_s1 + $0x284] ss:$8 sps:$4 sm:$0xff]  }
  0xad   : > { %1866 = vmatpush1.bf16.msra.mxu0 %v3619_v5  ;;  %v3681_v5 = vld [vmem:[%s5093_s1 + $0x674] ss:$8 sps:$4 sm:$0xff]  }
  0xae   : > { %1867 = vmatprep.subr.bf16.mxu0 %v3627_v6  ;;  %v3670_v6 = vld [vmem:[%s5093_s1 + $0x290] ss:$8 sps:$4 sm:$0xff]  }
  0xaf   : > { %1909 = vmatpush1.bf16.msra.mxu1 %v3622_v13  ;;  %v2096_v13 = vcombine.high %v4373_v19, %v4708_v4 }
  0xb0   : > { %1910 = vmatprep.subr.bf16.mxu1 %v3630_v14  ;;  %v3676_v14 = vld [vmem:[%s5093_s1 + $0x280] ss:$8 sps:$4 sm:$0xff]  }
  0xb1   : > { %1868 = vmatpush1.bf16.msra.mxu0 %v3625_v11  ;;  %v1304_v11 = vcombine.low %v4483_v61, %v4477_v25  ;;  %v4734_v61 = vrot.slane %v3245_v7, %v4126_v63  ;;  %v3742_v7 = vld [vmem:[%s5093_s1 + $0x7d0] ss:$8 sps:$4 sm:$0xff]  }
  0xb2   : > { %1869 = vmatprep.subr.bf16.mxu0 %v3633_v12  ;;  %v3679_v12 = vld [vmem:[%s5093_s1 + $0x670] ss:$8 sps:$4 sm:$0xff]  }
  0xb3   : > { %1911 = vmatpush1.bf16.msra.mxu1 %v3628_v20  ;;  %v1322_v20 = vcombine.low %v4511_v37, %v4514_v50  ;;  %v3691_v37 = vld [vmem:[%s5093_s1 + $0x650] ss:$8 sps:$4 sm:$0xff]  }
  0xb4   : > { %1912 = vmatprep.subr.bf16.mxu1 %v3636_v21  ;;  %v3693_v21 = vld [vmem:[%s5093_s1 + $0x654] ss:$8 sps:$4 sm:$0xff]  }
  0xb5   : > { %1870 = vmatpush2.bf16.msra.mxu0 %v3631_v15  ;;  %v3684_v15 = vld [vmem:[%s5093_s1 + $0x774] ss:$8 sps:$4 sm:$0xff]  }
  0xb6   : > { %1871 = vmatprep.subr.bf16.mxu0 %v3639_v16  ;;  %v3685_v16 = vld [vmem:[%s5093_s1 + $0x660] ss:$8 sps:$4 sm:$0xff]  }
  0xb7   : > { %1913 = vmatpush2.bf16.msra.mxu1 %v3634_v57  ;;  %v3690_v57 = vld [vmem:[%s5093_s1 + $0x764] ss:$8 sps:$4 sm:$0xff]  }
  0xb8   : > { %1914 = vmatprep.subr.bf16.mxu1 %v3642_v27  ;;  %v3699_v27 = vld [vmem:[%s5093_s1 + $0x644] ss:$8 sps:$4 sm:$0xff]  }
  0xb9   : > { %1872 = vmatpush2.bf16.msra.mxu0 %v3637_v23  ;;  %v3682_v23 = vld [vmem:[%s5093_s1 + $0x770] ss:$8 sps:$4 sm:$0xff]  }
  0xba   : > { %1873 = vmatprep.subr.bf16.mxu0 %v3645_v24  ;;  %v2098_v24 = vcombine.high %v4477_v25, %v4734_v61 }
  0xbb   : > { %1915 = vmatpush2.bf16.msra.mxu1 %v3640_v18  ;;  %v3697_v18 = vld [vmem:[%s5093_s1 + $0x640] ss:$8 sps:$4 sm:$0xff]  }
  0xbc   : > { %1916 = vmatprep.subr.bf16.mxu1 %v3648_v9  ;;  %v3705_v9 = vld [vmem:[%s5093_s1 + $0x634] ss:$8 sps:$4 sm:$0xff]  }
  0xbd   : > { %1874 = vmatpush2.bf16.msra.mxu0 %v3643_v28  ;;  %v3688_v28 = vld [vmem:[%s5093_s1 + $0x760] ss:$8 sps:$4 sm:$0xff]  }
  0xbe   : > { %1875 = vmatprep.subr.bf16.mxu0 %v3651_v29  ;;  %v3696_v29 = vld [vmem:[%s5093_s1 + $0x754] ss:$8 sps:$4 sm:$0xff]  }
  0xbf   : > { %1917 = vmatpush2.bf16.msra.mxu1 %v3646_v31  ;;  %v3703_v31 = vld [vmem:[%s5093_s1 + $0x630] ss:$8 sps:$4 sm:$0xff]  }
  0xc0   : > { %1918 = vmatprep.subr.bf16.mxu1 %v3654_v32  ;;  %v3711_v32 = vld [vmem:[%s5093_s1 + $0x624] ss:$8 sps:$4 sm:$0xff]  }
  0xc1   : > { %1876 = vmatpush2.bf16.msra.mxu0 %v3649_v8  ;;  %v3694_v8 = vld [vmem:[%s5093_s1 + $0x750] ss:$8 sps:$4 sm:$0xff]  }
  0xc2   : > { %1877 = vmatprep.subr.bf16.mxu0 %v3657_v30  ;;  %v3702_v30 = vld [vmem:[%s5093_s1 + $0x744] ss:$8 sps:$4 sm:$0xff]  }
  0xc3   : > { %1919 = vmatpush2.bf16.msra.mxu1 %v3652_v53  ;;  %v3714_v53 = vld [vmem:[%s5093_s1 + $0x724] ss:$8 sps:$4 sm:$0xff]  }
  0xc4   : > { %1920 = vmatprep.subr.bf16.mxu1 %v3660_v39  ;;  %v3712_v39 = vld [vmem:[%s5093_s1 + $0x720] ss:$8 sps:$4 sm:$0xff]  }
  0xc5   : > { %1878 = vmatpush2.bf16.msra.mxu0 %v3655_v17  ;;  %v3709_v17 = vld [vmem:[%s5093_s1 + $0x620] ss:$8 sps:$4 sm:$0xff]  }
  0xc6   : > { %1879 = vmatprep.subr.bf16.mxu0 %v3663_v35  ;;  %v3706_v35 = vld [vmem:[%s5093_s1 + $0x730] ss:$8 sps:$4 sm:$0xff]  }
  0xc7   : > { %1921 = vmatpush2.bf16.msra.mxu1 %v3658_v47  ;;  %v3724_v47 = vld [vmem:[%s5093_s1 + $0x700] ss:$8 sps:$4 sm:$0xff]  }
  0xc8   : > { %1922 = vmatprep.subr.bf16.mxu1 %v3666_v51  ;;  %v3733_v51 = vld [vmem:[%s5093_s1 + $0x6e0] ss:$8 sps:$4 sm:$0xff]  }
  0xc9   : > { %1880 = vmatpush2.bf16.msra.mxu0 %v3661_v42  ;;  %v3729_v42 = vld [vmem:[%s5093_s1 + $0x6f4] ss:$8 sps:$4 sm:$0xff]  }
  0xca   : > { %1881 = vmatprep.subr.bf16.mxu0 %v3669_v45  ;;  %v3727_v45 = vld [vmem:[%s5093_s1 + $0x6f0] ss:$8 sps:$4 sm:$0xff]  }
  0xcb   : > { %1923 = vmatpush2.bf16.msra.mxu1 %v3664_v59  ;;  %v3736_v59 = vld [vmem:[%s5093_s1 + $0x7e0] ss:$8 sps:$4 sm:$0xff]  }
  0xcc   : > { %1924 = vmatprep.subr.bf16.mxu1 %v3672_v60  ;;  %v3744_v60 = vld [vmem:[%s5093_s1 + $0x7d4] ss:$8 sps:$4 sm:$0xff]  }
  0xcd   : > { %1882 = vmatpush2.bf16.msra.mxu0 %v3667_v54  ;;  %v3730_v54 = vld [vmem:[%s5093_s1 + $0x7f0] ss:$8 sps:$4 sm:$0xff]  }
  0xce   : > { %1883 = vmatprep.subr.bf16.mxu0 %v3675_v56  ;;  %v3739_v56 = vld [vmem:[%s5093_s1 + $0x6d0] ss:$8 sps:$4 sm:$0xff]  }
  0xcf   : > { %1925 = vmatpush2.bf16.msra.mxu1 %v3670_v6  ;;  %v3753_v6 = vld [vmem:[%s5093_s1 + $0x6b4] ss:$8 sps:$4 sm:$0xff]  }
  0xd0   : > { %1926 = vmatprep.subr.bf16.mxu1 %v3678_v10  ;;  %v3750_v10 = vld [vmem:[%s5093_s1 + $0x7c4] ss:$8 sps:$4 sm:$0xff]  }
  0xd1   : > { %1884 = vmatpush2.bf16.msra.mxu0 %v3673_v22  ;;  %v1955_v22 = vrot.slane %v4660_v3, 1  ;;  %v3751_v3 = vld [vmem:[%s5093_s1 + $0x6b0] ss:$8 sps:$4 sm:$0xff]  }
  0xd2   : > { %2595 = vmatprep.subr.bf16.mxu0 %v3681_v5  ;;  %v1956_v5 = vrot.slane %v4662_v36, 1 }
  0xd3   : > { %1927 = vmatpush2.bf16.msra.mxu1 %v3676_v14 }
  0xd4   : > { %1886 = vmatmul.mubr.bf16.vlgmr.msra.gmra.mxu0 %v1304_v11  ;;  %2638 = vmatprep.subr.bf16.mxu1 %v3684_v15  ;;  %v1974_v36 = vcombine.low %v1955_v22, %v1956_v5  ;;  %v3759_v11 = vld [vmem:[%s5093_s1 + $0x6a4] ss:$8 sps:$4 sm:$0xff]   ;;  %v3765_v15 = vld [vmem:[%s5093_s1 + $0x694] ss:$8 sps:$4 sm:$0xff]  }
  0xd5   : > { %2596 = vmatpush1.bf16.msra.mxu0 %v3679_v12  ;;  %2627 = vmatprep.mubr.bf16.mxu0 %v2096_v13  ;;  %v3748_v12 = vld [vmem:[%s5093_s1 + $0x7c0] ss:$8 sps:$4 sm:$0xff]   ;;  %v3756_v13 = vld [vmem:[%s5093_s1 + $0x7b4] ss:$8 sps:$4 sm:$0xff]  }
  0xd6   : > { %2597 = vmatprep.subr.bf16.mxu0 %v3687_v62  ;;  %1929 = vmatmul.mubr.bf16.vlgmr.msra.gmra.mxu1 %v1322_v20  ;;  %v3757_v62 = vld [vmem:[%s5093_s1 + $0x6a0] ss:$8 sps:$4 sm:$0xff]   ;;  %v1981_v14 = vrot.slane %v1974_v36, %v4126_v63  ;;  %v3762_v20 = vld [vmem:[%s5093_s1 + $0x7a4] ss:$8 sps:$4 sm:$0xff]  }
  0xd7   : > { %2639 = vmatpush1.bf16.msra.mxu1 %v3682_v23  ;;  %2670 = vmatprep.mubr.bf16.mxu1 %v2098_v24  ;;  %v3771_v24 = vld [vmem:[%s5093_s1 + $0x684] ss:$8 sps:$4 sm:$0xff]  }
  0xd8   : > { %2640 = vmatprep.subr.bf16.mxu1 %v3690_v57  ;;  %v2099_v23 = vcombine.low %v4280_v43, %v1981_v14  ;;  %v3760_v57 = vld [vmem:[%s5093_s1 + $0x7a0] ss:$8 sps:$4 sm:$0xff]  }
  0xd9   : > { %2598 = vmatpush1.bf16.msra.mxu0 %v3685_v16  ;;  %v3754_v16 = vld [vmem:[%s5093_s1 + $0x7b0] ss:$8 sps:$4 sm:$0xff]   ;;  %v3769_v43 = vld [vmem:[%s5093_s1 + $0x680] ss:$8 sps:$4 sm:$0xff]  }
  0xda   : > { %2599 = vmatprep.subr.bf16.mxu0 %v3693_v21  ;;  %v3763_v21 = vld [vmem:[%s5093_s1 + $0x690] ss:$8 sps:$4 sm:$0xff]  }
  0xdb   : > { %2641 = vmatpush1.bf16.msra.mxu1 %v3688_v28  ;;  %v3777_v28 = vld [vmem:[%s5093_s1 + $0x874] ss:$8 sps:$4 sm:$0xff]  }
  0xdc   : > { %2642 = vmatprep.subr.bf16.mxu1 %v3696_v29  ;;  %v3766_v29 = vld [vmem:[%s5093_s1 + $0x790] ss:$8 sps:$4 sm:$0xff]  }
  0xdd   : > { %2600 = vmatpush1.bf16.msra.mxu0 %v3691_v37  ;;  %v3768_v37 = vld [vmem:[%s5093_s1 + $0x794] ss:$8 sps:$4 sm:$0xff]  }
  0xde   : > { %2601 = vmatprep.subr.bf16.mxu0 %v3699_v27  ;;  %v4919_v27 = vrot.slane %v2099_v23, %v4126_v63  ;;  %v3775_v63 = vld [vmem:[%s5093_s1 + $0x870] ss:$8 sps:$4 sm:$0xff]  }
  0xdf   : > { %2643 = vmatpush1.bf16.msra.mxu1 %v3694_v8 }
  0xe0   : > { %2644 = vmatprep.subr.bf16.mxu1 %v3702_v30  ;;  %v2108_v8 = vcombine.high %v4514_v50, %v4919_v27  ;;  %v3780_v30 = vld [vmem:[%s5093_s1 + $0x864] ss:$8 sps:$4 sm:$0xff]  }
  0xe1   : > { %2602 = vmatpush1.bf16.msra.mxu0 %v3697_v18  ;;  %v3774_v18 = vld [vmem:[%s5093_s1 + $0x784] ss:$8 sps:$4 sm:$0xff]  }
  0xe2   : > { %2603 = vmatprep.subr.bf16.mxu0 %v3705_v9  ;;  %v2095_v9 = vcombine.low %v4373_v19, %v4708_v4  ;;  %v3778_v19 = vld [vmem:[%s5093_s1 + $0x860] ss:$8 sps:$4 sm:$0xff]   ;;  %v2097_v4 = vcombine.low %v4477_v25, %v4734_v61  ;;  %v3789_v61 = vld [vmem:[%s5093_s1 + $0x834] ss:$8 sps:$4 sm:$0xff]  }
  0xe3   : > { %2645 = vmatpush1.bf16.msra.mxu1 %v3700_v1  ;;  %v3781_v1 = vld [vmem:[%s5093_s1 + $0x850] ss:$8 sps:$4 sm:$0xff]   ;;  %v3784_v25 = vld [vmem:[%s5093_s1 + $0x840] ss:$8 sps:$4 sm:$0xff]  }
  0xe4   : > { %2646 = vmatprep.subr.bf16.mxu1 %v3708_v33  ;;  %v3786_v33 = vld [vmem:[%s5093_s1 + $0x844] ss:$8 sps:$4 sm:$0xff]  }
  0xe5   : > { %2604 = vmatpush1.bf16.msra.mxu0 %v3703_v31  ;;  %v3772_v31 = vld [vmem:[%s5093_s1 + $0x780] ss:$8 sps:$4 sm:$0xff]  }
  0xe6   : > { %2605 = vmatprep.subr.bf16.mxu0 %v3711_v32  ;;  %v3783_v32 = vld [vmem:[%s5093_s1 + $0x854] ss:$8 sps:$4 sm:$0xff]  }
  0xe7   : > { %2647 = vmatpush1.bf16.msra.mxu1 %v3706_v35  ;;  %v3790_v35 = vld [vmem:[%s5093_s1 + $0x820] ss:$8 sps:$4 sm:$0xff]  }
  0xe8   : > { %2648 = vmatprep.subr.bf16.mxu1 %v3714_v53  ;;  %v3795_v53 = vld [vmem:[%s5093_s1 + $0x814] ss:$8 sps:$4 sm:$0xff]  }
  0xe9   : > { %2606 = vmatpush1.bf16.msra.mxu0 %v3709_v17  ;;  %v3787_v17 = vld [vmem:[%s5093_s1 + $0x830] ss:$8 sps:$4 sm:$0xff]  }
  0xea   : > { %2607 = vmatprep.subr.bf16.mxu0 %v3717_v34  ;;  %v3792_v34 = vld [vmem:[%s5093_s1 + $0x824] ss:$8 sps:$4 sm:$0xff]  }
  0xeb   : > { %2649 = vmatpush1.bf16.msra.mxu1 %v3712_v39  ;;  %v3796_v39 = vld [vmem:[%s5093_s1 + $0x800] ss:$8 sps:$4 sm:$0xff]  }
  0xec   : > { %2650 = vmatprep.subr.bf16.mxu1 %v3720_v40  ;;  %v3801_v40 = vld [vmem:[%s5093_s1 + $0x8f4] ss:$8 sps:$4 sm:$0xff]  }
  0xed   : > { %2608 = vmatpush1.bf16.msra.mxu0 %v3715_v38  ;;  %v3793_v38 = vld [vmem:[%s5093_s1 + $0x810] ss:$8 sps:$4 sm:$0xff]  }
  0xee   : > { %2609 = vmatprep.subr.bf16.mxu0 %v3723_v26  ;;  %v3798_v26 = vld [vmem:[%s5093_s1 + $0x804] ss:$8 sps:$4 sm:$0xff]  }
  0xef   : > { %2651 = vmatpush1.bf16.msra.mxu1 %v3718_v2  ;;  %v3802_v2 = vld [vmem:[%s5093_s1 + $0x8e0] ss:$8 sps:$4 sm:$0xff]  }
  0xf0   : > { %2652 = vmatprep.subr.bf16.mxu1 %v3726_v44  ;;  %v3807_v44 = vld [vmem:[%s5093_s1 + $0x8d4] ss:$8 sps:$4 sm:$0xff]  }
  0xf1   : > { %2610 = vmatpush1.bf16.msra.mxu0 %v3721_v41  ;;  %v3799_v41 = vld [vmem:[%s5093_s1 + $0x8f0] ss:$8 sps:$4 sm:$0xff]  }
  0xf2   : > { %2611 = vmatprep.subr.bf16.mxu0 %v3729_v42  ;;  %v3804_v42 = vld [vmem:[%s5093_s1 + $0x8e4] ss:$8 sps:$4 sm:$0xff]  }
  0xf3   : > { %2653 = vmatpush1.bf16.msra.mxu1 %v3724_v47  ;;  %v3808_v47 = vld [vmem:[%s5093_s1 + $0x8c0] ss:$8 sps:$4 sm:$0xff]  }
  0xf4   : > { %2654 = vmatprep.subr.bf16.mxu1 %v3732_v48  ;;  %v3813_v48 = vld [vmem:[%s5093_s1 + $0x8b4] ss:$8 sps:$4 sm:$0xff]  }
  0xf5   : > { %2612 = vmatpush2.bf16.msra.mxu0 %v3727_v45  ;;  %v3805_v45 = vld [vmem:[%s5093_s1 + $0x8d0] ss:$8 sps:$4 sm:$0xff]  }
  0xf6   : > { %2613 = vmatprep.subr.bf16.mxu0 %v3735_v46  ;;  %v3810_v46 = vld [vmem:[%s5093_s1 + $0x8c4] ss:$8 sps:$4 sm:$0xff]  }
  0xf7   : > { %2655 = vmatpush2.bf16.msra.mxu1 %v3730_v54  ;;  %v3814_v54 = vld [vmem:[%s5093_s1 + $0x8a0] ss:$8 sps:$4 sm:$0xff]  }
  0xf8   : > { %2656 = vmatprep.subr.bf16.mxu1 %v3738_v55  ;;  %v3819_v55 = vld [vmem:[%s5093_s1 + $0x894] ss:$8 sps:$4 sm:$0xff]  }
  0xf9   : > { %2614 = vmatpush2.bf16.msra.mxu0 %v3733_v51  ;;  %v3811_v51 = vld [vmem:[%s5093_s1 + $0x8b0] ss:$8 sps:$4 sm:$0xff]  }
  0xfa   : > { %2615 = vmatprep.subr.bf16.mxu0 %v3741_v52  ;;  %v3816_v52 = vld [vmem:[%s5093_s1 + $0x8a4] ss:$8 sps:$4 sm:$0xff]  }
  0xfb   : > { %2657 = vmatpush2.bf16.msra.mxu1 %v3736_v59  ;;  %v3820_v59 = vld [vmem:[%s5093_s1 + $0x880] ss:$8 sps:$4 sm:$0xff]  }
  0xfc   : > { %2658 = vmatprep.subr.bf16.mxu1 %v3744_v60  ;;  %v2107_v60 = vcombine.low %v4514_v50, %v4919_v27 }
  0xfd   : > { %2616 = vmatpush2.bf16.msra.mxu0 %v3739_v56  ;;  %v3817_v56 = vld [vmem:[%s5093_s1 + $0x890] ss:$8 sps:$4 sm:$0xff]  }
  0xfe   : > { %2617 = vmatprep.subr.bf16.mxu0 %v3747_v58  ;;  %v3822_v58 = vld [vmem:[%s5093_s1 + $0x884] ss:$8 sps:$4 sm:$0xff]  }
  0xff   : > { %2659 = vmatpush2.bf16.msra.mxu1 %v3742_v7 }
 0x100   : > { %2660 = vmatprep.subr.bf16.mxu1 %v3750_v10 }
 0x101   : > { %2618 = vmatpush2.bf16.msra.mxu0 %v3745_v0 }
 0x102   : > { %2619 = vmatprep.subr.bf16.mxu0 %v3753_v6 }
 0x103   : > { %2661 = vmatpush2.bf16.msra.mxu1 %v3748_v12 }
 0x104   : > { %2662 = vmatprep.subr.bf16.mxu1 %v3756_v13 }
 0x105   : > { %2620 = vmatpush2.bf16.msra.mxu0 %v3751_v3 }
 0x106   : > { %2621 = vmatprep.subr.bf16.mxu0 %v3759_v11 }
 0x107   : > { %2663 = vmatpush2.bf16.msra.mxu1 %v3754_v16 }
 0x108   : > { %2664 = vmatprep.subr.bf16.mxu1 %v3762_v20 }
 0x109   : > { %2622 = vmatpush2.bf16.msra.mxu0 %v3757_v62 }
 0x10a   : > { %2623 = vmatprep.subr.bf16.mxu0 %v3765_v15 }
 0x10b   : > { %2665 = vmatpush2.bf16.msra.mxu1 %v3760_v57 }
 0x10c   : > { %2666 = vmatprep.subr.bf16.mxu1 %v3768_v37 }
 0x10d   : > { %2624 = vmatpush2.bf16.msra.mxu0 %v3763_v21 }
 0x10e   : > { %2625 = vmatprep.subr.bf16.mxu0 %v3771_v24 }
 0x10f   : > { %2667 = vmatpush2.bf16.msra.mxu1 %v3766_v29 }
 0x110   : > { %2668 = vmatprep.subr.bf16.mxu1 %v3774_v18 }
 0x111   : > { %2626 = vmatpush2.bf16.msra.mxu0 %v3769_v43 }
 0x112   : > { %2681 = vmatprep.subr.bf16.mxu0 %v3777_v28 }
 0x113   : > { %2669 = vmatpush2.bf16.msra.mxu1 %v3772_v31 }
 0x114   : > { %2628 = vmatmul.mubr.bf16.vlgmr.msra.gmra.mxu0 %v2095_v9  ;;  %v1175_v0 = vpop.f32.mrf.mxu0 }
 0x115   : > { %2682 = vmatpush1.bf16.msra.mxu0 %v3775_v63  ;;  %2713 = vmatprep.mubr.bf16.mxu0 %v2108_v8  ;;  %v1218_v22 = vpop.f32.mrf.mxu1 }
 0x116   : > { %2683 = vmatprep.subr.bf16.mxu0 %v3780_v30  ;;  %2671 = vmatmul.mubr.bf16.vlgmr.msra.gmra.mxu1 %v2097_v4  ;;  %v1177_v5 = vpop.f32.mrf.mxu0  ;;  %v1219_v29 = vadd.f32 %v1218_v22, %v1175_v0 }
 0x117   : > { %v1220_v6 = vpop.f32.mrf.mxu1 }
 0x118   : > { %v1179_v7 = vpop.f32.mrf.mxu0  ;;  %v1221_v18 = vadd.f32 %v1220_v6, %v1177_v5 }
 0x119   : > { %2684 = vmatpush1.bf16.msra.mxu0 %v3778_v19  ;;  %v1222_v10 = vpop.f32.mrf.mxu1 }
 0x11a   : > { %2685 = vmatprep.subr.bf16.mxu0 %v3783_v32  ;;  %v1181_v3 = vpop.f32.mrf.mxu0  ;;  %v1223_v30 = vadd.f32 %v1222_v10, %v1179_v7 }
 0x11b   : > { %v1224_v11 = vpop.f32.mrf.mxu1 }
 0x11c   : > { %v1225_v19 = vadd.f32 %v1224_v11, %v1181_v3 }
 0x11d   : > { %2686 = vmatpush1.bf16.msra.mxu0 %v3781_v1 }
 0x11e   : > { %2687 = vmatprep.subr.bf16.mxu0 %v3786_v33 }
 0x121   : > { %2688 = vmatpush1.bf16.msra.mxu0 %v3784_v25 }
 0x122   : > { %2689 = vmatprep.subr.bf16.mxu0 %v3789_v61 }
 0x125   : > { %2690 = vmatpush1.bf16.msra.mxu0 %v3787_v17 }
 0x126   : > { %2691 = vmatprep.subr.bf16.mxu0 %v3792_v34  ;;  %v2732_v34 = vsub.s32 0, %v4099_v49 }
 0x129   : > { %2692 = vmatpush1.bf16.msra.mxu0 %v3790_v35 }
 0x12a   : > { %2693 = vmatprep.subr.bf16.mxu0 %v3795_v53 }
 0x12d   : > { %2694 = vmatpush1.bf16.msra.mxu0 %v3793_v38 }
 0x12e   : > { %2695 = vmatprep.subr.bf16.mxu0 %v3798_v26 }
 0x131   : > { %2696 = vmatpush1.bf16.msra.mxu0 %v3796_v39  ;;  %v2728_v39 = vld [vmem:[%s5094_s2] sm:$0x3] }
 0x132   : > { %2697 = vmatprep.subr.bf16.mxu0 %v3801_v40 }
 0x135   : > { %2698 = vmatpush2.bf16.msra.mxu0 %v3799_v41  ;;  %v2736_v41 = vsub.s32 1, %v4099_v49 }
 0x136   : > { %2699 = vmatprep.subr.bf16.mxu0 %v3804_v42 }
 0x139   : > { %2700 = vmatpush2.bf16.msra.mxu0 %v3802_v2 }
 0x13a   : > { %2701 = vmatprep.subr.bf16.mxu0 %v3807_v44 }
 0x13d   : > { %2702 = vmatpush2.bf16.msra.mxu0 %v3805_v45 }
 0x13e   : > { %2703 = vmatprep.subr.bf16.mxu0 %v3810_v46 }
 0x141   : > { %2704 = vmatpush2.bf16.msra.mxu0 %v3808_v47 }
 0x142   : > { %2705 = vmatprep.subr.bf16.mxu0 %v3813_v48  ;;  %v2733_v48 = vrot.slane %v2728_v39, %v2732_v34 }
 0x145   : > { %2706 = vmatpush2.bf16.msra.mxu0 %v3811_v51 }
 0x146   : > { %2707 = vmatprep.subr.bf16.mxu0 %v3816_v52 }
 0x149   : > { %2708 = vmatpush2.bf16.msra.mxu0 %v3814_v54 }
 0x14a   : > { %2709 = vmatprep.subr.bf16.mxu0 %v3819_v55 }
 0x14d   : > { %2710 = vmatpush2.bf16.msra.mxu0 %v3817_v56 }
 0x14e   : > { %2711 = vmatprep.subr.bf16.mxu0 %v3822_v58 }
 0x151   : > { %2712 = vmatpush2.bf16.msra.mxu0 %v3820_v59 }
 0x154   : > { %2714 = vmatmul.mubr.bf16.vlgmr.msra.gmra.mxu0 %v2107_v60  ;;  %v1261_v36 = vpop.f32.mrf.mxu0  ;;  %v2737_v60 = vrot.slane %v2728_v39, %v2736_v41 }
 0x155   : > { %v1262_v8 = vadd.f32 %v1261_v36, %v1219_v29 }
 0x156   : > { %v1263_v12 = vpop.f32.mrf.mxu0  ;;  %v1844_v13 = vpop.f32.mrf.mxu1 }
 0x157   : > { %v1264_v31 = vadd.f32 %v1263_v12, %v1221_v18  ;;  %v1845_v33 = vadd.f32 %v1844_v13, %v1262_v8 }
 0x158   : > { %v1265_v62 = vpop.f32.mrf.mxu0  ;;  %v1846_v14 = vpop.f32.mrf.mxu1 }
 0x159   : > { %v1266_v4 = vadd.f32 %v1265_v62, %v1223_v30  ;;  %v1847_v25 = vadd.f32 %v1846_v14, %v1264_v31 }
 0x15a   : > { %v1267_v15 = vpop.f32.mrf.mxu0  ;;  %v1848_v16 = vpop.f32.mrf.mxu1 }
 0x15b   : > { %v1268_v61 = vadd.f32 %v1267_v15, %v1225_v19  ;;  %v1849_v35 = vadd.f32 %v1848_v16, %v1266_v4 }
 0x15c   : > { %v1850_v21 = vpop.f32.mrf.mxu1 }
 0x15d   : > { %v1851_v42 = vadd.f32 %v1850_v21, %v1268_v61 }
 0x194   : > { %v1887_v20 = vpop.f32.mrf.mxu0 }
 0x195   : > { %v1888_v17 = vadd.f32 %v1887_v20, %v1845_v33 }
 0x196   : > { %v1889_v50 = vpop.f32.mrf.mxu0  ;;  %v1930_v23 = vpop.f32.mrf.mxu1 }
 0x197   : > { %v1890_v53 = vadd.f32 %v1889_v50, %v1847_v25  ;;  %v1931_v45 = vadd.f32 %v1930_v23, %v1888_v17 }
 0x198   : > { %v1891_v24 = vpop.f32.mrf.mxu0  ;;  %v1932_v57 = vpop.f32.mrf.mxu1 }
 0x199   : > { %v1892_v2 = vadd.f32 %v1891_v24, %v1849_v35  ;;  %v1933_v51 = vadd.f32 %v1932_v57, %v1890_v53 }
 0x19a   : > { %v1893_v37 = vpop.f32.mrf.mxu0  ;;  %v1934_v43 = vpop.f32.mrf.mxu1 }
 0x19b   : > { %v1894_v52 = vadd.f32 %v1893_v37, %v1851_v42  ;;  %v1935_v0 = vadd.f32 %v1934_v43, %v1892_v2 }
 0x19c   : > { %v1936_v28 = vpop.f32.mrf.mxu1 }
 0x19d   : > { %v1937_v3 = vadd.f32 %v1936_v28, %v1894_v52 }
 0x1d4   : > { %v2629_v27 = vpop.f32.mrf.mxu0 }
 0x1d6   : > { %v2672_v9 = vpop.f32.mrf.mxu1  ;;  %v2631_v63 = vpop.f32.mrf.mxu0 }
 0x1d7   : > { %v2673_v40 = vadd.f32 %v2672_v9, %v2629_v27 }
 0x1d8   : > { %v2674_v32 = vpop.f32.mrf.mxu1  ;;  %v2633_v1 = vpop.f32.mrf.mxu0 }
 0x1d9   : > { %v2675_v46 = vadd.f32 %v2674_v32, %v2631_v63 }
 0x1da   : > { %v2676_v38 = vpop.f32.mrf.mxu1  ;;  %v2635_v26 = vpop.f32.mrf.mxu0 }
 0x1db   : > { %v2677_v56 = vadd.f32 %v2676_v38, %v2633_v1 }
 0x1dc   : > { %v2678_v54 = vpop.f32.mrf.mxu1 }
 0x1dd   : > { %v2679_v22 = vadd.f32 %v2678_v54, %v2635_v26 }
 0x214   : > { %v2715_v44 = vpop.f32.mrf.mxu0 }
 0x215   : > { %v2716_v47 = vadd.f32 %v2715_v44, %v2673_v40 }
 0x216   : > { %v2717_v55 = vpop.f32.mrf.mxu0 }
 0x217   : > { %v2724_v58 = vadd.f32 %v2716_v47, %v1931_v45  ;;  %v2718_v59 = vadd.f32 %v2717_v55, %v2675_v46 }
 0x218   : > { %v2719_v49 = vpop.f32.mrf.mxu0 }
 0x219   : > { %v2740_v5 = vadd.f32 %v2733_v48, %v2724_v58  ;;  %v2725_v6 = vadd.f32 %v2718_v59, %v1933_v51  ;;  %v2720_v7 = vadd.f32 %v2719_v49, %v2677_v56 }
 0x21a   : > { %v2721_v10 = vpop.f32.mrf.mxu0 }
 0x21b   : > { %v2741_v36 = vadd.f32 %v2737_v60, %v2725_v6  ;;  %v2726_v11 = vadd.f32 %v2720_v7, %v1935_v0  ;;  %v2722_v12 = vadd.f32 %v2721_v10, %v2679_v22  ;;  %v2744_v13 = vmax.f32 %v2740_v5, 0.0 }
 0x21d   : > { %v2745_v62 = vmax.f32 %v2741_v36, 0.0  ;;  %v2742_v14 = vadd.f32 %v2733_v48, %v2726_v11  ;;  %v2727_v15 = vadd.f32 %v2722_v12, %v1937_v3 }
 0x21f   : > { %v2752_v16 = vcombine.low %v2744_v13, %v2745_v62  ;;  %v2753_v20 = vcombine.high %v2744_v13, %v2745_v62  ;;  %v2743_v21 = vadd.f32 %v2737_v60, %v2727_v15  ;;  %v2746_v50 = vmax.f32 %v2742_v14, 0.0 }
 0x221   : > { %2760 = vst [vmem:[%s163_s4] sm:$0xff] %v2752_v16  ;;  %2761 = vst [vmem:[%s163_s4 + $0x8] sm:$0xff] %v2753_v20  ;;  %v2747_v23 = vmax.f32 %v2743_v21, 0.0 }
 0x223   : > { %v2754_v24 = vcombine.low %v2746_v50, %v2747_v23  ;;  %v2755_v57 = vcombine.high %v2746_v50, %v2747_v23 }
 0x225   : > { %2762 = vst [vmem:[%s163_s4 + $0x10] sm:$0xff] %v2754_v24  ;;  %2763 = vst [vmem:[%s163_s4 + $0x18] sm:$0xff] %v2755_v57 }
 0x226   : > { %3836 = shalt.err (!%p3833_p3)
}
 0x227   : > { %s3837_s19 = scalar_lea.hbm %s5046_s8, 512  ;;  %s3841_s24 = scalar_lea.hbm %s5095_s3, 1024 }
 0x228   : > { %p3838_p4 = scmp.ne.s32.totalorder %s5046_s8, %s3837_s19  ;;  %p3842_p9 = scmp.lt.s32.totalorder %s5046_s8, %s5095_s3 }
 0x229   : > { %p3843_p10 = scmp.lt.s32.totalorder %s3841_s24, %s3837_s19 }
 0x22a   : > { %p3839_p7 = pnand %p3838_p4, %p3947_p5 }
 0x22b   : > { %p3844_p11 = por %p3843_p10, %p3842_p9 }
 0x22c   : > { %p3840_p8 = pneg %p3839_p7 }
 0x22e   : > { %p3845_p12 = pnand %p3844_p11, %p3840_p8 }
 0x230   : > { %3848 = shalt.err (!%p3845_p12)
}
 0x231   : > { %s3887_s28 = smov 128   ;;  %s3888_s29 = smov 8  }
 0x232   : > { %3349 = dma.vmem_to_hbm [thread:$0]  (%p3947_p5), %s5048_s5, 512, %s5046_s8, %s5052_s16, %s3887_s28, %s3887_s28, %s3888_s29  }
 0x233 PF: > { %p3355_p13 = scmp.ge.s32.totalorder %s3883_s15, 2  ;;  %s2793_s30 = sand.u32 1, %s3871_s12  }
 0x234   : > { %s2794_s4 = scalar_lea.sflag [#allocation3], %s2793_s30 }
 0x235   : > { %p3352_p0 = pnand %p3355_p13, %p3951_p6 }
 0x237   : > { %p3353_p1 = pneg %p3352_p0 }
 0x239   : > { %3866 = dma.done.wait (%p3353_p1), %s2794_s4, 512  }
 0x23a   : > { %3868 = vsyncadd (%p3353_p1), %s2794_s4, 4294966784  ;;  %p13_p2 = scmp.ge.s32.totalorder %s3934_s18, 4   ;;  %s5098_s12 = smov %s3875_s13 }
 0x23b   : > { %s5099_s13 = smov %s3879_s14  ;;  %s5100_s14 = smov %s3945_s21 }
 0x23c   : > { %s5101_s15 = smov %s3934_s18  ;;  %15 = sbr.rel (!%p13_p2) target bundleno = 3 (0x3), region = 69 }
 0x241   :  { %2799 = vsyncpa [#allocation3], 1 }
 0x242   :  { %2801 = vsyncpa [#allocation3 + $0x1], 1 }

</bundles_post_ra>
